<compile_context>
chip_gen: v5e
topology: v5e:2x2
jax: 0.10.0
libtpu: 0.0.40
codegen_flags: <defaults>
</compile_context>

<pallas_src>
import functools

import jax
import jax.numpy as jnp
from jax.experimental import pallas as pl
from jax.experimental.pallas import tpu as pltpu


# ----------------------------- row tiling helper -----------------------------

_MAX_TILE_ROWS = 1024  # large tiles: per-grid-step overhead amortized, ~85% HBM roofline


def _row_tiling(rows, max_tile=_MAX_TILE_ROWS):
    """Pick a row-tile: single full block when it fits, else balanced large tiles."""
    if rows <= max_tile:
        return rows, 1
    steps = pl.cdiv(rows, max_tile)
    tile = -(-rows // steps)      # ceil -> balanced steps (good for v7x 2-TC sharding)
    tile = -(-tile // 8) * 8      # keep sublane alignment
    return tile, pl.cdiv(rows, tile)


# ----------------------------- Pallas kernels -----------------------------

def _linear_kernel(x_ref, w_ref, b_ref, o_ref, *, relu):
    # bf16 MXU operands, f32 accumulation / elementwise
    y = jnp.dot(x_ref[...].astype(jnp.bfloat16), w_ref[...],
                preferred_element_type=jnp.float32)
    y = y + b_ref[...]
    if relu:
        y = jnp.maximum(y, 0.0)
    o_ref[...] = y.astype(o_ref.dtype)


def _mlp_kernel(x_ref, w1_ref, b1_ref, w2_ref, b2_ref, o_ref, *, relu_mid):
    # two fused linears; the [tile, hidden] intermediate stays on-chip
    h = jnp.dot(x_ref[...].astype(jnp.bfloat16), w1_ref[...],
                preferred_element_type=jnp.float32) + b1_ref[...]
    if relu_mid:
        h = jnp.maximum(h, 0.0)
    y = jnp.dot(h.astype(jnp.bfloat16), w2_ref[...],
                preferred_element_type=jnp.float32) + b2_ref[...]
    o_ref[...] = y.astype(o_ref.dtype)


def _ffn_residual_kernel(x_ref, xf_ref, w1_ref, b1_ref, w2_ref, b2_ref,
                         xo_ref, bo_ref):
    # backcast feed-forward (Linear -> ReLU -> Linear) fused with the residual add.
    h = jnp.dot(xf_ref[...].astype(jnp.bfloat16), w1_ref[...],
                preferred_element_type=jnp.float32) + b1_ref[...]
    h = jnp.maximum(h, 0.0)
    b = jnp.dot(h.astype(jnp.bfloat16), w2_ref[...],
                preferred_element_type=jnp.float32) + b2_ref[...]
    bo_ref[...] = b                      # backcast b (needed for the output head)
    xo_ref[...] = x_ref[...] + b         # residual update x <- x + b


def _matmul_kernel(x_ref, w_ref, o_ref):
    o_ref[...] = jnp.dot(x_ref[...].astype(jnp.bfloat16), w_ref[...],
                         preferred_element_type=jnp.float32)


# ----------------------------- Pallas wrappers -----------------------------

def pallas_linear(x, w, b, *, relu=False):
    """y = x @ w + b (optional fused ReLU). x:[rows,in] f32, w:[in,out] bf16."""
    rows, in_dim = x.shape
    out_dim = w.shape[1]
    tile, steps = _row_tiling(rows)
    return pl.pallas_call(
        functools.partial(_linear_kernel, relu=relu),
        out_shape=jax.ShapeDtypeStruct((rows, out_dim), jnp.float32),
        grid=(steps,),
        in_specs=[
            pl.BlockSpec((tile, in_dim), lambda i: (i, 0)),
            pl.BlockSpec((in_dim, out_dim), lambda i: (0, 0)),
            pl.BlockSpec((1, out_dim), lambda i: (0, 0)),
        ],
        out_specs=pl.BlockSpec((tile, out_dim), lambda i: (i, 0)),
        compiler_params=pltpu.CompilerParams(dimension_semantics=("parallel",)),
    )(x, w, b.reshape(1, out_dim))


def pallas_mlp(x, w1, b1, w2, b2, *, relu_mid=False):
    """y = (x @ w1 + b1) [ReLU] @ w2 + b2 fused in one kernel (output head)."""
    rows, in_dim = x.shape
    hid, out_dim = w1.shape[1], w2.shape[1]
    tile, steps = _row_tiling(rows)
    return pl.pallas_call(
        functools.partial(_mlp_kernel, relu_mid=relu_mid),
        out_shape=jax.ShapeDtypeStruct((rows, out_dim), jnp.float32),
        grid=(steps,),
        in_specs=[
            pl.BlockSpec((tile, in_dim), lambda i: (i, 0)),
            pl.BlockSpec((in_dim, hid), lambda i: (0, 0)),
            pl.BlockSpec((1, hid), lambda i: (0, 0)),
            pl.BlockSpec((hid, out_dim), lambda i: (0, 0)),
            pl.BlockSpec((1, out_dim), lambda i: (0, 0)),
        ],
        out_specs=pl.BlockSpec((tile, out_dim), lambda i: (i, 0)),
        compiler_params=pltpu.CompilerParams(dimension_semantics=("parallel",)),
    )(x, w1, b1.reshape(1, hid), w2, b2.reshape(1, out_dim))


def pallas_ffn_residual(x, xf, w1, b1, w2, b2):
    """Fused backcast feed-forward + residual: returns (x + b, b)."""
    rows, width = x.shape
    hid = w1.shape[1]
    tile, steps = _row_tiling(rows)
    return pl.pallas_call(
        _ffn_residual_kernel,
        out_shape=(jax.ShapeDtypeStruct((rows, width), jnp.float32),
                   jax.ShapeDtypeStruct((rows, width), jnp.float32)),
        grid=(steps,),
        in_specs=[
            pl.BlockSpec((tile, width), lambda i: (i, 0)),   # residual x
            pl.BlockSpec((tile, width), lambda i: (i, 0)),   # fourier output xf
            pl.BlockSpec((width, hid), lambda i: (0, 0)),
            pl.BlockSpec((1, hid), lambda i: (0, 0)),
            pl.BlockSpec((hid, width), lambda i: (0, 0)),
            pl.BlockSpec((1, width), lambda i: (0, 0)),
        ],
        out_specs=(pl.BlockSpec((tile, width), lambda i: (i, 0)),
                   pl.BlockSpec((tile, width), lambda i: (i, 0))),
        compiler_params=pltpu.CompilerParams(dimension_semantics=("parallel",)),
    )(x, xf, w1, b1.reshape(1, hid), w2, b2.reshape(1, width))


def pallas_matmul(x, w):
    """Plain y = x @ w (used for the packed spectral mode-mixing matmul)."""
    rows, kdim = x.shape
    out_dim = w.shape[1]
    tile, steps = _row_tiling(rows)
    return pl.pallas_call(
        _matmul_kernel,
        out_shape=jax.ShapeDtypeStruct((rows, out_dim), jnp.float32),
        grid=(steps,),
        in_specs=[pl.BlockSpec((tile, kdim), lambda i: (i, 0)),
                  pl.BlockSpec((kdim, out_dim), lambda i: (0, 0))],
        out_specs=pl.BlockSpec((tile, out_dim), lambda i: (i, 0)),
        compiler_params=pltpu.CompilerParams(dimension_semantics=("parallel",)),
    )(x, w)


# ----------------------------- spectral weight packing -----------------------------

def _pack_spectral_blockdiag(w_re, w_im):
    """[I, O, K] complex weights -> block-diagonal real matrix [K*2I, K*2O].

    Per mode k the block is [[wr, wi], [-wi, wr]] so that
    [xr | xi] @ block = [xr@wr - xi@wi | xr@wi + xi@wr] = [Re(out) | Im(out)].
    Packing all modes block-diagonally turns the batched per-mode complex matmul
    into one wide real matmul (MXU-friendly contraction, lane-dense output).
    """
    I, O, K = w_re.shape
    wr = jnp.transpose(w_re, (2, 0, 1))                       # [K, I, O]
    wi = jnp.transpose(w_im, (2, 0, 1))
    blk = jnp.concatenate(
        [jnp.concatenate([wr, wi], axis=2),
         jnp.concatenate([-wi, wr], axis=2)], axis=1)         # [K, 2I, 2O]
    eye = jnp.eye(K, dtype=w_re.dtype)
    big = jnp.einsum('kl,kio->kilo', eye, blk)                # [K, 2I, K, 2O]
    return big.reshape(K * 2 * I, K * 2 * O).astype(jnp.bfloat16)


# ----------------------------- FFNO forward -----------------------------

def forward_fourier(x, wbd_x, wbd_y, modes_x, modes_y):
    """SpectralConv2d.forward_fourier, channels-last layout [B, M, N, C]."""
    B, M, N, C = x.shape

    # --- y-direction (last spatial axis, size N) ---
    x_fty = jnp.fft.rfft(x, axis=2, norm="ortho")             # [B, M, N//2+1, C]
    xk = x_fty[:, :, :modes_y, :]                              # [B, M, Ky, C]
    xp = jnp.concatenate([jnp.real(xk), jnp.imag(xk)], axis=-1)  # [B, M, Ky, 2C]
    xp = xp.reshape(B * M, modes_y * 2 * C)
    yk = pallas_matmul(xp, wbd_y)                              # [B*M, Ky*2C]
    yk = yk.reshape(B, M, modes_y, 2 * C)
    outc = jax.lax.complex(yk[..., :C], yk[..., C:])           # [B, M, Ky, C]
    # irfft zero-pads the truncated spectrum -> no explicit zero-scatter needed
    xy = jnp.fft.irfft(outc, n=N, axis=2, norm="ortho")        # [B, M, N, C]

    # --- x-direction (second spatial axis, size M) ---
    x_ftx = jnp.fft.rfft(x, axis=1, norm="ortho")              # [B, M//2+1, N, C]
    xk = x_ftx[:, :modes_x, :, :]                               # [B, Kx, N, C]
    xk = jnp.transpose(xk, (0, 2, 1, 3))                        # [B, N, Kx, C]
    xp = jnp.concatenate([jnp.real(xk), jnp.imag(xk)], axis=-1)
    xp = xp.reshape(B * N, modes_x * 2 * C)
    yk = pallas_matmul(xp, wbd_x)                               # [B*N, Kx*2C]
    yk = yk.reshape(B, N, modes_x, 2 * C)
    outc = jax.lax.complex(yk[..., :C], yk[..., C:])            # [B, N, Kx, C]
    outc = jnp.transpose(outc, (0, 2, 1, 3))                    # [B, Kx, N, C]
    xx = jnp.fft.irfft(outc, n=M, axis=1, norm="ortho")         # [B, M, N, C]

    return xx + xy


def ffno_forward(params, x, *, modes_x, modes_y, padding=8):
    """FFNO.forward.  x: [B, Sx, Sy, input_dim] -> [B, Sx, Sy, output_dim]."""
    B, Sx, Sy, Ci = x.shape

    # get_grid + concat (+ zero-padding of the channel axis to a multiple of 8)
    gx = jnp.broadcast_to(jnp.linspace(0.0, 1.0, Sx, dtype=jnp.float32)[None, :, None, None],
                          (B, Sx, Sy, 1))
    gy = jnp.broadcast_to(jnp.linspace(0.0, 1.0, Sy, dtype=jnp.float32)[None, None, :, None],
                          (B, Sx, Sy, 1))
    feats = [x, gx, gy]
    pad_ch = params["in_w"].shape[0] - (Ci + 2)
    if pad_ch:
        feats.append(jnp.zeros((B, Sx, Sy, pad_ch), jnp.float32))
    xin = jnp.concatenate(feats, axis=-1)

    # in_proj
    width = params["in_w"].shape[1]
    h = pallas_linear(xin.reshape(-1, xin.shape[-1]), params["in_w"], params["in_b"])
    x = h.reshape(B, Sx, Sy, width)

    # pad spatial dims on the "right" (matches F.pad([0,P,0,P]) in NCHW)
    x = jnp.pad(x, ((0, 0), (0, padding), (0, padding), (0, 0)))
    M, N = Sx + padding, Sy + padding
    rows = B * M * N

    b = None
    for layer in params["layers"]:
        xf = forward_fourier(x, params["wbd_x"], params["wbd_y"], modes_x, modes_y)
        # Dropout is an inference no-op; FF1+ReLU+FF2+residual fused in one kernel.
        x_flat, b = pallas_ffn_residual(x.reshape(rows, width),
                                        xf.reshape(rows, width),
                                        layer["ff_w1"], layer["ff_b1"],
                                        layer["ff_w2"], layer["ff_b2"])
        x = x_flat.reshape(B, M, N, width)

    # crop padding from the last layer's backcast, then fused output head
    b = b.reshape(B, M, N, width)[:, :Sx, :Sy, :]
    out = pallas_mlp(b.reshape(-1, width), params["out_w1"], params["out_b1"],
                     params["out_w2"], params["out_b2"], relu_mid=False)
    return out.reshape(B, Sx, Sy, -1)


# ----------------------------- parameter init / packing -----------------------------

def _dense_init(key, fan_in, fan_out):
    scale = jnp.sqrt(2.0 / (fan_in + fan_out))
    return (jax.random.normal(key, (fan_in, fan_out), jnp.float32) * scale,
            jnp.zeros((fan_out,), jnp.float32))


def init_params(key, input_dim, output_dim, width, modes_x, modes_y,
                n_layers, factor):
    keys = jax.random.split(key, 8 + 2 * n_layers)
    params = {}
    params["in_w"], params["in_b"] = _dense_init(keys[0], input_dim + 2, width)

    # shared fourier weights (share_weight=True): shape (in_dim, out_dim, modes)
    fscale = jnp.sqrt(2.0 / (width + width))
    params["wx_re"] = jax.random.normal(keys[1], (width, width, modes_x), jnp.float32) * fscale
    params["wx_im"] = jax.random.normal(keys[2], (width, width, modes_x), jnp.float32) * fscale
    params["wy_re"] = jax.random.normal(keys[3], (width, width, modes_y), jnp.float32) * fscale
    params["wy_im"] = jax.random.normal(keys[4], (width, width, modes_y), jnp.float32) * fscale

    layers = []
    hidden = width * factor
    for i in range(n_layers):
        k1, k2 = keys[5 + 2 * i], keys[6 + 2 * i]
        w1, b1 = _dense_init(k1, width, hidden)
        w2, b2 = _dense_init(k2, hidden, width)
        layers.append({"ff_w1": w1, "ff_b1": b1, "ff_w2": w2, "ff_b2": b2})
    params["layers"] = tuple(layers)

    params["out_w1"], params["out_b1"] = _dense_init(keys[-2], width, 128)
    params["out_w2"], params["out_b2"] = _dense_init(keys[-1], 128, output_dim)
    return params


def prepare_params(raw):
    """One-time packing: pad in_proj channels to 8, bf16 weights, block-diag spectral W."""
    p = {}
    in_w = raw["in_w"]
    pad = (-in_w.shape[0]) % 8
    if pad:
        in_w = jnp.concatenate(
            [in_w, jnp.zeros((pad, in_w.shape[1]), in_w.dtype)], axis=0)
    p["in_w"] = in_w.astype(jnp.bfloat16)
    p["in_b"] = raw["in_b"]

    # weights are shared across layers -> pack once, reuse every layer
    p["wbd_x"] = _pack_spectral_blockdiag(raw["wx_re"], raw["wx_im"])
    p["wbd_y"] = _pack_spectral_blockdiag(raw["wy_re"], raw["wy_im"])

    layers = []
    for l in raw["layers"]:
        layers.append({"ff_w1": l["ff_w1"].astype(jnp.bfloat16), "ff_b1": l["ff_b1"],
                       "ff_w2": l["ff_w2"].astype(jnp.bfloat16), "ff_b2": l["ff_b2"]})
    p["layers"] = tuple(layers)

    p["out_w1"] = raw["out_w1"].astype(jnp.bfloat16)
    p["out_b1"] = raw["out_b1"]
    p["out_w2"] = raw["out_w2"].astype(jnp.bfloat16)
    p["out_b2"] = raw["out_b2"]
    return p


# ----------------------------- main -----------------------------

if __name__ == "__main__":
    B, Sx, Sy = 2, 16, 16
    input_dim, output_dim = 3, 1
    width, modes_x, modes_y = 32, 6, 6
    n_layers, factor = 2, 4

    key = jax.random.PRNGKey(0)
    kx, kp = jax.random.split(key)
    x = jax.random.normal(kx, (B, Sx, Sy, input_dim), jnp.float32)
    raw = init_params(kp, input_dim, output_dim, width, modes_x, modes_y,
                      n_layers, factor)
    params = prepare_params(raw)

    fwd = jax.jit(functools.partial(ffno_forward, modes_x=modes_x,
                                    modes_y=modes_y, padding=8))
    out = jax.block_until_ready(fwd(params, x))

    assert out.shape == (B, Sx, Sy, output_dim), out.shape
    assert bool(jnp.all(jnp.isfinite(out)))
    print("KERNEL_OK")
</pallas_src>

<mosaic_0001>
module attributes {stable_mosaic.version = 11 : i64} {
  func.func @_linear_kernel(%arg0: i32, %arg1: memref<512x8xf32, #tpu.memory_space<vmem>>, %arg2: memref<8x32xbf16, #tpu.memory_space<vmem>>, %arg3: memref<1x32xf32, #tpu.memory_space<vmem>>, %arg4: memref<512x32xf32, #tpu.memory_space<vmem>>) attributes {dimension_semantics = [#tpu.dimension_semantics<parallel>], iteration_bounds = array<i64: 1>, scalar_prefetch = 0 : i64, scratch_operands = 0 : i64, tpu.core_type = #tpu.core_type<tc>, window_params = [{transform_indices = @transform_0, window_bounds = array<i64: 512, 8>}, {pipeline_mode = #tpu.pipeline_mode<synchronous>, transform_indices = @transform_1, window_bounds = array<i64: 8, 32>}, {pipeline_mode = #tpu.pipeline_mode<synchronous>, transform_indices = @transform_2, window_bounds = array<i64: 1, 32>}, {transform_indices = @transform_3, window_bounds = array<i64: 512, 32>}]} {
    %c0 = arith.constant 0 : index
    %c0_0 = arith.constant 0 : index
    %0 = vector.load %arg1[%c0, %c0_0] : memref<512x8xf32, #tpu.memory_space<vmem>>, vector<512x8xf32>
    %1 = arith.truncf %0 : vector<512x8xf32> to vector<512x8xbf16>
    %c0_1 = arith.constant 0 : index
    %c0_2 = arith.constant 0 : index
    %2 = vector.load %arg2[%c0_1, %c0_2] : memref<8x32xbf16, #tpu.memory_space<vmem>>, vector<8x32xbf16>
    %cst = arith.constant dense<0.000000e+00> : vector<512x32xf32>
    %3 = tpu.matmul %1, %2, %cst {dimension_numbers = #tpu.dot_dimension_numbers<[1], [0], [0], [1], [0, 0, 1, 1], [], []>} : vector<512x8xbf16>, vector<8x32xbf16>, vector<512x32xf32> -> vector<512x32xf32>
    %c0_3 = arith.constant 0 : index
    %c0_4 = arith.constant 0 : index
    %4 = vector.load %arg3[%c0_3, %c0_4] : memref<1x32xf32, #tpu.memory_space<vmem>>, vector<1x32xf32>
    %5 = vector.broadcast %4 : vector<1x32xf32> to vector<512x32xf32>
    %6 = arith.addf %3, %5 : vector<512x32xf32>
    %c0_5 = arith.constant 0 : index
    %c0_6 = arith.constant 0 : index
    %7 = vector.load %arg4[%c0_5, %c0_6] : memref<512x32xf32, #tpu.memory_space<vmem>>, vector<512x32xf32>
    tpu.vector_store %arg4[%c0_5, %c0_6], %6 {strides = array<i32>} : memref<512x32xf32, #tpu.memory_space<vmem>>, vector<512x32xf32>,
    return
  }
  func.func @transform_0(%arg0: i32) -> (i32, i32) {
    %c0_i32 = arith.constant 0 : i32
    %c0_i32_0 = arith.constant 0 : i32
    return %arg0, %c0_i32 : i32, i32
  }
  func.func @transform_1(%arg0: i32) -> (i32, i32) {
    %c0_i32 = arith.constant 0 : i32
    %c0_i32_0 = arith.constant 0 : i32
    %c0_i32_1 = arith.constant 0 : i32
    return %c0_i32, %c0_i32_0 : i32, i32
  }
  func.func @transform_2(%arg0: i32) -> (i32, i32) {
    %c0_i32 = arith.constant 0 : i32
    %c0_i32_0 = arith.constant 0 : i32
    %c0_i32_1 = arith.constant 0 : i32
    return %c0_i32, %c0_i32_0 : i32, i32
  }
  func.func @transform_3(%arg0: i32) -> (i32, i32) {
    %c0_i32 = arith.constant 0 : i32
    %c0_i32_0 = arith.constant 0 : i32
    return %arg0, %c0_i32 : i32, i32
  }
}

module attributes {stable_mosaic.version = 11 : i64} {
  func.func @_matmul_kernel(%arg0: i32, %arg1: memref<48x384xf32, #tpu.memory_space<vmem>>, %arg2: memref<384x384xbf16, #tpu.memory_space<vmem>>, %arg3: memref<48x384xf32, #tpu.memory_space<vmem>>) attributes {dimension_semantics = [#tpu.dimension_semantics<parallel>], iteration_bounds = array<i64: 1>, scalar_prefetch = 0 : i64, scratch_operands = 0 : i64, tpu.core_type = #tpu.core_type<tc>, window_params = [{transform_indices = @transform_0, window_bounds = array<i64: 48, 384>}, {pipeline_mode = #tpu.pipeline_mode<synchronous>, transform_indices = @transform_1, window_bounds = array<i64: 384, 384>}, {transform_indices = @transform_2, window_bounds = array<i64: 48, 384>}]} {
    %c0 = arith.constant 0 : index
    %c0_0 = arith.constant 0 : index
    %0 = vector.load %arg1[%c0, %c0_0] : memref<48x384xf32, #tpu.memory_space<vmem>>, vector<48x384xf32>
    %1 = arith.truncf %0 : vector<48x384xf32> to vector<48x384xbf16>
    %c0_1 = arith.constant 0 : index
    %c0_2 = arith.constant 0 : index
    %2 = vector.load %arg2[%c0_1, %c0_2] : memref<384x384xbf16, #tpu.memory_space<vmem>>, vector<384x384xbf16>
    %cst = arith.constant dense<0.000000e+00> : vector<48x384xf32>
    %3 = tpu.matmul %1, %2, %cst {dimension_numbers = #tpu.dot_dimension_numbers<[1], [0], [0], [1], [0, 0, 1, 1], [], []>} : vector<48x384xbf16>, vector<384x384xbf16>, vector<48x384xf32> -> vector<48x384xf32>
    %c0_3 = arith.constant 0 : index
    %c0_4 = arith.constant 0 : index
    %4 = vector.load %arg3[%c0_3, %c0_4] : memref<48x384xf32, #tpu.memory_space<vmem>>, vector<48x384xf32>
    tpu.vector_store %arg3[%c0_3, %c0_4], %3 {strides = array<i32>} : memref<48x384xf32, #tpu.memory_space<vmem>>, vector<48x384xf32>,
    return
  }
  func.func @transform_0(%arg0: i32) -> (i32, i32) {
    %c0_i32 = arith.constant 0 : i32
    %c0_i32_0 = arith.constant 0 : i32
    return %arg0, %c0_i32 : i32, i32
  }
  func.func @transform_1(%arg0: i32) -> (i32, i32) {
    %c0_i32 = arith.constant 0 : i32
    %c0_i32_0 = arith.constant 0 : i32
    %c0_i32_1 = arith.constant 0 : i32
    return %c0_i32, %c0_i32_0 : i32, i32
  }
  func.func @transform_2(%arg0: i32) -> (i32, i32) {
    %c0_i32 = arith.constant 0 : i32
    %c0_i32_0 = arith.constant 0 : i32
    return %arg0, %c0_i32 : i32, i32
  }
}

module attributes {stable_mosaic.version = 11 : i64} {
  func.func @_ffn_residual_kernel(%arg0: i32, %arg1: memref<576x32xf32, #tpu.memory_space<vmem>>, %arg2: memref<576x32xf32, #tpu.memory_space<vmem>>, %arg3: memref<32x128xbf16, #tpu.memory_space<vmem>>, %arg4: memref<1x128xf32, #tpu.memory_space<vmem>>, %arg5: memref<128x32xbf16, #tpu.memory_space<vmem>>, %arg6: memref<1x32xf32, #tpu.memory_space<vmem>>, %arg7: memref<576x32xf32, #tpu.memory_space<vmem>>, %arg8: memref<576x32xf32, #tpu.memory_space<vmem>>) attributes {dimension_semantics = [#tpu.dimension_semantics<parallel>], iteration_bounds = array<i64: 2>, scalar_prefetch = 0 : i64, scratch_operands = 0 : i64, tpu.core_type = #tpu.core_type<tc>, window_params = [{transform_indices = @transform_0, window_bounds = array<i64: 576, 32>}, {transform_indices = @transform_1, window_bounds = array<i64: 576, 32>}, {pipeline_mode = #tpu.pipeline_mode<synchronous>, transform_indices = @transform_2, window_bounds = array<i64: 32, 128>}, {pipeline_mode = #tpu.pipeline_mode<synchronous>, transform_indices = @transform_3, window_bounds = array<i64: 1, 128>}, {pipeline_mode = #tpu.pipeline_mode<synchronous>, transform_indices = @transform_4, window_bounds = array<i64: 128, 32>}, {pipeline_mode = #tpu.pipeline_mode<synchronous>, transform_indices = @transform_5, window_bounds = array<i64: 1, 32>}, {transform_indices = @transform_6, window_bounds = array<i64: 576, 32>}, {transform_indices = @transform_7, window_bounds = array<i64: 576, 32>}]} {
    %c0 = arith.constant 0 : index
    %c0_0 = arith.constant 0 : index
    %0 = vector.load %arg2[%c0, %c0_0] : memref<576x32xf32, #tpu.memory_space<vmem>>, vector<576x32xf32>
    %1 = arith.truncf %0 : vector<576x32xf32> to vector<576x32xbf16>
    %c0_1 = arith.constant 0 : index
    %c0_2 = arith.constant 0 : index
    %2 = vector.load %arg3[%c0_1, %c0_2] : memref<32x128xbf16, #tpu.memory_space<vmem>>, vector<32x128xbf16>
    %cst = arith.constant dense<0.000000e+00> : vector<576x128xf32>
    %3 = tpu.matmul %1, %2, %cst {dimension_numbers = #tpu.dot_dimension_numbers<[1], [0], [0], [1], [0, 0, 1, 1], [], []>} : vector<576x32xbf16>, vector<32x128xbf16>, vector<576x128xf32> -> vector<576x128xf32>
    %c0_3 = arith.constant 0 : index
    %c0_4 = arith.constant 0 : index
    %4 = vector.load %arg4[%c0_3, %c0_4] : memref<1x128xf32, #tpu.memory_space<vmem>>, vector<1x128xf32>
    %5 = vector.broadcast %4 : vector<1x128xf32> to vector<576x128xf32>
    %6 = arith.addf %3, %5 : vector<576x128xf32>
    %cst_5 = arith.constant 0.000000e+00 : f32
    %7 = vector.broadcast %cst_5 : f32 to vector<576x128xf32>
    %8 = arith.maximumf %6, %7 : vector<576x128xf32>
    %9 = arith.truncf %8 : vector<576x128xf32> to vector<576x128xbf16>
    %c0_6 = arith.constant 0 : index
    %c0_7 = arith.constant 0 : index
    %10 = vector.load %arg5[%c0_6, %c0_7] : memref<128x32xbf16, #tpu.memory_space<vmem>>, vector<128x32xbf16>
    %cst_8 = arith.constant dense<0.000000e+00> : vector<576x32xf32>
    %11 = tpu.matmul %9, %10, %cst_8 {dimension_numbers = #tpu.dot_dimension_numbers<[1], [0], [0], [1], [0, 0, 1, 1], [], []>} : vector<576x128xbf16>, vector<128x32xbf16>, vector<576x32xf32> -> vector<576x32xf32>
    %c0_9 = arith.constant 0 : index
    %c0_10 = arith.constant 0 : index
    %12 = vector.load %arg6[%c0_9, %c0_10] : memref<1x32xf32, #tpu.memory_space<vmem>>, vector<1x32xf32>
    %13 = vector.broadcast %12 : vector<1x32xf32> to vector<576x32xf32>
    %14 = arith.addf %11, %13 : vector<576x32xf32>
    %c0_11 = arith.constant 0 : index
    %c0_12 = arith.constant 0 : index
    %15 = vector.load %arg8[%c0_11, %c0_12] : memref<576x32xf32, #tpu.memory_space<vmem>>, vector<576x32xf32>
    tpu.vector_store %arg8[%c0_11, %c0_12], %14 {strides = array<i32>} : memref<576x32xf32, #tpu.memory_space<vmem>>, vector<576x32xf32>,
    %c0_13 = arith.constant 0 : index
    %c0_14 = arith.constant 0 : index
    %16 = vector.load %arg1[%c0_13, %c0_14] : memref<576x32xf32, #tpu.memory_space<vmem>>, vector<576x32xf32>
    %17 = arith.addf %16, %14 : vector<576x32xf32>
    %c0_15 = arith.constant 0 : index
    %c0_16 = arith.constant 0 : index
    %18 = vector.load %arg7[%c0_15, %c0_16] : memref<576x32xf32, #tpu.memory_space<vmem>>, vector<576x32xf32>
    tpu.vector_store %arg7[%c0_15, %c0_16], %17 {strides = array<i32>} : memref<576x32xf32, #tpu.memory_space<vmem>>, vector<576x32xf32>,
    return
  }
  func.func @transform_0(%arg0: i32) -> (i32, i32) {
    %c0_i32 = arith.constant 0 : i32
    %c0_i32_0 = arith.constant 0 : i32
    return %arg0, %c0_i32 : i32, i32
  }
  func.func @transform_1(%arg0: i32) -> (i32, i32) {
    %c0_i32 = arith.constant 0 : i32
    %c0_i32_0 = arith.constant 0 : i32
    return %arg0, %c0_i32 : i32, i32
  }
  func.func @transform_2(%arg0: i32) -> (i32, i32) {
    %c0_i32 = arith.constant 0 : i32
    %c0_i32_0 = arith.constant 0 : i32
    %c0_i32_1 = arith.constant 0 : i32
    return %c0_i32, %c0_i32_0 : i32, i32
  }
  func.func @transform_3(%arg0: i32) -> (i32, i32) {
    %c0_i32 = arith.constant 0 : i32
    %c0_i32_0 = arith.constant 0 : i32
    %c0_i32_1 = arith.constant 0 : i32
    return %c0_i32, %c0_i32_0 : i32, i32
  }
  func.func @transform_4(%arg0: i32) -> (i32, i32) {
    %c0_i32 = arith.constant 0 : i32
    %c0_i32_0 = arith.constant 0 : i32
    %c0_i32_1 = arith.constant 0 : i32
    return %c0_i32, %c0_i32_0 : i32, i32
  }
  func.func @transform_5(%arg0: i32) -> (i32, i32) {
    %c0_i32 = arith.constant 0 : i32
    %c0_i32_0 = arith.constant 0 : i32
    %c0_i32_1 = arith.constant 0 : i32
    return %c0_i32, %c0_i32_0 : i32, i32
  }
  func.func @transform_6(%arg0: i32) -> (i32, i32) {
    %c0_i32 = arith.constant 0 : i32
    %c0_i32_0 = arith.constant 0 : i32
    return %arg0, %c0_i32 : i32, i32
  }
  func.func @transform_7(%arg0: i32) -> (i32, i32) {
    %c0_i32 = arith.constant 0 : i32
    %c0_i32_0 = arith.constant 0 : i32
    return %arg0, %c0_i32 : i32, i32
  }
}

module attributes {stable_mosaic.version = 11 : i64} {
  func.func @_ffn_residual_kernel(%arg0: i32, %arg1: memref<576x32xf32, #tpu.memory_space<vmem>>, %arg2: memref<576x32xf32, #tpu.memory_space<vmem>>, %arg3: memref<32x128xbf16, #tpu.memory_space<vmem>>, %arg4: memref<1x128xf32, #tpu.memory_space<vmem>>, %arg5: memref<128x32xbf16, #tpu.memory_space<vmem>>, %arg6: memref<1x32xf32, #tpu.memory_space<vmem>>, %arg7: memref<576x32xf32, #tpu.memory_space<vmem>>, %arg8: memref<576x32xf32, #tpu.memory_space<vmem>>) attributes {dimension_semantics = [#tpu.dimension_semantics<parallel>], iteration_bounds = array<i64: 2>, scalar_prefetch = 0 : i64, scratch_operands = 0 : i64, tpu.core_type = #tpu.core_type<tc>, window_params = [{transform_indices = @transform_0, window_bounds = array<i64: 576, 32>}, {transform_indices = @transform_1, window_bounds = array<i64: 576, 32>}, {pipeline_mode = #tpu.pipeline_mode<synchronous>, transform_indices = @transform_2, window_bounds = array<i64: 32, 128>}, {pipeline_mode = #tpu.pipeline_mode<synchronous>, transform_indices = @transform_3, window_bounds = array<i64: 1, 128>}, {pipeline_mode = #tpu.pipeline_mode<synchronous>, transform_indices = @transform_4, window_bounds = array<i64: 128, 32>}, {pipeline_mode = #tpu.pipeline_mode<synchronous>, transform_indices = @transform_5, window_bounds = array<i64: 1, 32>}, {transform_indices = @transform_6, window_bounds = array<i64: 576, 32>}, {transform_indices = @transform_7, window_bounds = array<i64: 576, 32>}]} {
    %c0 = arith.constant 0 : index
    %c0_0 = arith.constant 0 : index
    %0 = vector.load %arg2[%c0, %c0_0] : memref<576x32xf32, #tpu.memory_space<vmem>>, vector<576x32xf32>
    %1 = arith.truncf %0 : vector<576x32xf32> to vector<576x32xbf16>
    %c0_1 = arith.constant 0 : index
    %c0_2 = arith.constant 0 : index
    %2 = vector.load %arg3[%c0_1, %c0_2] : memref<32x128xbf16, #tpu.memory_space<vmem>>, vector<32x128xbf16>
    %cst = arith.constant dense<0.000000e+00> : vector<576x128xf32>
    %3 = tpu.matmul %1, %2, %cst {dimension_numbers = #tpu.dot_dimension_numbers<[1], [0], [0], [1], [0, 0, 1, 1], [], []>} : vector<576x32xbf16>, vector<32x128xbf16>, vector<576x128xf32> -> vector<576x128xf32>
    %c0_3 = arith.constant 0 : index
    %c0_4 = arith.constant 0 : index
    %4 = vector.load %arg4[%c0_3, %c0_4] : memref<1x128xf32, #tpu.memory_space<vmem>>, vector<1x128xf32>
    %5 = vector.broadcast %4 : vector<1x128xf32> to vector<576x128xf32>
    %6 = arith.addf %3, %5 : vector<576x128xf32>
    %cst_5 = arith.constant 0.000000e+00 : f32
    %7 = vector.broadcast %cst_5 : f32 to vector<576x128xf32>
    %8 = arith.maximumf %6, %7 : vector<576x128xf32>
    %9 = arith.truncf %8 : vector<576x128xf32> to vector<576x128xbf16>
    %c0_6 = arith.constant 0 : index
    %c0_7 = arith.constant 0 : index
    %10 = vector.load %arg5[%c0_6, %c0_7] : memref<128x32xbf16, #tpu.memory_space<vmem>>, vector<128x32xbf16>
    %cst_8 = arith.constant dense<0.000000e+00> : vector<576x32xf32>
    %11 = tpu.matmul %9, %10, %cst_8 {dimension_numbers = #tpu.dot_dimension_numbers<[1], [0], [0], [1], [0, 0, 1, 1], [], []>} : vector<576x128xbf16>, vector<128x32xbf16>, vector<576x32xf32> -> vector<576x32xf32>
    %c0_9 = arith.constant 0 : index
    %c0_10 = arith.constant 0 : index
    %12 = vector.load %arg6[%c0_9, %c0_10] : memref<1x32xf32, #tpu.memory_space<vmem>>, vector<1x32xf32>
    %13 = vector.broadcast %12 : vector<1x32xf32> to vector<576x32xf32>
    %14 = arith.addf %11, %13 : vector<576x32xf32>
    %c0_11 = arith.constant 0 : index
    %c0_12 = arith.constant 0 : index
    %15 = vector.load %arg8[%c0_11, %c0_12] : memref<576x32xf32, #tpu.memory_space<vmem>>, vector<576x32xf32>
    tpu.vector_store %arg8[%c0_11, %c0_12], %14 {strides = array<i32>} : memref<576x32xf32, #tpu.memory_space<vmem>>, vector<576x32xf32>,
    %c0_13 = arith.constant 0 : index
    %c0_14 = arith.constant 0 : index
    %16 = vector.load %arg1[%c0_13, %c0_14] : memref<576x32xf32, #tpu.memory_space<vmem>>, vector<576x32xf32>
    %17 = arith.addf %16, %14 : vector<576x32xf32>
    %c0_15 = arith.constant 0 : index
    %c0_16 = arith.constant 0 : index
    %18 = vector.load %arg7[%c0_15, %c0_16] : memref<576x32xf32, #tpu.memory_space<vmem>>, vector<576x32xf32>
    tpu.vector_store %arg7[%c0_15, %c0_16], %17 {strides = array<i32>} : memref<576x32xf32, #tpu.memory_space<vmem>>, vector<576x32xf32>,
    return
  }
  func.func @transform_0(%arg0: i32) -> (i32, i32) {
    %c0_i32 = arith.constant 0 : i32
    %c0_i32_0 = arith.constant 0 : i32
    return %arg0, %c0_i32 : i32, i32
  }
  func.func @transform_1(%arg0: i32) -> (i32, i32) {
    %c0_i32 = arith.constant 0 : i32
    %c0_i32_0 = arith.constant 0 : i32
    return %arg0, %c0_i32 : i32, i32
  }
  func.func @transform_2(%arg0: i32) -> (i32, i32) {
    %c0_i32 = arith.constant 0 : i32
    %c0_i32_0 = arith.constant 0 : i32
    %c0_i32_1 = arith.constant 0 : i32
    return %c0_i32, %c0_i32_0 : i32, i32
  }
  func.func @transform_3(%arg0: i32) -> (i32, i32) {
    %c0_i32 = arith.constant 0 : i32
    %c0_i32_0 = arith.constant 0 : i32
    %c0_i32_1 = arith.constant 0 : i32
    return %c0_i32, %c0_i32_0 : i32, i32
  }
  func.func @transform_4(%arg0: i32) -> (i32, i32) {
    %c0_i32 = arith.constant 0 : i32
    %c0_i32_0 = arith.constant 0 : i32
    %c0_i32_1 = arith.constant 0 : i32
    return %c0_i32, %c0_i32_0 : i32, i32
  }
  func.func @transform_5(%arg0: i32) -> (i32, i32) {
    %c0_i32 = arith.constant 0 : i32
    %c0_i32_0 = arith.constant 0 : i32
    %c0_i32_1 = arith.constant 0 : i32
    return %c0_i32, %c0_i32_0 : i32, i32
  }
  func.func @transform_6(%arg0: i32) -> (i32, i32) {
    %c0_i32 = arith.constant 0 : i32
    %c0_i32_0 = arith.constant 0 : i32
    return %arg0, %c0_i32 : i32, i32
  }
  func.func @transform_7(%arg0: i32) -> (i32, i32) {
    %c0_i32 = arith.constant 0 : i32
    %c0_i32_0 = arith.constant 0 : i32
    return %arg0, %c0_i32 : i32, i32
  }
}

module attributes {stable_mosaic.version = 11 : i64} {
  func.func @_mlp_kernel(%arg0: i32, %arg1: memref<512x32xf32, #tpu.memory_space<vmem>>, %arg2: memref<32x128xbf16, #tpu.memory_space<vmem>>, %arg3: memref<1x128xf32, #tpu.memory_space<vmem>>, %arg4: memref<128x1xbf16, #tpu.memory_space<vmem>>, %arg5: memref<1x1xf32, #tpu.memory_space<vmem>>, %arg6: memref<512x1xf32, #tpu.memory_space<vmem>>) attributes {dimension_semantics = [#tpu.dimension_semantics<parallel>], iteration_bounds = array<i64: 1>, scalar_prefetch = 0 : i64, scratch_operands = 0 : i64, tpu.core_type = #tpu.core_type<tc>, window_params = [{transform_indices = @transform_0, window_bounds = array<i64: 512, 32>}, {pipeline_mode = #tpu.pipeline_mode<synchronous>, transform_indices = @transform_1, window_bounds = array<i64: 32, 128>}, {pipeline_mode = #tpu.pipeline_mode<synchronous>, transform_indices = @transform_2, window_bounds = array<i64: 1, 128>}, {pipeline_mode = #tpu.pipeline_mode<synchronous>, transform_indices = @transform_3, window_bounds = array<i64: 128, 1>}, {pipeline_mode = #tpu.pipeline_mode<synchronous>, transform_indices = @transform_4, window_bounds = array<i64: 1, 1>}, {transform_indices = @transform_5, window_bounds = array<i64: 512, 1>}]} {
    %c0 = arith.constant 0 : index
    %c0_0 = arith.constant 0 : index
    %0 = vector.load %arg1[%c0, %c0_0] : memref<512x32xf32, #tpu.memory_space<vmem>>, vector<512x32xf32>
    %1 = arith.truncf %0 : vector<512x32xf32> to vector<512x32xbf16>
    %c0_1 = arith.constant 0 : index
    %c0_2 = arith.constant 0 : index
    %2 = vector.load %arg2[%c0_1, %c0_2] : memref<32x128xbf16, #tpu.memory_space<vmem>>, vector<32x128xbf16>
    %cst = arith.constant dense<0.000000e+00> : vector<512x128xf32>
    %3 = tpu.matmul %1, %2, %cst {dimension_numbers = #tpu.dot_dimension_numbers<[1], [0], [0], [1], [0, 0, 1, 1], [], []>} : vector<512x32xbf16>, vector<32x128xbf16>, vector<512x128xf32> -> vector<512x128xf32>
    %c0_3 = arith.constant 0 : index
    %c0_4 = arith.constant 0 : index
    %4 = vector.load %arg3[%c0_3, %c0_4] : memref<1x128xf32, #tpu.memory_space<vmem>>, vector<1x128xf32>
    %5 = vector.broadcast %4 : vector<1x128xf32> to vector<512x128xf32>
    %6 = arith.addf %3, %5 : vector<512x128xf32>
    %7 = arith.truncf %6 : vector<512x128xf32> to vector<512x128xbf16>
    %c0_5 = arith.constant 0 : index
    %c0_6 = arith.constant 0 : index
    %8 = vector.load %arg4[%c0_5, %c0_6] : memref<128x1xbf16, #tpu.memory_space<vmem>>, vector<128x1xbf16>
    %cst_7 = arith.constant dense<0.000000e+00> : vector<512x1xf32>
    %9 = tpu.matmul %7, %8, %cst_7 {dimension_numbers = #tpu.dot_dimension_numbers<[1], [0], [0], [1], [0, 0, 1, 1], [], []>} : vector<512x128xbf16>, vector<128x1xbf16>, vector<512x1xf32> -> vector<512x1xf32>
    %c0_8 = arith.constant 0 : index
    %c0_9 = arith.constant 0 : index
    %10 = vector.load %arg5[%c0_8, %c0_9] : memref<1x1xf32, #tpu.memory_space<vmem>>, vector<1x1xf32>
    %11 = vector.broadcast %10 : vector<1x1xf32> to vector<512x1xf32>
    %12 = arith.addf %9, %11 : vector<512x1xf32>
    %c0_10 = arith.constant 0 : index
    %c0_11 = arith.constant 0 : index
    %13 = vector.load %arg6[%c0_10, %c0_11] : memref<512x1xf32, #tpu.memory_space<vmem>>, vector<512x1xf32>
    tpu.vector_store %arg6[%c0_10, %c0_11], %12 {strides = array<i32>} : memref<512x1xf32, #tpu.memory_space<vmem>>, vector<512x1xf32>,
    return
  }
  func.func @transform_0(%arg0: i32) -> (i32, i32) {
    %c0_i32 = arith.constant 0 : i32
    %c0_i32_0 = arith.constant 0 : i32
    return %arg0, %c0_i32 : i32, i32
  }
  func.func @transform_1(%arg0: i32) -> (i32, i32) {
    %c0_i32 = arith.constant 0 : i32
    %c0_i32_0 = arith.constant 0 : i32
    %c0_i32_1 = arith.constant 0 : i32
    return %c0_i32, %c0_i32_0 : i32, i32
  }
  func.func @transform_2(%arg0: i32) -> (i32, i32) {
    %c0_i32 = arith.constant 0 : i32
    %c0_i32_0 = arith.constant 0 : i32
    %c0_i32_1 = arith.constant 0 : i32
    return %c0_i32, %c0_i32_0 : i32, i32
  }
  func.func @transform_3(%arg0: i32) -> (i32, i32) {
    %c0_i32 = arith.constant 0 : i32
    %c0_i32_0 = arith.constant 0 : i32
    %c0_i32_1 = arith.constant 0 : i32
    return %c0_i32, %c0_i32_0 : i32, i32
  }
  func.func @transform_4(%arg0: i32) -> (i32, i32) {
    %c0_i32 = arith.constant 0 : i32
    %c0_i32_0 = arith.constant 0 : i32
    %c0_i32_1 = arith.constant 0 : i32
    return %c0_i32, %c0_i32_0 : i32, i32
  }
  func.func @transform_5(%arg0: i32) -> (i32, i32) {
    %c0_i32 = arith.constant 0 : i32
    %c0_i32_0 = arith.constant 0 : i32
    return %arg0, %c0_i32 : i32, i32
  }
}

</mosaic_0001>

<bundles_post_ra>
// kernel: ffno_forward.8
= control target key start
LH: loop header
LB: loop body
LE: loop exit
PB: predicated region body
PF: predicated region fallthrough
CT: control target
= control target key end

     0   :  { %vm213_vm0 = vcmask 1043456   ;;  %vm116_vm1 = vcmask 64512   ;;  %vm386_vm2 = vcmask 261120   ;;  %s1063_s1 = inlined_call_operand.vmem [shape: bf16[8,32], index: 1, kind: input, shape index: {}]   ;;  %s1064_s0 = inlined_call_operand.vmem [shape: f32[512,8], index: 0, kind: input, shape index: {}]   ;;  %s1065_s2 = inlined_call_operand.vmem [shape: f32[1,32], index: 2, kind: input, shape index: {}]   ;;  %s1066_s3 = inlined_call_operand.vmem [shape: f32[512,32], index: 3, kind: output, shape index: {}]  }
   0x1   :  { %v111_v0 = vld [vmem:[%s1063_s1] sm:$0xf]  ;;  %v16_v2 = vld [vmem:[%s1064_s0 + $0x8] sm:$0xff]  ;;  %v17_v14 = vld [vmem:[%s1064_s0 + $0x10] sm:$0xff] }
   0x2   :  { %v15_v1 = vld [vmem:[%s1064_s0] sm:$0xff]  ;;  %v215_v3 = vsel %vm213_vm0, %v111_v0, 0  ;;  %v32_v6 = vld [vmem:[%s1064_s0 + $0x88] sm:$0xff]  ;;  %v18_v15 = vld [vmem:[%s1064_s0 + $0x18] sm:$0xff] }
   0x3   :  { %v79_v4 = vpack.c.bf16 %v16_v2, %v15_v1  ;;  %v31_v5 = vld [vmem:[%s1064_s0 + $0x80] sm:$0xff]  ;;  %224 = vmatpush.bf16.msra.mxu0 %v215_v3  ;;  %487 = vmatpush.bf16.msra.mxu1 %v215_v3  ;;  %v48_v9 = vld [vmem:[%s1064_s0 + $0x108] sm:$0xff]  ;;  %v33_v16 = vld [vmem:[%s1064_s0 + $0x90] sm:$0xff]  ;;  %v80_v22 = vpack.c.bf16 %v18_v15, %v17_v14 }
   0x4   :  { %v47_v7 = vld [vmem:[%s1064_s0 + $0x100] sm:$0xff]  ;;  %v87_v8 = vpack.c.bf16 %v32_v6, %v31_v5  ;;  %v64_v11 = vld [vmem:[%s1064_s0 + $0x188] sm:$0xff]  ;;  %488 = vmatpush.bf16.msra.mxu2 %v215_v3  ;;  %489 = vmatpush.bf16.msra.mxu3 %v215_v3  ;;  %v34_v17 = vld [vmem:[%s1064_s0 + $0x98] sm:$0xff] }
   0x5   :  { %v63_v10 = vld [vmem:[%s1064_s0 + $0x180] sm:$0xff]  ;;  %v95_v12 = vpack.c.bf16 %v48_v9, %v47_v7  ;;  %v49_v18 = vld [vmem:[%s1064_s0 + $0x110] sm:$0xff]  ;;  %v50_v19 = vld [vmem:[%s1064_s0 + $0x118] sm:$0xff]  ;;  %v88_v23 = vpack.c.bf16 %v34_v17, %v33_v16 }
   0x6   :  { %v103_v13 = vpack.c.bf16 %v64_v11, %v63_v10  ;;  %455 = vmatmul.msk.bf16.vlgmr.msra.gmra.mxu0 %vm116_vm1, %v79_v4  ;;  %463 = vmatmul.msk.bf16.vlgmr.msra.gmra.mxu1 %vm116_vm1, %v87_v8  ;;  %v65_v20 = vld [vmem:[%s1064_s0 + $0x190] sm:$0xff]  ;;  %v66_v21 = vld [vmem:[%s1064_s0 + $0x198] sm:$0xff]  ;;  %v96_v24 = vpack.c.bf16 %v50_v19, %v49_v18  ;;  %v19_v26 = vld [vmem:[%s1064_s0 + $0x20] sm:$0xff] }
   0x7   :  { %471 = vmatmul.msk.bf16.vlgmr.msra.gmra.mxu2 %vm116_vm1, %v95_v12  ;;  %v104_v25 = vpack.c.bf16 %v66_v21, %v65_v20  ;;  %v20_v27 = vld [vmem:[%s1064_s0 + $0x28] sm:$0xff]  ;;  %v35_v28 = vld [vmem:[%s1064_s0 + $0xa0] sm:$0xff]  ;;  %v21_v38 = vld [vmem:[%s1064_s0 + $0x30] sm:$0xff] }
   0x8   :  { %479 = vmatmul.msk.bf16.vlgmr.msra.gmra.mxu3 %vm116_vm1, %v103_v13  ;;  %v36_v29 = vld [vmem:[%s1064_s0 + $0xa8] sm:$0xff]  ;;  %v51_v30 = vld [vmem:[%s1064_s0 + $0x120] sm:$0xff]  ;;  %v81_v34 = vpack.c.bf16 %v20_v27, %v19_v26  ;;  %v22_v39 = vld [vmem:[%s1064_s0 + $0x38] sm:$0xff] }
   0x9   :  { %v52_v31 = vld [vmem:[%s1064_s0 + $0x128] sm:$0xff]  ;;  %v67_v32 = vld [vmem:[%s1064_s0 + $0x1a0] sm:$0xff]  ;;  %v89_v35 = vpack.c.bf16 %v36_v29, %v35_v28  ;;  %v37_v40 = vld [vmem:[%s1064_s0 + $0xb0] sm:$0xff]  ;;  %v82_v46 = vpack.c.bf16 %v22_v39, %v21_v38 }
   0xa   :  { %v68_v33 = vld [vmem:[%s1064_s0 + $0x1a8] sm:$0xff]  ;;  %v97_v36 = vpack.c.bf16 %v52_v31, %v51_v30  ;;  %v38_v41 = vld [vmem:[%s1064_s0 + $0xb8] sm:$0xff]  ;;  %v53_v42 = vld [vmem:[%s1064_s0 + $0x130] sm:$0xff] }
   0xb   :  { %v105_v37 = vpack.c.bf16 %v68_v33, %v67_v32  ;;  %v54_v43 = vld [vmem:[%s1064_s0 + $0x138] sm:$0xff]  ;;  %v69_v44 = vld [vmem:[%s1064_s0 + $0x1b0] sm:$0xff]  ;;  %v90_v47 = vpack.c.bf16 %v38_v41, %v37_v40  ;;  %v23_v50 = vld [vmem:[%s1064_s0 + $0x40] sm:$0xff] }
   0xc   :  { %v70_v45 = vld [vmem:[%s1064_s0 + $0x1b8] sm:$0xff]  ;;  %v98_v48 = vpack.c.bf16 %v54_v43, %v53_v42  ;;  %v24_v51 = vld [vmem:[%s1064_s0 + $0x48] sm:$0xff]  ;;  %v39_v52 = vld [vmem:[%s1064_s0 + $0xc0] sm:$0xff] }
   0xd   :  { %v106_v49 = vpack.c.bf16 %v70_v45, %v69_v44  ;;  %v40_v53 = vld [vmem:[%s1064_s0 + $0xc8] sm:$0xff]  ;;  %v55_v54 = vld [vmem:[%s1064_s0 + $0x140] sm:$0xff]  ;;  %v83_v58 = vpack.c.bf16 %v24_v51, %v23_v50  ;;  %v25_v62 = vld [vmem:[%s1064_s0 + $0x50] sm:$0xff] }
   0xe   :  { %v56_v55 = vld [vmem:[%s1064_s0 + $0x148] sm:$0xff]  ;;  %v71_v56 = vld [vmem:[%s1064_s0 + $0x1c0] sm:$0xff]  ;;  %v91_v59 = vpack.c.bf16 %v40_v53, %v39_v52  ;;  %v26_v63 = vld [vmem:[%s1064_s0 + $0x58] sm:$0xff] }
   0xf   :  { %v72_v57 = vld [vmem:[%s1064_s0 + $0x1c8] sm:$0xff]  ;;  %v99_v60 = vpack.c.bf16 %v56_v55, %v55_v54  ;;  %v41_v0 = vld [vmem:[%s1064_s0 + $0xd0] sm:$0xff]  ;;  %v42_v1 = vld [vmem:[%s1064_s0 + $0xd8] sm:$0xff]  ;;  %v84_v6 = vpack.c.bf16 %v26_v63, %v25_v62 }
  0x10   :  { %v107_v61 = vpack.c.bf16 %v72_v57, %v71_v56  ;;  %v57_v2 = vld [vmem:[%s1064_s0 + $0x150] sm:$0xff]  ;;  %v58_v3 = vld [vmem:[%s1064_s0 + $0x158] sm:$0xff]  ;;  %v92_v7 = vpack.c.bf16 %v42_v1, %v41_v0  ;;  %v27_v10 = vld [vmem:[%s1064_s0 + $0x60] sm:$0xff] }
  0x11   :  { %v73_v4 = vld [vmem:[%s1064_s0 + $0x1d0] sm:$0xff]  ;;  %v74_v5 = vld [vmem:[%s1064_s0 + $0x1d8] sm:$0xff]  ;;  %v100_v8 = vpack.c.bf16 %v58_v3, %v57_v2  ;;  %v28_v11 = vld [vmem:[%s1064_s0 + $0x68] sm:$0xff] }
  0x12   :  { %v108_v9 = vpack.c.bf16 %v74_v5, %v73_v4  ;;  %v43_v12 = vld [vmem:[%s1064_s0 + $0xe0] sm:$0xff]  ;;  %v44_v13 = vld [vmem:[%s1064_s0 + $0xe8] sm:$0xff]  ;;  %v85_v18 = vpack.c.bf16 %v28_v11, %v27_v10  ;;  %v61_v26 = vld [vmem:[%s1064_s0 + $0x170] sm:$0xff] }
  0x13   :  { %v59_v14 = vld [vmem:[%s1064_s0 + $0x160] sm:$0xff]  ;;  %v60_v15 = vld [vmem:[%s1064_s0 + $0x168] sm:$0xff]  ;;  %v93_v19 = vpack.c.bf16 %v44_v13, %v43_v12  ;;  %v62_v27 = vld [vmem:[%s1064_s0 + $0x178] sm:$0xff] }
  0x14   :  { %v75_v16 = vld [vmem:[%s1064_s0 + $0x1e0] sm:$0xff]  ;;  %v76_v17 = vld [vmem:[%s1064_s0 + $0x1e8] sm:$0xff]  ;;  %v101_v20 = vpack.c.bf16 %v60_v15, %v59_v14  ;;  %v77_v28 = vld [vmem:[%s1064_s0 + $0x1f0] sm:$0xff]  ;;  %v102_v32 = vpack.c.bf16 %v62_v27, %v61_v26 }
  0x15   :  { %v109_v21 = vpack.c.bf16 %v76_v17, %v75_v16  ;;  %v78_v29 = vld [vmem:[%s1064_s0 + $0x1f8] sm:$0xff] }
  0x16   :  { %456 = vmatmul.msk.bf16.gmra.mxu0 %vm116_vm1, %v80_v22  ;;  %464 = vmatmul.msk.bf16.gmra.mxu1 %vm116_vm1, %v88_v23  ;;  %v29_v22 = vld [vmem:[%s1064_s0 + $0x70] sm:$0xff]  ;;  %v30_v23 = vld [vmem:[%s1064_s0 + $0x78] sm:$0xff]  ;;  %v110_v33 = vpack.c.bf16 %v78_v29, %v77_v28 }
  0x17   :  { %472 = vmatmul.msk.bf16.gmra.mxu2 %vm116_vm1, %v96_v24  ;;  %v45_v24 = vld [vmem:[%s1064_s0 + $0xf0] sm:$0xff]  ;;  %v86_v30 = vpack.c.bf16 %v30_v23, %v29_v22 }
  0x18   :  { %480 = vmatmul.msk.bf16.gmra.mxu3 %vm116_vm1, %v104_v25  ;;  %v46_v25 = vld [vmem:[%s1064_s0 + $0xf8] sm:$0xff] }
  0x19   :  { %v94_v31 = vpack.c.bf16 %v46_v25, %v45_v24 }
  0x26   :  { %457 = vmatmul.msk.bf16.gmra.mxu0 %vm116_vm1, %v81_v34  ;;  %465 = vmatmul.msk.bf16.gmra.mxu1 %vm116_vm1, %v89_v35  ;;  %v741_v34 = vld [vmem:[%s1065_s2] ss:$0 sm:$0xff] }
  0x27   :  { %473 = vmatmul.msk.bf16.gmra.mxu2 %vm116_vm1, %v97_v36 }
  0x28   :  { %481 = vmatmul.msk.bf16.gmra.mxu3 %vm116_vm1, %v105_v37 }
  0x36   :  { %458 = vmatmul.msk.bf16.gmra.mxu0 %vm116_vm1, %v82_v46  ;;  %466 = vmatmul.msk.bf16.gmra.mxu1 %vm116_vm1, %v90_v47 }
  0x37   :  { %474 = vmatmul.msk.bf16.gmra.mxu2 %vm116_vm1, %v98_v48 }
  0x38   :  { %482 = vmatmul.msk.bf16.gmra.mxu3 %vm116_vm1, %v106_v49 }
  0x46   :  { %459 = vmatmul.msk.bf16.gmra.mxu0 %vm116_vm1, %v83_v58  ;;  %467 = vmatmul.msk.bf16.gmra.mxu1 %vm116_vm1, %v91_v59 }
  0x47   :  { %475 = vmatmul.msk.bf16.gmra.mxu2 %vm116_vm1, %v99_v60 }
  0x48   :  { %483 = vmatmul.msk.bf16.gmra.mxu3 %vm116_vm1, %v107_v61 }
  0x56   :  { %460 = vmatmul.msk.bf16.gmra.mxu0 %vm116_vm1, %v84_v6  ;;  %468 = vmatmul.msk.bf16.gmra.mxu1 %vm116_vm1, %v92_v7 }
  0x57   :  { %476 = vmatmul.msk.bf16.gmra.mxu2 %vm116_vm1, %v100_v8 }
  0x58   :  { %484 = vmatmul.msk.bf16.gmra.mxu3 %vm116_vm1, %v108_v9 }
  0x66   :  { %461 = vmatmul.msk.bf16.gmra.mxu0 %vm116_vm1, %v85_v18  ;;  %469 = vmatmul.msk.bf16.gmra.mxu1 %vm116_vm1, %v93_v19 }
  0x67   :  { %477 = vmatmul.msk.bf16.gmra.mxu2 %vm116_vm1, %v101_v20 }
  0x68   :  { %485 = vmatmul.msk.bf16.gmra.mxu3 %vm116_vm1, %v109_v21 }
  0x76   :  { %462 = vmatmul.msk.bf16.gmra.mxu0 %vm116_vm1, %v86_v30  ;;  %470 = vmatmul.msk.bf16.gmra.mxu1 %vm116_vm1, %v94_v31 }
  0x77   :  { %478 = vmatmul.msk.bf16.gmra.mxu2 %vm116_vm1, %v102_v32 }
  0x78   :  { %486 = vmatmul.msk.bf16.gmra.mxu3 %vm116_vm1, %v110_v33 }
  0x83   :  { %v226_v35 = vpop.f32.mrf.mxu0  ;;  %v266_v36 = vpop.f32.mrf.mxu1 }
  0x84   :  { %v227_v37 = vadd.f32 %v741_v34, %v226_v35  ;;  %v267_v38 = vadd.f32 %v741_v34, %v266_v36 }
  0x86   :  { %387 = vst.msk [vmem:[%s1066_s3] sm:$0xff] %vm386_vm2, %v227_v37 }
  0x87   :  { %403 = vst.msk [vmem:[%s1066_s3 + $0x80] sm:$0xff] %vm386_vm2, %v267_v38 }
  0x8a   :  { %v306_v39 = vpop.f32.mrf.mxu2 }
  0x8b   :  { %v346_v40 = vpop.f32.mrf.mxu3  ;;  %v307_v41 = vadd.f32 %v741_v34, %v306_v39  ;;  %v228_v43 = vpop.f32.mrf.mxu0 }
  0x8c   :  { %v347_v42 = vadd.f32 %v741_v34, %v346_v40  ;;  %v268_v44 = vpop.f32.mrf.mxu1  ;;  %v229_v45 = vadd.f32 %v741_v34, %v228_v43 }
  0x8d   :  { %v269_v46 = vadd.f32 %v741_v34, %v268_v44  ;;  %419 = vst.msk [vmem:[%s1066_s3 + $0x100] sm:$0xff] %vm386_vm2, %v307_v41 }
  0x8e   :  { %435 = vst.msk [vmem:[%s1066_s3 + $0x180] sm:$0xff] %vm386_vm2, %v347_v42 }
  0x8f   :  { %388 = vst.msk [vmem:[%s1066_s3 + $0x8] sm:$0xff] %vm386_vm2, %v229_v45 }
  0x90   :  { %404 = vst.msk [vmem:[%s1066_s3 + $0x88] sm:$0xff] %vm386_vm2, %v269_v46 }
  0x92   :  { %v308_v47 = vpop.f32.mrf.mxu2 }
  0x93   :  { %v348_v48 = vpop.f32.mrf.mxu3  ;;  %v309_v49 = vadd.f32 %v741_v34, %v308_v47  ;;  %v231_v51 = vpop.f32.mrf.mxu0 }
  0x94   :  { %v349_v50 = vadd.f32 %v741_v34, %v348_v48  ;;  %v271_v52 = vpop.f32.mrf.mxu1  ;;  %v232_v53 = vadd.f32 %v741_v34, %v231_v51 }
  0x95   :  { %v272_v54 = vadd.f32 %v741_v34, %v271_v52  ;;  %420 = vst.msk [vmem:[%s1066_s3 + $0x108] sm:$0xff] %vm386_vm2, %v309_v49 }
  0x96   :  { %436 = vst.msk [vmem:[%s1066_s3 + $0x188] sm:$0xff] %vm386_vm2, %v349_v50 }
  0x97   :  { %389 = vst.msk [vmem:[%s1066_s3 + $0x10] sm:$0xff] %vm386_vm2, %v232_v53 }
  0x98   :  { %405 = vst.msk [vmem:[%s1066_s3 + $0x90] sm:$0xff] %vm386_vm2, %v272_v54 }
  0x9a   :  { %v311_v55 = vpop.f32.mrf.mxu2 }
  0x9b   :  { %v351_v56 = vpop.f32.mrf.mxu3  ;;  %v312_v57 = vadd.f32 %v741_v34, %v311_v55  ;;  %v233_v59 = vpop.f32.mrf.mxu0 }
  0x9c   :  { %v352_v58 = vadd.f32 %v741_v34, %v351_v56  ;;  %v273_v60 = vpop.f32.mrf.mxu1  ;;  %v234_v61 = vadd.f32 %v741_v34, %v233_v59 }
  0x9d   :  { %v274_v62 = vadd.f32 %v741_v34, %v273_v60  ;;  %421 = vst.msk [vmem:[%s1066_s3 + $0x110] sm:$0xff] %vm386_vm2, %v312_v57 }
  0x9e   :  { %437 = vst.msk [vmem:[%s1066_s3 + $0x190] sm:$0xff] %vm386_vm2, %v352_v58 }
  0x9f   :  { %390 = vst.msk [vmem:[%s1066_s3 + $0x18] sm:$0xff] %vm386_vm2, %v234_v61 }
  0xa0   :  { %406 = vst.msk [vmem:[%s1066_s3 + $0x98] sm:$0xff] %vm386_vm2, %v274_v62 }
  0xa2   :  { %v313_v63 = vpop.f32.mrf.mxu2 }
  0xa3   :  { %v353_v0 = vpop.f32.mrf.mxu3  ;;  %v314_v1 = vadd.f32 %v741_v34, %v313_v63  ;;  %v236_v3 = vpop.f32.mrf.mxu0 }
  0xa4   :  { %v354_v2 = vadd.f32 %v741_v34, %v353_v0  ;;  %v276_v4 = vpop.f32.mrf.mxu1  ;;  %v237_v5 = vadd.f32 %v741_v34, %v236_v3 }
  0xa5   :  { %v277_v6 = vadd.f32 %v741_v34, %v276_v4  ;;  %422 = vst.msk [vmem:[%s1066_s3 + $0x118] sm:$0xff] %vm386_vm2, %v314_v1 }
  0xa6   :  { %438 = vst.msk [vmem:[%s1066_s3 + $0x198] sm:$0xff] %vm386_vm2, %v354_v2 }
  0xa7   :  { %391 = vst.msk [vmem:[%s1066_s3 + $0x20] sm:$0xff] %vm386_vm2, %v237_v5 }
  0xa8   :  { %407 = vst.msk [vmem:[%s1066_s3 + $0xa0] sm:$0xff] %vm386_vm2, %v277_v6 }
  0xaa   :  { %v316_v7 = vpop.f32.mrf.mxu2 }
  0xab   :  { %v356_v8 = vpop.f32.mrf.mxu3  ;;  %v317_v9 = vadd.f32 %v741_v34, %v316_v7  ;;  %v238_v11 = vpop.f32.mrf.mxu0 }
  0xac   :  { %v357_v10 = vadd.f32 %v741_v34, %v356_v8  ;;  %v278_v12 = vpop.f32.mrf.mxu1  ;;  %v239_v13 = vadd.f32 %v741_v34, %v238_v11 }
  0xad   :  { %v279_v14 = vadd.f32 %v741_v34, %v278_v12  ;;  %423 = vst.msk [vmem:[%s1066_s3 + $0x120] sm:$0xff] %vm386_vm2, %v317_v9 }
  0xae   :  { %439 = vst.msk [vmem:[%s1066_s3 + $0x1a0] sm:$0xff] %vm386_vm2, %v357_v10 }
  0xaf   :  { %392 = vst.msk [vmem:[%s1066_s3 + $0x28] sm:$0xff] %vm386_vm2, %v239_v13 }
  0xb0   :  { %408 = vst.msk [vmem:[%s1066_s3 + $0xa8] sm:$0xff] %vm386_vm2, %v279_v14 }
  0xb2   :  { %v318_v15 = vpop.f32.mrf.mxu2 }
  0xb3   :  { %v358_v16 = vpop.f32.mrf.mxu3  ;;  %v319_v17 = vadd.f32 %v741_v34, %v318_v15  ;;  %v241_v19 = vpop.f32.mrf.mxu0 }
  0xb4   :  { %v359_v18 = vadd.f32 %v741_v34, %v358_v16  ;;  %v281_v20 = vpop.f32.mrf.mxu1  ;;  %v242_v21 = vadd.f32 %v741_v34, %v241_v19 }
  0xb5   :  { %v282_v22 = vadd.f32 %v741_v34, %v281_v20  ;;  %424 = vst.msk [vmem:[%s1066_s3 + $0x128] sm:$0xff] %vm386_vm2, %v319_v17 }
  0xb6   :  { %440 = vst.msk [vmem:[%s1066_s3 + $0x1a8] sm:$0xff] %vm386_vm2, %v359_v18 }
  0xb7   :  { %393 = vst.msk [vmem:[%s1066_s3 + $0x30] sm:$0xff] %vm386_vm2, %v242_v21 }
  0xb8   :  { %409 = vst.msk [vmem:[%s1066_s3 + $0xb0] sm:$0xff] %vm386_vm2, %v282_v22 }
  0xba   :  { %v321_v23 = vpop.f32.mrf.mxu2 }
  0xbb   :  { %v361_v24 = vpop.f32.mrf.mxu3  ;;  %v322_v25 = vadd.f32 %v741_v34, %v321_v23  ;;  %v243_v27 = vpop.f32.mrf.mxu0 }
  0xbc   :  { %v362_v26 = vadd.f32 %v741_v34, %v361_v24  ;;  %v283_v28 = vpop.f32.mrf.mxu1  ;;  %v244_v29 = vadd.f32 %v741_v34, %v243_v27 }
  0xbd   :  { %v284_v30 = vadd.f32 %v741_v34, %v283_v28  ;;  %425 = vst.msk [vmem:[%s1066_s3 + $0x130] sm:$0xff] %vm386_vm2, %v322_v25 }
  0xbe   :  { %441 = vst.msk [vmem:[%s1066_s3 + $0x1b0] sm:$0xff] %vm386_vm2, %v362_v26 }
  0xbf   :  { %394 = vst.msk [vmem:[%s1066_s3 + $0x38] sm:$0xff] %vm386_vm2, %v244_v29 }
  0xc0   :  { %410 = vst.msk [vmem:[%s1066_s3 + $0xb8] sm:$0xff] %vm386_vm2, %v284_v30 }
  0xc2   :  { %v323_v31 = vpop.f32.mrf.mxu2 }
  0xc3   :  { %v363_v32 = vpop.f32.mrf.mxu3  ;;  %v324_v33 = vadd.f32 %v741_v34, %v323_v31  ;;  %v246_v36 = vpop.f32.mrf.mxu0 }
  0xc4   :  { %v364_v35 = vadd.f32 %v741_v34, %v363_v32  ;;  %v286_v37 = vpop.f32.mrf.mxu1  ;;  %v247_v38 = vadd.f32 %v741_v34, %v246_v36 }
  0xc5   :  { %v287_v39 = vadd.f32 %v741_v34, %v286_v37  ;;  %426 = vst.msk [vmem:[%s1066_s3 + $0x138] sm:$0xff] %vm386_vm2, %v324_v33 }
  0xc6   :  { %442 = vst.msk [vmem:[%s1066_s3 + $0x1b8] sm:$0xff] %vm386_vm2, %v364_v35 }
  0xc7   :  { %395 = vst.msk [vmem:[%s1066_s3 + $0x40] sm:$0xff] %vm386_vm2, %v247_v38 }
  0xc8   :  { %411 = vst.msk [vmem:[%s1066_s3 + $0xc0] sm:$0xff] %vm386_vm2, %v287_v39 }
  0xca   :  { %v326_v40 = vpop.f32.mrf.mxu2 }
  0xcb   :  { %v366_v41 = vpop.f32.mrf.mxu3  ;;  %v327_v42 = vadd.f32 %v741_v34, %v326_v40  ;;  %v248_v44 = vpop.f32.mrf.mxu0 }
  0xcc   :  { %v367_v43 = vadd.f32 %v741_v34, %v366_v41  ;;  %v288_v45 = vpop.f32.mrf.mxu1  ;;  %v249_v46 = vadd.f32 %v741_v34, %v248_v44 }
  0xcd   :  { %v289_v47 = vadd.f32 %v741_v34, %v288_v45  ;;  %427 = vst.msk [vmem:[%s1066_s3 + $0x140] sm:$0xff] %vm386_vm2, %v327_v42 }
  0xce   :  { %443 = vst.msk [vmem:[%s1066_s3 + $0x1c0] sm:$0xff] %vm386_vm2, %v367_v43 }
  0xcf   :  { %396 = vst.msk [vmem:[%s1066_s3 + $0x48] sm:$0xff] %vm386_vm2, %v249_v46 }
  0xd0   :  { %412 = vst.msk [vmem:[%s1066_s3 + $0xc8] sm:$0xff] %vm386_vm2, %v289_v47 }
  0xd2   :  { %v328_v48 = vpop.f32.mrf.mxu2 }
  0xd3   :  { %v368_v49 = vpop.f32.mrf.mxu3  ;;  %v329_v50 = vadd.f32 %v741_v34, %v328_v48  ;;  %v251_v52 = vpop.f32.mrf.mxu0 }
  0xd4   :  { %v369_v51 = vadd.f32 %v741_v34, %v368_v49  ;;  %v291_v53 = vpop.f32.mrf.mxu1  ;;  %v252_v54 = vadd.f32 %v741_v34, %v251_v52 }
  0xd5   :  { %v292_v55 = vadd.f32 %v741_v34, %v291_v53  ;;  %428 = vst.msk [vmem:[%s1066_s3 + $0x148] sm:$0xff] %vm386_vm2, %v329_v50 }
  0xd6   :  { %444 = vst.msk [vmem:[%s1066_s3 + $0x1c8] sm:$0xff] %vm386_vm2, %v369_v51 }
  0xd7   :  { %397 = vst.msk [vmem:[%s1066_s3 + $0x50] sm:$0xff] %vm386_vm2, %v252_v54 }
  0xd8   :  { %413 = vst.msk [vmem:[%s1066_s3 + $0xd0] sm:$0xff] %vm386_vm2, %v292_v55 }
  0xda   :  { %v331_v56 = vpop.f32.mrf.mxu2 }
  0xdb   :  { %v371_v57 = vpop.f32.mrf.mxu3  ;;  %v332_v58 = vadd.f32 %v741_v34, %v331_v56  ;;  %v253_v60 = vpop.f32.mrf.mxu0 }
  0xdc   :  { %v372_v59 = vadd.f32 %v741_v34, %v371_v57  ;;  %v293_v61 = vpop.f32.mrf.mxu1  ;;  %v254_v62 = vadd.f32 %v741_v34, %v253_v60 }
  0xdd   :  { %v294_v63 = vadd.f32 %v741_v34, %v293_v61  ;;  %429 = vst.msk [vmem:[%s1066_s3 + $0x150] sm:$0xff] %vm386_vm2, %v332_v58 }
  0xde   :  { %445 = vst.msk [vmem:[%s1066_s3 + $0x1d0] sm:$0xff] %vm386_vm2, %v372_v59 }
  0xdf   :  { %398 = vst.msk [vmem:[%s1066_s3 + $0x58] sm:$0xff] %vm386_vm2, %v254_v62 }
  0xe0   :  { %414 = vst.msk [vmem:[%s1066_s3 + $0xd8] sm:$0xff] %vm386_vm2, %v294_v63 }
  0xe2   :  { %v333_v0 = vpop.f32.mrf.mxu2 }
  0xe3   :  { %v373_v1 = vpop.f32.mrf.mxu3  ;;  %v334_v2 = vadd.f32 %v741_v34, %v333_v0  ;;  %v256_v4 = vpop.f32.mrf.mxu0 }
  0xe4   :  { %v374_v3 = vadd.f32 %v741_v34, %v373_v1  ;;  %v296_v5 = vpop.f32.mrf.mxu1  ;;  %v257_v6 = vadd.f32 %v741_v34, %v256_v4 }
  0xe5   :  { %v297_v7 = vadd.f32 %v741_v34, %v296_v5  ;;  %430 = vst.msk [vmem:[%s1066_s3 + $0x158] sm:$0xff] %vm386_vm2, %v334_v2 }
  0xe6   :  { %446 = vst.msk [vmem:[%s1066_s3 + $0x1d8] sm:$0xff] %vm386_vm2, %v374_v3 }
  0xe7   :  { %399 = vst.msk [vmem:[%s1066_s3 + $0x60] sm:$0xff] %vm386_vm2, %v257_v6 }
  0xe8   :  { %415 = vst.msk [vmem:[%s1066_s3 + $0xe0] sm:$0xff] %vm386_vm2, %v297_v7 }
  0xea   :  { %v336_v8 = vpop.f32.mrf.mxu2 }
  0xeb   :  { %v376_v9 = vpop.f32.mrf.mxu3  ;;  %v337_v10 = vadd.f32 %v741_v34, %v336_v8  ;;  %v258_v12 = vpop.f32.mrf.mxu0 }
  0xec   :  { %v377_v11 = vadd.f32 %v741_v34, %v376_v9  ;;  %v298_v13 = vpop.f32.mrf.mxu1  ;;  %v259_v14 = vadd.f32 %v741_v34, %v258_v12 }
  0xed   :  { %v299_v15 = vadd.f32 %v741_v34, %v298_v13  ;;  %431 = vst.msk [vmem:[%s1066_s3 + $0x160] sm:$0xff] %vm386_vm2, %v337_v10 }
  0xee   :  { %447 = vst.msk [vmem:[%s1066_s3 + $0x1e0] sm:$0xff] %vm386_vm2, %v377_v11 }
  0xef   :  { %400 = vst.msk [vmem:[%s1066_s3 + $0x68] sm:$0xff] %vm386_vm2, %v259_v14 }
  0xf0   :  { %416 = vst.msk [vmem:[%s1066_s3 + $0xe8] sm:$0xff] %vm386_vm2, %v299_v15 }
  0xf2   :  { %v338_v16 = vpop.f32.mrf.mxu2 }
  0xf3   :  { %v378_v17 = vpop.f32.mrf.mxu3  ;;  %v339_v18 = vadd.f32 %v741_v34, %v338_v16  ;;  %v261_v20 = vpop.f32.mrf.mxu0 }
  0xf4   :  { %v379_v19 = vadd.f32 %v741_v34, %v378_v17  ;;  %v301_v21 = vpop.f32.mrf.mxu1  ;;  %v262_v22 = vadd.f32 %v741_v34, %v261_v20 }
  0xf5   :  { %v302_v23 = vadd.f32 %v741_v34, %v301_v21  ;;  %432 = vst.msk [vmem:[%s1066_s3 + $0x168] sm:$0xff] %vm386_vm2, %v339_v18 }
  0xf6   :  { %448 = vst.msk [vmem:[%s1066_s3 + $0x1e8] sm:$0xff] %vm386_vm2, %v379_v19 }
  0xf7   :  { %401 = vst.msk [vmem:[%s1066_s3 + $0x70] sm:$0xff] %vm386_vm2, %v262_v22 }
  0xf8   :  { %417 = vst.msk [vmem:[%s1066_s3 + $0xf0] sm:$0xff] %vm386_vm2, %v302_v23 }
  0xfa   :  { %v341_v24 = vpop.f32.mrf.mxu2 }
  0xfb   :  { %v381_v25 = vpop.f32.mrf.mxu3  ;;  %v342_v26 = vadd.f32 %v741_v34, %v341_v24  ;;  %v263_v28 = vpop.f32.mrf.mxu0 }
  0xfc   :  { %v382_v27 = vadd.f32 %v741_v34, %v381_v25  ;;  %v303_v29 = vpop.f32.mrf.mxu1  ;;  %v264_v30 = vadd.f32 %v741_v34, %v263_v28 }
  0xfd   :  { %v304_v31 = vadd.f32 %v741_v34, %v303_v29  ;;  %433 = vst.msk [vmem:[%s1066_s3 + $0x170] sm:$0xff] %vm386_vm2, %v342_v26 }
  0xfe   :  { %449 = vst.msk [vmem:[%s1066_s3 + $0x1f0] sm:$0xff] %vm386_vm2, %v382_v27 }
  0xff   :  { %402 = vst.msk [vmem:[%s1066_s3 + $0x78] sm:$0xff] %vm386_vm2, %v264_v30 }
 0x100   :  { %418 = vst.msk [vmem:[%s1066_s3 + $0xf8] sm:$0xff] %vm386_vm2, %v304_v31 }
 0x102   :  { %v343_v32 = vpop.f32.mrf.mxu2 }
 0x103   :  { %v383_v33 = vpop.f32.mrf.mxu3  ;;  %v344_v35 = vadd.f32 %v741_v34, %v343_v32 }
 0x104   :  { %v384_v36 = vadd.f32 %v741_v34, %v383_v33 }
 0x105   :  { %434 = vst.msk [vmem:[%s1066_s3 + $0x178] sm:$0xff] %vm386_vm2, %v344_v35 }
 0x106   :  { %450 = vst.msk [vmem:[%s1066_s3 + $0x1f8] sm:$0xff] %vm386_vm2, %v384_v36 }

// kernel: reverse.11
= control target key start
LH: loop header
LB: loop body
LE: loop exit
PB: predicated region body
PF: predicated region fallthrough
CT: control target
= control target key end

     0   :  { %s3339_s0 = inlined_call_operand.vmem [shape: f32[2,24,32,11], index: 0, kind: input, shape index: {}]   ;;  %s3340_s1 = inlined_call_operand.vmem [shape: f32[2,24,32,11], index: 1, kind: output, shape index: {}]  }
   0x1   :  { %v221_v0 = vld [vmem:[%s3339_s0] sm:$0xff]  ;;  %v223_v1 = vld [vmem:[%s3339_s0 + $0x8] sm:$0xff]  ;;  %v225_v2 = vld [vmem:[%s3339_s0 + $0x10] sm:$0xff] }
   0x2   :  { %222 = vst [vmem:[#allocation0 + $0x8] sm:$0xff] %v221_v0  ;;  %v227_v3 = vld [vmem:[%s3339_s0 + $0x18] sm:$0xff]  ;;  %v229_v4 = vld [vmem:[%s3339_s0 + $0x20] sm:$0xff]  ;;  %v231_v5 = vld [vmem:[%s3339_s0 + $0x28] sm:$0xff] }
   0x3   :  { %224 = vst [vmem:[#allocation0 + $0x10] sm:$0xff] %v223_v1  ;;  %v233_v6 = vld [vmem:[%s3339_s0 + $0x30] sm:$0xff]  ;;  %v235_v7 = vld [vmem:[%s3339_s0 + $0x38] sm:$0xff]  ;;  %v237_v8 = vld [vmem:[%s3339_s0 + $0x40] sm:$0xff] }
   0x4   :  { %226 = vst [vmem:[#allocation0 + $0x20] sm:$0xff] %v225_v2  ;;  %v239_v9 = vld [vmem:[%s3339_s0 + $0x48] sm:$0xff]  ;;  %v241_v10 = vld [vmem:[%s3339_s0 + $0x50] sm:$0xff]  ;;  %v243_v11 = vld [vmem:[%s3339_s0 + $0x58] sm:$0xff] }
   0x5   :  { %228 = vst [vmem:[#allocation0 + $0x28] sm:$0xff] %v227_v3  ;;  %v245_v12 = vld [vmem:[%s3339_s0 + $0x60] sm:$0xff]  ;;  %v247_v13 = vld [vmem:[%s3339_s0 + $0x68] sm:$0xff]  ;;  %v249_v14 = vld [vmem:[%s3339_s0 + $0x70] sm:$0xff] }
   0x6   :  { %230 = vst [vmem:[#allocation0 + $0x38] sm:$0xff] %v229_v4  ;;  %v251_v15 = vld [vmem:[%s3339_s0 + $0x78] sm:$0xff]  ;;  %v253_v16 = vld [vmem:[%s3339_s0 + $0x80] sm:$0xff]  ;;  %v255_v17 = vld [vmem:[%s3339_s0 + $0x88] sm:$0xff] }
   0x7   :  { %232 = vst [vmem:[#allocation0 + $0x40] sm:$0xff] %v231_v5  ;;  %v257_v18 = vld [vmem:[%s3339_s0 + $0x90] sm:$0xff]  ;;  %v259_v19 = vld [vmem:[%s3339_s0 + $0x98] sm:$0xff]  ;;  %v261_v20 = vld [vmem:[%s3339_s0 + $0xa0] sm:$0xff] }
   0x8   :  { %234 = vst [vmem:[#allocation0 + $0x50] sm:$0xff] %v233_v6  ;;  %v263_v21 = vld [vmem:[%s3339_s0 + $0xa8] sm:$0xff]  ;;  %v265_v22 = vld [vmem:[%s3339_s0 + $0xb0] sm:$0xff]  ;;  %v267_v23 = vld [vmem:[%s3339_s0 + $0xb8] sm:$0xff] }
   0x9   :  { %236 = vst [vmem:[#allocation0 + $0x58] sm:$0xff] %v235_v7  ;;  %v269_v24 = vld [vmem:[%s3339_s0 + $0xc0] sm:$0xff]  ;;  %v271_v25 = vld [vmem:[%s3339_s0 + $0xc8] sm:$0xff]  ;;  %v273_v26 = vld [vmem:[%s3339_s0 + $0xd0] sm:$0xff] }
   0xa   :  { %238 = vst [vmem:[#allocation0 + $0x68] sm:$0xff] %v237_v8  ;;  %v275_v27 = vld [vmem:[%s3339_s0 + $0xd8] sm:$0xff]  ;;  %v277_v28 = vld [vmem:[%s3339_s0 + $0xe0] sm:$0xff]  ;;  %v279_v29 = vld [vmem:[%s3339_s0 + $0xe8] sm:$0xff] }
   0xb   :  { %240 = vst [vmem:[#allocation0 + $0x70] sm:$0xff] %v239_v9  ;;  %v281_v30 = vld [vmem:[%s3339_s0 + $0xf0] sm:$0xff]  ;;  %v283_v31 = vld [vmem:[%s3339_s0 + $0xf8] sm:$0xff]  ;;  %v285_v32 = vld [vmem:[%s3339_s0 + $0x100] sm:$0xff] }
   0xc   :  { %242 = vst [vmem:[#allocation0 + $0x80] sm:$0xff] %v241_v10  ;;  %v287_v33 = vld [vmem:[%s3339_s0 + $0x108] sm:$0xff]  ;;  %v289_v34 = vld [vmem:[%s3339_s0 + $0x110] sm:$0xff]  ;;  %v291_v35 = vld [vmem:[%s3339_s0 + $0x118] sm:$0xff] }
   0xd   :  { %244 = vst [vmem:[#allocation0 + $0x88] sm:$0xff] %v243_v11  ;;  %v293_v36 = vld [vmem:[%s3339_s0 + $0x120] sm:$0xff]  ;;  %v295_v37 = vld [vmem:[%s3339_s0 + $0x128] sm:$0xff]  ;;  %v297_v38 = vld [vmem:[%s3339_s0 + $0x130] sm:$0xff] }
   0xe   :  { %246 = vst [vmem:[#allocation0 + $0x98] sm:$0xff] %v245_v12  ;;  %v299_v39 = vld [vmem:[%s3339_s0 + $0x138] sm:$0xff]  ;;  %v301_v40 = vld [vmem:[%s3339_s0 + $0x140] sm:$0xff]  ;;  %v303_v41 = vld [vmem:[%s3339_s0 + $0x148] sm:$0xff] }
   0xf   :  { %248 = vst [vmem:[#allocation0 + $0xa0] sm:$0xff] %v247_v13  ;;  %v305_v42 = vld [vmem:[%s3339_s0 + $0x150] sm:$0xff]  ;;  %v307_v43 = vld [vmem:[%s3339_s0 + $0x158] sm:$0xff]  ;;  %v309_v44 = vld [vmem:[%s3339_s0 + $0x160] sm:$0xff] }
  0x10   :  { %250 = vst [vmem:[#allocation0 + $0xb0] sm:$0xff] %v249_v14  ;;  %v311_v45 = vld [vmem:[%s3339_s0 + $0x168] sm:$0xff]  ;;  %v313_v46 = vld [vmem:[%s3339_s0 + $0x170] sm:$0xff]  ;;  %v315_v47 = vld [vmem:[%s3339_s0 + $0x178] sm:$0xff] }
  0x11   :  { %252 = vst [vmem:[#allocation0 + $0xb8] sm:$0xff] %v251_v15  ;;  %v317_v48 = vld [vmem:[%s3339_s0 + $0x180] sm:$0xff]  ;;  %v319_v49 = vld [vmem:[%s3339_s0 + $0x188] sm:$0xff]  ;;  %v321_v50 = vld [vmem:[%s3339_s0 + $0x190] sm:$0xff] }
  0x12   :  { %254 = vst [vmem:[#allocation0 + $0xc8] sm:$0xff] %v253_v16  ;;  %v323_v51 = vld [vmem:[%s3339_s0 + $0x198] sm:$0xff]  ;;  %v325_v52 = vld [vmem:[%s3339_s0 + $0x1a0] sm:$0xff]  ;;  %v327_v53 = vld [vmem:[%s3339_s0 + $0x1a8] sm:$0xff] }
  0x13   :  { %256 = vst [vmem:[#allocation0 + $0xd0] sm:$0xff] %v255_v17  ;;  %v329_v54 = vld [vmem:[%s3339_s0 + $0x1b0] sm:$0xff]  ;;  %v331_v55 = vld [vmem:[%s3339_s0 + $0x1b8] sm:$0xff]  ;;  %v333_v56 = vld [vmem:[%s3339_s0 + $0x1c0] sm:$0xff] }
  0x14   :  { %258 = vst [vmem:[#allocation0 + $0xe0] sm:$0xff] %v257_v18  ;;  %v335_v57 = vld [vmem:[%s3339_s0 + $0x1c8] sm:$0xff]  ;;  %v337_v58 = vld [vmem:[%s3339_s0 + $0x1d0] sm:$0xff]  ;;  %v339_v59 = vld [vmem:[%s3339_s0 + $0x1d8] sm:$0xff] }
  0x15   :  { %260 = vst [vmem:[#allocation0 + $0xe8] sm:$0xff] %v259_v19  ;;  %v341_v60 = vld [vmem:[%s3339_s0 + $0x1e0] sm:$0xff]  ;;  %v343_v61 = vld [vmem:[%s3339_s0 + $0x1e8] sm:$0xff]  ;;  %v345_v62 = vld [vmem:[%s3339_s0 + $0x1f0] sm:$0xff] }
  0x16   :  { %262 = vst [vmem:[#allocation0 + $0xf8] sm:$0xff] %v261_v20  ;;  %v347_v63 = vld [vmem:[%s3339_s0 + $0x1f8] sm:$0xff]  ;;  %v349_v0 = vld [vmem:[%s3339_s0 + $0x200] sm:$0xff]  ;;  %v351_v1 = vld [vmem:[%s3339_s0 + $0x208] sm:$0xff] }
  0x17   :  { %264 = vst [vmem:[#allocation0 + $0x100] sm:$0xff] %v263_v21  ;;  %v353_v2 = vld [vmem:[%s3339_s0 + $0x210] sm:$0xff]  ;;  %v355_v3 = vld [vmem:[%s3339_s0 + $0x218] sm:$0xff]  ;;  %v357_v4 = vld [vmem:[%s3339_s0 + $0x220] sm:$0xff] }
  0x18   :  { %266 = vst [vmem:[#allocation0 + $0x110] sm:$0xff] %v265_v22  ;;  %v359_v5 = vld [vmem:[%s3339_s0 + $0x228] sm:$0xff]  ;;  %v361_v6 = vld [vmem:[%s3339_s0 + $0x230] sm:$0xff]  ;;  %v363_v7 = vld [vmem:[%s3339_s0 + $0x238] sm:$0xff] }
  0x19   :  { %268 = vst [vmem:[#allocation0 + $0x118] sm:$0xff] %v267_v23  ;;  %v365_v8 = vld [vmem:[%s3339_s0 + $0x240] sm:$0xff]  ;;  %v367_v9 = vld [vmem:[%s3339_s0 + $0x248] sm:$0xff]  ;;  %v369_v10 = vld [vmem:[%s3339_s0 + $0x250] sm:$0xff] }
  0x1a   :  { %270 = vst [vmem:[#allocation0 + $0x128] sm:$0xff] %v269_v24  ;;  %v371_v11 = vld [vmem:[%s3339_s0 + $0x258] sm:$0xff]  ;;  %v373_v12 = vld [vmem:[%s3339_s0 + $0x260] sm:$0xff]  ;;  %v375_v13 = vld [vmem:[%s3339_s0 + $0x268] sm:$0xff] }
  0x1b   :  { %272 = vst [vmem:[#allocation0 + $0x130] sm:$0xff] %v271_v25  ;;  %v377_v14 = vld [vmem:[%s3339_s0 + $0x270] sm:$0xff]  ;;  %v379_v15 = vld [vmem:[%s3339_s0 + $0x278] sm:$0xff]  ;;  %v381_v16 = vld [vmem:[%s3339_s0 + $0x280] sm:$0xff] }
  0x1c   :  { %274 = vst [vmem:[#allocation0 + $0x140] sm:$0xff] %v273_v26  ;;  %v383_v17 = vld [vmem:[%s3339_s0 + $0x288] sm:$0xff]  ;;  %v385_v18 = vld [vmem:[%s3339_s0 + $0x290] sm:$0xff]  ;;  %v387_v19 = vld [vmem:[%s3339_s0 + $0x298] sm:$0xff]  ;;  %v425_v26 = vlaneseq }
  0x1d   :  { %276 = vst [vmem:[#allocation0 + $0x148] sm:$0xff] %v275_v27  ;;  %v389_v20 = vld [vmem:[%s3339_s0 + $0x2a0] sm:$0xff]  ;;  %v391_v21 = vld [vmem:[%s3339_s0 + $0x2a8] sm:$0xff]  ;;  %v393_v22 = vld [vmem:[%s3339_s0 + $0x2b0] sm:$0xff] }
  0x1e   :  { %278 = vst [vmem:[#allocation0 + $0x158] sm:$0xff] %v277_v28  ;;  %v395_v23 = vld [vmem:[%s3339_s0 + $0x2b8] sm:$0xff]  ;;  %v397_v24 = vld [vmem:[%s3339_s0 + $0x2c0] sm:$0xff]  ;;  %v399_v25 = vld [vmem:[%s3339_s0 + $0x2c8] sm:$0xff] }
  0x1f   :  { %280 = vst [vmem:[#allocation0 + $0x160] sm:$0xff] %v279_v29  ;;  %v401_v27 = vld [vmem:[%s3339_s0 + $0x2d0] sm:$0xff]  ;;  %v403_v28 = vld [vmem:[%s3339_s0 + $0x2d8] sm:$0xff]  ;;  %v405_v29 = vld [vmem:[%s3339_s0 + $0x2e0] sm:$0xff] }
  0x20   :  { %282 = vst [vmem:[#allocation0 + $0x170] sm:$0xff] %v281_v30  ;;  %v418_v30 = vld [vmem:[#allocation0 + $0xf] ss:$-1 sm:$0xff] }
  0x21   :  { %284 = vst [vmem:[#allocation0 + $0x178] sm:$0xff] %v283_v31  ;;  %v407_v31 = vld [vmem:[%s3339_s0 + $0x2e8] sm:$0xff] }
  0x22   :  { %286 = vst [vmem:[#allocation0 + $0x188] sm:$0xff] %v285_v32  ;;  %v423_v32 = vld [vmem:[#allocation0 + $0x17] ss:$-1 sm:$0xff] }
  0x23   :  { %288 = vst [vmem:[#allocation0 + $0x190] sm:$0xff] %v287_v33  ;;  %v2850_v33 = vshrl.u32 %v425_v26, 7  ;;  %v619_v26 = vld [vmem:[#allocation0 + $0xbf] ss:$-1 sm:$0xff] }
  0x24   :  { %290 = vst [vmem:[#allocation0 + $0x1a0] sm:$0xff] %v289_v34  ;;  %v409_v34 = vld [vmem:[%s3339_s0 + $0x2f0] sm:$0xff] }
  0x25   :  { %292 = vst [vmem:[#allocation0 + $0x1a8] sm:$0xff] %v291_v35  ;;  %v431_v35 = vld [vmem:[#allocation0 + $0x7] ss:$-1 sm:$0xff]  ;;  %vm427_vm0 = vcmp.lt.s32.totalorder %v2850_v33, 3 }
  0x26   :  { %294 = vst [vmem:[#allocation0 + $0x1b8] sm:$0xff] %v293_v36  ;;  %v411_v36 = vld [vmem:[%s3339_s0 + $0x2f8] sm:$0xff] }
  0x27   :  { %296 = vst [vmem:[#allocation0 + $0x1c0] sm:$0xff] %v295_v37  ;;  %v419_v37 = vrot.slane %v418_v30, 5  ;;  %v632_v30 = vld [vmem:[#allocation0 + $0xb7] ss:$-1 sm:$0xff] }
  0x28   :  { %298 = vst [vmem:[#allocation0 + $0x1d0] sm:$0xff] %v297_v38  ;;  %v436_v38 = vld [vmem:[#allocation0 + $0xf] ss:$-1 sm:$0xff] }
  0x29   :  { %300 = vst [vmem:[#allocation0 + $0x1d8] sm:$0xff] %v299_v39  ;;  %v424_v39 = vrot.slane %v423_v32, 5  ;;  %v642_v32 = vld [vmem:[#allocation0 + $0xcf] ss:$-1 sm:$0xff] }
  0x2a   :  { %302 = vst [vmem:[#allocation0 + $0x1e8] sm:$0xff] %v301_v40  ;;  %v446_v40 = vld [vmem:[#allocation0 + $0x27] ss:$-1 sm:$0xff] }
  0x2b   :  { %304 = vst [vmem:[#allocation0 + $0x1f0] sm:$0xff] %v303_v41  ;;  %v432_v41 = vrot.slane %v431_v35, 5  ;;  %v647_v35 = vld [vmem:[#allocation0 + $0xd7] ss:$-1 sm:$0xff] }
  0x2c   :  { %306 = vst [vmem:[#allocation0 + $0x200] sm:$0xff] %v305_v42  ;;  %v451_v42 = vld [vmem:[#allocation0 + $0x2f] ss:$-1 sm:$0xff] }
  0x2d   :  { %308 = vst [vmem:[#allocation0 + $0x208] sm:$0xff] %v307_v43  ;;  %v437_v43 = vrot.slane %v436_v38, 5  ;;  %v643_v38 = vrot.slane %v642_v32, 5 }
  0x2e   :  { %310 = vst [vmem:[#allocation0 + $0x218] sm:$0xff] %v309_v44  ;;  %v459_v44 = vld [vmem:[#allocation0 + $0x1f] ss:$-1 sm:$0xff] }
  0x2f   :  { %312 = vst [vmem:[#allocation0 + $0x220] sm:$0xff] %v311_v45  ;;  %v447_v45 = vrot.slane %v446_v40, 5  ;;  %v648_v40 = vrot.slane %v647_v35, 5 }
  0x30   :  { %314 = vst [vmem:[#allocation0 + $0x230] sm:$0xff] %v313_v46  ;;  %v464_v46 = vld [vmem:[#allocation0 + $0x27] ss:$-1 sm:$0xff] }
  0x31   :  { %316 = vst [vmem:[#allocation0 + $0x238] sm:$0xff] %v315_v47  ;;  %v452_v47 = vrot.slane %v451_v42, 5 }
  0x32   :  { %318 = vst [vmem:[#allocation0 + $0x248] sm:$0xff] %v317_v48  ;;  %v474_v48 = vld [vmem:[#allocation0 + $0x3f] ss:$-1 sm:$0xff] }
  0x33   :  { %320 = vst [vmem:[#allocation0 + $0x250] sm:$0xff] %v319_v49  ;;  %v460_v49 = vrot.slane %v459_v44, 5 }
  0x34   :  { %322 = vst [vmem:[#allocation0 + $0x260] sm:$0xff] %v321_v50  ;;  %v479_v50 = vld [vmem:[#allocation0 + $0x47] ss:$-1 sm:$0xff] }
  0x35   :  { %324 = vst [vmem:[#allocation0 + $0x268] sm:$0xff] %v323_v51  ;;  %v465_v51 = vrot.slane %v464_v46, 5 }
  0x36   :  { %326 = vst [vmem:[#allocation0 + $0x278] sm:$0xff] %v325_v52  ;;  %v487_v52 = vld [vmem:[#allocation0 + $0x37] ss:$-1 sm:$0xff] }
  0x37   :  { %328 = vst [vmem:[#allocation0 + $0x280] sm:$0xff] %v327_v53  ;;  %v475_v53 = vrot.slane %v474_v48, 5 }
  0x38   :  { %330 = vst [vmem:[#allocation0 + $0x290] sm:$0xff] %v329_v54  ;;  %v492_v54 = vld [vmem:[#allocation0 + $0x3f] ss:$-1 sm:$0xff] }
  0x39   :  { %332 = vst [vmem:[#allocation0 + $0x298] sm:$0xff] %v331_v55  ;;  %v480_v55 = vrot.slane %v479_v50, 5 }
  0x3a   :  { %334 = vst [vmem:[#allocation0 + $0x2a8] sm:$0xff] %v333_v56  ;;  %v502_v56 = vld [vmem:[#allocation0 + $0x57] ss:$-1 sm:$0xff] }
  0x3b   :  { %336 = vst [vmem:[#allocation0 + $0x2b0] sm:$0xff] %v335_v57  ;;  %v488_v57 = vrot.slane %v487_v52, 5 }
  0x3c   :  { %338 = vst [vmem:[#allocation0 + $0x2c0] sm:$0xff] %v337_v58  ;;  %v507_v58 = vld [vmem:[#allocation0 + $0x5f] ss:$-1 sm:$0xff] }
  0x3d   :  { %340 = vst [vmem:[#allocation0 + $0x2c8] sm:$0xff] %v339_v59  ;;  %v493_v59 = vrot.slane %v492_v54, 5 }
  0x3e   :  { %342 = vst [vmem:[#allocation0 + $0x2d8] sm:$0xff] %v341_v60  ;;  %v515_v60 = vld [vmem:[#allocation0 + $0x4f] ss:$-1 sm:$0xff] }
  0x3f   :  { %344 = vst [vmem:[#allocation0 + $0x2e0] sm:$0xff] %v343_v61  ;;  %v503_v61 = vrot.slane %v502_v56, 5 }
  0x40   :  { %346 = vst [vmem:[#allocation0 + $0x2f0] sm:$0xff] %v345_v62  ;;  %v520_v62 = vld [vmem:[#allocation0 + $0x57] ss:$-1 sm:$0xff] }
  0x41   :  { %348 = vst [vmem:[#allocation0 + $0x2f8] sm:$0xff] %v347_v63  ;;  %v508_v63 = vrot.slane %v507_v58, 5 }
  0x42   :  { %350 = vst [vmem:[#allocation0 + $0x308] sm:$0xff] %v349_v0  ;;  %v530_v0 = vld [vmem:[#allocation0 + $0x6f] ss:$-1 sm:$0xff] }
  0x43   :  { %352 = vst [vmem:[#allocation0 + $0x310] sm:$0xff] %v351_v1  ;;  %v516_v1 = vrot.slane %v515_v60, 5 }
  0x44   :  { %354 = vst [vmem:[#allocation0 + $0x320] sm:$0xff] %v353_v2  ;;  %v535_v2 = vld [vmem:[#allocation0 + $0x77] ss:$-1 sm:$0xff] }
  0x45   :  { %356 = vst [vmem:[#allocation0 + $0x328] sm:$0xff] %v355_v3  ;;  %v521_v3 = vrot.slane %v520_v62, 5 }
  0x46   :  { %358 = vst [vmem:[#allocation0 + $0x338] sm:$0xff] %v357_v4  ;;  %v543_v4 = vld [vmem:[#allocation0 + $0x67] ss:$-1 sm:$0xff] }
  0x47   :  { %360 = vst [vmem:[#allocation0 + $0x340] sm:$0xff] %v359_v5  ;;  %v531_v5 = vrot.slane %v530_v0, 5 }
  0x48   :  { %362 = vst [vmem:[#allocation0 + $0x350] sm:$0xff] %v361_v6  ;;  %v548_v6 = vld [vmem:[#allocation0 + $0x6f] ss:$-1 sm:$0xff] }
  0x49   :  { %364 = vst [vmem:[#allocation0 + $0x358] sm:$0xff] %v363_v7  ;;  %v536_v7 = vrot.slane %v535_v2, 5 }
  0x4a   :  { %366 = vst [vmem:[#allocation0 + $0x368] sm:$0xff] %v365_v8  ;;  %v558_v8 = vld [vmem:[#allocation0 + $0x87] ss:$-1 sm:$0xff] }
  0x4b   :  { %368 = vst [vmem:[#allocation0 + $0x370] sm:$0xff] %v367_v9  ;;  %v544_v9 = vrot.slane %v543_v4, 5 }
  0x4c   :  { %370 = vst [vmem:[#allocation0 + $0x380] sm:$0xff] %v369_v10  ;;  %v563_v10 = vld [vmem:[#allocation0 + $0x8f] ss:$-1 sm:$0xff] }
  0x4d   :  { %372 = vst [vmem:[#allocation0 + $0x388] sm:$0xff] %v371_v11  ;;  %v549_v11 = vrot.slane %v548_v6, 5 }
  0x4e   :  { %374 = vst [vmem:[#allocation0 + $0x398] sm:$0xff] %v373_v12  ;;  %v571_v12 = vld [vmem:[#allocation0 + $0x7f] ss:$-1 sm:$0xff] }
  0x4f   :  { %376 = vst [vmem:[#allocation0 + $0x3a0] sm:$0xff] %v375_v13  ;;  %v559_v13 = vrot.slane %v558_v8, 5 }
  0x50   :  { %378 = vst [vmem:[#allocation0 + $0x3b0] sm:$0xff] %v377_v14  ;;  %v576_v14 = vld [vmem:[#allocation0 + $0x87] ss:$-1 sm:$0xff] }
  0x51   :  { %380 = vst [vmem:[#allocation0 + $0x3b8] sm:$0xff] %v379_v15  ;;  %v564_v15 = vrot.slane %v563_v10, 5 }
  0x52   :  { %382 = vst [vmem:[#allocation0 + $0x3c8] sm:$0xff] %v381_v16  ;;  %v586_v16 = vld [vmem:[#allocation0 + $0x9f] ss:$-1 sm:$0xff] }
  0x53   :  { %384 = vst [vmem:[#allocation0 + $0x3d0] sm:$0xff] %v383_v17  ;;  %v572_v17 = vrot.slane %v571_v12, 5 }
  0x54   :  { %386 = vst [vmem:[#allocation0 + $0x3e0] sm:$0xff] %v385_v18  ;;  %v591_v18 = vld [vmem:[#allocation0 + $0xa7] ss:$-1 sm:$0xff] }
  0x55   :  { %388 = vst [vmem:[#allocation0 + $0x3e8] sm:$0xff] %v387_v19  ;;  %v577_v19 = vrot.slane %v576_v14, 5 }
  0x56   :  { %390 = vst [vmem:[#allocation0 + $0x3f8] sm:$0xff] %v389_v20  ;;  %v599_v20 = vld [vmem:[#allocation0 + $0x97] ss:$-1 sm:$0xff] }
  0x57   :  { %392 = vst [vmem:[#allocation0 + $0x400] sm:$0xff] %v391_v21  ;;  %v587_v21 = vrot.slane %v586_v16, 5 }
  0x58   :  { %394 = vst [vmem:[#allocation0 + $0x410] sm:$0xff] %v393_v22  ;;  %v604_v22 = vld [vmem:[#allocation0 + $0x9f] ss:$-1 sm:$0xff] }
  0x59   :  { %396 = vst [vmem:[#allocation0 + $0x418] sm:$0xff] %v395_v23  ;;  %v592_v23 = vrot.slane %v591_v18, 5 }
  0x5a   :  { %398 = vst [vmem:[#allocation0 + $0x428] sm:$0xff] %v397_v24  ;;  %v614_v24 = vld [vmem:[#allocation0 + $0xb7] ss:$-1 sm:$0xff] }
  0x5b   :  { %400 = vst [vmem:[#allocation0 + $0x430] sm:$0xff] %v399_v25  ;;  %v600_v25 = vrot.slane %v599_v20, 5 }
  0x5c   :  { %402 = vst [vmem:[#allocation0 + $0x440] sm:$0xff] %v401_v27  ;;  %v605_v27 = vrot.slane %v604_v22, 5 }
  0x5d   :  { %404 = vst [vmem:[#allocation0 + $0x448] sm:$0xff] %v403_v28  ;;  %v627_v28 = vld [vmem:[#allocation0 + $0xaf] ss:$-1 sm:$0xff] }
  0x5e   :  { %406 = vst [vmem:[#allocation0 + $0x458] sm:$0xff] %v405_v29  ;;  %v615_v29 = vrot.slane %v614_v24, 5 }
  0x5f   :  { %408 = vst [vmem:[#allocation0 + $0x460] sm:$0xff] %v407_v31  ;;  %v620_v31 = vrot.slane %v619_v26, 5 }
  0x60   :  { %410 = vst [vmem:[#allocation0 + $0x470] sm:$0xff] %v409_v34  ;;  %v628_v34 = vrot.slane %v627_v28, 5 }
  0x61   :  { %412 = vst [vmem:[#allocation0 + $0x478] sm:$0xff] %v411_v36  ;;  %v633_v36 = vrot.slane %v632_v30, 5 }
  0x62   :  { %420 = vst [vmem:[#allocation1] sm:$0xff] %v419_v37  ;;  %v655_v37 = vld [vmem:[#allocation0 + $0xc7] ss:$-1 sm:$0xff] }
  0x63   :  { %428 = vst.msk [vmem:[#allocation1] sm:$0xff] %vm427_vm0, %v424_v39  ;;  %v660_v39 = vld [vmem:[#allocation0 + $0xcf] ss:$-1 sm:$0xff]  ;;  %v656_v42 = vrot.slane %v655_v37, 5 }
  0x64   :  { %433 = vst [vmem:[#allocation1 + $0x8] sm:$0xff] %v432_v41  ;;  %v670_v41 = vld [vmem:[#allocation0 + $0xe7] ss:$-1 sm:$0xff]  ;;  %v661_v44 = vrot.slane %v660_v39, 5 }
  0x65   :  { %441 = vst.msk [vmem:[#allocation1 + $0x8] sm:$0xff] %vm427_vm0, %v437_v43  ;;  %v675_v43 = vld [vmem:[#allocation0 + $0xef] ss:$-1 sm:$0xff]  ;;  %v671_v46 = vrot.slane %v670_v41, 5 }
  0x66   :  { %448 = vst [vmem:[#allocation1 + $0x10] sm:$0xff] %v447_v45  ;;  %v683_v45 = vld [vmem:[#allocation0 + $0xdf] ss:$-1 sm:$0xff]  ;;  %v676_v48 = vrot.slane %v675_v43, 5 }
  0x67   :  { %456 = vst.msk [vmem:[#allocation1 + $0x10] sm:$0xff] %vm427_vm0, %v452_v47  ;;  %v688_v47 = vld [vmem:[#allocation0 + $0xe7] ss:$-1 sm:$0xff]  ;;  %v684_v50 = vrot.slane %v683_v45, 5 }
  0x68   :  { %461 = vst [vmem:[#allocation1 + $0x18] sm:$0xff] %v460_v49  ;;  %v698_v49 = vld [vmem:[#allocation0 + $0xff] ss:$-1 sm:$0xff]  ;;  %v689_v52 = vrot.slane %v688_v47, 5 }
  0x69   :  { %469 = vst.msk [vmem:[#allocation1 + $0x18] sm:$0xff] %vm427_vm0, %v465_v51  ;;  %v703_v51 = vld [vmem:[#allocation0 + $0x107] ss:$-1 sm:$0xff]  ;;  %v699_v54 = vrot.slane %v698_v49, 5 }
  0x6a   :  { %476 = vst [vmem:[#allocation1 + $0x20] sm:$0xff] %v475_v53  ;;  %v711_v53 = vld [vmem:[#allocation0 + $0xf7] ss:$-1 sm:$0xff]  ;;  %v704_v56 = vrot.slane %v703_v51, 5 }
  0x6b   :  { %484 = vst.msk [vmem:[#allocation1 + $0x20] sm:$0xff] %vm427_vm0, %v480_v55  ;;  %v716_v55 = vld [vmem:[#allocation0 + $0xff] ss:$-1 sm:$0xff]  ;;  %v712_v58 = vrot.slane %v711_v53, 5 }
  0x6c   :  { %489 = vst [vmem:[#allocation1 + $0x28] sm:$0xff] %v488_v57  ;;  %v726_v57 = vld [vmem:[#allocation0 + $0x117] ss:$-1 sm:$0xff]  ;;  %v717_v60 = vrot.slane %v716_v55, 5 }
  0x6d   :  { %497 = vst.msk [vmem:[#allocation1 + $0x28] sm:$0xff] %vm427_vm0, %v493_v59  ;;  %v731_v59 = vld [vmem:[#allocation0 + $0x11f] ss:$-1 sm:$0xff]  ;;  %v727_v62 = vrot.slane %v726_v57, 5 }
  0x6e   :  { %504 = vst [vmem:[#allocation1 + $0x30] sm:$0xff] %v503_v61  ;;  %v739_v61 = vld [vmem:[#allocation0 + $0x10f] ss:$-1 sm:$0xff]  ;;  %v732_v0 = vrot.slane %v731_v59, 5  ;;  %v1980_v33 = vld [vmem:[#allocation1 + $0x10] sm:$0xff] }
  0x6f   :  { %512 = vst.msk [vmem:[#allocation1 + $0x30] sm:$0xff] %vm427_vm0, %v508_v63  ;;  %v744_v63 = vld [vmem:[#allocation0 + $0x117] ss:$-1 sm:$0xff]  ;;  %v740_v2 = vrot.slane %v739_v61, 5 }
  0x70   :  { %517 = vst [vmem:[#allocation1 + $0x38] sm:$0xff] %v516_v1  ;;  %v754_v1 = vld [vmem:[#allocation0 + $0x12f] ss:$-1 sm:$0xff]  ;;  %v745_v4 = vrot.slane %v744_v63, 5 }
  0x71   :  { %525 = vst.msk [vmem:[#allocation1 + $0x38] sm:$0xff] %vm427_vm0, %v521_v3  ;;  %v759_v3 = vld [vmem:[#allocation0 + $0x137] ss:$-1 sm:$0xff]  ;;  %v755_v6 = vrot.slane %v754_v1, 5 }
  0x72   :  { %532 = vst [vmem:[#allocation1 + $0x40] sm:$0xff] %v531_v5  ;;  %v767_v5 = vld [vmem:[#allocation0 + $0x127] ss:$-1 sm:$0xff]  ;;  %v760_v8 = vrot.slane %v759_v3, 5 }
  0x73   :  { %540 = vst.msk [vmem:[#allocation1 + $0x40] sm:$0xff] %vm427_vm0, %v536_v7  ;;  %v772_v7 = vld [vmem:[#allocation0 + $0x12f] ss:$-1 sm:$0xff]  ;;  %v768_v10 = vrot.slane %v767_v5, 5 }
  0x74   :  { %545 = vst [vmem:[#allocation1 + $0x48] sm:$0xff] %v544_v9  ;;  %v782_v9 = vld [vmem:[#allocation0 + $0x147] ss:$-1 sm:$0xff]  ;;  %v773_v12 = vrot.slane %v772_v7, 5 }
  0x75   :  { %553 = vst.msk [vmem:[#allocation1 + $0x48] sm:$0xff] %vm427_vm0, %v549_v11  ;;  %v787_v11 = vld [vmem:[#allocation0 + $0x14f] ss:$-1 sm:$0xff]  ;;  %v783_v14 = vrot.slane %v782_v9, 5 }
  0x76   :  { %560 = vst [vmem:[#allocation1 + $0x50] sm:$0xff] %v559_v13  ;;  %v795_v13 = vld [vmem:[#allocation0 + $0x13f] ss:$-1 sm:$0xff]  ;;  %v788_v16 = vrot.slane %v787_v11, 5 }
  0x77   :  { %568 = vst.msk [vmem:[#allocation1 + $0x50] sm:$0xff] %vm427_vm0, %v564_v15  ;;  %v800_v15 = vld [vmem:[#allocation0 + $0x147] ss:$-1 sm:$0xff]  ;;  %v796_v18 = vrot.slane %v795_v13, 5 }
  0x78   :  { %573 = vst [vmem:[#allocation1 + $0x58] sm:$0xff] %v572_v17  ;;  %v810_v17 = vld [vmem:[#allocation0 + $0x15f] ss:$-1 sm:$0xff]  ;;  %v801_v20 = vrot.slane %v800_v15, 5 }
  0x79   :  { %581 = vst.msk [vmem:[#allocation1 + $0x58] sm:$0xff] %vm427_vm0, %v577_v19  ;;  %v815_v19 = vld [vmem:[#allocation0 + $0x167] ss:$-1 sm:$0xff]  ;;  %v811_v22 = vrot.slane %v810_v17, 5 }
  0x7a   :  { %588 = vst [vmem:[#allocation1 + $0x60] sm:$0xff] %v587_v21  ;;  %v823_v21 = vld [vmem:[#allocation0 + $0x157] ss:$-1 sm:$0xff]  ;;  %v816_v24 = vrot.slane %v815_v19, 5 }
  0x7b   :  { %596 = vst.msk [vmem:[#allocation1 + $0x60] sm:$0xff] %vm427_vm0, %v592_v23  ;;  %v828_v23 = vld [vmem:[#allocation0 + $0x15f] ss:$-1 sm:$0xff]  ;;  %v824_v26 = vrot.slane %v823_v21, 5 }
  0x7c   :  { %601 = vst [vmem:[#allocation1 + $0x68] sm:$0xff] %v600_v25  ;;  %v838_v25 = vld [vmem:[#allocation0 + $0x177] ss:$-1 sm:$0xff]  ;;  %v829_v28 = vrot.slane %v828_v23, 5 }
  0x7d   :  { %609 = vst.msk [vmem:[#allocation1 + $0x68] sm:$0xff] %vm427_vm0, %v605_v27  ;;  %v843_v27 = vld [vmem:[#allocation0 + $0x17f] ss:$-1 sm:$0xff]  ;;  %v839_v30 = vrot.slane %v838_v25, 5 }
  0x7e   :  { %616 = vst [vmem:[#allocation1 + $0x70] sm:$0xff] %v615_v29  ;;  %v851_v29 = vld [vmem:[#allocation0 + $0x16f] ss:$-1 sm:$0xff]  ;;  %v844_v32 = vrot.slane %v843_v27, 5 }
  0x7f   :  { %624 = vst.msk [vmem:[#allocation1 + $0x70] sm:$0xff] %vm427_vm0, %v620_v31  ;;  %v856_v31 = vld [vmem:[#allocation0 + $0x177] ss:$-1 sm:$0xff]  ;;  %v852_v35 = vrot.slane %v851_v29, 5 }
  0x80   :  { %629 = vst [vmem:[#allocation1 + $0x78] sm:$0xff] %v628_v34  ;;  %v866_v34 = vld [vmem:[#allocation0 + $0x18f] ss:$-1 sm:$0xff]  ;;  %v857_v37 = vrot.slane %v856_v31, 5 }
  0x81   :  { %637 = vst.msk [vmem:[#allocation1 + $0x78] sm:$0xff] %vm427_vm0, %v633_v36  ;;  %v871_v36 = vld [vmem:[#allocation0 + $0x197] ss:$-1 sm:$0xff]  ;;  %v867_v39 = vrot.slane %v866_v34, 5 }
  0x82   :  { %644 = vst [vmem:[#allocation1 + $0x80] sm:$0xff] %v643_v38  ;;  %v879_v38 = vld [vmem:[#allocation0 + $0x187] ss:$-1 sm:$0xff]  ;;  %v872_v41 = vrot.slane %v871_v36, 5 }
  0x83   :  { %652 = vst.msk [vmem:[#allocation1 + $0x80] sm:$0xff] %vm427_vm0, %v648_v40  ;;  %v884_v40 = vld [vmem:[#allocation0 + $0x18f] ss:$-1 sm:$0xff]  ;;  %v880_v43 = vrot.slane %v879_v38, 5 }
  0x84   :  { %657 = vst [vmem:[#allocation1 + $0x88] sm:$0xff] %v656_v42  ;;  %v894_v42 = vld [vmem:[#allocation0 + $0x1a7] ss:$-1 sm:$0xff]  ;;  %v885_v45 = vrot.slane %v884_v40, 5 }
  0x85   :  { %665 = vst.msk [vmem:[#allocation1 + $0x88] sm:$0xff] %vm427_vm0, %v661_v44  ;;  %v899_v44 = vld [vmem:[#allocation0 + $0x1af] ss:$-1 sm:$0xff]  ;;  %v895_v47 = vrot.slane %v894_v42, 5 }
  0x86   :  { %672 = vst [vmem:[#allocation1 + $0x90] sm:$0xff] %v671_v46  ;;  %v907_v46 = vld [vmem:[#allocation0 + $0x19f] ss:$-1 sm:$0xff]  ;;  %v900_v49 = vrot.slane %v899_v44, 5 }
  0x87   :  { %680 = vst.msk [vmem:[#allocation1 + $0x90] sm:$0xff] %vm427_vm0, %v676_v48  ;;  %v912_v48 = vld [vmem:[#allocation0 + $0x1a7] ss:$-1 sm:$0xff]  ;;  %v908_v51 = vrot.slane %v907_v46, 5 }
  0x88   :  { %685 = vst [vmem:[#allocation1 + $0x98] sm:$0xff] %v684_v50  ;;  %v922_v50 = vld [vmem:[#allocation0 + $0x1bf] ss:$-1 sm:$0xff]  ;;  %v913_v53 = vrot.slane %v912_v48, 5 }
  0x89   :  { %693 = vst.msk [vmem:[#allocation1 + $0x98] sm:$0xff] %vm427_vm0, %v689_v52  ;;  %v927_v52 = vld [vmem:[#allocation0 + $0x1c7] ss:$-1 sm:$0xff]  ;;  %v923_v55 = vrot.slane %v922_v50, 5 }
  0x8a   :  { %700 = vst [vmem:[#allocation1 + $0xa0] sm:$0xff] %v699_v54  ;;  %v935_v54 = vld [vmem:[#allocation0 + $0x1b7] ss:$-1 sm:$0xff]  ;;  %v928_v57 = vrot.slane %v927_v52, 5 }
  0x8b   :  { %708 = vst.msk [vmem:[#allocation1 + $0xa0] sm:$0xff] %vm427_vm0, %v704_v56  ;;  %v940_v56 = vld [vmem:[#allocation0 + $0x1bf] ss:$-1 sm:$0xff]  ;;  %v936_v59 = vrot.slane %v935_v54, 5 }
  0x8c   :  { %713 = vst [vmem:[#allocation1 + $0xa8] sm:$0xff] %v712_v58  ;;  %v950_v58 = vld [vmem:[#allocation0 + $0x1d7] ss:$-1 sm:$0xff]  ;;  %v941_v61 = vrot.slane %v940_v56, 5 }
  0x8d   :  { %721 = vst.msk [vmem:[#allocation1 + $0xa8] sm:$0xff] %vm427_vm0, %v717_v60  ;;  %v955_v60 = vld [vmem:[#allocation0 + $0x1df] ss:$-1 sm:$0xff]  ;;  %v951_v63 = vrot.slane %v950_v58, 5 }
  0x8e   :  { %728 = vst [vmem:[#allocation1 + $0xb0] sm:$0xff] %v727_v62  ;;  %v963_v62 = vld [vmem:[#allocation0 + $0x1cf] ss:$-1 sm:$0xff]  ;;  %v956_v1 = vrot.slane %v955_v60, 5 }
  0x8f   :  { %736 = vst.msk [vmem:[#allocation1 + $0xb0] sm:$0xff] %vm427_vm0, %v732_v0  ;;  %v968_v0 = vld [vmem:[#allocation0 + $0x1d7] ss:$-1 sm:$0xff]  ;;  %v964_v3 = vrot.slane %v963_v62, 5 }
  0x90   :  { %741 = vst [vmem:[#allocation1 + $0xb8] sm:$0xff] %v740_v2  ;;  %v978_v2 = vld [vmem:[#allocation0 + $0x1ef] ss:$-1 sm:$0xff]  ;;  %v969_v5 = vrot.slane %v968_v0, 5 }
  0x91   :  { %749 = vst.msk [vmem:[#allocation1 + $0xb8] sm:$0xff] %vm427_vm0, %v745_v4  ;;  %v983_v4 = vld [vmem:[#allocation0 + $0x1f7] ss:$-1 sm:$0xff]  ;;  %v979_v7 = vrot.slane %v978_v2, 5 }
  0x92   :  { %756 = vst [vmem:[#allocation1 + $0xc0] sm:$0xff] %v755_v6  ;;  %v991_v6 = vld [vmem:[#allocation0 + $0x1e7] ss:$-1 sm:$0xff]  ;;  %v984_v9 = vrot.slane %v983_v4, 5 }
  0x93   :  { %764 = vst.msk [vmem:[#allocation1 + $0xc0] sm:$0xff] %vm427_vm0, %v760_v8  ;;  %v996_v8 = vld [vmem:[#allocation0 + $0x1ef] ss:$-1 sm:$0xff]  ;;  %v992_v11 = vrot.slane %v991_v6, 5 }
  0x94   :  { %769 = vst [vmem:[#allocation1 + $0xc8] sm:$0xff] %v768_v10  ;;  %v1006_v10 = vld [vmem:[#allocation0 + $0x207] ss:$-1 sm:$0xff]  ;;  %v997_v13 = vrot.slane %v996_v8, 5 }
  0x95   :  { %777 = vst.msk [vmem:[#allocation1 + $0xc8] sm:$0xff] %vm427_vm0, %v773_v12  ;;  %v1011_v12 = vld [vmem:[#allocation0 + $0x20f] ss:$-1 sm:$0xff]  ;;  %v1007_v15 = vrot.slane %v1006_v10, 5 }
  0x96   :  { %784 = vst [vmem:[#allocation1 + $0xd0] sm:$0xff] %v783_v14  ;;  %v1019_v14 = vld [vmem:[#allocation0 + $0x1ff] ss:$-1 sm:$0xff]  ;;  %v1012_v17 = vrot.slane %v1011_v12, 5 }
  0x97   :  { %792 = vst.msk [vmem:[#allocation1 + $0xd0] sm:$0xff] %vm427_vm0, %v788_v16  ;;  %v1024_v16 = vld [vmem:[#allocation0 + $0x207] ss:$-1 sm:$0xff]  ;;  %v1020_v19 = vrot.slane %v1019_v14, 5 }
  0x98   :  { %797 = vst [vmem:[#allocation1 + $0xd8] sm:$0xff] %v796_v18  ;;  %v1034_v18 = vld [vmem:[#allocation0 + $0x21f] ss:$-1 sm:$0xff]  ;;  %v1025_v21 = vrot.slane %v1024_v16, 5 }
  0x99   :  { %805 = vst.msk [vmem:[#allocation1 + $0xd8] sm:$0xff] %vm427_vm0, %v801_v20  ;;  %v1039_v20 = vld [vmem:[#allocation0 + $0x227] ss:$-1 sm:$0xff]  ;;  %v1035_v23 = vrot.slane %v1034_v18, 5 }
  0x9a   :  { %812 = vst [vmem:[#allocation1 + $0xe0] sm:$0xff] %v811_v22  ;;  %v1047_v22 = vld [vmem:[#allocation0 + $0x217] ss:$-1 sm:$0xff]  ;;  %v1040_v25 = vrot.slane %v1039_v20, 5 }
  0x9b   :  { %820 = vst.msk [vmem:[#allocation1 + $0xe0] sm:$0xff] %vm427_vm0, %v816_v24  ;;  %v1052_v24 = vld [vmem:[#allocation0 + $0x21f] ss:$-1 sm:$0xff]  ;;  %v1048_v27 = vrot.slane %v1047_v22, 5 }
  0x9c   :  { %825 = vst [vmem:[#allocation1 + $0xe8] sm:$0xff] %v824_v26  ;;  %v1062_v26 = vld [vmem:[#allocation0 + $0x237] ss:$-1 sm:$0xff]  ;;  %v1053_v29 = vrot.slane %v1052_v24, 5 }
  0x9d   :  { %833 = vst.msk [vmem:[#allocation1 + $0xe8] sm:$0xff] %vm427_vm0, %v829_v28  ;;  %v1067_v28 = vld [vmem:[#allocation0 + $0x23f] ss:$-1 sm:$0xff]  ;;  %v1063_v31 = vrot.slane %v1062_v26, 5 }
  0x9e   :  { %840 = vst [vmem:[#allocation1 + $0xf0] sm:$0xff] %v839_v30  ;;  %v1075_v30 = vld [vmem:[#allocation0 + $0x22f] ss:$-1 sm:$0xff]  ;;  %v1068_v34 = vrot.slane %v1067_v28, 5 }
  0x9f   :  { %848 = vst.msk [vmem:[#allocation1 + $0xf0] sm:$0xff] %vm427_vm0, %v844_v32  ;;  %v1080_v32 = vld [vmem:[#allocation0 + $0x237] ss:$-1 sm:$0xff]  ;;  %v1076_v36 = vrot.slane %v1075_v30, 5 }
  0xa0   :  { %853 = vst [vmem:[#allocation1 + $0xf8] sm:$0xff] %v852_v35  ;;  %v1090_v35 = vld [vmem:[#allocation0 + $0x24f] ss:$-1 sm:$0xff]  ;;  %v1081_v38 = vrot.slane %v1080_v32, 5 }
  0xa1   :  { %861 = vst.msk [vmem:[#allocation1 + $0xf8] sm:$0xff] %vm427_vm0, %v857_v37  ;;  %v1095_v37 = vld [vmem:[#allocation0 + $0x257] ss:$-1 sm:$0xff]  ;;  %v1091_v40 = vrot.slane %v1090_v35, 5 }
  0xa2   :  { %868 = vst [vmem:[#allocation1 + $0x100] sm:$0xff] %v867_v39  ;;  %v1103_v39 = vld [vmem:[#allocation0 + $0x247] ss:$-1 sm:$0xff]  ;;  %v1096_v42 = vrot.slane %v1095_v37, 5 }
  0xa3   :  { %876 = vst.msk [vmem:[#allocation1 + $0x100] sm:$0xff] %vm427_vm0, %v872_v41  ;;  %v1108_v41 = vld [vmem:[#allocation0 + $0x24f] ss:$-1 sm:$0xff]  ;;  %v1104_v44 = vrot.slane %v1103_v39, 5 }
  0xa4   :  { %881 = vst [vmem:[#allocation1 + $0x108] sm:$0xff] %v880_v43  ;;  %v1118_v43 = vld [vmem:[#allocation0 + $0x267] ss:$-1 sm:$0xff]  ;;  %v1109_v46 = vrot.slane %v1108_v41, 5 }
  0xa5   :  { %889 = vst.msk [vmem:[#allocation1 + $0x108] sm:$0xff] %vm427_vm0, %v885_v45  ;;  %v1123_v45 = vld [vmem:[#allocation0 + $0x26f] ss:$-1 sm:$0xff]  ;;  %v1119_v48 = vrot.slane %v1118_v43, 5 }
  0xa6   :  { %896 = vst [vmem:[#allocation1 + $0x110] sm:$0xff] %v895_v47  ;;  %v1131_v47 = vld [vmem:[#allocation0 + $0x25f] ss:$-1 sm:$0xff]  ;;  %v1124_v50 = vrot.slane %v1123_v45, 5 }
  0xa7   :  { %904 = vst.msk [vmem:[#allocation1 + $0x110] sm:$0xff] %vm427_vm0, %v900_v49  ;;  %v1136_v49 = vld [vmem:[#allocation0 + $0x267] ss:$-1 sm:$0xff]  ;;  %v1132_v52 = vrot.slane %v1131_v47, 5 }
  0xa8   :  { %909 = vst [vmem:[#allocation1 + $0x118] sm:$0xff] %v908_v51  ;;  %v1146_v51 = vld [vmem:[#allocation0 + $0x27f] ss:$-1 sm:$0xff]  ;;  %v1137_v54 = vrot.slane %v1136_v49, 5 }
  0xa9   :  { %917 = vst.msk [vmem:[#allocation1 + $0x118] sm:$0xff] %vm427_vm0, %v913_v53  ;;  %v1151_v53 = vld [vmem:[#allocation0 + $0x287] ss:$-1 sm:$0xff]  ;;  %v1147_v56 = vrot.slane %v1146_v51, 5 }
  0xaa   :  { %924 = vst [vmem:[#allocation1 + $0x120] sm:$0xff] %v923_v55  ;;  %v1159_v55 = vld [vmem:[#allocation0 + $0x277] ss:$-1 sm:$0xff]  ;;  %v1152_v58 = vrot.slane %v1151_v53, 5 }
  0xab   :  { %932 = vst.msk [vmem:[#allocation1 + $0x120] sm:$0xff] %vm427_vm0, %v928_v57  ;;  %v1164_v57 = vld [vmem:[#allocation0 + $0x27f] ss:$-1 sm:$0xff]  ;;  %v1160_v60 = vrot.slane %v1159_v55, 5 }
  0xac   :  { %937 = vst [vmem:[#allocation1 + $0x128] sm:$0xff] %v936_v59  ;;  %v1174_v59 = vld [vmem:[#allocation0 + $0x297] ss:$-1 sm:$0xff]  ;;  %v1165_v62 = vrot.slane %v1164_v57, 5 }
  0xad   :  { %945 = vst.msk [vmem:[#allocation1 + $0x128] sm:$0xff] %vm427_vm0, %v941_v61  ;;  %v1179_v61 = vld [vmem:[#allocation0 + $0x29f] ss:$-1 sm:$0xff]  ;;  %v1175_v0 = vrot.slane %v1174_v59, 5 }
  0xae   :  { %952 = vst [vmem:[#allocation1 + $0x130] sm:$0xff] %v951_v63  ;;  %v1187_v63 = vld [vmem:[#allocation0 + $0x28f] ss:$-1 sm:$0xff]  ;;  %v1180_v2 = vrot.slane %v1179_v61, 5 }
  0xaf   :  { %960 = vst.msk [vmem:[#allocation1 + $0x130] sm:$0xff] %vm427_vm0, %v956_v1  ;;  %v1192_v1 = vld [vmem:[#allocation0 + $0x297] ss:$-1 sm:$0xff]  ;;  %v1188_v4 = vrot.slane %v1187_v63, 5 }
  0xb0   :  { %965 = vst [vmem:[#allocation1 + $0x138] sm:$0xff] %v964_v3  ;;  %v1202_v3 = vld [vmem:[#allocation0 + $0x2af] ss:$-1 sm:$0xff]  ;;  %v1193_v6 = vrot.slane %v1192_v1, 5 }
  0xb1   :  { %973 = vst.msk [vmem:[#allocation1 + $0x138] sm:$0xff] %vm427_vm0, %v969_v5  ;;  %v1207_v5 = vld [vmem:[#allocation0 + $0x2b7] ss:$-1 sm:$0xff]  ;;  %v1203_v8 = vrot.slane %v1202_v3, 5 }
  0xb2   :  { %980 = vst [vmem:[#allocation1 + $0x140] sm:$0xff] %v979_v7  ;;  %v1215_v7 = vld [vmem:[#allocation0 + $0x2a7] ss:$-1 sm:$0xff]  ;;  %v1208_v10 = vrot.slane %v1207_v5, 5 }
  0xb3   :  { %988 = vst.msk [vmem:[#allocation1 + $0x140] sm:$0xff] %vm427_vm0, %v984_v9  ;;  %v1220_v9 = vld [vmem:[#allocation0 + $0x2af] ss:$-1 sm:$0xff]  ;;  %v1216_v12 = vrot.slane %v1215_v7, 5 }
  0xb4   :  { %993 = vst [vmem:[#allocation1 + $0x148] sm:$0xff] %v992_v11  ;;  %v1230_v11 = vld [vmem:[#allocation0 + $0x2c7] ss:$-1 sm:$0xff]  ;;  %v1221_v14 = vrot.slane %v1220_v9, 5 }
  0xb5   :  { %1001 = vst.msk [vmem:[#allocation1 + $0x148] sm:$0xff] %vm427_vm0, %v997_v13  ;;  %v1235_v13 = vld [vmem:[#allocation0 + $0x2cf] ss:$-1 sm:$0xff]  ;;  %v1231_v16 = vrot.slane %v1230_v11, 5 }
  0xb6   :  { %1008 = vst [vmem:[#allocation1 + $0x150] sm:$0xff] %v1007_v15  ;;  %v1243_v15 = vld [vmem:[#allocation0 + $0x2bf] ss:$-1 sm:$0xff]  ;;  %v1236_v18 = vrot.slane %v1235_v13, 5 }
  0xb7   :  { %1016 = vst.msk [vmem:[#allocation1 + $0x150] sm:$0xff] %vm427_vm0, %v1012_v17  ;;  %v1248_v17 = vld [vmem:[#allocation0 + $0x2c7] ss:$-1 sm:$0xff]  ;;  %v1244_v20 = vrot.slane %v1243_v15, 5 }
  0xb8   :  { %1021 = vst [vmem:[#allocation1 + $0x158] sm:$0xff] %v1020_v19  ;;  %v1258_v19 = vld [vmem:[#allocation0 + $0x2df] ss:$-1 sm:$0xff]  ;;  %v1249_v22 = vrot.slane %v1248_v17, 5 }
  0xb9   :  { %1029 = vst.msk [vmem:[#allocation1 + $0x158] sm:$0xff] %vm427_vm0, %v1025_v21  ;;  %v1263_v21 = vld [vmem:[#allocation0 + $0x2e7] ss:$-1 sm:$0xff]  ;;  %v1259_v24 = vrot.slane %v1258_v19, 5 }
  0xba   :  { %1036 = vst [vmem:[#allocation1 + $0x160] sm:$0xff] %v1035_v23  ;;  %v1271_v23 = vld [vmem:[#allocation0 + $0x2d7] ss:$-1 sm:$0xff]  ;;  %v1264_v26 = vrot.slane %v1263_v21, 5 }
  0xbb   :  { %1044 = vst.msk [vmem:[#allocation1 + $0x160] sm:$0xff] %vm427_vm0, %v1040_v25  ;;  %v1276_v25 = vld [vmem:[#allocation0 + $0x2df] ss:$-1 sm:$0xff]  ;;  %v1272_v28 = vrot.slane %v1271_v23, 5 }
  0xbc   :  { %1049 = vst [vmem:[#allocation1 + $0x168] sm:$0xff] %v1048_v27  ;;  %v1286_v27 = vld [vmem:[#allocation0 + $0x2f7] ss:$-1 sm:$0xff]  ;;  %v1277_v30 = vrot.slane %v1276_v25, 5 }
  0xbd   :  { %1057 = vst.msk [vmem:[#allocation1 + $0x168] sm:$0xff] %vm427_vm0, %v1053_v29  ;;  %v1291_v29 = vld [vmem:[#allocation0 + $0x2ff] ss:$-1 sm:$0xff]  ;;  %v1287_v32 = vrot.slane %v1286_v27, 5 }
  0xbe   :  { %1064 = vst [vmem:[#allocation1 + $0x170] sm:$0xff] %v1063_v31  ;;  %v1299_v31 = vld [vmem:[#allocation0 + $0x2ef] ss:$-1 sm:$0xff]  ;;  %v1292_v35 = vrot.slane %v1291_v29, 5 }
  0xbf   :  { %1072 = vst.msk [vmem:[#allocation1 + $0x170] sm:$0xff] %vm427_vm0, %v1068_v34  ;;  %v1304_v34 = vld [vmem:[#allocation0 + $0x2f7] ss:$-1 sm:$0xff]  ;;  %v1300_v37 = vrot.slane %v1299_v31, 5 }
  0xc0   :  { %1077 = vst [vmem:[#allocation1 + $0x178] sm:$0xff] %v1076_v36  ;;  %v1314_v36 = vld [vmem:[#allocation0 + $0x30f] ss:$-1 sm:$0xff]  ;;  %v1305_v39 = vrot.slane %v1304_v34, 5 }
  0xc1   :  { %1085 = vst.msk [vmem:[#allocation1 + $0x178] sm:$0xff] %vm427_vm0, %v1081_v38  ;;  %v1319_v38 = vld [vmem:[#allocation0 + $0x317] ss:$-1 sm:$0xff]  ;;  %v1315_v41 = vrot.slane %v1314_v36, 5 }
  0xc2   :  { %1092 = vst [vmem:[#allocation1 + $0x180] sm:$0xff] %v1091_v40  ;;  %v1327_v40 = vld [vmem:[#allocation0 + $0x307] ss:$-1 sm:$0xff]  ;;  %v1320_v43 = vrot.slane %v1319_v38, 5 }
  0xc3   :  { %1100 = vst.msk [vmem:[#allocation1 + $0x180] sm:$0xff] %vm427_vm0, %v1096_v42  ;;  %v1332_v42 = vld [vmem:[#allocation0 + $0x30f] ss:$-1 sm:$0xff]  ;;  %v1328_v45 = vrot.slane %v1327_v40, 5 }
  0xc4   :  { %1105 = vst [vmem:[#allocation1 + $0x188] sm:$0xff] %v1104_v44  ;;  %v1342_v44 = vld [vmem:[#allocation0 + $0x327] ss:$-1 sm:$0xff]  ;;  %v1333_v47 = vrot.slane %v1332_v42, 5 }
  0xc5   :  { %1113 = vst.msk [vmem:[#allocation1 + $0x188] sm:$0xff] %vm427_vm0, %v1109_v46  ;;  %v1347_v46 = vld [vmem:[#allocation0 + $0x32f] ss:$-1 sm:$0xff]  ;;  %v1343_v49 = vrot.slane %v1342_v44, 5 }
  0xc6   :  { %1120 = vst [vmem:[#allocation1 + $0x190] sm:$0xff] %v1119_v48  ;;  %v1355_v48 = vld [vmem:[#allocation0 + $0x31f] ss:$-1 sm:$0xff]  ;;  %v1348_v51 = vrot.slane %v1347_v46, 5 }
  0xc7   :  { %1128 = vst.msk [vmem:[#allocation1 + $0x190] sm:$0xff] %vm427_vm0, %v1124_v50  ;;  %v1360_v50 = vld [vmem:[#allocation0 + $0x327] ss:$-1 sm:$0xff]  ;;  %v1356_v53 = vrot.slane %v1355_v48, 5 }
  0xc8   :  { %1133 = vst [vmem:[#allocation1 + $0x198] sm:$0xff] %v1132_v52  ;;  %v1370_v52 = vld [vmem:[#allocation0 + $0x33f] ss:$-1 sm:$0xff]  ;;  %v1361_v55 = vrot.slane %v1360_v50, 5 }
  0xc9   :  { %1141 = vst.msk [vmem:[#allocation1 + $0x198] sm:$0xff] %vm427_vm0, %v1137_v54  ;;  %v1375_v54 = vld [vmem:[#allocation0 + $0x347] ss:$-1 sm:$0xff]  ;;  %v1371_v57 = vrot.slane %v1370_v52, 5 }
  0xca   :  { %1148 = vst [vmem:[#allocation1 + $0x1a0] sm:$0xff] %v1147_v56  ;;  %v1383_v56 = vld [vmem:[#allocation0 + $0x337] ss:$-1 sm:$0xff]  ;;  %v1376_v59 = vrot.slane %v1375_v54, 5 }
  0xcb   :  { %1156 = vst.msk [vmem:[#allocation1 + $0x1a0] sm:$0xff] %vm427_vm0, %v1152_v58  ;;  %v1388_v58 = vld [vmem:[#allocation0 + $0x33f] ss:$-1 sm:$0xff]  ;;  %v1384_v61 = vrot.slane %v1383_v56, 5 }
  0xcc   :  { %1161 = vst [vmem:[#allocation1 + $0x1a8] sm:$0xff] %v1160_v60  ;;  %v1398_v60 = vld [vmem:[#allocation0 + $0x357] ss:$-1 sm:$0xff]  ;;  %v1389_v63 = vrot.slane %v1388_v58, 5 }
  0xcd   :  { %1169 = vst.msk [vmem:[#allocation1 + $0x1a8] sm:$0xff] %vm427_vm0, %v1165_v62  ;;  %v1403_v62 = vld [vmem:[#allocation0 + $0x35f] ss:$-1 sm:$0xff]  ;;  %v1399_v1 = vrot.slane %v1398_v60, 5 }
  0xce   :  { %1176 = vst [vmem:[#allocation1 + $0x1b0] sm:$0xff] %v1175_v0  ;;  %v1411_v0 = vld [vmem:[#allocation0 + $0x34f] ss:$-1 sm:$0xff]  ;;  %v1404_v3 = vrot.slane %v1403_v62, 5 }
  0xcf   :  { %1184 = vst.msk [vmem:[#allocation1 + $0x1b0] sm:$0xff] %vm427_vm0, %v1180_v2  ;;  %v1416_v2 = vld [vmem:[#allocation0 + $0x357] ss:$-1 sm:$0xff]  ;;  %v1412_v5 = vrot.slane %v1411_v0, 5 }
  0xd0   :  { %1189 = vst [vmem:[#allocation1 + $0x1b8] sm:$0xff] %v1188_v4  ;;  %v1426_v4 = vld [vmem:[#allocation0 + $0x36f] ss:$-1 sm:$0xff]  ;;  %v1417_v7 = vrot.slane %v1416_v2, 5 }
  0xd1   :  { %1197 = vst.msk [vmem:[#allocation1 + $0x1b8] sm:$0xff] %vm427_vm0, %v1193_v6  ;;  %v1431_v6 = vld [vmem:[#allocation0 + $0x377] ss:$-1 sm:$0xff]  ;;  %v1427_v9 = vrot.slane %v1426_v4, 5 }
  0xd2   :  { %1204 = vst [vmem:[#allocation1 + $0x1c0] sm:$0xff] %v1203_v8  ;;  %v1439_v8 = vld [vmem:[#allocation0 + $0x367] ss:$-1 sm:$0xff]  ;;  %v1432_v11 = vrot.slane %v1431_v6, 5 }
  0xd3   :  { %1212 = vst.msk [vmem:[#allocation1 + $0x1c0] sm:$0xff] %vm427_vm0, %v1208_v10  ;;  %v1444_v10 = vld [vmem:[#allocation0 + $0x36f] ss:$-1 sm:$0xff]  ;;  %v1440_v13 = vrot.slane %v1439_v8, 5 }
  0xd4   :  { %1217 = vst [vmem:[#allocation1 + $0x1c8] sm:$0xff] %v1216_v12  ;;  %v1454_v12 = vld [vmem:[#allocation0 + $0x387] ss:$-1 sm:$0xff]  ;;  %v1445_v15 = vrot.slane %v1444_v10, 5 }
  0xd5   :  { %1225 = vst.msk [vmem:[#allocation1 + $0x1c8] sm:$0xff] %vm427_vm0, %v1221_v14  ;;  %v1459_v14 = vld [vmem:[#allocation0 + $0x38f] ss:$-1 sm:$0xff]  ;;  %v1455_v17 = vrot.slane %v1454_v12, 5 }
  0xd6   :  { %1232 = vst [vmem:[#allocation1 + $0x1d0] sm:$0xff] %v1231_v16  ;;  %v1467_v16 = vld [vmem:[#allocation0 + $0x37f] ss:$-1 sm:$0xff]  ;;  %v1460_v19 = vrot.slane %v1459_v14, 5 }
  0xd7   :  { %1240 = vst.msk [vmem:[#allocation1 + $0x1d0] sm:$0xff] %vm427_vm0, %v1236_v18  ;;  %v1472_v18 = vld [vmem:[#allocation0 + $0x387] ss:$-1 sm:$0xff]  ;;  %v1468_v21 = vrot.slane %v1467_v16, 5 }
  0xd8   :  { %1245 = vst [vmem:[#allocation1 + $0x1d8] sm:$0xff] %v1244_v20  ;;  %v1482_v20 = vld [vmem:[#allocation0 + $0x39f] ss:$-1 sm:$0xff]  ;;  %v1473_v23 = vrot.slane %v1472_v18, 5 }
  0xd9   :  { %1253 = vst.msk [vmem:[#allocation1 + $0x1d8] sm:$0xff] %vm427_vm0, %v1249_v22  ;;  %v1487_v22 = vld [vmem:[#allocation0 + $0x3a7] ss:$-1 sm:$0xff]  ;;  %v1483_v25 = vrot.slane %v1482_v20, 5 }
  0xda   :  { %1260 = vst [vmem:[#allocation1 + $0x1e0] sm:$0xff] %v1259_v24  ;;  %v1495_v24 = vld [vmem:[#allocation0 + $0x397] ss:$-1 sm:$0xff]  ;;  %v1488_v27 = vrot.slane %v1487_v22, 5 }
  0xdb   :  { %1268 = vst.msk [vmem:[#allocation1 + $0x1e0] sm:$0xff] %vm427_vm0, %v1264_v26  ;;  %v1500_v26 = vld [vmem:[#allocation0 + $0x39f] ss:$-1 sm:$0xff]  ;;  %v1496_v29 = vrot.slane %v1495_v24, 5 }
  0xdc   :  { %1273 = vst [vmem:[#allocation1 + $0x1e8] sm:$0xff] %v1272_v28  ;;  %v1510_v28 = vld [vmem:[#allocation0 + $0x3b7] ss:$-1 sm:$0xff]  ;;  %v1501_v31 = vrot.slane %v1500_v26, 5 }
  0xdd   :  { %1281 = vst.msk [vmem:[#allocation1 + $0x1e8] sm:$0xff] %vm427_vm0, %v1277_v30  ;;  %v1515_v30 = vld [vmem:[#allocation0 + $0x3bf] ss:$-1 sm:$0xff]  ;;  %v1511_v34 = vrot.slane %v1510_v28, 5 }
  0xde   :  { %1288 = vst [vmem:[#allocation1 + $0x1f0] sm:$0xff] %v1287_v32  ;;  %v1523_v32 = vld [vmem:[#allocation0 + $0x3af] ss:$-1 sm:$0xff]  ;;  %v1516_v36 = vrot.slane %v1515_v30, 5 }
  0xdf   :  { %1296 = vst.msk [vmem:[#allocation1 + $0x1f0] sm:$0xff] %vm427_vm0, %v1292_v35  ;;  %v1528_v35 = vld [vmem:[#allocation0 + $0x3b7] ss:$-1 sm:$0xff]  ;;  %v1524_v38 = vrot.slane %v1523_v32, 5 }
  0xe0   :  { %1301 = vst [vmem:[#allocation1 + $0x1f8] sm:$0xff] %v1300_v37  ;;  %v1538_v37 = vld [vmem:[#allocation0 + $0x3cf] ss:$-1 sm:$0xff]  ;;  %v1529_v40 = vrot.slane %v1528_v35, 5 }
  0xe1   :  { %1309 = vst.msk [vmem:[#allocation1 + $0x1f8] sm:$0xff] %vm427_vm0, %v1305_v39  ;;  %v1543_v39 = vld [vmem:[#allocation0 + $0x3d7] ss:$-1 sm:$0xff]  ;;  %v1539_v42 = vrot.slane %v1538_v37, 5 }
  0xe2   :  { %1316 = vst [vmem:[#allocation1 + $0x200] sm:$0xff] %v1315_v41  ;;  %v1551_v41 = vld [vmem:[#allocation0 + $0x3c7] ss:$-1 sm:$0xff]  ;;  %v1544_v44 = vrot.slane %v1543_v39, 5 }
  0xe3   :  { %1324 = vst.msk [vmem:[#allocation1 + $0x200] sm:$0xff] %vm427_vm0, %v1320_v43  ;;  %v1556_v43 = vld [vmem:[#allocation0 + $0x3cf] ss:$-1 sm:$0xff]  ;;  %v1552_v46 = vrot.slane %v1551_v41, 5 }
  0xe4   :  { %1329 = vst [vmem:[#allocation1 + $0x208] sm:$0xff] %v1328_v45  ;;  %v1566_v45 = vld [vmem:[#allocation0 + $0x3e7] ss:$-1 sm:$0xff]  ;;  %v1557_v48 = vrot.slane %v1556_v43, 5  ;;  %v1978_v41 = vld [vmem:[#allocation1 + $0x8] sm:$0xff] }
  0xe5   :  { %1337 = vst.msk [vmem:[#allocation1 + $0x208] sm:$0xff] %vm427_vm0, %v1333_v47  ;;  %v1571_v47 = vld [vmem:[#allocation0 + $0x3ef] ss:$-1 sm:$0xff]  ;;  %v1567_v50 = vrot.slane %v1566_v45, 5  ;;  %v1984_v43 = vld [vmem:[#allocation1 + $0x20] sm:$0xff]  ;;  %v1988_v45 = vld [vmem:[#allocation1 + $0x30] sm:$0xff] }
  0xe6   :  { %1344 = vst [vmem:[#allocation1 + $0x210] sm:$0xff] %v1343_v49  ;;  %v1579_v49 = vld [vmem:[#allocation0 + $0x3df] ss:$-1 sm:$0xff]  ;;  %v1572_v52 = vrot.slane %v1571_v47, 5  ;;  %v1992_v47 = vld [vmem:[#allocation1 + $0x40] sm:$0xff] }
  0xe7   :  { %1352 = vst.msk [vmem:[#allocation1 + $0x210] sm:$0xff] %vm427_vm0, %v1348_v51  ;;  %v1584_v51 = vld [vmem:[#allocation0 + $0x3e7] ss:$-1 sm:$0xff]  ;;  %v1580_v54 = vrot.slane %v1579_v49, 5  ;;  %v1996_v49 = vld [vmem:[#allocation1 + $0x50] sm:$0xff] }
  0xe8   :  { %1357 = vst [vmem:[#allocation1 + $0x218] sm:$0xff] %v1356_v53  ;;  %v1594_v53 = vld [vmem:[#allocation0 + $0x3ff] ss:$-1 sm:$0xff]  ;;  %v1585_v56 = vrot.slane %v1584_v51, 5  ;;  %v2000_v51 = vld [vmem:[#allocation1 + $0x60] sm:$0xff] }
  0xe9   :  { %1365 = vst.msk [vmem:[#allocation1 + $0x218] sm:$0xff] %vm427_vm0, %v1361_v55  ;;  %v1599_v55 = vld [vmem:[#allocation0 + $0x407] ss:$-1 sm:$0xff]  ;;  %v1595_v58 = vrot.slane %v1594_v53, 5  ;;  %v2004_v53 = vld [vmem:[#allocation1 + $0x70] sm:$0xff] }
  0xea   :  { %1372 = vst [vmem:[#allocation1 + $0x220] sm:$0xff] %v1371_v57  ;;  %v1607_v57 = vld [vmem:[#allocation0 + $0x3f7] ss:$-1 sm:$0xff]  ;;  %v1600_v60 = vrot.slane %v1599_v55, 5  ;;  %v2008_v55 = vld [vmem:[#allocation1 + $0x80] sm:$0xff] }
  0xeb   :  { %1380 = vst.msk [vmem:[#allocation1 + $0x220] sm:$0xff] %vm427_vm0, %v1376_v59  ;;  %v1612_v59 = vld [vmem:[#allocation0 + $0x3ff] ss:$-1 sm:$0xff]  ;;  %v1608_v62 = vrot.slane %v1607_v57, 5  ;;  %v2012_v57 = vld [vmem:[#allocation1 + $0x90] sm:$0xff] }
  0xec   :  { %1385 = vst [vmem:[#allocation1 + $0x228] sm:$0xff] %v1384_v61  ;;  %v1622_v61 = vld [vmem:[#allocation0 + $0x417] ss:$-1 sm:$0xff]  ;;  %v1613_v0 = vrot.slane %v1612_v59, 5  ;;  %v2016_v59 = vld [vmem:[#allocation1 + $0xa0] sm:$0xff] }
  0xed   :  { %1393 = vst.msk [vmem:[#allocation1 + $0x228] sm:$0xff] %vm427_vm0, %v1389_v63  ;;  %v1627_v63 = vld [vmem:[#allocation0 + $0x41f] ss:$-1 sm:$0xff]  ;;  %v1623_v2 = vrot.slane %v1622_v61, 5  ;;  %v2020_v61 = vld [vmem:[#allocation1 + $0xb0] sm:$0xff] }
  0xee   :  { %1400 = vst [vmem:[#allocation1 + $0x230] sm:$0xff] %v1399_v1  ;;  %v1635_v1 = vld [vmem:[#allocation0 + $0x40f] ss:$-1 sm:$0xff]  ;;  %v1628_v4 = vrot.slane %v1627_v63, 5  ;;  %v2024_v63 = vld [vmem:[#allocation1 + $0xc0] sm:$0xff] }
  0xef   :  { %1408 = vst.msk [vmem:[#allocation1 + $0x230] sm:$0xff] %vm427_vm0, %v1404_v3  ;;  %v1640_v3 = vld [vmem:[#allocation0 + $0x417] ss:$-1 sm:$0xff]  ;;  %v1636_v6 = vrot.slane %v1635_v1, 5 }
  0xf0   :  { %1413 = vst [vmem:[#allocation1 + $0x238] sm:$0xff] %v1412_v5  ;;  %v1650_v5 = vld [vmem:[#allocation0 + $0x42f] ss:$-1 sm:$0xff]  ;;  %v1641_v8 = vrot.slane %v1640_v3, 5  ;;  %v2028_v1 = vld [vmem:[#allocation1 + $0xd0] sm:$0xff]  ;;  %v2032_v3 = vld [vmem:[#allocation1 + $0xe0] sm:$0xff] }
  0xf1   :  { %1421 = vst.msk [vmem:[#allocation1 + $0x238] sm:$0xff] %vm427_vm0, %v1417_v7  ;;  %v1655_v7 = vld [vmem:[#allocation0 + $0x437] ss:$-1 sm:$0xff]  ;;  %v1651_v10 = vrot.slane %v1650_v5, 5 }
  0xf2   :  { %1428 = vst [vmem:[#allocation1 + $0x240] sm:$0xff] %v1427_v9  ;;  %v1663_v9 = vld [vmem:[#allocation0 + $0x427] ss:$-1 sm:$0xff]  ;;  %v1656_v12 = vrot.slane %v1655_v7, 5  ;;  %v2036_v5 = vld [vmem:[#allocation1 + $0xf0] sm:$0xff] }
  0xf3   :  { %1436 = vst.msk [vmem:[#allocation1 + $0x240] sm:$0xff] %vm427_vm0, %v1432_v11  ;;  %v1668_v11 = vld [vmem:[#allocation0 + $0x42f] ss:$-1 sm:$0xff]  ;;  %v1664_v14 = vrot.slane %v1663_v9, 5  ;;  %v2040_v7 = vld [vmem:[#allocation1 + $0x100] sm:$0xff]  ;;  %v2044_v9 = vld [vmem:[#allocation1 + $0x110] sm:$0xff] }
  0xf4   :  { %1441 = vst [vmem:[#allocation1 + $0x248] sm:$0xff] %v1440_v13  ;;  %v1678_v13 = vld [vmem:[#allocation0 + $0x447] ss:$-1 sm:$0xff]  ;;  %v1669_v16 = vrot.slane %v1668_v11, 5 }
  0xf5   :  { %1449 = vst.msk [vmem:[#allocation1 + $0x248] sm:$0xff] %vm427_vm0, %v1445_v15  ;;  %v1683_v15 = vld [vmem:[#allocation0 + $0x44f] ss:$-1 sm:$0xff]  ;;  %v1679_v18 = vrot.slane %v1678_v13, 5  ;;  %v2048_v11 = vld [vmem:[#allocation1 + $0x120] sm:$0xff]  ;;  %v2052_v13 = vld [vmem:[#allocation1 + $0x130] sm:$0xff] }
  0xf6   :  { %1456 = vst [vmem:[#allocation1 + $0x250] sm:$0xff] %v1455_v17  ;;  %v1691_v17 = vld [vmem:[#allocation0 + $0x43f] ss:$-1 sm:$0xff]  ;;  %v1684_v20 = vrot.slane %v1683_v15, 5  ;;  %v2056_v15 = vld [vmem:[#allocation1 + $0x140] sm:$0xff] }
  0xf7   :  { %1464 = vst.msk [vmem:[#allocation1 + $0x250] sm:$0xff] %vm427_vm0, %v1460_v19  ;;  %v1696_v19 = vld [vmem:[#allocation0 + $0x447] ss:$-1 sm:$0xff]  ;;  %v1692_v22 = vrot.slane %v1691_v17, 5  ;;  %v2060_v17 = vld [vmem:[#allocation1 + $0x150] sm:$0xff] }
  0xf8   :  { %1469 = vst [vmem:[#allocation1 + $0x258] sm:$0xff] %v1468_v21  ;;  %v1706_v21 = vld [vmem:[#allocation0 + $0x45f] ss:$-1 sm:$0xff]  ;;  %v1697_v24 = vrot.slane %v1696_v19, 5  ;;  %v2064_v19 = vld [vmem:[#allocation1 + $0x160] sm:$0xff] }
  0xf9   :  { %1477 = vst.msk [vmem:[#allocation1 + $0x258] sm:$0xff] %vm427_vm0, %v1473_v23  ;;  %v1711_v23 = vld [vmem:[#allocation0 + $0x467] ss:$-1 sm:$0xff]  ;;  %v1707_v26 = vrot.slane %v1706_v21, 5  ;;  %v2068_v21 = vld [vmem:[#allocation1 + $0x170] sm:$0xff] }
  0xfa   :  { %1484 = vst [vmem:[#allocation1 + $0x260] sm:$0xff] %v1483_v25  ;;  %v1719_v25 = vld [vmem:[#allocation0 + $0x457] ss:$-1 sm:$0xff]  ;;  %v1712_v28 = vrot.slane %v1711_v23, 5  ;;  %v2072_v23 = vld [vmem:[#allocation1 + $0x180] sm:$0xff] }
  0xfb   :  { %1492 = vst.msk [vmem:[#allocation1 + $0x260] sm:$0xff] %vm427_vm0, %v1488_v27  ;;  %v1724_v27 = vld [vmem:[#allocation0 + $0x45f] ss:$-1 sm:$0xff]  ;;  %v1720_v30 = vrot.slane %v1719_v25, 5  ;;  %v2076_v25 = vld [vmem:[#allocation1 + $0x190] sm:$0xff] }
  0xfc   :  { %1497 = vst [vmem:[#allocation1 + $0x268] sm:$0xff] %v1496_v29  ;;  %v1734_v29 = vld [vmem:[#allocation0 + $0x477] ss:$-1 sm:$0xff]  ;;  %v1725_v32 = vrot.slane %v1724_v27, 5  ;;  %v2080_v27 = vld [vmem:[#allocation1 + $0x1a0] sm:$0xff] }
  0xfd   :  { %1505 = vst.msk [vmem:[#allocation1 + $0x268] sm:$0xff] %vm427_vm0, %v1501_v31  ;;  %v1739_v31 = vld [vmem:[#allocation0 + $0x47f] ss:$-1 sm:$0xff]  ;;  %v1735_v35 = vrot.slane %v1734_v29, 5  ;;  %v2084_v29 = vld [vmem:[#allocation1 + $0x1b0] sm:$0xff] }
  0xfe   :  { %1512 = vst [vmem:[#allocation1 + $0x270] sm:$0xff] %v1511_v34  ;;  %v1747_v34 = vld [vmem:[#allocation0 + $0x46f] ss:$-1 sm:$0xff]  ;;  %v1740_v37 = vrot.slane %v1739_v31, 5  ;;  %v2088_v31 = vld [vmem:[#allocation1 + $0x1c0] sm:$0xff] }
  0xff   :  { %1520 = vst.msk [vmem:[#allocation1 + $0x270] sm:$0xff] %vm427_vm0, %v1516_v36  ;;  %v1752_v36 = vld [vmem:[#allocation0 + $0x477] ss:$-1 sm:$0xff] }
 0x100   :  { %1525 = vst [vmem:[#allocation1 + $0x278] sm:$0xff] %v1524_v38  ;;  %v1748_v38 = vrot.slane %v1747_v34, 5  ;;  %v1753_v39 = vrot.slane %v1752_v36, 5  ;;  %v2092_v34 = vld [vmem:[#allocation1 + $0x1d0] sm:$0xff]  ;;  %v2096_v36 = vld [vmem:[#allocation1 + $0x1e0] sm:$0xff] }
 0x101   :  { %1533 = vst.msk [vmem:[#allocation1 + $0x278] sm:$0xff] %vm427_vm0, %v1529_v40  ;;  %v1976_v40 = vld [vmem:[#allocation1] sm:$0xff] }
 0x102   :  { %1540 = vst [vmem:[#allocation1 + $0x280] sm:$0xff] %v1539_v42  ;;  %v1982_v42 = vld [vmem:[#allocation1 + $0x18] sm:$0xff] }
 0x103   :  { %1548 = vst.msk [vmem:[#allocation1 + $0x280] sm:$0xff] %vm427_vm0, %v1544_v44  ;;  %v1986_v44 = vld [vmem:[#allocation1 + $0x28] sm:$0xff] }
 0x104   :  { %1553 = vst [vmem:[#allocation1 + $0x288] sm:$0xff] %v1552_v46  ;;  %v1990_v46 = vld [vmem:[#allocation1 + $0x38] sm:$0xff] }
 0x105   :  { %1561 = vst.msk [vmem:[#allocation1 + $0x288] sm:$0xff] %vm427_vm0, %v1557_v48  ;;  %v1994_v48 = vld [vmem:[#allocation1 + $0x48] sm:$0xff] }
 0x106   :  { %1568 = vst [vmem:[#allocation1 + $0x290] sm:$0xff] %v1567_v50  ;;  %v1998_v50 = vld [vmem:[#allocation1 + $0x58] sm:$0xff] }
 0x107   :  { %1576 = vst.msk [vmem:[#allocation1 + $0x290] sm:$0xff] %vm427_vm0, %v1572_v52  ;;  %v2002_v52 = vld [vmem:[#allocation1 + $0x68] sm:$0xff] }
 0x108   :  { %1581 = vst [vmem:[#allocation1 + $0x298] sm:$0xff] %v1580_v54  ;;  %v2006_v54 = vld [vmem:[#allocation1 + $0x78] sm:$0xff] }
 0x109   :  { %1589 = vst.msk [vmem:[#allocation1 + $0x298] sm:$0xff] %vm427_vm0, %v1585_v56  ;;  %v2010_v56 = vld [vmem:[#allocation1 + $0x88] sm:$0xff] }
 0x10a   :  { %1596 = vst [vmem:[#allocation1 + $0x2a0] sm:$0xff] %v1595_v58  ;;  %v2014_v58 = vld [vmem:[#allocation1 + $0x98] sm:$0xff] }
 0x10b   :  { %1604 = vst.msk [vmem:[#allocation1 + $0x2a0] sm:$0xff] %vm427_vm0, %v1600_v60  ;;  %v2018_v60 = vld [vmem:[#allocation1 + $0xa8] sm:$0xff] }
 0x10c   :  { %1609 = vst [vmem:[#allocation1 + $0x2a8] sm:$0xff] %v1608_v62  ;;  %v2022_v62 = vld [vmem:[#allocation1 + $0xb8] sm:$0xff] }
 0x10d   :  { %1617 = vst.msk [vmem:[#allocation1 + $0x2a8] sm:$0xff] %vm427_vm0, %v1613_v0  ;;  %v2026_v0 = vld [vmem:[#allocation1 + $0xc8] sm:$0xff] }
 0x10e   :  { %1624 = vst [vmem:[#allocation1 + $0x2b0] sm:$0xff] %v1623_v2  ;;  %v2030_v2 = vld [vmem:[#allocation1 + $0xd8] sm:$0xff] }
 0x10f   :  { %1632 = vst.msk [vmem:[#allocation1 + $0x2b0] sm:$0xff] %vm427_vm0, %v1628_v4  ;;  %v2034_v4 = vld [vmem:[#allocation1 + $0xe8] sm:$0xff] }
 0x110   :  { %1637 = vst [vmem:[#allocation1 + $0x2b8] sm:$0xff] %v1636_v6  ;;  %v2038_v6 = vld [vmem:[#allocation1 + $0xf8] sm:$0xff] }
 0x111   :  { %1645 = vst.msk [vmem:[#allocation1 + $0x2b8] sm:$0xff] %vm427_vm0, %v1641_v8  ;;  %v2042_v8 = vld [vmem:[#allocation1 + $0x108] sm:$0xff] }
 0x112   :  { %1652 = vst [vmem:[#allocation1 + $0x2c0] sm:$0xff] %v1651_v10  ;;  %v2046_v10 = vld [vmem:[#allocation1 + $0x118] sm:$0xff] }
 0x113   :  { %1660 = vst.msk [vmem:[#allocation1 + $0x2c0] sm:$0xff] %vm427_vm0, %v1656_v12  ;;  %v2050_v12 = vld [vmem:[#allocation1 + $0x128] sm:$0xff] }
 0x114   :  { %1665 = vst [vmem:[#allocation1 + $0x2c8] sm:$0xff] %v1664_v14  ;;  %v2054_v14 = vld [vmem:[#allocation1 + $0x138] sm:$0xff] }
 0x115   :  { %1673 = vst.msk [vmem:[#allocation1 + $0x2c8] sm:$0xff] %vm427_vm0, %v1669_v16  ;;  %v2058_v16 = vld [vmem:[#allocation1 + $0x148] sm:$0xff] }
 0x116   :  { %1680 = vst [vmem:[#allocation1 + $0x2d0] sm:$0xff] %v1679_v18  ;;  %v2062_v18 = vld [vmem:[#allocation1 + $0x158] sm:$0xff] }
 0x117   :  { %1688 = vst.msk [vmem:[#allocation1 + $0x2d0] sm:$0xff] %vm427_vm0, %v1684_v20  ;;  %v2066_v20 = vld [vmem:[#allocation1 + $0x168] sm:$0xff] }
 0x118   :  { %1693 = vst [vmem:[#allocation1 + $0x2d8] sm:$0xff] %v1692_v22  ;;  %v2070_v22 = vld [vmem:[#allocation1 + $0x178] sm:$0xff] }
 0x119   :  { %1701 = vst.msk [vmem:[#allocation1 + $0x2d8] sm:$0xff] %vm427_vm0, %v1697_v24  ;;  %v2074_v24 = vld [vmem:[#allocation1 + $0x188] sm:$0xff] }
 0x11a   :  { %1708 = vst [vmem:[#allocation1 + $0x2e0] sm:$0xff] %v1707_v26  ;;  %v2078_v26 = vld [vmem:[#allocation1 + $0x198] sm:$0xff] }
 0x11b   :  { %1716 = vst.msk [vmem:[#allocation1 + $0x2e0] sm:$0xff] %vm427_vm0, %v1712_v28  ;;  %v2082_v28 = vld [vmem:[#allocation1 + $0x1a8] sm:$0xff] }
 0x11c   :  { %1721 = vst [vmem:[#allocation1 + $0x2e8] sm:$0xff] %v1720_v30  ;;  %v2086_v30 = vld [vmem:[#allocation1 + $0x1b8] sm:$0xff] }
 0x11d   :  { %1729 = vst.msk [vmem:[#allocation1 + $0x2e8] sm:$0xff] %vm427_vm0, %v1725_v32  ;;  %v2090_v32 = vld [vmem:[#allocation1 + $0x1c8] sm:$0xff] }
 0x11e   :  { %1736 = vst [vmem:[#allocation1 + $0x2f0] sm:$0xff] %v1735_v35  ;;  %v2094_v35 = vld [vmem:[#allocation1 + $0x1d8] sm:$0xff] }
 0x11f   :  { %1744 = vst.msk [vmem:[#allocation1 + $0x2f0] sm:$0xff] %vm427_vm0, %v1740_v37  ;;  %v2098_v37 = vld [vmem:[#allocation1 + $0x1e8] sm:$0xff] }
 0x120   :  { %1749 = vst [vmem:[#allocation1 + $0x2f8] sm:$0xff] %v1748_v38  ;;  %v2100_v38 = vld [vmem:[#allocation1 + $0x1f0] sm:$0xff] }
 0x121   :  { %1757 = vst.msk [vmem:[#allocation1 + $0x2f8] sm:$0xff] %vm427_vm0, %v1753_v39  ;;  %v2102_v39 = vld [vmem:[#allocation1 + $0x1f8] sm:$0xff] }
 0x122   :  { %1977 = vst [vmem:[%s3340_s1] sm:$0xff] %v1976_v40  ;;  %v2104_v40 = vld [vmem:[#allocation1 + $0x200] sm:$0xff] }
 0x123   :  { %1979 = vst [vmem:[%s3340_s1 + $0x8] sm:$0xff] %v1978_v41  ;;  %v2106_v41 = vld [vmem:[#allocation1 + $0x208] sm:$0xff] }
 0x124   :  { %1981 = vst [vmem:[%s3340_s1 + $0x10] sm:$0xff] %v1980_v33  ;;  %v2108_v33 = vld [vmem:[#allocation1 + $0x210] sm:$0xff] }
 0x125   :  { %1983 = vst [vmem:[%s3340_s1 + $0x18] sm:$0xff] %v1982_v42  ;;  %v2110_v42 = vld [vmem:[#allocation1 + $0x218] sm:$0xff] }
 0x126   :  { %1985 = vst [vmem:[%s3340_s1 + $0x20] sm:$0xff] %v1984_v43  ;;  %v2112_v43 = vld [vmem:[#allocation1 + $0x220] sm:$0xff] }
 0x127   :  { %1987 = vst [vmem:[%s3340_s1 + $0x28] sm:$0xff] %v1986_v44  ;;  %v2114_v44 = vld [vmem:[#allocation1 + $0x228] sm:$0xff] }
 0x128   :  { %1989 = vst [vmem:[%s3340_s1 + $0x30] sm:$0xff] %v1988_v45  ;;  %v2116_v45 = vld [vmem:[#allocation1 + $0x230] sm:$0xff] }
 0x129   :  { %1991 = vst [vmem:[%s3340_s1 + $0x38] sm:$0xff] %v1990_v46  ;;  %v2118_v46 = vld [vmem:[#allocation1 + $0x238] sm:$0xff] }
 0x12a   :  { %1993 = vst [vmem:[%s3340_s1 + $0x40] sm:$0xff] %v1992_v47  ;;  %v2120_v47 = vld [vmem:[#allocation1 + $0x240] sm:$0xff] }
 0x12b   :  { %1995 = vst [vmem:[%s3340_s1 + $0x48] sm:$0xff] %v1994_v48  ;;  %v2122_v48 = vld [vmem:[#allocation1 + $0x248] sm:$0xff] }
 0x12c   :  { %1997 = vst [vmem:[%s3340_s1 + $0x50] sm:$0xff] %v1996_v49  ;;  %v2124_v49 = vld [vmem:[#allocation1 + $0x250] sm:$0xff] }
 0x12d   :  { %1999 = vst [vmem:[%s3340_s1 + $0x58] sm:$0xff] %v1998_v50  ;;  %v2126_v50 = vld [vmem:[#allocation1 + $0x258] sm:$0xff] }
 0x12e   :  { %2001 = vst [vmem:[%s3340_s1 + $0x60] sm:$0xff] %v2000_v51  ;;  %v2128_v51 = vld [vmem:[#allocation1 + $0x260] sm:$0xff] }
 0x12f   :  { %2003 = vst [vmem:[%s3340_s1 + $0x68] sm:$0xff] %v2002_v52  ;;  %v2130_v52 = vld [vmem:[#allocation1 + $0x268] sm:$0xff] }
 0x130   :  { %2005 = vst [vmem:[%s3340_s1 + $0x70] sm:$0xff] %v2004_v53  ;;  %v2132_v53 = vld [vmem:[#allocation1 + $0x270] sm:$0xff] }
 0x131   :  { %2007 = vst [vmem:[%s3340_s1 + $0x78] sm:$0xff] %v2006_v54  ;;  %v2134_v54 = vld [vmem:[#allocation1 + $0x278] sm:$0xff] }
 0x132   :  { %2009 = vst [vmem:[%s3340_s1 + $0x80] sm:$0xff] %v2008_v55  ;;  %v2136_v55 = vld [vmem:[#allocation1 + $0x280] sm:$0xff] }
 0x133   :  { %2011 = vst [vmem:[%s3340_s1 + $0x88] sm:$0xff] %v2010_v56  ;;  %v2138_v56 = vld [vmem:[#allocation1 + $0x288] sm:$0xff] }
 0x134   :  { %2013 = vst [vmem:[%s3340_s1 + $0x90] sm:$0xff] %v2012_v57  ;;  %v2140_v57 = vld [vmem:[#allocation1 + $0x290] sm:$0xff] }
 0x135   :  { %2015 = vst [vmem:[%s3340_s1 + $0x98] sm:$0xff] %v2014_v58  ;;  %v2142_v58 = vld [vmem:[#allocation1 + $0x298] sm:$0xff] }
 0x136   :  { %2017 = vst [vmem:[%s3340_s1 + $0xa0] sm:$0xff] %v2016_v59  ;;  %v2144_v59 = vld [vmem:[#allocation1 + $0x2a0] sm:$0xff] }
 0x137   :  { %2019 = vst [vmem:[%s3340_s1 + $0xa8] sm:$0xff] %v2018_v60  ;;  %v2146_v60 = vld [vmem:[#allocation1 + $0x2a8] sm:$0xff] }
 0x138   :  { %2021 = vst [vmem:[%s3340_s1 + $0xb0] sm:$0xff] %v2020_v61  ;;  %v2148_v61 = vld [vmem:[#allocation1 + $0x2b0] sm:$0xff] }
 0x139   :  { %2023 = vst [vmem:[%s3340_s1 + $0xb8] sm:$0xff] %v2022_v62  ;;  %v2150_v62 = vld [vmem:[#allocation1 + $0x2b8] sm:$0xff] }
 0x13a   :  { %2025 = vst [vmem:[%s3340_s1 + $0xc0] sm:$0xff] %v2024_v63  ;;  %v2152_v63 = vld [vmem:[#allocation1 + $0x2c0] sm:$0xff] }
 0x13b   :  { %2027 = vst [vmem:[%s3340_s1 + $0xc8] sm:$0xff] %v2026_v0  ;;  %v2154_v0 = vld [vmem:[#allocation1 + $0x2c8] sm:$0xff] }
 0x13c   :  { %2029 = vst [vmem:[%s3340_s1 + $0xd0] sm:$0xff] %v2028_v1  ;;  %v2156_v1 = vld [vmem:[#allocation1 + $0x2d0] sm:$0xff] }
 0x13d   :  { %2031 = vst [vmem:[%s3340_s1 + $0xd8] sm:$0xff] %v2030_v2  ;;  %v2158_v2 = vld [vmem:[#allocation1 + $0x2d8] sm:$0xff] }
 0x13e   :  { %2033 = vst [vmem:[%s3340_s1 + $0xe0] sm:$0xff] %v2032_v3  ;;  %v2160_v3 = vld [vmem:[#allocation1 + $0x2e0] sm:$0xff] }
 0x13f   :  { %2035 = vst [vmem:[%s3340_s1 + $0xe8] sm:$0xff] %v2034_v4  ;;  %v2162_v4 = vld [vmem:[#allocation1 + $0x2e8] sm:$0xff] }
 0x140   :  { %2037 = vst [vmem:[%s3340_s1 + $0xf0] sm:$0xff] %v2036_v5  ;;  %v2164_v5 = vld [vmem:[#allocation1 + $0x2f0] sm:$0xff] }
 0x141   :  { %2039 = vst [vmem:[%s3340_s1 + $0xf8] sm:$0xff] %v2038_v6  ;;  %v2166_v6 = vld [vmem:[#allocation1 + $0x2f8] sm:$0xff] }
 0x142   :  { %2041 = vst [vmem:[%s3340_s1 + $0x100] sm:$0xff] %v2040_v7 }
 0x143   :  { %2043 = vst [vmem:[%s3340_s1 + $0x108] sm:$0xff] %v2042_v8 }
 0x144   :  { %2045 = vst [vmem:[%s3340_s1 + $0x110] sm:$0xff] %v2044_v9 }
 0x145   :  { %2047 = vst [vmem:[%s3340_s1 + $0x118] sm:$0xff] %v2046_v10 }
 0x146   :  { %2049 = vst [vmem:[%s3340_s1 + $0x120] sm:$0xff] %v2048_v11 }
 0x147   :  { %2051 = vst [vmem:[%s3340_s1 + $0x128] sm:$0xff] %v2050_v12 }
 0x148   :  { %2053 = vst [vmem:[%s3340_s1 + $0x130] sm:$0xff] %v2052_v13 }
 0x149   :  { %2055 = vst [vmem:[%s3340_s1 + $0x138] sm:$0xff] %v2054_v14 }
 0x14a   :  { %2057 = vst [vmem:[%s3340_s1 + $0x140] sm:$0xff] %v2056_v15 }
 0x14b   :  { %2059 = vst [vmem:[%s3340_s1 + $0x148] sm:$0xff] %v2058_v16 }
 0x14c   :  { %2061 = vst [vmem:[%s3340_s1 + $0x150] sm:$0xff] %v2060_v17 }
 0x14d   :  { %2063 = vst [vmem:[%s3340_s1 + $0x158] sm:$0xff] %v2062_v18 }
 0x14e   :  { %2065 = vst [vmem:[%s3340_s1 + $0x160] sm:$0xff] %v2064_v19 }
 0x14f   :  { %2067 = vst [vmem:[%s3340_s1 + $0x168] sm:$0xff] %v2066_v20 }
 0x150   :  { %2069 = vst [vmem:[%s3340_s1 + $0x170] sm:$0xff] %v2068_v21 }
 0x151   :  { %2071 = vst [vmem:[%s3340_s1 + $0x178] sm:$0xff] %v2070_v22 }
 0x152   :  { %2073 = vst [vmem:[%s3340_s1 + $0x180] sm:$0xff] %v2072_v23 }
 0x153   :  { %2075 = vst [vmem:[%s3340_s1 + $0x188] sm:$0xff] %v2074_v24 }
 0x154   :  { %2077 = vst [vmem:[%s3340_s1 + $0x190] sm:$0xff] %v2076_v25 }
 0x155   :  { %2079 = vst [vmem:[%s3340_s1 + $0x198] sm:$0xff] %v2078_v26 }
 0x156   :  { %2081 = vst [vmem:[%s3340_s1 + $0x1a0] sm:$0xff] %v2080_v27 }
 0x157   :  { %2083 = vst [vmem:[%s3340_s1 + $0x1a8] sm:$0xff] %v2082_v28 }
 0x158   :  { %2085 = vst [vmem:[%s3340_s1 + $0x1b0] sm:$0xff] %v2084_v29 }
 0x159   :  { %2087 = vst [vmem:[%s3340_s1 + $0x1b8] sm:$0xff] %v2086_v30 }
 0x15a   :  { %2089 = vst [vmem:[%s3340_s1 + $0x1c0] sm:$0xff] %v2088_v31 }
 0x15b   :  { %2091 = vst [vmem:[%s3340_s1 + $0x1c8] sm:$0xff] %v2090_v32 }
 0x15c   :  { %2093 = vst [vmem:[%s3340_s1 + $0x1d0] sm:$0xff] %v2092_v34 }
 0x15d   :  { %2095 = vst [vmem:[%s3340_s1 + $0x1d8] sm:$0xff] %v2094_v35 }
 0x15e   :  { %2097 = vst [vmem:[%s3340_s1 + $0x1e0] sm:$0xff] %v2096_v36 }
 0x15f   :  { %2099 = vst [vmem:[%s3340_s1 + $0x1e8] sm:$0xff] %v2098_v37 }
 0x160   :  { %2101 = vst [vmem:[%s3340_s1 + $0x1f0] sm:$0xff] %v2100_v38 }
 0x161   :  { %2103 = vst [vmem:[%s3340_s1 + $0x1f8] sm:$0xff] %v2102_v39 }
 0x162   :  { %2105 = vst [vmem:[%s3340_s1 + $0x200] sm:$0xff] %v2104_v40 }
 0x163   :  { %2107 = vst [vmem:[%s3340_s1 + $0x208] sm:$0xff] %v2106_v41 }
 0x164   :  { %2109 = vst [vmem:[%s3340_s1 + $0x210] sm:$0xff] %v2108_v33 }
 0x165   :  { %2111 = vst [vmem:[%s3340_s1 + $0x218] sm:$0xff] %v2110_v42 }
 0x166   :  { %2113 = vst [vmem:[%s3340_s1 + $0x220] sm:$0xff] %v2112_v43 }
 0x167   :  { %2115 = vst [vmem:[%s3340_s1 + $0x228] sm:$0xff] %v2114_v44 }
 0x168   :  { %2117 = vst [vmem:[%s3340_s1 + $0x230] sm:$0xff] %v2116_v45 }
 0x169   :  { %2119 = vst [vmem:[%s3340_s1 + $0x238] sm:$0xff] %v2118_v46 }
 0x16a   :  { %2121 = vst [vmem:[%s3340_s1 + $0x240] sm:$0xff] %v2120_v47 }
 0x16b   :  { %2123 = vst [vmem:[%s3340_s1 + $0x248] sm:$0xff] %v2122_v48 }
 0x16c   :  { %2125 = vst [vmem:[%s3340_s1 + $0x250] sm:$0xff] %v2124_v49 }
 0x16d   :  { %2127 = vst [vmem:[%s3340_s1 + $0x258] sm:$0xff] %v2126_v50 }
 0x16e   :  { %2129 = vst [vmem:[%s3340_s1 + $0x260] sm:$0xff] %v2128_v51 }
 0x16f   :  { %2131 = vst [vmem:[%s3340_s1 + $0x268] sm:$0xff] %v2130_v52 }
 0x170   :  { %2133 = vst [vmem:[%s3340_s1 + $0x270] sm:$0xff] %v2132_v53 }
 0x171   :  { %2135 = vst [vmem:[%s3340_s1 + $0x278] sm:$0xff] %v2134_v54 }
 0x172   :  { %2137 = vst [vmem:[%s3340_s1 + $0x280] sm:$0xff] %v2136_v55 }
 0x173   :  { %2139 = vst [vmem:[%s3340_s1 + $0x288] sm:$0xff] %v2138_v56 }
 0x174   :  { %2141 = vst [vmem:[%s3340_s1 + $0x290] sm:$0xff] %v2140_v57 }
 0x175   :  { %2143 = vst [vmem:[%s3340_s1 + $0x298] sm:$0xff] %v2142_v58 }
 0x176   :  { %2145 = vst [vmem:[%s3340_s1 + $0x2a0] sm:$0xff] %v2144_v59 }
 0x177   :  { %2147 = vst [vmem:[%s3340_s1 + $0x2a8] sm:$0xff] %v2146_v60 }
 0x178   :  { %2149 = vst [vmem:[%s3340_s1 + $0x2b0] sm:$0xff] %v2148_v61 }
 0x179   :  { %2151 = vst [vmem:[%s3340_s1 + $0x2b8] sm:$0xff] %v2150_v62 }
 0x17a   :  { %2153 = vst [vmem:[%s3340_s1 + $0x2c0] sm:$0xff] %v2152_v63 }
 0x17b   :  { %2155 = vst [vmem:[%s3340_s1 + $0x2c8] sm:$0xff] %v2154_v0 }
 0x17c   :  { %2157 = vst [vmem:[%s3340_s1 + $0x2d0] sm:$0xff] %v2156_v1 }
 0x17d   :  { %2159 = vst [vmem:[%s3340_s1 + $0x2d8] sm:$0xff] %v2158_v2 }
 0x17e   :  { %2161 = vst [vmem:[%s3340_s1 + $0x2e0] sm:$0xff] %v2160_v3 }
 0x17f   :  { %2163 = vst [vmem:[%s3340_s1 + $0x2e8] sm:$0xff] %v2162_v4 }
 0x180   :  { %2165 = vst [vmem:[%s3340_s1 + $0x2f0] sm:$0xff] %v2164_v5 }
 0x181   :  { %2167 = vst [vmem:[%s3340_s1 + $0x2f8] sm:$0xff] %v2166_v6 }

// kernel: ffno_forward.10
= control target key start
LH: loop header
LB: loop body
LE: loop exit
PB: predicated region body
PF: predicated region fallthrough
CT: control target
= control target key end

     0   :  { %s1734_s1 = inlined_call_operand.vmem [shape: bf16[384,384], index: 1, kind: input, shape index: {}]   ;;  %s1735_s0 = inlined_call_operand.vmem [shape: f32[48,384], index: 0, kind: input, shape index: {}]   ;;  %s1736_s2 = inlined_call_operand.vmem [shape: f32[48,384], index: 2, kind: output, shape index: {}]  }
   0x1   :  { %v842_v0 = vld [vmem:[%s1734_s1 + $0xa8] sm:$0xf]  ;;  %v1066_v1 = vld [vmem:[%s1734_s1 + $0xb0] sm:$0xf0]  ;;  %v1065_v5 = vld [vmem:[%s1734_s1 + $0xac] sm:$0xf] }
   0x2   :  { %v1034_v2 = vld [vmem:[%s1734_s1 + $0x228] sm:$0xf]  ;;  %v843_v3 = vor.u32 %v1066_v1, %v842_v0  ;;  %v1114_v4 = vld [vmem:[%s1734_s1 + $0x230] sm:$0xf0]  ;;  %v844_v6 = vld [vmem:[%s1734_s1 + $0xb4] sm:$0xf0] }
   0x3   :  { %v1035_v7 = vor.u32 %v1114_v4, %v1034_v2  ;;  %v847_v8 = vor.u32 %v1065_v5, %v844_v6  ;;  %v830_v9 = vld [vmem:[%s1734_s1 + $0x90] sm:$0xf]  ;;  %v1063_v10 = vld [vmem:[%s1734_s1 + $0x98] sm:$0xf0]  ;;  %v1062_v14 = vld [vmem:[%s1734_s1 + $0x94] sm:$0xf] }
   0x4   :  { %v1022_v11 = vld [vmem:[%s1734_s1 + $0x210] sm:$0xf]  ;;  %518 = vmatpush.bf16.msra.mxu0 %v843_v3  ;;  %1116 = vmatpush.bf16.msra.mxu1 %v843_v3  ;;  %v831_v12 = vor.u32 %v1063_v10, %v830_v9  ;;  %v1111_v13 = vld [vmem:[%s1734_s1 + $0x218] sm:$0xf0]  ;;  %v832_v15 = vld [vmem:[%s1734_s1 + $0x9c] sm:$0xf0] }
   0x5   :  { %566 = vmatpush.bf16.msra.mxu2 %v1035_v7  ;;  %590 = vmatpush.bf16.msra.mxu3 %v847_v8  ;;  %v1023_v16 = vor.u32 %v1111_v13, %v1022_v11  ;;  %v835_v17 = vor.u32 %v1062_v14, %v832_v15  ;;  %v818_v18 = vld [vmem:[%s1734_s1 + $0x78] sm:$0xf]  ;;  %v1060_v19 = vld [vmem:[%s1734_s1 + $0x80] sm:$0xf0]  ;;  %v1059_v22 = vld [vmem:[%s1734_s1 + $0x7c] sm:$0xf] }
   0x6   :  { %v1010_v20 = vld [vmem:[%s1734_s1 + $0x1f8] sm:$0xf]  ;;  %v1108_v21 = vld [vmem:[%s1734_s1 + $0x200] sm:$0xf0]  ;;  %v820_v23 = vld [vmem:[%s1734_s1 + $0x84] sm:$0xf0]  ;;  %v819_v24 = vor.u32 %v1060_v19, %v818_v18 }
   0x7   :  { %v1011_v25 = vor.u32 %v1108_v21, %v1010_v20  ;;  %v823_v26 = vor.u32 %v1059_v22, %v820_v23  ;;  %v806_v27 = vld [vmem:[%s1734_s1 + $0x60] sm:$0xf]  ;;  %v1057_v28 = vld [vmem:[%s1734_s1 + $0x68] sm:$0xf0]  ;;  %v1056_v31 = vld [vmem:[%s1734_s1 + $0x64] sm:$0xf] }
   0x8   :  { %519 = vmatpush.bf16.msra.mxu0 %v831_v12  ;;  %1117 = vmatpush.bf16.msra.mxu1 %v831_v12  ;;  %v998_v29 = vld [vmem:[%s1734_s1 + $0x1e0] sm:$0xf]  ;;  %v1105_v30 = vld [vmem:[%s1734_s1 + $0x1e8] sm:$0xf0]  ;;  %v808_v32 = vld [vmem:[%s1734_s1 + $0x6c] sm:$0xf0]  ;;  %v807_v33 = vor.u32 %v1057_v28, %v806_v27 }
   0x9   :  { %567 = vmatpush.bf16.msra.mxu2 %v1023_v16  ;;  %591 = vmatpush.bf16.msra.mxu3 %v835_v17  ;;  %v999_v34 = vor.u32 %v1105_v30, %v998_v29  ;;  %v811_v35 = vor.u32 %v1056_v31, %v808_v32  ;;  %v794_v36 = vld [vmem:[%s1734_s1 + $0x48] sm:$0xf]  ;;  %v1054_v37 = vld [vmem:[%s1734_s1 + $0x50] sm:$0xf0]  ;;  %v1053_v40 = vld [vmem:[%s1734_s1 + $0x4c] sm:$0xf] }
   0xa   :  { %v986_v38 = vld [vmem:[%s1734_s1 + $0x1c8] sm:$0xf]  ;;  %v1102_v39 = vld [vmem:[%s1734_s1 + $0x1d0] sm:$0xf0]  ;;  %v796_v41 = vld [vmem:[%s1734_s1 + $0x54] sm:$0xf0]  ;;  %v795_v42 = vor.u32 %v1054_v37, %v794_v36 }
   0xb   :  { %v987_v43 = vor.u32 %v1102_v39, %v986_v38  ;;  %v799_v44 = vor.u32 %v1053_v40, %v796_v41  ;;  %v782_v45 = vld [vmem:[%s1734_s1 + $0x30] sm:$0xf]  ;;  %v1051_v46 = vld [vmem:[%s1734_s1 + $0x38] sm:$0xf0]  ;;  %v1050_v49 = vld [vmem:[%s1734_s1 + $0x34] sm:$0xf] }
   0xc   :  { %520 = vmatpush.bf16.msra.mxu0 %v819_v24  ;;  %1118 = vmatpush.bf16.msra.mxu1 %v819_v24  ;;  %v974_v47 = vld [vmem:[%s1734_s1 + $0x1b0] sm:$0xf]  ;;  %v1099_v48 = vld [vmem:[%s1734_s1 + $0x1b8] sm:$0xf0]  ;;  %v784_v50 = vld [vmem:[%s1734_s1 + $0x3c] sm:$0xf0]  ;;  %v783_v51 = vor.u32 %v1051_v46, %v782_v45 }
   0xd   :  { %568 = vmatpush.bf16.msra.mxu2 %v1011_v25  ;;  %592 = vmatpush.bf16.msra.mxu3 %v823_v26  ;;  %v975_v52 = vor.u32 %v1099_v48, %v974_v47  ;;  %v787_v53 = vor.u32 %v1050_v49, %v784_v50  ;;  %v770_v54 = vld [vmem:[%s1734_s1 + $0x18] sm:$0xf]  ;;  %v1048_v55 = vld [vmem:[%s1734_s1 + $0x20] sm:$0xf0]  ;;  %v1047_v58 = vld [vmem:[%s1734_s1 + $0x1c] sm:$0xf] }
   0xe   :  { %v962_v56 = vld [vmem:[%s1734_s1 + $0x198] sm:$0xf]  ;;  %v1096_v57 = vld [vmem:[%s1734_s1 + $0x1a0] sm:$0xf0]  ;;  %v772_v59 = vld [vmem:[%s1734_s1 + $0x24] sm:$0xf0]  ;;  %v771_v60 = vor.u32 %v1048_v55, %v770_v54 }
   0xf   :  { %v758_v61 = vld [vmem:[%s1734_s1] sm:$0xf]  ;;  %v1045_v62 = vld [vmem:[%s1734_s1 + $0x8] sm:$0xf0]  ;;  %v963_v0 = vor.u32 %v1096_v57, %v962_v56  ;;  %v775_v1 = vor.u32 %v1047_v58, %v772_v59  ;;  %v1044_v3 = vld [vmem:[%s1734_s1 + $0x4] sm:$0xf] }
  0x10   :  { %521 = vmatpush.bf16.msra.mxu0 %v807_v33  ;;  %1119 = vmatpush.bf16.msra.mxu1 %v807_v33  ;;  %v950_v63 = vld [vmem:[%s1734_s1 + $0x180] sm:$0xf]  ;;  %v1093_v2 = vld [vmem:[%s1734_s1 + $0x188] sm:$0xf0]  ;;  %v760_v4 = vld [vmem:[%s1734_s1 + $0xc] sm:$0xf0]  ;;  %v759_v11 = vor.u32 %v1045_v62, %v758_v61 }
  0x11   :  { %569 = vmatpush.bf16.msra.mxu2 %v999_v34  ;;  %593 = vmatpush.bf16.msra.mxu3 %v811_v35  ;;  %v938_v5 = vld [vmem:[%s1734_s1 + $0x168] sm:$0xf]  ;;  %v1090_v6 = vld [vmem:[%s1734_s1 + $0x170] sm:$0xf0]  ;;  %v11_v7 = vld [vmem:[%s1735_s0] sm:$0xff]  ;;  %v951_v15 = vor.u32 %v1093_v2, %v950_v63  ;;  %v763_v16 = vor.u32 %v1044_v3, %v760_v4 }
  0x12   :  { %v14_v8 = vld [vmem:[%s1735_s0 + $0x18] sm:$0xff]  ;;  %v1089_v9 = vld [vmem:[%s1734_s1 + $0x16c] sm:$0xf]  ;;  %v13_v12 = vld [vmem:[%s1735_s0 + $0x10] sm:$0xff]  ;;  %v939_v20 = vor.u32 %v1090_v6, %v938_v5 }
  0x13   :  { %v940_v10 = vld [vmem:[%s1734_s1 + $0x174] sm:$0xf0]  ;;  %v23_v13 = vld [vmem:[%s1735_s0 + $0x60] sm:$0xff]  ;;  %v16_v17 = vld [vmem:[%s1735_s0 + $0x28] sm:$0xff]  ;;  %v1336_v25 = vpack.c.bf16 %v14_v8, %v11_v7 }
  0x14   :  { %522 = vmatpush.bf16.msra.mxu0 %v795_v42  ;;  %1120 = vmatpush.bf16.msra.mxu1 %v795_v42  ;;  %v26_v14 = vld [vmem:[%s1735_s0 + $0x78] sm:$0xff]  ;;  %v926_v18 = vld [vmem:[%s1734_s1 + $0x150] sm:$0xf]  ;;  %v943_v21 = vor.u32 %v1089_v9, %v940_v10  ;;  %v1086_v28 = vld [vmem:[%s1734_s1 + $0x154] sm:$0xf]  ;;  %v1349_v30 = vpack.c.bf16 %v16_v17, %v13_v12 }
  0x15   :  { %570 = vmatpush.bf16.msra.mxu2 %v987_v43  ;;  %594 = vmatpush.bf16.msra.mxu3 %v799_v44  ;;  %v850_v19 = vld [vmem:[%s1734_s1 + $0xb0] sm:$0xf]  ;;  %v1067_v22 = vld [vmem:[%s1734_s1 + $0xb8] sm:$0xf0]  ;;  %v1341_v27 = vpack.c.bf16 %v26_v14, %v23_v13  ;;  %v928_v29 = vld [vmem:[%s1734_s1 + $0x15c] sm:$0xf0] }
  0x16   :  { %v946_v23 = vld [vmem:[%s1734_s1 + $0x170] sm:$0xf]  ;;  %v1091_v24 = vld [vmem:[%s1734_s1 + $0x178] sm:$0xf0]  ;;  %v914_v31 = vld [vmem:[%s1734_s1 + $0x138] sm:$0xf]  ;;  %v851_v32 = vor.u32 %v1067_v22, %v850_v19  ;;  %v931_v36 = vor.u32 %v1086_v28, %v928_v29 }
  0x17   :  { %v1087_v26 = vld [vmem:[%s1734_s1 + $0x158] sm:$0xf0]  ;;  %v838_v33 = vld [vmem:[%s1734_s1 + $0x98] sm:$0xf]  ;;  %v947_v34 = vor.u32 %v1091_v24, %v946_v23  ;;  %v1064_v37 = vld [vmem:[%s1734_s1 + $0xa0] sm:$0xf0] }
  0x18   :  { %523 = vmatpush.bf16.msra.mxu0 %v783_v51  ;;  %1121 = vmatpush.bf16.msra.mxu1 %v783_v51  ;;  %v927_v35 = vor.u32 %v1087_v26, %v926_v18  ;;  %v934_v38 = vld [vmem:[%s1734_s1 + $0x158] sm:$0xf]  ;;  %v1088_v39 = vld [vmem:[%s1734_s1 + $0x160] sm:$0xf0]  ;;  %v1083_v41 = vld [vmem:[%s1734_s1 + $0x13c] sm:$0xf]  ;;  %v839_v44 = vor.u32 %v1064_v37, %v838_v33 }
  0x19   :  { %571 = vmatpush.bf16.msra.mxu2 %v975_v52  ;;  %595 = vmatpush.bf16.msra.mxu3 %v787_v53  ;;  %v1084_v40 = vld [vmem:[%s1734_s1 + $0x140] sm:$0xf0]  ;;  %v916_v42 = vld [vmem:[%s1734_s1 + $0x144] sm:$0xf0]  ;;  %v902_v43 = vld [vmem:[%s1734_s1 + $0x120] sm:$0xf]  ;;  %v935_v46 = vor.u32 %v1088_v39, %v934_v38 }
  0x1a   :  { %v826_v45 = vld [vmem:[%s1734_s1 + $0x80] sm:$0xf]  ;;  %v915_v47 = vor.u32 %v1084_v40, %v914_v31  ;;  %v919_v48 = vor.u32 %v1083_v41, %v916_v42  ;;  %v1061_v49 = vld [vmem:[%s1734_s1 + $0x88] sm:$0xf0]  ;;  %v1080_v53 = vld [vmem:[%s1734_s1 + $0x124] sm:$0xf] }
  0x1b   :  { %v922_v50 = vld [vmem:[%s1734_s1 + $0x140] sm:$0xf]  ;;  %v1085_v51 = vld [vmem:[%s1734_s1 + $0x148] sm:$0xf0]  ;;  %v904_v54 = vld [vmem:[%s1734_s1 + $0x12c] sm:$0xf0]  ;;  %v827_v56 = vor.u32 %v1061_v49, %v826_v45 }
  0x1c   :  { %524 = vmatpush.bf16.msra.mxu0 %v771_v60  ;;  %1122 = vmatpush.bf16.msra.mxu1 %v771_v60  ;;  %v1081_v52 = vld [vmem:[%s1734_s1 + $0x128] sm:$0xf0]  ;;  %v890_v55 = vld [vmem:[%s1734_s1 + $0x108] sm:$0xf]  ;;  %v923_v58 = vor.u32 %v1085_v51, %v922_v50  ;;  %v907_v60 = vor.u32 %v1080_v53, %v904_v54  ;;  %v1058_v61 = vld [vmem:[%s1734_s1 + $0x70] sm:$0xf0] }
  0x1d   :  { %572 = vmatpush.bf16.msra.mxu2 %v963_v0  ;;  %596 = vmatpush.bf16.msra.mxu3 %v775_v1  ;;  %v814_v57 = vld [vmem:[%s1734_s1 + $0x68] sm:$0xf]  ;;  %v903_v59 = vor.u32 %v1081_v52, %v902_v43  ;;  %v1082_v63 = vld [vmem:[%s1734_s1 + $0x130] sm:$0xf0]  ;;  %v1077_v1 = vld [vmem:[%s1734_s1 + $0x10c] sm:$0xf] }
  0x1e   :  { %v910_v62 = vld [vmem:[%s1734_s1 + $0x128] sm:$0xf]  ;;  %v1078_v0 = vld [vmem:[%s1734_s1 + $0x110] sm:$0xf0]  ;;  %v892_v2 = vld [vmem:[%s1734_s1 + $0x114] sm:$0xf0]  ;;  %v815_v8 = vor.u32 %v1058_v61, %v814_v57 }
  0x1f   :  { %v17_v3 = vld [vmem:[%s1735_s0 + $0x30] sm:$0xff]  ;;  %v20_v4 = vld [vmem:[%s1735_s0 + $0x48] sm:$0xff]  ;;  %v19_v5 = vld [vmem:[%s1735_s0 + $0x40] sm:$0xff]  ;;  %v911_v9 = vor.u32 %v1082_v63, %v910_v62  ;;  %v895_v12 = vor.u32 %v1077_v1, %v892_v2 }
  0x20   :  { %525 = vmatpush.bf16.msra.mxu0 %v759_v11  ;;  %1123 = vmatpush.bf16.msra.mxu1 %v759_v11  ;;  %v22_v6 = vld [vmem:[%s1735_s0 + $0x58] sm:$0xff]  ;;  %v878_v7 = vld [vmem:[%s1734_s1 + $0xf0] sm:$0xf]  ;;  %v891_v11 = vor.u32 %v1078_v0, %v890_v55  ;;  %v1074_v18 = vld [vmem:[%s1734_s1 + $0xf4] sm:$0xf] }
  0x21   :  { %573 = vmatpush.bf16.msra.mxu2 %v951_v15  ;;  %597 = vmatpush.bf16.msra.mxu3 %v763_v16  ;;  %v802_v10 = vld [vmem:[%s1734_s1 + $0x50] sm:$0xf]  ;;  %v1055_v13 = vld [vmem:[%s1734_s1 + $0x58] sm:$0xf0]  ;;  %v1454_v16 = vpack.c.bf16 %v20_v4, %v17_v3  ;;  %v880_v19 = vld [vmem:[%s1734_s1 + $0xfc] sm:$0xf0] }
  0x22   :  { %v898_v14 = vld [vmem:[%s1734_s1 + $0x110] sm:$0xf]  ;;  %v1079_v15 = vld [vmem:[%s1734_s1 + $0x118] sm:$0xf0]  ;;  %v803_v22 = vor.u32 %v1055_v13, %v802_v10  ;;  %v790_v24 = vld [vmem:[%s1734_s1 + $0x38] sm:$0xf]  ;;  %v883_v28 = vor.u32 %v1074_v18, %v880_v19 }
  0x23   :  { %526 = vmatmul.bf16.vlgmr.msra.gmra.mxu0 %v1336_v25  ;;  %536 = vmatmul.bf16.vlgmr.msra.gmra.mxu1 %v1341_v27  ;;  %v1075_v17 = vld [vmem:[%s1734_s1 + $0xf8] sm:$0xf0]  ;;  %v899_v23 = vor.u32 %v1079_v15, %v898_v14  ;;  %v1052_v29 = vld [vmem:[%s1734_s1 + $0x40] sm:$0xf0]  ;;  %v886_v31 = vld [vmem:[%s1734_s1 + $0xf8] sm:$0xf] }
  0x24   :  { %542 = vmatpush.bf16.msrb.mxu1 %v939_v20  ;;  %614 = vmatpush.bf16.msrb.mxu0 %v943_v21  ;;  %v1465_v20 = vpack.c.bf16 %v22_v6, %v19_v5  ;;  %v866_v21 = vld [vmem:[%s1734_s1 + $0xd8] sm:$0xf]  ;;  %v879_v26 = vor.u32 %v1075_v17, %v878_v7  ;;  %v1072_v33 = vld [vmem:[%s1734_s1 + $0xe0] sm:$0xf0]  ;;  %v1069_v37 = vld [vmem:[%s1734_s1 + $0xc8] sm:$0xf0]  ;;  %v791_v38 = vor.u32 %v1052_v29, %v790_v24 }
  0x25   :  { %574 = vmatmul.bf16.vlgmr.msra.gmra.mxu2 %v1349_v30  ;;  %598 = vmatmul.bf16.vlgmr.msra.gmra.mxu3 %v1336_v25  ;;  %v778_v40 = vld [vmem:[%s1734_s1 + $0x20] sm:$0xf]  ;;  %v867_v41 = vor.u32 %v1072_v33, %v866_v21  ;;  %v1049_v43 = vld [vmem:[%s1734_s1 + $0x28] sm:$0xf0]  ;;  %v1036_v49 = vld [vmem:[%s1734_s1 + $0x234] sm:$0xf0] }
  0x26   :  { %662 = vmatpush.bf16.msrb.mxu2 %v851_v32  ;;  %686 = vmatpush.bf16.msrb.mxu3 %v947_v34  ;;  %v1076_v32 = vld [vmem:[%s1734_s1 + $0x100] sm:$0xf0]  ;;  %v1071_v34 = vld [vmem:[%s1734_s1 + $0xdc] sm:$0xf]  ;;  %v1073_v45 = vld [vmem:[%s1734_s1 + $0xe8] sm:$0xf0]  ;;  %v779_v53 = vor.u32 %v1049_v43, %v778_v40 }
  0x27   :  { %v887_v39 = vor.u32 %v1076_v32, %v886_v31  ;;  %v1042_v50 = vld [vmem:[%s1734_s1 + $0x230] sm:$0xf]  ;;  %v1115_v51 = vld [vmem:[%s1734_s1 + $0x238] sm:$0xf0]  ;;  %v12_v52 = vld [vmem:[%s1735_s0 + $0x8] sm:$0xff] }
  0x28   :  { %543 = vmatpush.bf16.msrb.mxu1 %v927_v35  ;;  %615 = vmatpush.bf16.msrb.mxu0 %v931_v36  ;;  %v868_v35 = vld [vmem:[%s1734_s1 + $0xe4] sm:$0xf0]  ;;  %v854_v36 = vld [vmem:[%s1734_s1 + $0xc0] sm:$0xf]  ;;  %v1070_v62 = vld [vmem:[%s1734_s1 + $0xd0] sm:$0xf0]  ;;  %v1043_v63 = vor.u32 %v1115_v51, %v1042_v50 }
  0x29   :  { %v871_v42 = vor.u32 %v1071_v34, %v868_v35  ;;  %v855_v55 = vor.u32 %v1069_v37, %v854_v36  ;;  %v862_v61 = vld [vmem:[%s1734_s1 + $0xc8] sm:$0xf]  ;;  %v1110_v0 = vld [vmem:[%s1734_s1 + $0x214] sm:$0xf]  ;;  %v1024_v1 = vld [vmem:[%s1734_s1 + $0x21c] sm:$0xf0] }
  0x2a   :  { %663 = vmatpush.bf16.msrb.mxu2 %v839_v44  ;;  %687 = vmatpush.bf16.msrb.mxu3 %v935_v46  ;;  %v874_v44 = vld [vmem:[%s1734_s1 + $0xe0] sm:$0xf]  ;;  %v1068_v46 = vld [vmem:[%s1734_s1 + $0xc4] sm:$0xf]  ;;  %v25_v3 = vld [vmem:[%s1735_s0 + $0x70] sm:$0xff]  ;;  %v863_v6 = vor.u32 %v1070_v62, %v862_v61 }
  0x2b   :  { %v875_v54 = vor.u32 %v1073_v45, %v874_v44  ;;  %v28_v4 = vld [vmem:[%s1735_s0 + $0x88] sm:$0xff]  ;;  %v1030_v7 = vld [vmem:[%s1734_s1 + $0x218] sm:$0xf]  ;;  %v1018_v14 = vld [vmem:[%s1734_s1 + $0x200] sm:$0xf] }
  0x2c   :  { %544 = vmatpush.bf16.msrb.mxu1 %v915_v47  ;;  %616 = vmatpush.bf16.msrb.mxu0 %v919_v48  ;;  %v856_v47 = vld [vmem:[%s1734_s1 + $0xcc] sm:$0xf0]  ;;  %v1113_v48 = vld [vmem:[%s1734_s1 + $0x22c] sm:$0xf]  ;;  %v1568_v10 = vpack.c.bf16 %v28_v4, %v25_v3  ;;  %v1104_v18 = vld [vmem:[%s1734_s1 + $0x1e4] sm:$0xf] }
  0x2d   :  { %v859_v57 = vor.u32 %v1068_v46, %v856_v47  ;;  %v1109_v15 = vld [vmem:[%s1734_s1 + $0x208] sm:$0xf0]  ;;  %v1000_v19 = vld [vmem:[%s1734_s1 + $0x1ec] sm:$0xf0]  ;;  %v18_v29 = vld [vmem:[%s1735_s0 + $0x38] sm:$0xff] }
  0x2e   :  { %664 = vmatpush.bf16.msrb.mxu2 %v827_v56  ;;  %688 = vmatpush.bf16.msrb.mxu3 %v923_v58  ;;  %v15_v56 = vld [vmem:[%s1735_s0 + $0x20] sm:$0xff]  ;;  %v766_v58 = vld [vmem:[%s1734_s1 + $0x8] sm:$0xf]  ;;  %v1019_v21 = vor.u32 %v1109_v15, %v1018_v14  ;;  %v1003_v24 = vor.u32 %v1104_v18, %v1000_v19  ;;  %v21_v32 = vld [vmem:[%s1735_s0 + $0x50] sm:$0xff] }
  0x2f   :  { %v1554_v2 = vpack.c.bf16 %v15_v56, %v12_v52  ;;  %v994_v33 = vld [vmem:[%s1734_s1 + $0x1d0] sm:$0xf]  ;;  %v1103_v34 = vld [vmem:[%s1734_s1 + $0x1d8] sm:$0xf0]  ;;  %v1098_v36 = vld [vmem:[%s1734_s1 + $0x1b4] sm:$0xf] }
  0x30   :  { %545 = vmatpush.bf16.msrb.mxu1 %v903_v59  ;;  %617 = vmatpush.bf16.msrb.mxu0 %v907_v60  ;;  %v1046_v59 = vld [vmem:[%s1734_s1 + $0x10] sm:$0xf0]  ;;  %v1039_v60 = vor.u32 %v1113_v48, %v1036_v49  ;;  %v976_v37 = vld [vmem:[%s1734_s1 + $0x1bc] sm:$0xf0]  ;;  %v982_v40 = vld [vmem:[%s1734_s1 + $0x1b8] sm:$0xf] }
  0x31   :  { %v767_v5 = vor.u32 %v1046_v59, %v766_v58  ;;  %v1095_v43 = vld [vmem:[%s1734_s1 + $0x19c] sm:$0xf]  ;;  %v964_v44 = vld [vmem:[%s1734_s1 + $0x1a4] sm:$0xf0]  ;;  %v970_v46 = vld [vmem:[%s1734_s1 + $0x1a0] sm:$0xf] }
  0x32   :  { %665 = vmatpush.bf16.msrb.mxu2 %v815_v8  ;;  %689 = vmatpush.bf16.msrb.mxu3 %v911_v9  ;;  %v1112_v8 = vld [vmem:[%s1734_s1 + $0x220] sm:$0xf0]  ;;  %v1027_v9 = vor.u32 %v1110_v0, %v1024_v1  ;;  %v1097_v47 = vld [vmem:[%s1734_s1 + $0x1a8] sm:$0xf0]  ;;  %v967_v48 = vor.u32 %v1095_v43, %v964_v44  ;;  %v952_v50 = vld [vmem:[%s1734_s1 + $0x18c] sm:$0xf0] }
  0x33   :  { %531 = vmatmul.bf16.gmra.mxu0 %v1454_v16  ;;  %v1031_v13 = vor.u32 %v1112_v8, %v1030_v7  ;;  %v1092_v49 = vld [vmem:[%s1734_s1 + $0x184] sm:$0xf]  ;;  %v971_v51 = vor.u32 %v1097_v47, %v970_v46  ;;  %v958_v52 = vld [vmem:[%s1734_s1 + $0x188] sm:$0xf] }
  0x34   :  { %546 = vmatpush.bf16.msrb.mxu1 %v891_v11  ;;  %618 = vmatpush.bf16.msrb.mxu0 %v895_v12  ;;  %v1107_v11 = vld [vmem:[%s1734_s1 + $0x1fc] sm:$0xf]  ;;  %v1012_v12 = vld [vmem:[%s1734_s1 + $0x204] sm:$0xf0]  ;;  %v27_v56 = vld [vmem:[%s1735_s0 + $0x80] sm:$0xff] }
  0x35   :  { %579 = vmatmul.bf16.gmra.mxu2 %v1465_v20  ;;  %603 = vmatmul.bf16.gmra.mxu3 %v1454_v16  ;;  %v1015_v17 = vor.u32 %v1107_v11, %v1012_v12 }
  0x36   :  { %666 = vmatpush.bf16.msrb.mxu2 %v803_v22  ;;  %690 = vmatpush.bf16.msrb.mxu3 %v899_v23  ;;  %v1006_v22 = vld [vmem:[%s1734_s1 + $0x1e8] sm:$0xf]  ;;  %v1106_v23 = vld [vmem:[%s1734_s1 + $0x1f0] sm:$0xf0] }
  0x37   :  { %v1007_v31 = vor.u32 %v1106_v23, %v1006_v22 }
  0x38   :  { %547 = vmatpush.bf16.msrb.mxu1 %v879_v26  ;;  %619 = vmatpush.bf16.msrb.mxu0 %v883_v28  ;;  %v1101_v26 = vld [vmem:[%s1734_s1 + $0x1cc] sm:$0xf]  ;;  %v988_v28 = vld [vmem:[%s1734_s1 + $0x1d4] sm:$0xf0] }
  0x39   :  { %v991_v35 = vor.u32 %v1101_v26, %v988_v28 }
  0x3a   :  { %667 = vmatpush.bf16.msrb.mxu2 %v791_v38  ;;  %691 = vmatpush.bf16.msrb.mxu3 %v887_v39  ;;  %v33_v38 = vpack.c.bf16 %v21_v32, %v18_v29  ;;  %v995_v39 = vor.u32 %v1103_v34, %v994_v33 }
  0x3c   :  { %548 = vmatpush.bf16.msrb.mxu1 %v867_v41  ;;  %620 = vmatpush.bf16.msrb.mxu0 %v871_v42  ;;  %v1100_v41 = vld [vmem:[%s1734_s1 + $0x1c0] sm:$0xf0]  ;;  %v979_v42 = vor.u32 %v1098_v36, %v976_v37 }
  0x3d   :  { %v983_v45 = vor.u32 %v1100_v41, %v982_v40 }
  0x3e   :  { %668 = vmatpush.bf16.msrb.mxu2 %v779_v53  ;;  %692 = vmatpush.bf16.msrb.mxu3 %v875_v54  ;;  %v955_v53 = vor.u32 %v1092_v49, %v952_v50 }
  0x40   :  { %549 = vmatpush.bf16.msrb.mxu1 %v855_v55  ;;  %621 = vmatpush.bf16.msrb.mxu0 %v859_v57  ;;  %v24_v55 = vld [vmem:[%s1735_s0 + $0x68] sm:$0xff] }
  0x41   :  { %v36_v57 = vpack.c.bf16 %v27_v56, %v24_v55 }
  0x42   :  { %669 = vmatpush.bf16.msrb.mxu2 %v767_v5  ;;  %693 = vmatpush.bf16.msrb.mxu3 %v863_v6 }
  0x43   :  { %550 = vmatmul.bf16.vlgmr.msrb.gmra.mxu1 %v1554_v2  ;;  %622 = vmatmul.bf16.vlgmr.msrb.gmra.mxu0 %v1554_v2 }
  0x44   :  { %638 = vmatpush.bf16.msra.mxu1 %v1039_v60  ;;  %710 = vmatpush.bf16.msra.mxu0 %v1043_v63 }
  0x45   :  { %584 = vmatmul.bf16.gmra.mxu2 %v1568_v10  ;;  %608 = vmatmul.bf16.gmra.mxu3 %v1341_v27 }
  0x46   :  { %1124 = vmatpush.bf16.msra.mxu2 %v1043_v63 }
  0x48   :  { %639 = vmatpush.bf16.msra.mxu1 %v1027_v9  ;;  %711 = vmatpush.bf16.msra.mxu0 %v1031_v13 }
  0x4a   :  { %1125 = vmatpush.bf16.msra.mxu2 %v1031_v13 }
  0x4c   :  { %640 = vmatpush.bf16.msra.mxu1 %v1015_v17  ;;  %712 = vmatpush.bf16.msra.mxu0 %v1019_v21 }
  0x4e   :  { %1126 = vmatpush.bf16.msra.mxu2 %v1019_v21 }
  0x50   :  { %641 = vmatpush.bf16.msra.mxu1 %v1003_v24  ;;  %713 = vmatpush.bf16.msra.mxu0 %v1007_v31 }
  0x52   :  { %1127 = vmatpush.bf16.msra.mxu2 %v1007_v31 }
  0x53   :  { %555 = vmatmul.bf16.gmra.mxu1 %v33_v38  ;;  %627 = vmatmul.bf16.gmra.mxu0 %v33_v38 }
  0x54   :  { %642 = vmatpush.bf16.msra.mxu1 %v991_v35  ;;  %714 = vmatpush.bf16.msra.mxu0 %v995_v39 }
  0x55   :  { %670 = vmatmul.bf16.vlgmr.msrb.gmra.mxu2 %v1336_v25  ;;  %694 = vmatmul.bf16.vlgmr.msrb.gmra.mxu3 %v1554_v2  ;;  %v1094_v25 = vld [vmem:[%s1734_s1 + $0x190] sm:$0xf0] }
  0x56   :  { %1128 = vmatpush.bf16.msra.mxu2 %v995_v39  ;;  %v959_v54 = vor.u32 %v1094_v25, %v958_v52 }
  0x58   :  { %643 = vmatpush.bf16.msra.mxu1 %v979_v42  ;;  %715 = vmatpush.bf16.msra.mxu0 %v983_v45 }
  0x5a   :  { %1129 = vmatpush.bf16.msra.mxu2 %v983_v45 }
  0x5c   :  { %644 = vmatpush.bf16.msra.mxu1 %v967_v48  ;;  %716 = vmatpush.bf16.msra.mxu0 %v971_v51 }
  0x5e   :  { %1130 = vmatpush.bf16.msra.mxu2 %v971_v51 }
  0x60   :  { %645 = vmatpush.bf16.msra.mxu1 %v955_v53  ;;  %717 = vmatpush.bf16.msra.mxu0 %v959_v54 }
  0x62   :  { %1131 = vmatpush.bf16.msra.mxu2 %v959_v54 }
  0x63   :  { %560 = vmatmul.bf16.gmra.mxu1 %v36_v57  ;;  %632 = vmatmul.bf16.gmra.mxu0 %v36_v57 }
  0x65   :  { %675 = vmatmul.bf16.gmra.mxu2 %v1454_v16  ;;  %699 = vmatmul.bf16.gmra.mxu3 %v33_v38 }
  0x73   :  { %646 = vmatmul.bf16.vlgmr.msra.gmra.mxu1 %v1349_v30  ;;  %718 = vmatmul.bf16.vlgmr.msra.gmra.mxu0 %v1349_v30 }
  0x75   :  { %680 = vmatmul.bf16.gmra.mxu2 %v1341_v27  ;;  %704 = vmatmul.bf16.gmra.mxu3 %v36_v57 }
  0x83   :  { %651 = vmatmul.bf16.gmra.mxu1 %v1465_v20  ;;  %723 = vmatmul.bf16.gmra.mxu0 %v1465_v20 }
  0x85   :  { %728 = vmatmul.bf16.vlgmr.msra.gmra.mxu2 %v1568_v10 }
  0x93   :  { %656 = vmatmul.bf16.gmra.mxu1 %v1568_v10 }
  0xa0   :  { %v527_v58 = vpop.f32.mrf.mxu0  ;;  %v537_v61 = vpop.f32.mrf.mxu1 }
  0xa8   :  { %v575_v59 = vpop.f32.mrf.mxu2  ;;  %v599_v60 = vpop.f32.mrf.mxu3 }
  0xa9   :  { %v529_v16 = vpop.f32.mrf.mxu0  ;;  %v539_v30 = vpop.f32.mrf.mxu1 }
  0xb0   :  { %v577_v62 = vpop.f32.mrf.mxu2  ;;  %v601_v63 = vpop.f32.mrf.mxu3 }
  0xb1   :  { %v532_v0 = vpop.f32.mrf.mxu0 }
  0xb8   :  { %v580_v1 = vpop.f32.mrf.mxu2  ;;  %v1668_v27 = vpop.f32.mrf.mxu3 }
  0xb9   :  { %v534_v2 = vpop.f32.mrf.mxu0 }
  0xc0   :  { %v551_v3 = vpop.f32.mrf.mxu1  ;;  %v582_v20 = vpop.f32.mrf.mxu2 }
  0xc1   :  { %v552_v4 = vadd.f32 %v551_v3, %v527_v58  ;;  %v1670_v5 = vpop.f32.mrf.mxu3  ;;  %v623_v6 = vpop.f32.mrf.mxu0 }
  0xc2   :  { %v624_v42 = vadd.f32 %v623_v6, %v599_v60 }
  0xc3   :  { %v576_v7 = vadd.f32 %v575_v59, %v552_v4 }
  0xc5   :  { %734 = vst [vmem:[%s1736_s2] sm:$0xff] %v576_v7 }
  0xc8   :  { %v553_v8 = vpop.f32.mrf.mxu1  ;;  %v585_v10 = vpop.f32.mrf.mxu2 }
  0xc9   :  { %v554_v9 = vadd.f32 %v553_v8, %v529_v16  ;;  %v1675_v11 = vpop.f32.mrf.mxu3  ;;  %v625_v12 = vpop.f32.mrf.mxu0 }
  0xca   :  { %v626_v50 = vadd.f32 %v625_v12, %v601_v63 }
  0xcb   :  { %v578_v13 = vadd.f32 %v577_v62, %v554_v9 }
  0xcd   :  { %737 = vst [vmem:[%s1736_s2 + $0x18] sm:$0xff] %v578_v13 }
  0xd0   :  { %v556_v14 = vpop.f32.mrf.mxu1  ;;  %v587_v17 = vpop.f32.mrf.mxu2 }
  0xd1   :  { %v557_v15 = vadd.f32 %v556_v14, %v532_v0  ;;  %v1680_v18 = vpop.f32.mrf.mxu3  ;;  %v628_v19 = vpop.f32.mrf.mxu0 }
  0xd2   :  { %v629_v57 = vadd.f32 %v628_v19, %v1668_v27 }
  0xd3   :  { %v581_v21 = vadd.f32 %v580_v1, %v557_v15 }
  0xd5   :  { %740 = vst [vmem:[%s1736_s2 + $0x30] sm:$0xff] %v581_v21 }
  0xd8   :  { %v558_v22 = vpop.f32.mrf.mxu1  ;;  %v671_v24 = vpop.f32.mrf.mxu2 }
  0xd9   :  { %v559_v23 = vadd.f32 %v558_v22, %v534_v2  ;;  %v630_v26 = vpop.f32.mrf.mxu0  ;;  %v695_v29 = vpop.f32.mrf.mxu3 }
  0xda   :  { %v696_v45 = vadd.f32 %v695_v29, %v671_v24  ;;  %v631_v0 = vadd.f32 %v630_v26, %v1670_v5 }
  0xdb   :  { %v583_v28 = vadd.f32 %v582_v20, %v559_v23 }
  0xdd   :  { %743 = vst [vmem:[%s1736_s2 + $0x48] sm:$0xff] %v583_v28 }
  0xe0   :  { %v561_v31 = vpop.f32.mrf.mxu1  ;;  %v673_v33 = vpop.f32.mrf.mxu2 }
  0xe1   :  { %v562_v32 = vadd.f32 %v561_v31, %v537_v61  ;;  %v633_v34 = vpop.f32.mrf.mxu0  ;;  %v697_v36 = vpop.f32.mrf.mxu3 }
  0xe2   :  { %v698_v52 = vadd.f32 %v697_v36, %v673_v33  ;;  %v634_v5 = vadd.f32 %v633_v34, %v1675_v11 }
  0xe3   :  { %v586_v35 = vadd.f32 %v585_v10, %v562_v32 }
  0xe5   :  { %746 = vst [vmem:[%s1736_s2 + $0x60] sm:$0xff] %v586_v35 }
  0xe8   :  { %v563_v37 = vpop.f32.mrf.mxu1  ;;  %v676_v39 = vpop.f32.mrf.mxu2 }
  0xe9   :  { %v564_v38 = vadd.f32 %v563_v37, %v539_v30  ;;  %v635_v40 = vpop.f32.mrf.mxu0  ;;  %v700_v43 = vpop.f32.mrf.mxu3 }
  0xea   :  { %v701_v59 = vadd.f32 %v700_v43, %v676_v39  ;;  %v636_v14 = vadd.f32 %v635_v40, %v1680_v18 }
  0xeb   :  { %v588_v41 = vadd.f32 %v587_v17, %v564_v38 }
  0xed   :  { %749 = vst [vmem:[%s1736_s2 + $0x78] sm:$0xff] %v588_v41 }
  0xf0   :  { %v647_v44 = vpop.f32.mrf.mxu1  ;;  %v678_v47 = vpop.f32.mrf.mxu2 }
  0xf1   :  { %v648_v46 = vadd.f32 %v647_v44, %v624_v42  ;;  %v719_v48 = vpop.f32.mrf.mxu0  ;;  %v702_v25 = vpop.f32.mrf.mxu3 }
  0xf2   :  { %v720_v49 = vadd.f32 %v719_v48, %v696_v45  ;;  %v703_v27 = vadd.f32 %v702_v25, %v678_v47 }
  0xf3   :  { %735 = vst [vmem:[%s1736_s2 + $0x8] sm:$0xff] %v648_v46 }
  0xf4   :  { %736 = vst [vmem:[%s1736_s2 + $0x10] sm:$0xff] %v720_v49 }
  0xf8   :  { %v649_v51 = vpop.f32.mrf.mxu1  ;;  %v681_v54 = vpop.f32.mrf.mxu2 }
  0xf9   :  { %v650_v53 = vadd.f32 %v649_v51, %v626_v50  ;;  %v721_v55 = vpop.f32.mrf.mxu0  ;;  %v705_v62 = vpop.f32.mrf.mxu3 }
  0xfa   :  { %v722_v56 = vadd.f32 %v721_v55, %v698_v52  ;;  %v706_v30 = vadd.f32 %v705_v62, %v681_v54 }
  0xfb   :  { %738 = vst [vmem:[%s1736_s2 + $0x20] sm:$0xff] %v650_v53 }
  0xfc   :  { %739 = vst [vmem:[%s1736_s2 + $0x28] sm:$0xff] %v722_v56 }
 0x100   :  { %v652_v58 = vpop.f32.mrf.mxu1  ;;  %v683_v16 = vpop.f32.mrf.mxu2 }
 0x101   :  { %v653_v60 = vadd.f32 %v652_v58, %v629_v57  ;;  %v724_v61 = vpop.f32.mrf.mxu0  ;;  %v707_v7 = vpop.f32.mrf.mxu3 }
 0x102   :  { %v725_v63 = vadd.f32 %v724_v61, %v701_v59  ;;  %v708_v8 = vadd.f32 %v707_v7, %v683_v16 }
 0x103   :  { %741 = vst [vmem:[%s1736_s2 + $0x38] sm:$0xff] %v653_v60 }
 0x104   :  { %742 = vst [vmem:[%s1736_s2 + $0x40] sm:$0xff] %v725_v63 }
 0x108   :  { %v654_v1 = vpop.f32.mrf.mxu1  ;;  %v729_v3 = vpop.f32.mrf.mxu2 }
 0x109   :  { %v655_v2 = vadd.f32 %v654_v1, %v631_v0  ;;  %v730_v4 = vadd.f32 %v729_v3, %v706_v30  ;;  %v726_v20 = vpop.f32.mrf.mxu0 }
 0x10a   :  { %v727_v6 = vadd.f32 %v726_v20, %v703_v27 }
 0x10b   :  { %744 = vst [vmem:[%s1736_s2 + $0x50] sm:$0xff] %v655_v2 }
 0x10c   :  { %748 = vst [vmem:[%s1736_s2 + $0x70] sm:$0xff] %v730_v4 }
 0x10d   :  { %745 = vst [vmem:[%s1736_s2 + $0x58] sm:$0xff] %v727_v6 }
 0x110   :  { %v657_v9 = vpop.f32.mrf.mxu1  ;;  %v731_v12 = vpop.f32.mrf.mxu2 }
 0x111   :  { %v658_v10 = vadd.f32 %v657_v9, %v634_v5  ;;  %v732_v13 = vadd.f32 %v731_v12, %v708_v8 }
 0x113   :  { %747 = vst [vmem:[%s1736_s2 + $0x68] sm:$0xff] %v658_v10 }
 0x114   :  { %751 = vst [vmem:[%s1736_s2 + $0x88] sm:$0xff] %v732_v13 }
 0x118   :  { %v659_v15 = vpop.f32.mrf.mxu1 }
 0x119   :  { %v660_v17 = vadd.f32 %v659_v15, %v636_v14 }
 0x11b   :  { %750 = vst [vmem:[%s1736_s2 + $0x80] sm:$0xff] %v660_v17 }

// kernel: ffno_forward.11
= control target key start
LH: loop header
LB: loop body
LE: loop exit
PB: predicated region body
PF: predicated region fallthrough
CT: control target
= control target key end

     0   :  { %13 = vsyncpa [#allocation3], 0  ;;  %s2570_s0 = inlined_call_operand.vmem [shape: f32[1152,32], index: 0, kind: input, shape index: {}]   ;;  %s2571_s1 = inlined_call_operand.vmem [shape: f32[1152,32], index: 1, kind: input, shape index: {}]   ;;  %s2572_s2 = inlined_call_operand.vmem [shape: bf16[32,128], index: 2, kind: input, shape index: {}]   ;;  %s2573_s3 = inlined_call_operand.vmem [shape: f32[1,128], index: 3, kind: input, shape index: {}]   ;;  %s2574_s4 = inlined_call_operand.vmem [shape: bf16[128,32], index: 4, kind: input, shape index: {}]   ;;  %s2575_s5 = inlined_call_operand.vmem [shape: f32[1,32], index: 5, kind: input, shape index: {}]   ;;  %s2576_s6 = inlined_call_operand.vmem [shape: f32[1152,32], index: 6, kind: output, shape index: {0}]   ;;  %s2577_s7 = inlined_call_operand.hbm [shape: f32[1152,32], index: 7, kind: output, shape index: {1}]  }
   0x1   :  { %15 = vsyncpa [#allocation3 + $0x1], 0  ;;  %s1779_s24 = smov 0   ;;  %s1781_s25 = smov 0  }
   0x2   :  { %s1783_s26 = smov 0   ;;  %s1785_s27 = smov 0  }
   0x3 LB: > { %s1800_s28 = sadd.s32 4294967295, %s1735_s27   ;;  %s1520_s29 = sadd.s32 4294967294, %s1735_s27   ;;  %s1735_s27 = sphi %s1785_s27, %s2583_s27   ;;  %s1731_s26 = sphi %s1783_s26, %s2582_s26   ;;  %s1727_s25 = sphi %s1781_s25, %s2581_s25   ;;  %s1723_s24 = sphi %s1779_s24, %s2580_s24  }
   0x4   : > { %s1804_s30 = sadd.s32 1, %s1735_s27   ;;  %s190_s8 = sadd.s32 1, %s1731_s26 }
   0x5   : > { %s187_s9 = ssub.s32 %s1735_s27, %s1804_s30  ;;  %p200_p0 = scmp.ne.s32.totalorder %s1731_s26, %s1727_s25 }
   0x6   : > { %p188_p1 = scmp.eq.s32.totalorder %s187_s9, 0  ;;  %p201_p2 = scmp.eq.s32.totalorder %s1800_s28, 1 }
   0x7   : > { %p206_p3 = scmp.ne.s32.totalorder %s1727_s25, %s1723_s24  ;;  %p207_p4 = scmp.eq.s32.totalorder %s1520_s29, 1 }
   0x8   : > { %s1815_s10 = scalar_select %p188_p1, %s1731_s26, %s190_s8  }
   0x9   : > { %p1817_p5 = por %p201_p2, %p200_p0  ;;  %p1821_p6 = por %p207_p4, %p206_p3 }
   0xa   : > { %p1523_p7 = scmp.ge.s32.totalorder %s1735_s27, 1  ;;  %p255_p8 = scmp.lt.s32.totalorder %s1735_s27, 3 }
   0xc   : > { %p256_p9 = pnand %p1523_p7, %p255_p8 }
   0xd   : > { %s297_s15 = smul.u32 (!%p256_p9), 72, %s1800_s28  ;;  %s294_s14 = sand.u32 (!%p256_p9), 1, %s1727_s25  }
   0xe   : > { %259 = sbr.rel (%p256_p9) target bundleno = 873 (0x369), region = 44 }
   0xf   : > { %p298_p10 = scmp.lt.s32.totalorder (!%p256_p9), %s297_s15, 143  ;;  %s1616_s16 = smul.u32 (!%p256_p9), 576, %s1800_s28 }
  0x10   : > { %s1402_s28 = scalar_lea.sflag (!%p256_p9), [#allocation3], %s294_s14 }
  0x11   : > { %s1417_s22 = scalar_lea.hbm (!%p256_p9), %s2577_s7, %s1616_s16 }
  0x12   : > { %s1420_s29 = sshll.u32 (!%p256_p9), %s1417_s22, 4  ;;  %s1421_s29 = int_to_ptr.hbm [resolvable:$true] %s1420_s29 }
  0x13   : > { %v1607_v0 = vld [vmem:[%s2572_s2 + $0x8] sm:$0xff]  ;;  %v1606_v1 = vld [vmem:[%s2572_s2] sm:$0xff]  ;;  %s2585_s15 = smov (!%p298_p10, %s297_s15), 143  ;;  %vm445_vm0 = vcmask 261120   ;;  %v1615_v17 = vld [vmem:[%s2574_s4 + $0x38] sm:$0xff] }
  0x14   : > { %560 = vmatpush.bf16.msra.mxu0 %v1607_v0  ;;  %1617 = vmatpush.bf16.msra.mxu3 %v1607_v0  ;;  %s1834_s18 = sshll.u32 %s2585_s15, 3  ;;  %v1614_v21 = vld [vmem:[%s2574_s4 + $0x30] sm:$0xff]  ;;  %v1613_v22 = vld [vmem:[%s2574_s4 + $0x28] sm:$0xff]  ;;  %v1612_v23 = vld [vmem:[%s2574_s4 + $0x20] sm:$0xff]  ;;  %s1627_s15 = smul.u32 576, %s294_s14 }
  0x15   : > { %s1840_s21 = scalar_lea.vmem %s2571_s1, %s1834_s18  ;;  %919 = vmatpush.bf16.msra.mxu1 %v1615_v17  ;;  %1619 = vmatpush.bf16.msra.mxu2 %v1615_v17  ;;  %v1611_v26 = vld [vmem:[%s2574_s4 + $0x18] sm:$0xff]  ;;  %v1610_v28 = vld [vmem:[%s2574_s4 + $0x10] sm:$0xff]  ;;  %v1609_v29 = vld [vmem:[%s2574_s4 + $0x8] sm:$0xff]  ;;  %s1950_s19 = scalar_lea.vmem %s2570_s0, %s1834_s18 }
  0x16   : > { %v317_v2 = vld [vmem:[%s1840_s21] sm:$0xff]  ;;  %v318_v3 = vld [vmem:[%s1840_s21 + $0x8] sm:$0xff]  ;;  %v319_v5 = vld [vmem:[%s1840_s21 + $0x10] sm:$0xff]  ;;  %s1965_s8 = scalar_lea.vmem %s2576_s6, %s1834_s18  ;;  %s1967_s9 = scalar_lea.vmem [#allocation2], %s1627_s15 }
  0x17   : > { %v389_v4 = vpack.c.bf16 %v318_v3, %v317_v2  ;;  %v320_v6 = vld [vmem:[%s1840_s21 + $0x18] sm:$0xff]  ;;  %v321_v8 = vld [vmem:[%s1840_s21 + $0x20] sm:$0xff]  ;;  %v322_v9 = vld [vmem:[%s1840_s21 + $0x28] sm:$0xff]  ;;  %s1418_s23 = sshll.u32 %s1967_s9, 4  ;;  %s1687_s18 = sshra.s32 %s1421_s29, 4  ;;  %s1419_s23 = int_to_ptr.vmem [resolvable:$true] %s1418_s23  ;;  %s1688_s18 = int_to_ptr.hbm [resolvable:$true] %s1687_s18 }
  0x18   : > { %561 = vmatpush.bf16.msra.mxu0 %v1606_v1  ;;  %1618 = vmatpush.bf16.msra.mxu3 %v1606_v1  ;;  %v390_v7 = vpack.c.bf16 %v320_v6, %v319_v5  ;;  %v391_v10 = vpack.c.bf16 %v322_v9, %v321_v8  ;;  %v323_v11 = vld [vmem:[%s1840_s21 + $0x30] sm:$0xff]  ;;  %v324_v12 = vld [vmem:[%s1840_s21 + $0x38] sm:$0xff]  ;;  %v325_v14 = vld [vmem:[%s1840_s21 + $0x40] sm:$0xff]  ;;  %p1694_p0 = scmp.lt.s32.totalorder %s1688_s18, %s2577_s7 }
  0x19   : > { %v392_v13 = vpack.c.bf16 %v324_v12, %v323_v11  ;;  %v326_v15 = vld [vmem:[%s1840_s21 + $0x48] sm:$0xff]  ;;  %v327_v18 = vld [vmem:[%s1840_s21 + $0x50] sm:$0xff]  ;;  %v328_v19 = vld [vmem:[%s1840_s21 + $0x58] sm:$0xff]  ;;  %920 = vmatpush.bf16.msra.mxu1 %v1614_v21  ;;  %1620 = vmatpush.bf16.msra.mxu2 %v1614_v21 }
  0x1a   : > { %v393_v16 = vpack.c.bf16 %v326_v15, %v325_v14  ;;  %v394_v20 = vpack.c.bf16 %v328_v19, %v327_v18  ;;  %v329_v24 = vld [vmem:[%s1840_s21 + $0x60] sm:$0xff]  ;;  %v330_v25 = vld [vmem:[%s1840_s21 + $0x68] sm:$0xff]  ;;  %v331_v31 = vld [vmem:[%s1840_s21 + $0x70] sm:$0xff] }
  0x1b   : > { %1535 = vmatmul.msk.bf16.vlgmr.msra.gmra.mxu0 %vm445_vm0, %v389_v4  ;;  %v395_v27 = vpack.c.bf16 %v330_v25, %v329_v24  ;;  %v1608_v30 = vld [vmem:[%s2574_s4] sm:$0xff]  ;;  %v332_v32 = vld [vmem:[%s1840_s21 + $0x78] sm:$0xff]  ;;  %v334_v35 = vld [vmem:[%s1840_s21 + $0x88] sm:$0xff] }
  0x1c   : > { %v396_v33 = vpack.c.bf16 %v332_v32, %v331_v31  ;;  %v333_v34 = vld [vmem:[%s1840_s21 + $0x80] sm:$0xff]  ;;  %v335_v44 = vld [vmem:[%s1840_s21 + $0x90] sm:$0xff]  ;;  %v336_v45 = vld [vmem:[%s1840_s21 + $0x98] sm:$0xff] }
  0x1d   : > { %921 = vmatpush.bf16.msra.mxu1 %v1613_v22  ;;  %1621 = vmatpush.bf16.msra.mxu2 %v1613_v22  ;;  %v397_v36 = vpack.c.bf16 %v334_v35, %v333_v34  ;;  %v1895_v38 = vld [vmem:[%s2573_s3] ss:$0 sm:$0xff]  ;;  %v398_v47 = vpack.c.bf16 %v336_v45, %v335_v44  ;;  %v338_v55 = vld [vmem:[%s1840_s21 + $0xa8] sm:$0xff]  ;;  %v339_v0 = vld [vmem:[%s1840_s21 + $0xb0] sm:$0xff] }
  0x1e   : > { %v337_v54 = vld [vmem:[%s1840_s21 + $0xa0] sm:$0xff]  ;;  %v340_v1 = vld [vmem:[%s1840_s21 + $0xb8] sm:$0xff]  ;;  %v342_v11 = vld [vmem:[%s1840_s21 + $0xc8] sm:$0xff] }
  0x1f   : > { %v399_v57 = vpack.c.bf16 %v338_v55, %v337_v54  ;;  %v400_v3 = vpack.c.bf16 %v340_v1, %v339_v0  ;;  %v344_v21 = vld [vmem:[%s1840_s21 + $0xd8] sm:$0xff]  ;;  %v346_v31 = vld [vmem:[%s1840_s21 + $0xe8] sm:$0xff] }
  0x21   : > { %922 = vmatpush.bf16.msra.mxu1 %v1612_v23  ;;  %1622 = vmatpush.bf16.msra.mxu2 %v1612_v23 }
  0x25   : > { %923 = vmatpush.bf16.msra.mxu1 %v1611_v26  ;;  %1623 = vmatpush.bf16.msra.mxu2 %v1611_v26 }
  0x29   : > { %924 = vmatpush.bf16.msra.mxu1 %v1610_v28  ;;  %1624 = vmatpush.bf16.msra.mxu2 %v1610_v28 }
  0x2b   : > { %1536 = vmatmul.msk.bf16.gmra.mxu0 %vm445_vm0, %v390_v7 }
  0x2d   : > { %925 = vmatpush.bf16.msra.mxu1 %v1609_v29  ;;  %1625 = vmatpush.bf16.msra.mxu2 %v1609_v29 }
  0x31   : > { %926 = vmatpush.bf16.msra.mxu1 %v1608_v30  ;;  %1626 = vmatpush.bf16.msra.mxu2 %v1608_v30  ;;  %v345_v30 = vld [vmem:[%s1840_s21 + $0xe0] sm:$0xff] }
  0x3b   : > { %1537 = vmatmul.msk.bf16.gmra.mxu0 %vm445_vm0, %v391_v10  ;;  %v341_v10 = vld [vmem:[%s1840_s21 + $0xc0] sm:$0xff] }
  0x4b   : > { %1538 = vmatmul.msk.bf16.gmra.mxu0 %vm445_vm0, %v392_v13  ;;  %v401_v13 = vpack.c.bf16 %v342_v11, %v341_v10  ;;  %v357_v10 = vld [vmem:[%s1840_s21 + $0x140] sm:$0xff]  ;;  %v358_v11 = vld [vmem:[%s1840_s21 + $0x148] sm:$0xff] }
  0x5b   : > { %1539 = vmatmul.msk.bf16.gmra.mxu0 %vm445_vm0, %v393_v16 }
  0x6b   : > { %1540 = vmatmul.msk.bf16.gmra.mxu0 %vm445_vm0, %v394_v20  ;;  %v343_v20 = vld [vmem:[%s1840_s21 + $0xd0] sm:$0xff] }
  0x6c   : > { %v402_v23 = vpack.c.bf16 %v344_v21, %v343_v20 }
  0x7b   : > { %1541 = vmatmul.msk.bf16.gmra.mxu0 %vm445_vm0, %v395_v27 }
  0x8b   : > { %1542 = vmatmul.msk.bf16.gmra.mxu0 %vm445_vm0, %v396_v33  ;;  %v403_v33 = vpack.c.bf16 %v346_v31, %v345_v30  ;;  %v359_v31 = vld [vmem:[%s1840_s21 + $0x150] sm:$0xff] }
  0x98   : > { %v563_v37 = vpop.f32.mrf.mxu0 }
  0x99   : > { %v564_v39 = vadd.f32 %v1895_v38, %v563_v37 }
  0x9b   : > { %1543 = vmatmul.msk.bf16.gmra.mxu0 %vm445_vm0, %v397_v36  ;;  %v743_v42 = vmax.f32 %v564_v39, 0.0 }
  0xa0   : > { %v565_v40 = vpop.f32.mrf.mxu0 }
  0xa1   : > { %v566_v41 = vadd.f32 %v1895_v38, %v565_v40 }
  0xa3   : > { %v744_v43 = vmax.f32 %v566_v41, 0.0  ;;  %v347_v41 = vld [vmem:[%s1840_s21 + $0xf0] sm:$0xff] }
  0xa5   : > { %v815_v46 = vpack.c.bf16 %v744_v43, %v743_v42  ;;  %v348_v42 = vld [vmem:[%s1840_s21 + $0xf8] sm:$0xff] }
  0xa6   : > { %v404_v44 = vpack.c.bf16 %v348_v42, %v347_v41 }
  0xa7   : > { %927 = vmatmul.bf16.vlgmr.msra.gmra.mxu1 %v815_v46 }
  0xa8   : > { %v568_v48 = vpop.f32.mrf.mxu0 }
  0xa9   : > { %v569_v49 = vadd.f32 %v1895_v38, %v568_v48 }
  0xab   : > { %1544 = vmatmul.msk.bf16.gmra.mxu0 %vm445_vm0, %v398_v47  ;;  %v745_v52 = vmax.f32 %v569_v49, 0.0 }
  0xb0   : > { %v570_v50 = vpop.f32.mrf.mxu0 }
  0xb1   : > { %v571_v51 = vadd.f32 %v1895_v38, %v570_v50 }
  0xb3   : > { %v746_v53 = vmax.f32 %v571_v51, 0.0  ;;  %v349_v51 = vld [vmem:[%s1840_s21 + $0x100] sm:$0xff] }
  0xb5   : > { %v816_v56 = vpack.c.bf16 %v746_v53, %v745_v52  ;;  %v350_v52 = vld [vmem:[%s1840_s21 + $0x108] sm:$0xff] }
  0xb6   : > { %v405_v54 = vpack.c.bf16 %v350_v52, %v349_v51  ;;  %v362_v51 = vld [vmem:[%s1840_s21 + $0x168] sm:$0xff] }
  0xb7   : > { %932 = vmatmul.bf16.gmra.mxu1 %v816_v56  ;;  %v355_v56 = vld [vmem:[%s1840_s21 + $0x130] sm:$0xff] }
  0xb8   : > { %v573_v58 = vpop.f32.mrf.mxu0 }
  0xb9   : > { %v574_v59 = vadd.f32 %v1895_v38, %v573_v58 }
  0xbb   : > { %1545 = vmatmul.msk.bf16.gmra.mxu0 %vm445_vm0, %v399_v57  ;;  %v747_v62 = vmax.f32 %v574_v59, 0.0  ;;  %v356_v57 = vld [vmem:[%s1840_s21 + $0x138] sm:$0xff] }
  0xbc   : > { %v408_v58 = vpack.c.bf16 %v356_v57, %v355_v56 }
  0xbe   : > { %1554 = vmatmul.msk.bf16.vlgmr.msra.gmra.mxu3 %vm445_vm0, %v408_v58 }
  0xc0   : > { %v575_v60 = vpop.f32.mrf.mxu0 }
  0xc1   : > { %v576_v61 = vadd.f32 %v1895_v38, %v575_v60 }
  0xc3   : > { %v748_v63 = vmax.f32 %v576_v61, 0.0 }
  0xc5   : > { %v817_v2 = vpack.c.bf16 %v748_v63, %v747_v62  ;;  %v1955_v62 = vld [vmem:[%s2575_s5] ss:$0 sm:$0xff] }
  0xc7   : > { %937 = vmatmul.bf16.gmra.mxu1 %v817_v2  ;;  %v1180_v2 = vld [vmem:[%s1950_s19] sm:$0xff] }
  0xc8   : > { %v578_v4 = vpop.f32.mrf.mxu0 }
  0xc9   : > { %v579_v5 = vadd.f32 %v1895_v38, %v578_v4  ;;  %v352_v4 = vld [vmem:[%s1840_s21 + $0x118] sm:$0xff] }
  0xcb   : > { %1546 = vmatmul.msk.bf16.gmra.mxu0 %vm445_vm0, %v400_v3  ;;  %v749_v8 = vmax.f32 %v579_v5, 0.0  ;;  %v351_v3 = vld [vmem:[%s1840_s21 + $0x110] sm:$0xff] }
  0xd0   : > { %v580_v6 = vpop.f32.mrf.mxu0 }
  0xd1   : > { %v581_v7 = vadd.f32 %v1895_v38, %v580_v6 }
  0xd3   : > { %v750_v9 = vmax.f32 %v581_v7, 0.0 }
  0xd5   : > { %v818_v12 = vpack.c.bf16 %v750_v9, %v749_v8  ;;  %v406_v8 = vpack.c.bf16 %v352_v4, %v351_v3 }
  0xd7   : > { %942 = vmatmul.bf16.gmra.mxu1 %v818_v12  ;;  %v409_v12 = vpack.c.bf16 %v358_v11, %v357_v10 }
  0xd8   : > { %v583_v14 = vpop.f32.mrf.mxu0 }
  0xd9   : > { %v584_v15 = vadd.f32 %v1895_v38, %v583_v14  ;;  %v1181_v14 = vld [vmem:[%s1950_s19 + $0x8] sm:$0xff]  ;;  %1555 = vmatmul.msk.bf16.gmra.mxu3 %vm445_vm0, %v409_v12 }
  0xdb   : > { %1547 = vmatmul.msk.bf16.gmra.mxu0 %vm445_vm0, %v401_v13  ;;  %v751_v18 = vmax.f32 %v584_v15, 0.0 }
  0xe0   : > { %v585_v16 = vpop.f32.mrf.mxu0 }
  0xe1   : > { %v586_v17 = vadd.f32 %v1895_v38, %v585_v16 }
  0xe3   : > { %v752_v19 = vmax.f32 %v586_v17, 0.0 }
  0xe5   : > { %v819_v22 = vpack.c.bf16 %v752_v19, %v751_v18 }
  0xe7   : > { %947 = vmatmul.bf16.gmra.mxu1 %v819_v22 }
  0xe8   : > { %v588_v24 = vpop.f32.mrf.mxu0 }
  0xe9   : > { %v589_v25 = vadd.f32 %v1895_v38, %v588_v24  ;;  %v353_v24 = vld [vmem:[%s1840_s21 + $0x120] sm:$0xff] }
  0xeb   : > { %1548 = vmatmul.msk.bf16.gmra.mxu0 %vm445_vm0, %v402_v23  ;;  %v753_v28 = vmax.f32 %v589_v25, 0.0  ;;  %v1182_v23 = vld [vmem:[%s1950_s19 + $0x10] sm:$0xff]  ;;  %v354_v25 = vld [vmem:[%s1840_s21 + $0x128] sm:$0xff] }
  0xf0   : > { %v590_v26 = vpop.f32.mrf.mxu0 }
  0xf1   : > { %v591_v27 = vadd.f32 %v1895_v38, %v590_v26 }
  0xf3   : > { %v754_v29 = vmax.f32 %v591_v27, 0.0 }
  0xf5   : > { %v820_v32 = vpack.c.bf16 %v754_v29, %v753_v28  ;;  %v407_v29 = vpack.c.bf16 %v354_v25, %v353_v24  ;;  %v366_v24 = vld [vmem:[%s1840_s21 + $0x188] sm:$0xff] }
  0xf7   : > { %952 = vmatmul.bf16.gmra.mxu1 %v820_v32  ;;  %v360_v32 = vld [vmem:[%s1840_s21 + $0x158] sm:$0xff] }
  0xf8   : > { %v593_v34 = vpop.f32.mrf.mxu0 }
  0xf9   : > { %v594_v35 = vadd.f32 %v1895_v38, %v593_v34 }
  0xfb   : > { %1549 = vmatmul.msk.bf16.gmra.mxu0 %vm445_vm0, %v403_v33  ;;  %v755_v39 = vmax.f32 %v594_v35, 0.0  ;;  %v410_v33 = vpack.c.bf16 %v360_v32, %v359_v31  ;;  %v1183_v35 = vld [vmem:[%s1950_s19 + $0x18] sm:$0xff] }
  0xfd   : > { %1556 = vmatmul.msk.bf16.gmra.mxu3 %vm445_vm0, %v410_v33 }
 0x100   : > { %v595_v36 = vpop.f32.mrf.mxu0 }
 0x101   : > { %v596_v37 = vadd.f32 %v1895_v38, %v595_v36 }
 0x103   : > { %v756_v40 = vmax.f32 %v596_v37, 0.0 }
 0x105   : > { %v821_v43 = vpack.c.bf16 %v756_v40, %v755_v39 }
 0x107   : > { %957 = vmatmul.bf16.gmra.mxu1 %v821_v43 }
 0x108   : > { %v598_v45 = vpop.f32.mrf.mxu0 }
 0x109   : > { %v599_v46 = vadd.f32 %v1895_v38, %v598_v45  ;;  %v1184_v45 = vld [vmem:[%s1950_s19 + $0x20] sm:$0xff] }
 0x10b   : > { %1550 = vmatmul.msk.bf16.gmra.mxu0 %vm445_vm0, %v404_v44  ;;  %v757_v49 = vmax.f32 %v599_v46, 0.0 }
 0x110   : > { %v600_v47 = vpop.f32.mrf.mxu0 }
 0x111   : > { %v601_v48 = vadd.f32 %v1895_v38, %v600_v47 }
 0x113   : > { %v758_v50 = vmax.f32 %v601_v48, 0.0 }
 0x115   : > { %v822_v53 = vpack.c.bf16 %v758_v50, %v757_v49  ;;  %v361_v50 = vld [vmem:[%s1840_s21 + $0x160] sm:$0xff] }
 0x116   : > { %v411_v52 = vpack.c.bf16 %v362_v51, %v361_v50 }
 0x117   : > { %962 = vmatmul.bf16.gmra.mxu1 %v822_v53 }
 0x118   : > { %v603_v55 = vpop.f32.mrf.mxu0  ;;  %1557 = vmatmul.msk.bf16.gmra.mxu3 %vm445_vm0, %v411_v52 }
 0x119   : > { %v604_v59 = vadd.f32 %v1895_v38, %v603_v55 }
 0x11b   : > { %1551 = vmatmul.msk.bf16.gmra.mxu0 %vm445_vm0, %v405_v54  ;;  %v759_v63 = vmax.f32 %v604_v59, 0.0  ;;  %v1185_v54 = vld [vmem:[%s1950_s19 + $0x28] sm:$0xff] }
 0x120   : > { %v605_v60 = vpop.f32.mrf.mxu0 }
 0x121   : > { %v606_v61 = vadd.f32 %v1895_v38, %v605_v60 }
 0x123   : > { %v760_v0 = vmax.f32 %v606_v61, 0.0 }
 0x124   : > { %v928_v1 = vpop.f32.mrf.mxu1 }
 0x125   : > { %v929_v5 = vadd.f32 %v1955_v62, %v928_v1  ;;  %v823_v6 = vpack.c.bf16 %v760_v0, %v759_v63  ;;  %v1186_v0 = vld [vmem:[%s1950_s19 + $0x30] sm:$0xff] }
 0x127   : > { %1108 = vst.msk [vmem:[%s1967_s9] sm:$0xff] %vm445_vm0, %v929_v5  ;;  %v1252_v7 = vadd.f32 %v1180_v2, %v929_v5  ;;  %967 = vmatmul.bf16.gmra.mxu1 %v823_v6  ;;  %v363_v5 = vld [vmem:[%s1840_s21 + $0x170] sm:$0xff]  ;;  %v364_v6 = vld [vmem:[%s1840_s21 + $0x178] sm:$0xff] }
 0x128   : > { %v608_v9 = vpop.f32.mrf.mxu0 }
 0x129   : > { %1324 = vst.msk [vmem:[%s1965_s8] sm:$0xff] %vm445_vm0, %v1252_v7  ;;  %v609_v16 = vadd.f32 %v1895_v38, %v608_v9  ;;  %v412_v7 = vpack.c.bf16 %v364_v6, %v363_v5  ;;  %v1187_v9 = vld [vmem:[%s1950_s19 + $0x38] sm:$0xff] }
 0x12b   : > { %1552 = vmatmul.msk.bf16.gmra.mxu0 %vm445_vm0, %v406_v8  ;;  %v761_v20 = vmax.f32 %v609_v16, 0.0  ;;  %1558 = vmatmul.msk.bf16.gmra.mxu3 %vm445_vm0, %v412_v7 }
 0x12c   : > { %v930_v13 = vpop.f32.mrf.mxu1 }
 0x12d   : > { %v931_v15 = vadd.f32 %v1955_v62, %v930_v13 }
 0x12f   : > { %1109 = vst.msk [vmem:[%s1967_s9 + $0x8] sm:$0xff] %vm445_vm0, %v931_v15  ;;  %v1253_v17 = vadd.f32 %v1181_v14, %v931_v15 }
 0x130   : > { %v610_v18 = vpop.f32.mrf.mxu0 }
 0x131   : > { %1325 = vst.msk [vmem:[%s1965_s8 + $0x8] sm:$0xff] %vm445_vm0, %v1253_v17  ;;  %v611_v19 = vadd.f32 %v1895_v38, %v610_v18  ;;  %v1188_v18 = vld [vmem:[%s1950_s19 + $0x40] sm:$0xff] }
 0x133   : > { %v762_v21 = vmax.f32 %v611_v19, 0.0 }
 0x134   : > { %v933_v22 = vpop.f32.mrf.mxu1 }
 0x135   : > { %v934_v26 = vadd.f32 %v1955_v62, %v933_v22  ;;  %v824_v27 = vpack.c.bf16 %v762_v21, %v761_v20 }
 0x137   : > { %1110 = vst.msk [vmem:[%s1967_s9 + $0x10] sm:$0xff] %vm445_vm0, %v934_v26  ;;  %v1254_v28 = vadd.f32 %v1182_v23, %v934_v26  ;;  %972 = vmatmul.bf16.gmra.mxu1 %v824_v27  ;;  %v365_v23 = vld [vmem:[%s1840_s21 + $0x180] sm:$0xff]  ;;  %v1189_v27 = vld [vmem:[%s1950_s19 + $0x48] sm:$0xff] }
 0x138   : > { %v613_v30 = vpop.f32.mrf.mxu0  ;;  %v413_v25 = vpack.c.bf16 %v366_v24, %v365_v23 }
 0x139   : > { %1326 = vst.msk [vmem:[%s1965_s8 + $0x10] sm:$0xff] %vm445_vm0, %v1254_v28  ;;  %v614_v37 = vadd.f32 %v1895_v38, %v613_v30 }
 0x13b   : > { %1553 = vmatmul.msk.bf16.gmra.mxu0 %vm445_vm0, %v407_v29  ;;  %v763_v42 = vmax.f32 %v614_v37, 0.0  ;;  %1559 = vmatmul.msk.bf16.gmra.mxu3 %vm445_vm0, %v413_v25 }
 0x13c   : > { %v935_v34 = vpop.f32.mrf.mxu1 }
 0x13d   : > { %v936_v36 = vadd.f32 %v1955_v62, %v935_v34 }
 0x13f   : > { %1111 = vst.msk [vmem:[%s1967_s9 + $0x18] sm:$0xff] %vm445_vm0, %v936_v36  ;;  %v1255_v39 = vadd.f32 %v1183_v35, %v936_v36  ;;  %v1190_v36 = vld [vmem:[%s1950_s19 + $0x50] sm:$0xff] }
 0x140   : > { %v615_v40 = vpop.f32.mrf.mxu0 }
 0x141   : > { %1327 = vst.msk [vmem:[%s1965_s8 + $0x18] sm:$0xff] %vm445_vm0, %v1255_v39  ;;  %v616_v41 = vadd.f32 %v1895_v38, %v615_v40  ;;  %v2104_v24 = vpop.f32.mrf.mxu3 }
 0x143   : > { %v764_v43 = vmax.f32 %v616_v41, 0.0 }
 0x144   : > { %v938_v44 = vpop.f32.mrf.mxu1 }
 0x145   : > { %v939_v46 = vadd.f32 %v1955_v62, %v938_v44  ;;  %v825_v47 = vpack.c.bf16 %v764_v43, %v763_v42  ;;  %v367_v42 = vld [vmem:[%s1840_s21 + $0x190] sm:$0xff]  ;;  %v368_v43 = vld [vmem:[%s1840_s21 + $0x198] sm:$0xff] }
 0x146   : > { %v414_v44 = vpack.c.bf16 %v368_v43, %v367_v42 }
 0x147   : > { %1112 = vst.msk [vmem:[%s1967_s9 + $0x20] sm:$0xff] %vm445_vm0, %v939_v46  ;;  %v1256_v48 = vadd.f32 %v1184_v45, %v939_v46  ;;  %977 = vmatmul.bf16.gmra.mxu1 %v825_v47  ;;  %v1191_v46 = vld [vmem:[%s1950_s19 + $0x58] sm:$0xff] }
 0x148   : > { %v618_v49 = vpop.f32.mrf.mxu0 }
 0x149   : > { %1328 = vst.msk [vmem:[%s1965_s8 + $0x20] sm:$0xff] %vm445_vm0, %v1256_v48  ;;  %v619_v56 = vadd.f32 %v1895_v38, %v618_v49 }
 0x14b   : > { %v765_v60 = vmax.f32 %v619_v56, 0.0  ;;  %1560 = vmatmul.msk.bf16.gmra.mxu3 %vm445_vm0, %v414_v44 }
 0x14c   : > { %v940_v53 = vpop.f32.mrf.mxu1 }
 0x14d   : > { %v941_v55 = vadd.f32 %v1955_v62, %v940_v53 }
 0x14f   : > { %1113 = vst.msk [vmem:[%s1967_s9 + $0x28] sm:$0xff] %vm445_vm0, %v941_v55  ;;  %v1257_v57 = vadd.f32 %v1185_v54, %v941_v55  ;;  %v1192_v55 = vld [vmem:[%s1950_s19 + $0x60] sm:$0xff] }
 0x150   : > { %v620_v58 = vpop.f32.mrf.mxu0 }
 0x151   : > { %1329 = vst.msk [vmem:[%s1965_s8 + $0x28] sm:$0xff] %vm445_vm0, %v1257_v57  ;;  %v621_v59 = vadd.f32 %v1895_v38, %v620_v58 }
 0x153   : > { %v766_v61 = vmax.f32 %v621_v59, 0.0 }
 0x154   : > { %v943_v63 = vpop.f32.mrf.mxu1 }
 0x155   : > { %v944_v1 = vadd.f32 %v1955_v62, %v943_v63  ;;  %v826_v2 = vpack.c.bf16 %v766_v61, %v765_v60  ;;  %v369_v60 = vld [vmem:[%s1840_s21 + $0x1a0] sm:$0xff]  ;;  %v370_v61 = vld [vmem:[%s1840_s21 + $0x1a8] sm:$0xff] }
 0x156   : > { %v415_v63 = vpack.c.bf16 %v370_v61, %v369_v60  ;;  %v1199_v60 = vld [vmem:[%s1950_s19 + $0x98] sm:$0xff] }
 0x157   : > { %1114 = vst.msk [vmem:[%s1967_s9 + $0x30] sm:$0xff] %vm445_vm0, %v944_v1  ;;  %v1258_v3 = vadd.f32 %v1186_v0, %v944_v1  ;;  %982 = vmatmul.bf16.gmra.mxu1 %v826_v2  ;;  %v1193_v1 = vld [vmem:[%s1950_s19 + $0x68] sm:$0xff] }
 0x158   : > { %v623_v4 = vpop.f32.mrf.mxu0 }
 0x159   : > { %1330 = vst.msk [vmem:[%s1965_s8 + $0x30] sm:$0xff] %vm445_vm0, %v1258_v3  ;;  %v624_v11 = vadd.f32 %v1895_v38, %v623_v4 }
 0x15b   : > { %v767_v15 = vmax.f32 %v624_v11, 0.0  ;;  %1561 = vmatmul.msk.bf16.gmra.mxu3 %vm445_vm0, %v415_v63 }
 0x15c   : > { %v945_v8 = vpop.f32.mrf.mxu1 }
 0x15d   : > { %v946_v10 = vadd.f32 %v1955_v62, %v945_v8 }
 0x15f   : > { %1115 = vst.msk [vmem:[%s1967_s9 + $0x38] sm:$0xff] %vm445_vm0, %v946_v10  ;;  %v1259_v12 = vadd.f32 %v1187_v9, %v946_v10  ;;  %v1194_v10 = vld [vmem:[%s1950_s19 + $0x70] sm:$0xff] }
 0x160   : > { %v625_v13 = vpop.f32.mrf.mxu0 }
 0x161   : > { %1331 = vst.msk [vmem:[%s1965_s8 + $0x38] sm:$0xff] %vm445_vm0, %v1259_v12  ;;  %v626_v14 = vadd.f32 %v1895_v38, %v625_v13 }
 0x163   : > { %v768_v16 = vmax.f32 %v626_v14, 0.0 }
 0x164   : > { %v948_v17 = vpop.f32.mrf.mxu1 }
 0x165   : > { %v827_v19 = vpack.c.bf16 %v768_v16, %v767_v15  ;;  %v949_v20 = vadd.f32 %v1955_v62, %v948_v17  ;;  %v371_v15 = vld [vmem:[%s1840_s21 + $0x1b0] sm:$0xff]  ;;  %v372_v16 = vld [vmem:[%s1840_s21 + $0x1b8] sm:$0xff] }
 0x166   : > { %v416_v17 = vpack.c.bf16 %v372_v16, %v371_v15  ;;  %v1201_v16 = vld [vmem:[%s1950_s19 + $0xa8] sm:$0xff] }
 0x167   : > { %1116 = vst.msk [vmem:[%s1967_s9 + $0x40] sm:$0xff] %vm445_vm0, %v949_v20  ;;  %v1260_v21 = vadd.f32 %v1188_v18, %v949_v20  ;;  %987 = vmatmul.bf16.gmra.mxu1 %v827_v19  ;;  %v1195_v19 = vld [vmem:[%s1950_s19 + $0x78] sm:$0xff] }
 0x168   : > { %v628_v22 = vpop.f32.mrf.mxu0 }
 0x169   : > { %1332 = vst.msk [vmem:[%s1965_s8 + $0x40] sm:$0xff] %vm445_vm0, %v1260_v21  ;;  %v629_v29 = vadd.f32 %v1895_v38, %v628_v22 }
 0x16b   : > { %v769_v33 = vmax.f32 %v629_v29, 0.0  ;;  %1562 = vmatmul.msk.bf16.gmra.mxu3 %vm445_vm0, %v416_v17  ;;  %v1196_v29 = vld [vmem:[%s1950_s19 + $0x80] sm:$0xff]  ;;  %v659_v17 = vadd.f32 %v1895_v38, %v2104_v24 }
 0x16c   : > { %v950_v26 = vpop.f32.mrf.mxu1 }
 0x16d   : > { %v951_v28 = vadd.f32 %v1955_v62, %v950_v26 }
 0x16f   : > { %1117 = vst.msk [vmem:[%s1967_s9 + $0x48] sm:$0xff] %vm445_vm0, %v951_v28  ;;  %v1261_v30 = vadd.f32 %v1189_v27, %v951_v28 }
 0x170   : > { %v630_v31 = vpop.f32.mrf.mxu0 }
 0x171   : > { %1333 = vst.msk [vmem:[%s1965_s8 + $0x48] sm:$0xff] %vm445_vm0, %v1261_v30  ;;  %v631_v32 = vadd.f32 %v1895_v38, %v630_v31 }
 0x173   : > { %v770_v34 = vmax.f32 %v631_v32, 0.0 }
 0x174   : > { %v953_v35 = vpop.f32.mrf.mxu1 }
 0x175   : > { %v828_v37 = vpack.c.bf16 %v770_v34, %v769_v33  ;;  %v954_v39 = vadd.f32 %v1955_v62, %v953_v35  ;;  %v660_v34 = vpop.f32.mrf.mxu3  ;;  %v373_v35 = vld [vmem:[%s1840_s21 + $0x1c0] sm:$0xff] }
 0x177   : > { %1118 = vst.msk [vmem:[%s1967_s9 + $0x50] sm:$0xff] %vm445_vm0, %v954_v39  ;;  %v1262_v40 = vadd.f32 %v1190_v36, %v954_v39  ;;  %992 = vmatmul.bf16.gmra.mxu1 %v828_v37  ;;  %v374_v36 = vld [vmem:[%s1840_s21 + $0x1c8] sm:$0xff] }
 0x178   : > { %v633_v41 = vpop.f32.mrf.mxu0  ;;  %v417_v37 = vpack.c.bf16 %v374_v36, %v373_v35 }
 0x179   : > { %1334 = vst.msk [vmem:[%s1965_s8 + $0x50] sm:$0xff] %vm445_vm0, %v1262_v40  ;;  %v634_v48 = vadd.f32 %v1895_v38, %v633_v41  ;;  %v1197_v40 = vld [vmem:[%s1950_s19 + $0x88] sm:$0xff] }
 0x17b   : > { %v771_v52 = vmax.f32 %v634_v48, 0.0  ;;  %1563 = vmatmul.msk.bf16.gmra.mxu3 %vm445_vm0, %v417_v37 }
 0x17c   : > { %v955_v45 = vpop.f32.mrf.mxu1 }
 0x17d   : > { %v956_v47 = vadd.f32 %v1955_v62, %v955_v45  ;;  %v2123_v45 = vpop.f32.mrf.mxu3 }
 0x17e   : > { %v664_v35 = vadd.f32 %v1895_v38, %v2123_v45 }
 0x17f   : > { %1119 = vst.msk [vmem:[%s1967_s9 + $0x58] sm:$0xff] %vm445_vm0, %v956_v47  ;;  %v1263_v49 = vadd.f32 %v1191_v46, %v956_v47 }
 0x180   : > { %v635_v50 = vpop.f32.mrf.mxu0 }
 0x181   : > { %1335 = vst.msk [vmem:[%s1965_s8 + $0x58] sm:$0xff] %vm445_vm0, %v1263_v49  ;;  %v636_v51 = vadd.f32 %v1895_v38, %v635_v50  ;;  %v1198_v50 = vld [vmem:[%s1950_s19 + $0x90] sm:$0xff] }
 0x183   : > { %v772_v53 = vmax.f32 %v636_v51, 0.0 }
 0x184   : > { %v958_v54 = vpop.f32.mrf.mxu1 }
 0x185   : > { %v829_v56 = vpack.c.bf16 %v772_v53, %v771_v52  ;;  %v959_v57 = vadd.f32 %v1955_v62, %v958_v54 }
 0x187   : > { %1120 = vst.msk [vmem:[%s1967_s9 + $0x60] sm:$0xff] %vm445_vm0, %v959_v57  ;;  %v1264_v58 = vadd.f32 %v1192_v55, %v959_v57  ;;  %997 = vmatmul.bf16.gmra.mxu1 %v829_v56  ;;  %v665_v55 = vpop.f32.mrf.mxu3  ;;  %v375_v56 = vld [vmem:[%s1840_s21 + $0x1d0] sm:$0xff]  ;;  %v376_v57 = vld [vmem:[%s1840_s21 + $0x1d8] sm:$0xff] }
 0x188   : > { %v638_v59 = vpop.f32.mrf.mxu0  ;;  %v666_v36 = vadd.f32 %v1895_v38, %v665_v55 }
 0x189   : > { %1336 = vst.msk [vmem:[%s1965_s8 + $0x60] sm:$0xff] %vm445_vm0, %v1264_v58  ;;  %v639_v3 = vadd.f32 %v1895_v38, %v638_v59  ;;  %v418_v58 = vpack.c.bf16 %v376_v57, %v375_v56 }
 0x18b   : > { %v773_v7 = vmax.f32 %v639_v3, 0.0  ;;  %1564 = vmatmul.msk.bf16.gmra.mxu3 %vm445_vm0, %v418_v58 }
 0x18c   : > { %v960_v0 = vpop.f32.mrf.mxu1 }
 0x18d   : > { %v961_v2 = vadd.f32 %v1955_v62, %v960_v0 }
 0x18f   : > { %1121 = vst.msk [vmem:[%s1967_s9 + $0x68] sm:$0xff] %vm445_vm0, %v961_v2  ;;  %v1265_v4 = vadd.f32 %v1193_v1, %v961_v2  ;;  %v2142_v2 = vpop.f32.mrf.mxu3 }
 0x190   : > { %v640_v5 = vpop.f32.mrf.mxu0 }
 0x191   : > { %1337 = vst.msk [vmem:[%s1965_s8 + $0x68] sm:$0xff] %vm445_vm0, %v1265_v4  ;;  %v641_v6 = vadd.f32 %v1895_v38, %v640_v5 }
 0x193   : > { %v774_v8 = vmax.f32 %v641_v6, 0.0 }
 0x194   : > { %v963_v9 = vpop.f32.mrf.mxu1 }
 0x195   : > { %v830_v11 = vpack.c.bf16 %v774_v8, %v773_v7  ;;  %v964_v12 = vadd.f32 %v1955_v62, %v963_v9  ;;  %v1200_v7 = vld [vmem:[%s1950_s19 + $0xa0] sm:$0xff] }
 0x197   : > { %1122 = vst.msk [vmem:[%s1967_s9 + $0x70] sm:$0xff] %vm445_vm0, %v964_v12  ;;  %v1266_v13 = vadd.f32 %v1194_v10, %v964_v12  ;;  %1002 = vmatmul.bf16.gmra.mxu1 %v830_v11  ;;  %v670_v11 = vpop.f32.mrf.mxu3  ;;  %v377_v12 = vld [vmem:[%s1840_s21 + $0x1e0] sm:$0xff] }
 0x198   : > { %v643_v14 = vpop.f32.mrf.mxu0  ;;  %v671_v55 = vadd.f32 %v1895_v38, %v670_v11 }
 0x199   : > { %1338 = vst.msk [vmem:[%s1965_s8 + $0x70] sm:$0xff] %vm445_vm0, %v1266_v13  ;;  %v644_v21 = vadd.f32 %v1895_v38, %v643_v14  ;;  %v378_v13 = vld [vmem:[%s1840_s21 + $0x1e8] sm:$0xff] }
 0x19a   : > { %v419_v14 = vpack.c.bf16 %v378_v13, %v377_v12 }
 0x19b   : > { %v775_v26 = vmax.f32 %v644_v21, 0.0 }
 0x19c   : > { %v965_v18 = vpop.f32.mrf.mxu1  ;;  %1565 = vmatmul.msk.bf16.gmra.mxu3 %vm445_vm0, %v419_v14 }
 0x19d   : > { %v966_v20 = vadd.f32 %v1955_v62, %v965_v18  ;;  %v661_v18 = vadd.f32 %v1895_v38, %v660_v34  ;;  %v1203_v34 = vld [vmem:[%s1950_s19 + $0xb8] sm:$0xff] }
 0x19f   : > { %1123 = vst.msk [vmem:[%s1967_s9 + $0x78] sm:$0xff] %vm445_vm0, %v966_v20  ;;  %v1267_v22 = vadd.f32 %v1195_v19, %v966_v20  ;;  %v2163_v21 = vpop.f32.mrf.mxu3 }
 0x1a0   : > { %v645_v23 = vpop.f32.mrf.mxu0 }
 0x1a1   : > { %1339 = vst.msk [vmem:[%s1965_s8 + $0x78] sm:$0xff] %vm445_vm0, %v1267_v22  ;;  %v646_v25 = vadd.f32 %v1895_v38, %v645_v23  ;;  %v781_v22 = vmax.f32 %v659_v17, 0.0  ;;  %v782_v23 = vmax.f32 %v661_v18, 0.0  ;;  %v1208_v17 = vld [vmem:[%s1950_s19 + $0xe0] sm:$0xff] }
 0x1a3   : > { %v776_v27 = vmax.f32 %v646_v25, 0.0  ;;  %v1202_v25 = vld [vmem:[%s1950_s19 + $0xb0] sm:$0xff] }
 0x1a4   : > { %v968_v28 = vpop.f32.mrf.mxu1 }
 0x1a5   : > { %v831_v30 = vpack.c.bf16 %v776_v27, %v775_v26  ;;  %v969_v31 = vadd.f32 %v1955_v62, %v968_v28  ;;  %v834_v27 = vpack.c.bf16 %v782_v23, %v781_v22  ;;  %v385_v22 = vld [vmem:[%s1840_s21 + $0x220] sm:$0xff]  ;;  %v386_v23 = vld [vmem:[%s1840_s21 + $0x228] sm:$0xff] }
 0x1a7   : > { %1124 = vst.msk [vmem:[%s1967_s9 + $0x80] sm:$0xff] %vm445_vm0, %v969_v31  ;;  %v1268_v32 = vadd.f32 %v1196_v29, %v969_v31  ;;  %1007 = vmatmul.bf16.gmra.mxu1 %v831_v30  ;;  %v675_v29 = vpop.f32.mrf.mxu3  ;;  %v379_v30 = vld [vmem:[%s1840_s21 + $0x1f0] sm:$0xff]  ;;  %v380_v31 = vld [vmem:[%s1840_s21 + $0x1f8] sm:$0xff] }
 0x1a8   : > { %v648_v33 = vpop.f32.mrf.mxu0 }
 0x1a9   : > { %1340 = vst.msk [vmem:[%s1965_s8 + $0x80] sm:$0xff] %vm445_vm0, %v1268_v32  ;;  %v649_v42 = vadd.f32 %v1895_v38, %v648_v33  ;;  %v420_v32 = vpack.c.bf16 %v380_v31, %v379_v30 }
 0x1ab   : > { %v777_v47 = vmax.f32 %v649_v42, 0.0  ;;  %v784_v42 = vmax.f32 %v666_v36, 0.0 }
 0x1ac   : > { %v970_v39 = vpop.f32.mrf.mxu1  ;;  %1566 = vmatmul.msk.bf16.gmra.mxu3 %vm445_vm0, %v420_v32 }
 0x1ad   : > { %v971_v41 = vadd.f32 %v1955_v62, %v970_v39 }
 0x1af   : > { %1125 = vst.msk [vmem:[%s1967_s9 + $0x88] sm:$0xff] %vm445_vm0, %v971_v41  ;;  %v1269_v43 = vadd.f32 %v1197_v40, %v971_v41  ;;  %v2183_v40 = vpop.f32.mrf.mxu3  ;;  %v783_v41 = vmax.f32 %v664_v35, 0.0  ;;  %v1210_v35 = vld [vmem:[%s1950_s19 + $0xf0] sm:$0xff] }
 0x1b0   : > { %v650_v44 = vpop.f32.mrf.mxu0 }
 0x1b1   : > { %1341 = vst.msk [vmem:[%s1965_s8 + $0x88] sm:$0xff] %vm445_vm0, %v1269_v43  ;;  %v651_v46 = vadd.f32 %v1895_v38, %v650_v44  ;;  %v1204_v44 = vld [vmem:[%s1950_s19 + $0xc0] sm:$0xff] }
 0x1b3   : > { %v778_v48 = vmax.f32 %v651_v46, 0.0  ;;  %v835_v46 = vpack.c.bf16 %v784_v42, %v783_v41  ;;  %v387_v41 = vld [vmem:[%s1840_s21 + $0x230] sm:$0xff]  ;;  %v388_v42 = vld [vmem:[%s1840_s21 + $0x238] sm:$0xff] }
 0x1b4   : > { %v973_v49 = vpop.f32.mrf.mxu1 }
 0x1b5   : > { %v832_v51 = vpack.c.bf16 %v778_v48, %v777_v47  ;;  %v974_v52 = vadd.f32 %v1955_v62, %v973_v49  ;;  %v381_v49 = vld [vmem:[%s1840_s21 + $0x200] sm:$0xff] }
 0x1b7   : > { %1126 = vst.msk [vmem:[%s1967_s9 + $0x90] sm:$0xff] %vm445_vm0, %v974_v52  ;;  %v1270_v53 = vadd.f32 %v1198_v50, %v974_v52  ;;  %1012 = vmatmul.bf16.gmra.mxu1 %v832_v51  ;;  %v680_v48 = vpop.f32.mrf.mxu3  ;;  %v382_v50 = vld [vmem:[%s1840_s21 + $0x208] sm:$0xff] }
 0x1b8   : > { %v653_v54 = vpop.f32.mrf.mxu0  ;;  %v421_v51 = vpack.c.bf16 %v382_v50, %v381_v49 }
 0x1b9   : > { %1342 = vst.msk [vmem:[%s1965_s8 + $0x90] sm:$0xff] %vm445_vm0, %v1270_v53  ;;  %v654_v63 = vadd.f32 %v1895_v38, %v653_v54  ;;  %v1205_v53 = vld [vmem:[%s1950_s19 + $0xc8] sm:$0xff]  ;;  %v669_v54 = vadd.f32 %v1895_v38, %v2142_v2 }
 0x1bb   : > { %v779_v4 = vmax.f32 %v654_v63, 0.0  ;;  %v1206_v63 = vld [vmem:[%s1950_s19 + $0xd0] sm:$0xff] }
 0x1bc   : > { %v975_v59 = vpop.f32.mrf.mxu1  ;;  %1567 = vmatmul.msk.bf16.gmra.mxu3 %vm445_vm0, %v421_v51 }
 0x1bd   : > { %v976_v61 = vadd.f32 %v1955_v62, %v975_v59  ;;  %v785_v59 = vmax.f32 %v669_v54, 0.0  ;;  %v1212_v54 = vld [vmem:[%s1950_s19 + $0x100] sm:$0xff] }
 0x1bf   : > { %1127 = vst.msk [vmem:[%s1967_s9 + $0x98] sm:$0xff] %vm445_vm0, %v976_v61  ;;  %v1271_v0 = vadd.f32 %v1199_v60, %v976_v61  ;;  %v2203_v58 = vpop.f32.mrf.mxu3  ;;  %v786_v60 = vmax.f32 %v671_v55, 0.0 }
 0x1c0   : > { %v655_v1 = vpop.f32.mrf.mxu0 }
 0x1c1   : > { %1343 = vst.msk [vmem:[%s1965_s8 + $0x98] sm:$0xff] %vm445_vm0, %v1271_v0  ;;  %v656_v3 = vadd.f32 %v1895_v38, %v655_v1  ;;  %v836_v1 = vpack.c.bf16 %v786_v60, %v785_v59  ;;  %v1213_v59 = vld [vmem:[%s1950_s19 + $0x108] sm:$0xff]  ;;  %v2273_v60 = vld [vmem:[%s2573_s3] ss:$0 sm:$0xff] }
 0x1c3   : > { %v780_v5 = vmax.f32 %v656_v3, 0.0 }
 0x1c4   : > { %v978_v6 = vpop.f32.mrf.mxu1 }
 0x1c5   : > { %v979_v8 = vadd.f32 %v1955_v62, %v978_v6  ;;  %v833_v9 = vpack.c.bf16 %v780_v5, %v779_v4  ;;  %v383_v4 = vld [vmem:[%s1840_s21 + $0x210] sm:$0xff]  ;;  %v384_v5 = vld [vmem:[%s1840_s21 + $0x218] sm:$0xff]  ;;  %s1689_s21 = scalar_lea.hbm %s1688_s18, 576 }
 0x1c6   : > { %v422_v6 = vpack.c.bf16 %v384_v5, %v383_v4  ;;  %v1214_v5 = vld [vmem:[%s1950_s19 + $0x110] sm:$0xff]  ;;  %p1690_p11 = scmp.ne.s32.totalorder %s1688_s18, %s1689_s21 }
 0x1c7   : > { %1128 = vst.msk [vmem:[%s1967_s9 + $0xa0] sm:$0xff] %vm445_vm0, %v979_v8  ;;  %v1272_v10 = vadd.f32 %v1200_v7, %v979_v8  ;;  %1017 = vmatmul.bf16.vlgmr.msra.gmra.mxu2 %v833_v9  ;;  %v685_v3 = vpop.f32.mrf.mxu3  ;;  %v1207_v8 = vld [vmem:[%s1950_s19 + $0xd8] sm:$0xff]  ;;  %v674_v9 = vadd.f32 %v1895_v38, %v2163_v21 }
 0x1c8   : > { %p1691_p12 = pnand %p1690_p11, %p1817_p5 }
 0x1c9   : > { %1344 = vst.msk [vmem:[%s1965_s8 + $0xa0] sm:$0xff] %vm445_vm0, %v1272_v10  ;;  %v676_v10 = vadd.f32 %v1895_v38, %v675_v29  ;;  %v787_v14 = vmax.f32 %v674_v9, 0.0 }
 0x1ca   : > { %p1692_p13 = pneg %p1691_p12 }
 0x1cc   : > { %v980_v15 = vpop.f32.mrf.mxu1  ;;  %1568 = vmatmul.msk.bf16.gmra.mxu3 %vm445_vm0, %v422_v6 }
 0x1cd   : > { %v981_v19 = vadd.f32 %v1955_v62, %v980_v15  ;;  %v788_v15 = vmax.f32 %v676_v10, 0.0 }
 0x1cf   : > { %1129 = vst.msk [vmem:[%s1967_s9 + $0xa8] sm:$0xff] %vm445_vm0, %v981_v19  ;;  %v1273_v20 = vadd.f32 %v1201_v16, %v981_v19  ;;  %v2223_v13 = vpop.f32.mrf.mxu3  ;;  %v837_v19 = vpack.c.bf16 %v788_v15, %v787_v14 }
 0x1d1   : > { %1345 = vst.msk [vmem:[%s1965_s8 + $0xa8] sm:$0xff] %vm445_vm0, %v1273_v20 }
 0x1d4   : > { %v983_v24 = vpop.f32.mrf.mxu1 }
 0x1d5   : > { %v984_v26 = vadd.f32 %v1955_v62, %v983_v24  ;;  %v423_v24 = vpack.c.bf16 %v386_v23, %v385_v22  ;;  %v1216_v22 = vld [vmem:[%s1950_s19 + $0x120] sm:$0xff] }
 0x1d7   : > { %1130 = vst.msk [vmem:[%s1967_s9 + $0xb0] sm:$0xff] %vm445_vm0, %v984_v26  ;;  %v1274_v28 = vadd.f32 %v1202_v25, %v984_v26  ;;  %1022 = vmatmul.bf16.gmra.mxu2 %v834_v27  ;;  %v690_v21 = vpop.f32.mrf.mxu3  ;;  %v1209_v26 = vld [vmem:[%s1950_s19 + $0xe8] sm:$0xff]  ;;  %v679_v27 = vadd.f32 %v1895_v38, %v2183_v40 }
 0x1d9   : > { %1346 = vst.msk [vmem:[%s1965_s8 + $0xb0] sm:$0xff] %vm445_vm0, %v1274_v28  ;;  %v681_v28 = vadd.f32 %v1895_v38, %v680_v48  ;;  %v789_v32 = vmax.f32 %v679_v27, 0.0 }
 0x1dc   : > { %v985_v33 = vpop.f32.mrf.mxu1  ;;  %1569 = vmatmul.msk.bf16.gmra.mxu3 %vm445_vm0, %v423_v24 }
 0x1dd   : > { %v986_v37 = vadd.f32 %v1955_v62, %v985_v33  ;;  %v790_v33 = vmax.f32 %v681_v28, 0.0 }
 0x1df   : > { %1131 = vst.msk [vmem:[%s1967_s9 + $0xb8] sm:$0xff] %vm445_vm0, %v986_v37  ;;  %v1275_v39 = vadd.f32 %v1203_v34, %v986_v37  ;;  %v693_v31 = vpop.f32.mrf.mxu3  ;;  %v838_v37 = vpack.c.bf16 %v790_v33, %v789_v32 }
 0x1e1   : > { %1347 = vst.msk [vmem:[%s1965_s8 + $0xb8] sm:$0xff] %vm445_vm0, %v1275_v39 }
 0x1e4   : > { %v988_v43 = vpop.f32.mrf.mxu1 }
 0x1e5   : > { %v989_v45 = vadd.f32 %v1955_v62, %v988_v43  ;;  %v424_v43 = vpack.c.bf16 %v388_v42, %v387_v41 }
 0x1e7   : > { %1132 = vst.msk [vmem:[%s1967_s9 + $0xc0] sm:$0xff] %vm445_vm0, %v989_v45  ;;  %v1276_v47 = vadd.f32 %v1204_v44, %v989_v45  ;;  %1027 = vmatmul.bf16.gmra.mxu2 %v835_v46  ;;  %v695_v40 = vpop.f32.mrf.mxu3  ;;  %v1211_v45 = vld [vmem:[%s1950_s19 + $0xf8] sm:$0xff]  ;;  %v684_v46 = vadd.f32 %v1895_v38, %v2203_v58 }
 0x1e9   : > { %1348 = vst.msk [vmem:[%s1965_s8 + $0xc0] sm:$0xff] %vm445_vm0, %v1276_v47  ;;  %v686_v47 = vadd.f32 %v1895_v38, %v685_v3  ;;  %v791_v51 = vmax.f32 %v684_v46, 0.0  ;;  %v1219_v46 = vld [vmem:[%s1950_s19 + $0x138] sm:$0xff] }
 0x1ec   : > { %v990_v52 = vpop.f32.mrf.mxu1  ;;  %1570 = vmatmul.msk.bf16.gmra.mxu3 %vm445_vm0, %v424_v43 }
 0x1ed   : > { %v991_v56 = vadd.f32 %v1955_v62, %v990_v52  ;;  %v792_v52 = vmax.f32 %v686_v47, 0.0 }
 0x1ef   : > { %1133 = vst.msk [vmem:[%s1967_s9 + $0xc8] sm:$0xff] %vm445_vm0, %v991_v56  ;;  %v1277_v57 = vadd.f32 %v1205_v53, %v991_v56  ;;  %v698_v50 = vpop.f32.mrf.mxu3  ;;  %v839_v38 = vpack.c.bf16 %v792_v52, %v791_v51  ;;  %v1220_v52 = vld [vmem:[%s1950_s19 + $0x140] sm:$0xff] }
 0x1f0   : > { %v699_v24 = vadd.f32 %v2273_v60, %v698_v50 }
 0x1f1   : > { %1349 = vst.msk [vmem:[%s1965_s8 + $0xc8] sm:$0xff] %vm445_vm0, %v1277_v57 }
 0x1f2   : > { %v797_v27 = vmax.f32 %v699_v24, 0.0 }
 0x1f4   : > { %v993_v61 = vpop.f32.mrf.mxu1 }
 0x1f5   : > { %v994_v0 = vadd.f32 %v1955_v62, %v993_v61  ;;  %v689_v61 = vadd.f32 %v2273_v60, %v2223_v13  ;;  %v696_v13 = vadd.f32 %v2273_v60, %v695_v40 }
 0x1f7   : > { %1134 = vst.msk [vmem:[%s1967_s9 + $0xd0] sm:$0xff] %vm445_vm0, %v994_v0  ;;  %v1278_v2 = vadd.f32 %v1206_v63, %v994_v0  ;;  %1032 = vmatmul.bf16.gmra.mxu2 %v836_v1  ;;  %v700_v57 = vpop.f32.mrf.mxu3  ;;  %v691_v63 = vadd.f32 %v2273_v60, %v690_v21 }
 0x1f9   : > { %1350 = vst.msk [vmem:[%s1965_s8 + $0xd0] sm:$0xff] %vm445_vm0, %v1278_v2  ;;  %v793_v2 = vmax.f32 %v689_v61, 0.0  ;;  %v794_v3 = vmax.f32 %v691_v63, 0.0  ;;  %v1221_v61 = vld [vmem:[%s1950_s19 + $0x148] sm:$0xff] }
 0x1fc   : > { %v995_v7 = vpop.f32.mrf.mxu1 }
 0x1fd   : > { %v996_v11 = vadd.f32 %v1955_v62, %v995_v7 }
 0x1ff   : > { %1135 = vst.msk [vmem:[%s1967_s9 + $0xd8] sm:$0xff] %vm445_vm0, %v996_v11  ;;  %v1279_v12 = vadd.f32 %v1207_v8, %v996_v11  ;;  %v703_v6 = vpop.f32.mrf.mxu3  ;;  %v840_v8 = vpack.c.bf16 %v794_v3, %v793_v2  ;;  %v1215_v11 = vld [vmem:[%s1950_s19 + $0x118] sm:$0xff]  ;;  %v1222_v3 = vld [vmem:[%s1950_s19 + $0x150] sm:$0xff] }
 0x200   : > { %v704_v40 = vadd.f32 %v2273_v60, %v703_v6 }
 0x201   : > { %1351 = vst.msk [vmem:[%s1965_s8 + $0xd8] sm:$0xff] %vm445_vm0, %v1279_v12  ;;  %v694_v12 = vadd.f32 %v2273_v60, %v693_v31 }
 0x202   : > { %v799_v43 = vmax.f32 %v704_v40, 0.0 }
 0x204   : > { %v998_v16 = vpop.f32.mrf.mxu1 }
 0x205   : > { %v999_v18 = vadd.f32 %v1955_v62, %v998_v16 }
 0x207   : > { %1136 = vst.msk [vmem:[%s1967_s9 + $0xe0] sm:$0xff] %vm445_vm0, %v999_v18  ;;  %v1280_v20 = vadd.f32 %v1208_v17, %v999_v18  ;;  %1037 = vmatmul.bf16.gmra.mxu2 %v837_v19  ;;  %v705_v15 = vpop.f32.mrf.mxu3  ;;  %v795_v17 = vmax.f32 %v694_v12, 0.0  ;;  %v796_v18 = vmax.f32 %v696_v13, 0.0  ;;  %v1223_v12 = vld [vmem:[%s1950_s19 + $0x158] sm:$0xff] }
 0x208   : > { %v706_v41 = vadd.f32 %v2273_v60, %v705_v15 }
 0x209   : > { %1352 = vst.msk [vmem:[%s1965_s8 + $0xe0] sm:$0xff] %vm445_vm0, %v1280_v20  ;;  %v841_v19 = vpack.c.bf16 %v796_v18, %v795_v17  ;;  %v1224_v18 = vld [vmem:[%s1950_s19 + $0x160] sm:$0xff] }
 0x20c   : > { %v1000_v25 = vpop.f32.mrf.mxu1 }
 0x20d   : > { %v1001_v29 = vadd.f32 %v1955_v62, %v1000_v25  ;;  %v701_v25 = vadd.f32 %v2273_v60, %v700_v57 }
 0x20f   : > { %1137 = vst.msk [vmem:[%s1967_s9 + $0xe8] sm:$0xff] %vm445_vm0, %v1001_v29  ;;  %v1281_v30 = vadd.f32 %v1209_v26, %v1001_v29  ;;  %v708_v20 = vpop.f32.mrf.mxu3  ;;  %v798_v28 = vmax.f32 %v701_v25, 0.0 }
 0x211   : > { %1353 = vst.msk [vmem:[%s1965_s8 + $0xe8] sm:$0xff] %vm445_vm0, %v1281_v30  ;;  %v1217_v30 = vld [vmem:[%s1950_s19 + $0x128] sm:$0xff] }
 0x214   : > { %v1003_v34 = vpop.f32.mrf.mxu1 }
 0x215   : > { %v1004_v36 = vadd.f32 %v1955_v62, %v1003_v34  ;;  %v842_v34 = vpack.c.bf16 %v798_v28, %v797_v27  ;;  %v1225_v27 = vld [vmem:[%s1950_s19 + $0x168] sm:$0xff] }
 0x217   : > { %1138 = vst.msk [vmem:[%s1967_s9 + $0xf0] sm:$0xff] %vm445_vm0, %v1004_v36  ;;  %v1282_v39 = vadd.f32 %v1210_v35, %v1004_v36  ;;  %1042 = vmatmul.bf16.gmra.mxu2 %v838_v37  ;;  %v710_v31 = vpop.f32.mrf.mxu3  ;;  %v1218_v36 = vld [vmem:[%s1950_s19 + $0x130] sm:$0xff] }
 0x219   : > { %1354 = vst.msk [vmem:[%s1965_s8 + $0xf0] sm:$0xff] %vm445_vm0, %v1282_v39 }
 0x21c   : > { %v1005_v44 = vpop.f32.mrf.mxu1 }
 0x21d   : > { %v1006_v48 = vadd.f32 %v1955_v62, %v1005_v44  ;;  %v800_v44 = vmax.f32 %v706_v41, 0.0 }
 0x21f   : > { %1139 = vst.msk [vmem:[%s1967_s9 + $0xf8] sm:$0xff] %vm445_vm0, %v1006_v48  ;;  %v1283_v49 = vadd.f32 %v1211_v45, %v1006_v48  ;;  %v713_v39 = vpop.f32.mrf.mxu3 }
 0x220   : > { %v714_v6 = vadd.f32 %v2273_v60, %v713_v39 }
 0x221   : > { %1355 = vst.msk [vmem:[%s1965_s8 + $0xf8] sm:$0xff] %vm445_vm0, %v1283_v49  ;;  %v843_v49 = vpack.c.bf16 %v800_v44, %v799_v43 }
 0x224   : > { %v1008_v53 = vpop.f32.mrf.mxu1 }
 0x225   : > { %v1009_v55 = vadd.f32 %v1955_v62, %v1008_v53 }
 0x227   : > { %1140 = vst.msk [vmem:[%s1967_s9 + $0x100] sm:$0xff] %vm445_vm0, %v1009_v55  ;;  %v1284_v56 = vadd.f32 %v1212_v54, %v1009_v55  ;;  %1047 = vmatmul.bf16.gmra.mxu2 %v839_v38  ;;  %v715_v50 = vpop.f32.mrf.mxu3  ;;  %v709_v54 = vadd.f32 %v2273_v60, %v708_v20  ;;  %v711_v55 = vadd.f32 %v2273_v60, %v710_v31 }
 0x229   : > { %1356 = vst.msk [vmem:[%s1965_s8 + $0x100] sm:$0xff] %vm445_vm0, %v1284_v56  ;;  %v801_v57 = vmax.f32 %v709_v54, 0.0 }
 0x22c   : > { %v1010_v58 = vpop.f32.mrf.mxu1 }
 0x22d   : > { %v1011_v0 = vadd.f32 %v1955_v62, %v1010_v58  ;;  %v802_v58 = vmax.f32 %v711_v55, 0.0 }
 0x22f   : > { %1141 = vst.msk [vmem:[%s1967_s9 + $0x108] sm:$0xff] %vm445_vm0, %v1011_v0  ;;  %v1285_v1 = vadd.f32 %v1213_v59, %v1011_v0  ;;  %v718_v56 = vpop.f32.mrf.mxu3 }
 0x230   : > { %v719_v20 = vadd.f32 %v2273_v60, %v718_v56  ;;  %v1229_v56 = vld [vmem:[%s1950_s19 + $0x188] sm:$0xff] }
 0x231   : > { %1357 = vst.msk [vmem:[%s1965_s8 + $0x108] sm:$0xff] %vm445_vm0, %v1285_v1  ;;  %v844_v1 = vpack.c.bf16 %v802_v58, %v801_v57 }
 0x232   : > { %v805_v24 = vmax.f32 %v719_v20, 0.0 }
 0x234   : > { %v1013_v4 = vpop.f32.mrf.mxu1 }
 0x235   : > { %v1014_v7 = vadd.f32 %v1955_v62, %v1013_v4 }
 0x237   : > { %1142 = vst.msk [vmem:[%s1967_s9 + $0x110] sm:$0xff] %vm445_vm0, %v1014_v7  ;;  %v1286_v9 = vadd.f32 %v1214_v5, %v1014_v7  ;;  %1052 = vmatmul.bf16.gmra.mxu2 %v840_v8  ;;  %v720_v4 = vpop.f32.mrf.mxu3  ;;  %v716_v7 = vadd.f32 %v2273_v60, %v715_v50 }
 0x239   : > { %1358 = vst.msk [vmem:[%s1965_s8 + $0x110] sm:$0xff] %vm445_vm0, %v1286_v9  ;;  %v803_v9 = vmax.f32 %v714_v6, 0.0 }
 0x23c   : > { %v1015_v10 = vpop.f32.mrf.mxu1 }
 0x23d   : > { %v1016_v14 = vadd.f32 %v1955_v62, %v1015_v10  ;;  %v804_v10 = vmax.f32 %v716_v7, 0.0 }
 0x23f   : > { %1143 = vst.msk [vmem:[%s1967_s9 + $0x118] sm:$0xff] %vm445_vm0, %v1016_v14  ;;  %v1287_v16 = vadd.f32 %v1215_v11, %v1016_v14  ;;  %v723_v14 = vpop.f32.mrf.mxu3  ;;  %v845_v15 = vpack.c.bf16 %v804_v10, %v803_v9  ;;  %v1231_v9 = vld [vmem:[%s1950_s19 + $0x198] sm:$0xff] }
 0x241   : > { %1359 = vst.msk [vmem:[%s1965_s8 + $0x118] sm:$0xff] %vm445_vm0, %v1287_v16 }
 0x247   : > { %1057 = vmatmul.bf16.gmra.mxu2 %v841_v19 }
 0x24a   : > { %v1018_v21 = vpop.f32.mrf.mxu2 }
 0x24b   : > { %v1019_v23 = vadd.f32 %v1955_v62, %v1018_v21  ;;  %v721_v21 = vadd.f32 %v2273_v60, %v720_v4 }
 0x24d   : > { %1144 = vst.msk [vmem:[%s1967_s9 + $0x120] sm:$0xff] %vm445_vm0, %v1019_v23  ;;  %v1288_v26 = vadd.f32 %v1216_v22, %v1019_v23  ;;  %v725_v23 = vpop.f32.mrf.mxu3  ;;  %v806_v25 = vmax.f32 %v721_v21, 0.0 }
 0x24f   : > { %1360 = vst.msk [vmem:[%s1965_s8 + $0x120] sm:$0xff] %vm445_vm0, %v1288_v26 }
 0x252   : > { %v1020_v29 = vpop.f32.mrf.mxu2 }
 0x253   : > { %v1021_v32 = vadd.f32 %v1955_v62, %v1020_v29  ;;  %v846_v29 = vpack.c.bf16 %v806_v25, %v805_v24 }
 0x255   : > { %1145 = vst.msk [vmem:[%s1967_s9 + $0x128] sm:$0xff] %vm445_vm0, %v1021_v32  ;;  %v1289_v33 = vadd.f32 %v1217_v30, %v1021_v32  ;;  %v728_v31 = vpop.f32.mrf.mxu3 }
 0x257   : > { %1361 = vst.msk [vmem:[%s1965_s8 + $0x128] sm:$0xff] %vm445_vm0, %v1289_v33  ;;  %1062 = vmatmul.bf16.gmra.mxu2 %v842_v34  ;;  %v1226_v33 = vld [vmem:[%s1950_s19 + $0x170] sm:$0xff] }
 0x25a   : > { %v1023_v35 = vpop.f32.mrf.mxu2 }
 0x25b   : > { %v1024_v37 = vadd.f32 %v1955_v62, %v1023_v35  ;;  %v724_v35 = vadd.f32 %v2273_v60, %v723_v14 }
 0x25d   : > { %1146 = vst.msk [vmem:[%s1967_s9 + $0x130] sm:$0xff] %vm445_vm0, %v1024_v37  ;;  %v1290_v42 = vadd.f32 %v1218_v36, %v1024_v37  ;;  %v726_v36 = vadd.f32 %v2273_v60, %v725_v23  ;;  %v807_v39 = vmax.f32 %v724_v35, 0.0  ;;  %v730_v43 = vpop.f32.mrf.mxu3  ;;  %v1233_v23 = vld [vmem:[%s1950_s19 + $0x1a8] sm:$0xff]  ;;  %v1236_v35 = vld [vmem:[%s1950_s19 + $0x1c0] sm:$0xff] }
 0x25f   : > { %1362 = vst.msk [vmem:[%s1965_s8 + $0x130] sm:$0xff] %vm445_vm0, %v1290_v42  ;;  %v808_v40 = vmax.f32 %v726_v36, 0.0  ;;  %v1227_v42 = vld [vmem:[%s1950_s19 + $0x178] sm:$0xff] }
 0x262   : > { %v1025_v45 = vpop.f32.mrf.mxu2 }
 0x263   : > { %v1026_v47 = vadd.f32 %v1955_v62, %v1025_v45  ;;  %v847_v45 = vpack.c.bf16 %v808_v40, %v807_v39  ;;  %v1237_v40 = vld [vmem:[%s1950_s19 + $0x1c8] sm:$0xff] }
 0x265   : > { %1147 = vst.msk [vmem:[%s1967_s9 + $0x138] sm:$0xff] %vm445_vm0, %v1026_v47  ;;  %v1291_v48 = vadd.f32 %v1219_v46, %v1026_v47  ;;  %v733_v50 = vpop.f32.mrf.mxu3 }
 0x267   : > { %1363 = vst.msk [vmem:[%s1965_s8 + $0x138] sm:$0xff] %vm445_vm0, %v1291_v48  ;;  %1067 = vmatmul.bf16.gmra.mxu2 %v843_v49  ;;  %v1228_v48 = vld [vmem:[%s1950_s19 + $0x180] sm:$0xff] }
 0x26a   : > { %v1028_v51 = vpop.f32.mrf.mxu2 }
 0x26b   : > { %v1029_v53 = vadd.f32 %v1955_v62, %v1028_v51  ;;  %v729_v51 = vadd.f32 %v2273_v60, %v728_v31  ;;  %v1235_v31 = vld [vmem:[%s1950_s19 + $0x1b8] sm:$0xff] }
 0x26d   : > { %1148 = vst.msk [vmem:[%s1967_s9 + $0x140] sm:$0xff] %vm445_vm0, %v1029_v53  ;;  %v1292_v38 = vadd.f32 %v1220_v52, %v1029_v53  ;;  %v731_v52 = vadd.f32 %v2273_v60, %v730_v43  ;;  %v809_v54 = vmax.f32 %v729_v51, 0.0 }
 0x26f   : > { %1364 = vst.msk [vmem:[%s1965_s8 + $0x140] sm:$0xff] %vm445_vm0, %v1292_v38  ;;  %v810_v55 = vmax.f32 %v731_v52, 0.0  ;;  %v1240_v52 = vld [vmem:[%s1950_s19 + $0x1e0] sm:$0xff] }
 0x271   : > { %v848_v58 = vpack.c.bf16 %v810_v55, %v809_v54 }
 0x272   : > { %v1030_v59 = vpop.f32.mrf.mxu2 }
 0x273   : > { %v1031_v63 = vadd.f32 %v1955_v62, %v1030_v59 }
 0x275   : > { %1149 = vst.msk [vmem:[%s1967_s9 + $0x148] sm:$0xff] %vm445_vm0, %v1031_v63  ;;  %v1293_v0 = vadd.f32 %v1221_v61, %v1031_v63  ;;  %v735_v61 = vpop.f32.mrf.mxu3 }
 0x277   : > { %1365 = vst.msk [vmem:[%s1965_s8 + $0x148] sm:$0xff] %vm445_vm0, %v1293_v0  ;;  %1072 = vmatmul.bf16.gmra.mxu2 %v844_v1  ;;  %v1230_v0 = vld [vmem:[%s1950_s19 + $0x190] sm:$0xff] }
 0x27a   : > { %v1033_v2 = vpop.f32.mrf.mxu2 }
 0x27b   : > { %v1034_v5 = vadd.f32 %v1955_v62, %v1033_v2  ;;  %v2351_v62 = vld [vmem:[%s2575_s5] ss:$0 sm:$0xff]  ;;  %v734_v2 = vadd.f32 %v2273_v60, %v733_v50 }
 0x27d   : > { %1150 = vst.msk [vmem:[%s1967_s9 + $0x150] sm:$0xff] %vm445_vm0, %v1034_v5  ;;  %v1294_v8 = vadd.f32 %v1222_v3, %v1034_v5  ;;  %v736_v3 = vadd.f32 %v2273_v60, %v735_v61  ;;  %v738_v5 = vpop.f32.mrf.mxu3  ;;  %v811_v6 = vmax.f32 %v734_v2, 0.0 }
 0x27f   : > { %1366 = vst.msk [vmem:[%s1965_s8 + $0x150] sm:$0xff] %vm445_vm0, %v1294_v8  ;;  %v812_v7 = vmax.f32 %v736_v3, 0.0 }
 0x282   : > { %v1035_v11 = vpop.f32.mrf.mxu2 }
 0x283   : > { %v1036_v13 = vadd.f32 %v2351_v62, %v1035_v11  ;;  %v849_v11 = vpack.c.bf16 %v812_v7, %v811_v6 }
 0x285   : > { %1151 = vst.msk [vmem:[%s1967_s9 + $0x158] sm:$0xff] %vm445_vm0, %v1036_v13  ;;  %v1295_v16 = vadd.f32 %v1223_v12, %v1036_v13  ;;  %v740_v13 = vpop.f32.mrf.mxu3 }
 0x287   : > { %1367 = vst.msk [vmem:[%s1965_s8 + $0x158] sm:$0xff] %vm445_vm0, %v1295_v16  ;;  %1077 = vmatmul.bf16.gmra.mxu2 %v845_v15  ;;  %v1232_v15 = vld [vmem:[%s1950_s19 + $0x1a0] sm:$0xff] }
 0x28a   : > { %v1038_v17 = vpop.f32.mrf.mxu2 }
 0x28b   : > { %v1039_v19 = vadd.f32 %v2351_v62, %v1038_v17  ;;  %v739_v17 = vadd.f32 %v2273_v60, %v738_v5  ;;  %v1244_v5 = vld [vmem:[%s1950_s19 + $0x200] sm:$0xff] }
 0x28d   : > { %1152 = vst.msk [vmem:[%s1967_s9 + $0x160] sm:$0xff] %vm445_vm0, %v1039_v19  ;;  %v1296_v22 = vadd.f32 %v1224_v18, %v1039_v19  ;;  %v741_v18 = vadd.f32 %v2273_v60, %v740_v13  ;;  %v813_v20 = vmax.f32 %v739_v17, 0.0  ;;  %v1246_v13 = vld [vmem:[%s1950_s19 + $0x210] sm:$0xff]  ;;  %v1247_v17 = vld [vmem:[%s1950_s19 + $0x218] sm:$0xff] }
 0x28f   : > { %1368 = vst.msk [vmem:[%s1965_s8 + $0x160] sm:$0xff] %vm445_vm0, %v1296_v22  ;;  %v814_v21 = vmax.f32 %v741_v18, 0.0 }
 0x291   : > { %v850_v25 = vpack.c.bf16 %v814_v21, %v813_v20  ;;  %v1248_v21 = vld [vmem:[%s1950_s19 + $0x220] sm:$0xff] }
 0x292   : > { %v1040_v26 = vpop.f32.mrf.mxu2 }
 0x293   : > { %v1041_v28 = vadd.f32 %v2351_v62, %v1040_v26 }
 0x295   : > { %1153 = vst.msk [vmem:[%s1967_s9 + $0x168] sm:$0xff] %vm445_vm0, %v1041_v28  ;;  %v1297_v30 = vadd.f32 %v1225_v27, %v1041_v28  ;;  %v1234_v27 = vld [vmem:[%s1950_s19 + $0x1b0] sm:$0xff] }
 0x297   : > { %1369 = vst.msk [vmem:[%s1965_s8 + $0x168] sm:$0xff] %vm445_vm0, %v1297_v30  ;;  %1082 = vmatmul.bf16.gmra.mxu2 %v846_v29 }
 0x29a   : > { %v1043_v32 = vpop.f32.mrf.mxu2 }
 0x29b   : > { %v1044_v34 = vadd.f32 %v2351_v62, %v1043_v32 }
 0x29d   : > { %1154 = vst.msk [vmem:[%s1967_s9 + $0x170] sm:$0xff] %vm445_vm0, %v1044_v34  ;;  %v1298_v37 = vadd.f32 %v1226_v33, %v1044_v34 }
 0x29f   : > { %1370 = vst.msk [vmem:[%s1965_s8 + $0x170] sm:$0xff] %vm445_vm0, %v1298_v37 }
 0x2a2   : > { %v1045_v41 = vpop.f32.mrf.mxu2 }
 0x2a3   : > { %v1046_v44 = vadd.f32 %v2351_v62, %v1045_v41 }
 0x2a5   : > { %1155 = vst.msk [vmem:[%s1967_s9 + $0x178] sm:$0xff] %vm445_vm0, %v1046_v44  ;;  %v1299_v46 = vadd.f32 %v1227_v42, %v1046_v44  ;;  %v1238_v44 = vld [vmem:[%s1950_s19 + $0x1d0] sm:$0xff] }
 0x2a7   : > { %1371 = vst.msk [vmem:[%s1965_s8 + $0x178] sm:$0xff] %vm445_vm0, %v1299_v46  ;;  %1087 = vmatmul.bf16.gmra.mxu2 %v847_v45 }
 0x2aa   : > { %v1048_v47 = vpop.f32.mrf.mxu2 }
 0x2ab   : > { %v1049_v49 = vadd.f32 %v2351_v62, %v1048_v47 }
 0x2ad   : > { %1156 = vst.msk [vmem:[%s1967_s9 + $0x180] sm:$0xff] %vm445_vm0, %v1049_v49  ;;  %v1300_v53 = vadd.f32 %v1228_v48, %v1049_v49  ;;  %v1239_v48 = vld [vmem:[%s1950_s19 + $0x1d8] sm:$0xff] }
 0x2af   : > { %1372 = vst.msk [vmem:[%s1965_s8 + $0x180] sm:$0xff] %vm445_vm0, %v1300_v53 }
 0x2b2   : > { %v1050_v38 = vpop.f32.mrf.mxu2 }
 0x2b3   : > { %v1051_v57 = vadd.f32 %v2351_v62, %v1050_v38  ;;  %v1241_v38 = vld [vmem:[%s1950_s19 + $0x1e8] sm:$0xff] }
 0x2b5   : > { %1157 = vst.msk [vmem:[%s1967_s9 + $0x188] sm:$0xff] %vm445_vm0, %v1051_v57  ;;  %v1301_v59 = vadd.f32 %v1229_v56, %v1051_v57 }
 0x2b7   : > { %1373 = vst.msk [vmem:[%s1965_s8 + $0x188] sm:$0xff] %vm445_vm0, %v1301_v59  ;;  %1092 = vmatmul.bf16.gmra.mxu2 %v848_v58  ;;  %v1242_v59 = vld [vmem:[%s1950_s19 + $0x1f0] sm:$0xff] }
 0x2ba   : > { %v1053_v63 = vpop.f32.mrf.mxu2 }
 0x2bb   : > { %v1054_v1 = vadd.f32 %v2351_v62, %v1053_v63 }
 0x2bd   : > { %1158 = vst.msk [vmem:[%s1967_s9 + $0x190] sm:$0xff] %vm445_vm0, %v1054_v1  ;;  %v1302_v4 = vadd.f32 %v1230_v0, %v1054_v1  ;;  %v1243_v1 = vld [vmem:[%s1950_s19 + $0x1f8] sm:$0xff] }
 0x2bf   : > { %1374 = vst.msk [vmem:[%s1965_s8 + $0x190] sm:$0xff] %vm445_vm0, %v1302_v4 }
 0x2c2   : > { %v1055_v8 = vpop.f32.mrf.mxu2 }
 0x2c3   : > { %v1056_v10 = vadd.f32 %v2351_v62, %v1055_v8 }
 0x2c5   : > { %1159 = vst.msk [vmem:[%s1967_s9 + $0x198] sm:$0xff] %vm445_vm0, %v1056_v10  ;;  %v1303_v12 = vadd.f32 %v1231_v9, %v1056_v10  ;;  %v1245_v9 = vld [vmem:[%s1950_s19 + $0x208] sm:$0xff] }
 0x2c7   : > { %1375 = vst.msk [vmem:[%s1965_s8 + $0x198] sm:$0xff] %vm445_vm0, %v1303_v12  ;;  %1097 = vmatmul.bf16.gmra.mxu2 %v849_v11 }
 0x2ca   : > { %v1058_v14 = vpop.f32.mrf.mxu2 }
 0x2cb   : > { %v1059_v16 = vadd.f32 %v2351_v62, %v1058_v14 }
 0x2cd   : > { %1160 = vst.msk [vmem:[%s1967_s9 + $0x1a0] sm:$0xff] %vm445_vm0, %v1059_v16  ;;  %v1304_v19 = vadd.f32 %v1232_v15, %v1059_v16 }
 0x2cf   : > { %1376 = vst.msk [vmem:[%s1965_s8 + $0x1a0] sm:$0xff] %vm445_vm0, %v1304_v19 }
 0x2d2   : > { %v1060_v22 = vpop.f32.mrf.mxu2 }
 0x2d3   : > { %v1061_v24 = vadd.f32 %v2351_v62, %v1060_v22 }
 0x2d5   : > { %1161 = vst.msk [vmem:[%s1967_s9 + $0x1a8] sm:$0xff] %vm445_vm0, %v1061_v24  ;;  %v1305_v60 = vadd.f32 %v1233_v23, %v1061_v24 }
 0x2d7   : > { %1377 = vst.msk [vmem:[%s1965_s8 + $0x1a8] sm:$0xff] %vm445_vm0, %v1305_v60  ;;  %1102 = vmatmul.bf16.gmra.mxu2 %v850_v25  ;;  %v1249_v25 = vld [vmem:[%s1950_s19 + $0x228] sm:$0xff] }
 0x2da   : > { %v1063_v26 = vpop.f32.mrf.mxu2 }
 0x2db   : > { %v1064_v28 = vadd.f32 %v2351_v62, %v1063_v26 }
 0x2dd   : > { %1162 = vst.msk [vmem:[%s1967_s9 + $0x1b0] sm:$0xff] %vm445_vm0, %v1064_v28  ;;  %v1306_v29 = vadd.f32 %v1234_v27, %v1064_v28  ;;  %v1250_v28 = vld [vmem:[%s1950_s19 + $0x230] sm:$0xff] }
 0x2df   : > { %1378 = vst.msk [vmem:[%s1965_s8 + $0x1b0] sm:$0xff] %vm445_vm0, %v1306_v29 }
 0x2e2   : > { %v1065_v30 = vpop.f32.mrf.mxu2 }
 0x2e3   : > { %v1066_v32 = vadd.f32 %v2351_v62, %v1065_v30 }
 0x2e5   : > { %1163 = vst.msk [vmem:[%s1967_s9 + $0x1b8] sm:$0xff] %vm445_vm0, %v1066_v32  ;;  %v1307_v33 = vadd.f32 %v1235_v31, %v1066_v32  ;;  %v1251_v32 = vld [vmem:[%s1950_s19 + $0x238] sm:$0xff]  ;;  %s1693_s19 = scalar_lea.hbm %s2577_s7, 1152 }
 0x2e6   : > { %p1695_p1 = scmp.lt.s32.totalorder %s1693_s19, %s1689_s21 }
 0x2e7   : > { %1379 = vst.msk [vmem:[%s1965_s8 + $0x1b8] sm:$0xff] %vm445_vm0, %v1307_v33 }
 0x2e8   : > { %p1696_p2 = por %p1695_p1, %p1694_p0 }
 0x2ea   : > { %v1068_v34 = vpop.f32.mrf.mxu2  ;;  %p1697_p3 = pnand %p1696_p2, %p1692_p13 }
 0x2eb   : > { %v1069_v36 = vadd.f32 %v2351_v62, %v1068_v34 }
 0x2ed   : > { %1164 = vst.msk [vmem:[%s1967_s9 + $0x1c0] sm:$0xff] %vm445_vm0, %v1069_v36  ;;  %v1308_v37 = vadd.f32 %v1236_v35, %v1069_v36 }
 0x2ef   : > { %1380 = vst.msk [vmem:[%s1965_s8 + $0x1c0] sm:$0xff] %vm445_vm0, %v1308_v37 }
 0x2f2   : > { %v1070_v39 = vpop.f32.mrf.mxu2 }
 0x2f3   : > { %v1071_v41 = vadd.f32 %v2351_v62, %v1070_v39 }
 0x2f5   : > { %1165 = vst.msk [vmem:[%s1967_s9 + $0x1c8] sm:$0xff] %vm445_vm0, %v1071_v41  ;;  %v1309_v42 = vadd.f32 %v1237_v40, %v1071_v41 }
 0x2f7   : > { %1381 = vst.msk [vmem:[%s1965_s8 + $0x1c8] sm:$0xff] %vm445_vm0, %v1309_v42 }
 0x2fa   : > { %v1073_v43 = vpop.f32.mrf.mxu2 }
 0x2fb   : > { %v1074_v45 = vadd.f32 %v2351_v62, %v1073_v43 }
 0x2fd   : > { %1166 = vst.msk [vmem:[%s1967_s9 + $0x1d0] sm:$0xff] %vm445_vm0, %v1074_v45  ;;  %v1310_v46 = vadd.f32 %v1238_v44, %v1074_v45 }
 0x2ff   : > { %1382 = vst.msk [vmem:[%s1965_s8 + $0x1d0] sm:$0xff] %vm445_vm0, %v1310_v46 }
 0x302   : > { %v1075_v47 = vpop.f32.mrf.mxu2 }
 0x303   : > { %v1076_v49 = vadd.f32 %v2351_v62, %v1075_v47 }
 0x305   : > { %1167 = vst.msk [vmem:[%s1967_s9 + $0x1d8] sm:$0xff] %vm445_vm0, %v1076_v49  ;;  %v1311_v50 = vadd.f32 %v1239_v48, %v1076_v49 }
 0x307   : > { %1383 = vst.msk [vmem:[%s1965_s8 + $0x1d8] sm:$0xff] %vm445_vm0, %v1311_v50 }
 0x30a   : > { %v1078_v51 = vpop.f32.mrf.mxu2 }
 0x30b   : > { %v1079_v53 = vadd.f32 %v2351_v62, %v1078_v51 }
 0x30d   : > { %1168 = vst.msk [vmem:[%s1967_s9 + $0x1e0] sm:$0xff] %vm445_vm0, %v1079_v53  ;;  %v1312_v54 = vadd.f32 %v1240_v52, %v1079_v53 }
 0x30f   : > { %1384 = vst.msk [vmem:[%s1965_s8 + $0x1e0] sm:$0xff] %vm445_vm0, %v1312_v54 }
 0x312   : > { %v1080_v55 = vpop.f32.mrf.mxu2 }
 0x313   : > { %v1081_v56 = vadd.f32 %v2351_v62, %v1080_v55 }
 0x315   : > { %1169 = vst.msk [vmem:[%s1967_s9 + $0x1e8] sm:$0xff] %vm445_vm0, %v1081_v56  ;;  %v1313_v57 = vadd.f32 %v1241_v38, %v1081_v56 }
 0x317   : > { %1385 = vst.msk [vmem:[%s1965_s8 + $0x1e8] sm:$0xff] %vm445_vm0, %v1313_v57 }
 0x31a   : > { %v1083_v58 = vpop.f32.mrf.mxu2 }
 0x31b   : > { %v1084_v61 = vadd.f32 %v2351_v62, %v1083_v58 }
 0x31d   : > { %1170 = vst.msk [vmem:[%s1967_s9 + $0x1f0] sm:$0xff] %vm445_vm0, %v1084_v61  ;;  %v1314_v63 = vadd.f32 %v1242_v59, %v1084_v61 }
 0x31f   : > { %1386 = vst.msk [vmem:[%s1965_s8 + $0x1f0] sm:$0xff] %vm445_vm0, %v1314_v63 }
 0x322   : > { %v1085_v0 = vpop.f32.mrf.mxu2 }
 0x323   : > { %v1086_v2 = vadd.f32 %v2351_v62, %v1085_v0 }
 0x325   : > { %1171 = vst.msk [vmem:[%s1967_s9 + $0x1f8] sm:$0xff] %vm445_vm0, %v1086_v2  ;;  %v1315_v3 = vadd.f32 %v1243_v1, %v1086_v2 }
 0x327   : > { %1387 = vst.msk [vmem:[%s1965_s8 + $0x1f8] sm:$0xff] %vm445_vm0, %v1315_v3 }
 0x32a   : > { %v1088_v4 = vpop.f32.mrf.mxu2 }
 0x32b   : > { %v1089_v6 = vadd.f32 %v2351_v62, %v1088_v4 }
 0x32d   : > { %1172 = vst.msk [vmem:[%s1967_s9 + $0x200] sm:$0xff] %vm445_vm0, %v1089_v6  ;;  %v1316_v7 = vadd.f32 %v1244_v5, %v1089_v6 }
 0x32f   : > { %1388 = vst.msk [vmem:[%s1965_s8 + $0x200] sm:$0xff] %vm445_vm0, %v1316_v7 }
 0x332   : > { %v1090_v8 = vpop.f32.mrf.mxu2 }
 0x333   : > { %v1091_v10 = vadd.f32 %v2351_v62, %v1090_v8 }
 0x335   : > { %1173 = vst.msk [vmem:[%s1967_s9 + $0x208] sm:$0xff] %vm445_vm0, %v1091_v10  ;;  %v1317_v11 = vadd.f32 %v1245_v9, %v1091_v10 }
 0x337   : > { %1389 = vst.msk [vmem:[%s1965_s8 + $0x208] sm:$0xff] %vm445_vm0, %v1317_v11 }
 0x33a   : > { %v1093_v12 = vpop.f32.mrf.mxu2 }
 0x33b   : > { %v1094_v14 = vadd.f32 %v2351_v62, %v1093_v12 }
 0x33d   : > { %1174 = vst.msk [vmem:[%s1967_s9 + $0x210] sm:$0xff] %vm445_vm0, %v1094_v14  ;;  %v1318_v15 = vadd.f32 %v1246_v13, %v1094_v14 }
 0x33f   : > { %1390 = vst.msk [vmem:[%s1965_s8 + $0x210] sm:$0xff] %vm445_vm0, %v1318_v15 }
 0x342   : > { %v1095_v16 = vpop.f32.mrf.mxu2 }
 0x343   : > { %v1096_v18 = vadd.f32 %v2351_v62, %v1095_v16 }
 0x345   : > { %1175 = vst.msk [vmem:[%s1967_s9 + $0x218] sm:$0xff] %vm445_vm0, %v1096_v18  ;;  %v1319_v19 = vadd.f32 %v1247_v17, %v1096_v18 }
 0x347   : > { %1391 = vst.msk [vmem:[%s1965_s8 + $0x218] sm:$0xff] %vm445_vm0, %v1319_v19 }
 0x34a   : > { %v1098_v20 = vpop.f32.mrf.mxu2 }
 0x34b   : > { %v1099_v22 = vadd.f32 %v2351_v62, %v1098_v20 }
 0x34d   : > { %1176 = vst.msk [vmem:[%s1967_s9 + $0x220] sm:$0xff] %vm445_vm0, %v1099_v22  ;;  %v1320_v23 = vadd.f32 %v1248_v21, %v1099_v22 }
 0x34f   : > { %1392 = vst.msk [vmem:[%s1965_s8 + $0x220] sm:$0xff] %vm445_vm0, %v1320_v23 }
 0x352   : > { %v1100_v24 = vpop.f32.mrf.mxu2 }
 0x353   : > { %v1101_v60 = vadd.f32 %v2351_v62, %v1100_v24 }
 0x355   : > { %1177 = vst.msk [vmem:[%s1967_s9 + $0x228] sm:$0xff] %vm445_vm0, %v1101_v60  ;;  %v1321_v26 = vadd.f32 %v1249_v25, %v1101_v60 }
 0x357   : > { %1393 = vst.msk [vmem:[%s1965_s8 + $0x228] sm:$0xff] %vm445_vm0, %v1321_v26 }
 0x35a   : > { %v1103_v27 = vpop.f32.mrf.mxu2 }
 0x35b   : > { %v1104_v29 = vadd.f32 %v2351_v62, %v1103_v27 }
 0x35d   : > { %1178 = vst.msk [vmem:[%s1967_s9 + $0x230] sm:$0xff] %vm445_vm0, %v1104_v29  ;;  %v1322_v30 = vadd.f32 %v1250_v28, %v1104_v29 }
 0x35f   : > { %1394 = vst.msk [vmem:[%s1965_s8 + $0x230] sm:$0xff] %vm445_vm0, %v1322_v30 }
 0x362   : > { %v1105_v31 = vpop.f32.mrf.mxu2 }
 0x363   : > { %v1106_v33 = vadd.f32 %v2351_v62, %v1105_v31 }
 0x365   : > { %1179 = vst.msk [vmem:[%s1967_s9 + $0x238] sm:$0xff] %vm445_vm0, %v1106_v33  ;;  %v1323_v34 = vadd.f32 %v1251_v32, %v1106_v33 }
 0x366   : > { %1700 = shalt.err (!%p1697_p3)
}
 0x367   : > { %s1737_s14 = smov 128   ;;  %s1738_s9 = smov 8   ;;  %1395 = vst.msk [vmem:[%s1965_s8 + $0x238] sm:$0xff] %vm445_vm0, %v1323_v34 }
 0x368   : > { %1628 = dma.vmem_to_hbm [thread:$0]  (%p1817_p5), %s1419_s23, 9216, %s1421_s29, %s1402_s28, %s1737_s14, %s1737_s14, %s1738_s9  }
 0x369 PF: > { %p1634_p4 = scmp.ge.s32.totalorder %s1735_s27, 2  ;;  %s1443_s20 = sand.u32 1, %s1723_s24  }
 0x36a   : > { %s1444_s22 = scalar_lea.sflag [#allocation3], %s1443_s20 }
 0x36b   : > { %p1631_p7 = pnand %p1634_p4, %p1821_p6 }
 0x36d   : > { %p1632_p8 = pneg %p1631_p7 }
 0x36f   : > { %1718 = dma.done.wait (%p1632_p8), %s1444_s22, 9216  }
 0x370   : > { %1720 = vsyncadd (%p1632_p8), %s1444_s22, 4294958080  ;;  %p18_p5 = scmp.ge.s32.totalorder %s1804_s30, 4   ;;  %s2580_s24 = smov %s1727_s25 }
 0x371   : > { %s2581_s25 = smov %s1731_s26  ;;  %s2582_s26 = smov %s1815_s10 }
 0x372   : > { %s2583_s27 = smov %s1804_s30  ;;  %20 = sbr.rel (!%p18_p5) target bundleno = 3 (0x3), region = 94 }
 0x377   :  { %1450 = vsyncpa [#allocation3], 1 }
 0x378   :  { %1452 = vsyncpa [#allocation3 + $0x1], 1 }

// kernel: ffno_forward.14
= control target key start
LH: loop header
LB: loop body
LE: loop exit
PB: predicated region body
PF: predicated region fallthrough
CT: control target
= control target key end

     0   :  { %13 = vsyncpa [#allocation3], 0  ;;  %s2570_s0 = inlined_call_operand.vmem [shape: f32[1152,32], index: 0, kind: input, shape index: {}]   ;;  %s2571_s1 = inlined_call_operand.vmem [shape: f32[1152,32], index: 1, kind: input, shape index: {}]   ;;  %s2572_s2 = inlined_call_operand.vmem [shape: bf16[32,128], index: 2, kind: input, shape index: {}]   ;;  %s2573_s3 = inlined_call_operand.vmem [shape: f32[1,128], index: 3, kind: input, shape index: {}]   ;;  %s2574_s4 = inlined_call_operand.vmem [shape: bf16[128,32], index: 4, kind: input, shape index: {}]   ;;  %s2575_s5 = inlined_call_operand.vmem [shape: f32[1,32], index: 5, kind: input, shape index: {}]   ;;  %s2576_s6 = inlined_call_operand.hbm [shape: f32[1152,32], index: 6, kind: output, shape index: {0}]   ;;  %s2577_s7 = inlined_call_operand.vmem [shape: f32[1152,32], index: 7, kind: output, shape index: {1}]  }
   0x1   :  { %15 = vsyncpa [#allocation3 + $0x1], 0  ;;  %s1779_s24 = smov 0   ;;  %s1781_s25 = smov 0  }
   0x2   :  { %s1783_s26 = smov 0   ;;  %s1785_s27 = smov 0  }
   0x3 LB: > { %s1800_s28 = sadd.s32 4294967295, %s1735_s27   ;;  %s1520_s29 = sadd.s32 4294967294, %s1735_s27   ;;  %s1735_s27 = sphi %s1785_s27, %s2583_s27   ;;  %s1731_s26 = sphi %s1783_s26, %s2582_s26   ;;  %s1727_s25 = sphi %s1781_s25, %s2581_s25   ;;  %s1723_s24 = sphi %s1779_s24, %s2580_s24  }
   0x4   : > { %s1804_s30 = sadd.s32 1, %s1735_s27   ;;  %s164_s8 = sadd.s32 1, %s1731_s26 }
   0x5   : > { %s161_s9 = ssub.s32 %s1735_s27, %s1804_s30  ;;  %p174_p0 = scmp.ne.s32.totalorder %s1731_s26, %s1727_s25 }
   0x6   : > { %p162_p1 = scmp.eq.s32.totalorder %s161_s9, 0  ;;  %p175_p2 = scmp.eq.s32.totalorder %s1800_s28, 1 }
   0x7   : > { %p180_p3 = scmp.ne.s32.totalorder %s1727_s25, %s1723_s24  ;;  %p181_p4 = scmp.eq.s32.totalorder %s1520_s29, 1 }
   0x8   : > { %s1815_s10 = scalar_select %p162_p1, %s1731_s26, %s164_s8  }
   0x9   : > { %p1817_p5 = por %p175_p2, %p174_p0  ;;  %p1821_p6 = por %p181_p4, %p180_p3 }
   0xa   : > { %p1523_p7 = scmp.ge.s32.totalorder %s1735_s27, 1  ;;  %p255_p8 = scmp.lt.s32.totalorder %s1735_s27, 3 }
   0xc   : > { %p256_p9 = pnand %p1523_p7, %p255_p8 }
   0xd   : > { %s297_s15 = smul.u32 (!%p256_p9), 72, %s1800_s28  ;;  %s287_s14 = sand.u32 (!%p256_p9), 1, %s1727_s25  }
   0xe   : > { %259 = sbr.rel (%p256_p9) target bundleno = 875 (0x36b), region = 44 }
   0xf   : > { %p298_p10 = scmp.lt.s32.totalorder (!%p256_p9), %s297_s15, 143  ;;  %s1627_s22 = smul.u32 (!%p256_p9), 576, %s287_s14 }
  0x10   : > { %s1616_s16 = smul.u32 (!%p256_p9), 576, %s1800_s28  ;;  %s1397_s28 = scalar_lea.sflag (!%p256_p9), [#allocation3], %s287_s14 }
  0x11   : > { %s1969_s9 = scalar_lea.vmem (!%p256_p9), [#allocation2], %s1627_s22 }
  0x12   : > { %s1413_s22 = scalar_lea.hbm (!%p256_p9), %s2576_s6, %s1616_s16  ;;  %s1414_s23 = sshll.u32 (!%p256_p9), %s1969_s9, 4  ;;  %s1415_s23 = int_to_ptr.vmem [resolvable:$true] %s1414_s23 }
  0x13   : > { %v1607_v0 = vld [vmem:[%s2572_s2 + $0x8] sm:$0xff]  ;;  %v1606_v1 = vld [vmem:[%s2572_s2] sm:$0xff]  ;;  %s2585_s15 = smov (!%p298_p10, %s297_s15), 143  ;;  %vm445_vm0 = vcmask 261120   ;;  %v1615_v17 = vld [vmem:[%s2574_s4 + $0x38] sm:$0xff]  ;;  %s1416_s29 = sshll.u32 %s1413_s22, 4  ;;  %s1417_s29 = int_to_ptr.hbm [resolvable:$true] %s1416_s29 }
  0x14   : > { %560 = vmatpush.bf16.msra.mxu0 %v1607_v0  ;;  %1617 = vmatpush.bf16.msra.mxu3 %v1607_v0  ;;  %s1834_s18 = sshll.u32 %s2585_s15, 3  ;;  %v1614_v21 = vld [vmem:[%s2574_s4 + $0x30] sm:$0xff]  ;;  %v1613_v22 = vld [vmem:[%s2574_s4 + $0x28] sm:$0xff]  ;;  %v1612_v23 = vld [vmem:[%s2574_s4 + $0x20] sm:$0xff]  ;;  %s1693_s15 = scalar_lea.hbm %s2576_s6, 1152 }
  0x15   : > { %s1840_s21 = scalar_lea.vmem %s2571_s1, %s1834_s18  ;;  %919 = vmatpush.bf16.msra.mxu1 %v1615_v17  ;;  %1619 = vmatpush.bf16.msra.mxu2 %v1615_v17  ;;  %v1611_v26 = vld [vmem:[%s2574_s4 + $0x18] sm:$0xff]  ;;  %v1610_v28 = vld [vmem:[%s2574_s4 + $0x10] sm:$0xff]  ;;  %v1609_v29 = vld [vmem:[%s2574_s4 + $0x8] sm:$0xff]  ;;  %s1948_s17 = scalar_lea.vmem %s2570_s0, %s1834_s18 }
  0x16   : > { %v317_v2 = vld [vmem:[%s1840_s21] sm:$0xff]  ;;  %v318_v3 = vld [vmem:[%s1840_s21 + $0x8] sm:$0xff]  ;;  %v319_v5 = vld [vmem:[%s1840_s21 + $0x10] sm:$0xff]  ;;  %s1961_s8 = scalar_lea.vmem %s2577_s7, %s1834_s18  ;;  %s1687_s18 = sshra.s32 %s1417_s29, 4  ;;  %s1688_s18 = int_to_ptr.hbm [resolvable:$true] %s1687_s18 }
  0x17   : > { %v389_v4 = vpack.c.bf16 %v318_v3, %v317_v2  ;;  %v320_v6 = vld [vmem:[%s1840_s21 + $0x18] sm:$0xff]  ;;  %v321_v8 = vld [vmem:[%s1840_s21 + $0x20] sm:$0xff]  ;;  %v322_v9 = vld [vmem:[%s1840_s21 + $0x28] sm:$0xff]  ;;  %p1694_p0 = scmp.lt.s32.totalorder %s1688_s18, %s2576_s6 }
  0x18   : > { %561 = vmatpush.bf16.msra.mxu0 %v1606_v1  ;;  %1618 = vmatpush.bf16.msra.mxu3 %v1606_v1  ;;  %v390_v7 = vpack.c.bf16 %v320_v6, %v319_v5  ;;  %v391_v10 = vpack.c.bf16 %v322_v9, %v321_v8  ;;  %v323_v11 = vld [vmem:[%s1840_s21 + $0x30] sm:$0xff]  ;;  %v324_v12 = vld [vmem:[%s1840_s21 + $0x38] sm:$0xff]  ;;  %v325_v14 = vld [vmem:[%s1840_s21 + $0x40] sm:$0xff] }
  0x19   : > { %v392_v13 = vpack.c.bf16 %v324_v12, %v323_v11  ;;  %v326_v15 = vld [vmem:[%s1840_s21 + $0x48] sm:$0xff]  ;;  %v327_v18 = vld [vmem:[%s1840_s21 + $0x50] sm:$0xff]  ;;  %v328_v19 = vld [vmem:[%s1840_s21 + $0x58] sm:$0xff]  ;;  %920 = vmatpush.bf16.msra.mxu1 %v1614_v21  ;;  %1620 = vmatpush.bf16.msra.mxu2 %v1614_v21 }
  0x1a   : > { %v393_v16 = vpack.c.bf16 %v326_v15, %v325_v14  ;;  %v394_v20 = vpack.c.bf16 %v328_v19, %v327_v18  ;;  %v329_v24 = vld [vmem:[%s1840_s21 + $0x60] sm:$0xff]  ;;  %v330_v25 = vld [vmem:[%s1840_s21 + $0x68] sm:$0xff]  ;;  %v331_v31 = vld [vmem:[%s1840_s21 + $0x70] sm:$0xff] }
  0x1b   : > { %1535 = vmatmul.msk.bf16.vlgmr.msra.gmra.mxu0 %vm445_vm0, %v389_v4  ;;  %v395_v27 = vpack.c.bf16 %v330_v25, %v329_v24  ;;  %v1608_v30 = vld [vmem:[%s2574_s4] sm:$0xff]  ;;  %v332_v32 = vld [vmem:[%s1840_s21 + $0x78] sm:$0xff]  ;;  %v334_v35 = vld [vmem:[%s1840_s21 + $0x88] sm:$0xff] }
  0x1c   : > { %v396_v33 = vpack.c.bf16 %v332_v32, %v331_v31  ;;  %v333_v34 = vld [vmem:[%s1840_s21 + $0x80] sm:$0xff]  ;;  %v335_v44 = vld [vmem:[%s1840_s21 + $0x90] sm:$0xff]  ;;  %v336_v45 = vld [vmem:[%s1840_s21 + $0x98] sm:$0xff] }
  0x1d   : > { %921 = vmatpush.bf16.msra.mxu1 %v1613_v22  ;;  %1621 = vmatpush.bf16.msra.mxu2 %v1613_v22  ;;  %v397_v36 = vpack.c.bf16 %v334_v35, %v333_v34  ;;  %v1895_v38 = vld [vmem:[%s2573_s3] ss:$0 sm:$0xff]  ;;  %v398_v47 = vpack.c.bf16 %v336_v45, %v335_v44  ;;  %v338_v55 = vld [vmem:[%s1840_s21 + $0xa8] sm:$0xff]  ;;  %v339_v0 = vld [vmem:[%s1840_s21 + $0xb0] sm:$0xff] }
  0x1e   : > { %v337_v54 = vld [vmem:[%s1840_s21 + $0xa0] sm:$0xff]  ;;  %v340_v1 = vld [vmem:[%s1840_s21 + $0xb8] sm:$0xff]  ;;  %v342_v11 = vld [vmem:[%s1840_s21 + $0xc8] sm:$0xff] }
  0x1f   : > { %v399_v57 = vpack.c.bf16 %v338_v55, %v337_v54  ;;  %v400_v3 = vpack.c.bf16 %v340_v1, %v339_v0  ;;  %v344_v21 = vld [vmem:[%s1840_s21 + $0xd8] sm:$0xff]  ;;  %v346_v31 = vld [vmem:[%s1840_s21 + $0xe8] sm:$0xff] }
  0x21   : > { %922 = vmatpush.bf16.msra.mxu1 %v1612_v23  ;;  %1622 = vmatpush.bf16.msra.mxu2 %v1612_v23 }
  0x25   : > { %923 = vmatpush.bf16.msra.mxu1 %v1611_v26  ;;  %1623 = vmatpush.bf16.msra.mxu2 %v1611_v26 }
  0x29   : > { %924 = vmatpush.bf16.msra.mxu1 %v1610_v28  ;;  %1624 = vmatpush.bf16.msra.mxu2 %v1610_v28 }
  0x2b   : > { %1536 = vmatmul.msk.bf16.gmra.mxu0 %vm445_vm0, %v390_v7 }
  0x2d   : > { %925 = vmatpush.bf16.msra.mxu1 %v1609_v29  ;;  %1625 = vmatpush.bf16.msra.mxu2 %v1609_v29 }
  0x31   : > { %926 = vmatpush.bf16.msra.mxu1 %v1608_v30  ;;  %1626 = vmatpush.bf16.msra.mxu2 %v1608_v30  ;;  %v345_v30 = vld [vmem:[%s1840_s21 + $0xe0] sm:$0xff] }
  0x3b   : > { %1537 = vmatmul.msk.bf16.gmra.mxu0 %vm445_vm0, %v391_v10  ;;  %v341_v10 = vld [vmem:[%s1840_s21 + $0xc0] sm:$0xff] }
  0x4b   : > { %1538 = vmatmul.msk.bf16.gmra.mxu0 %vm445_vm0, %v392_v13  ;;  %v401_v13 = vpack.c.bf16 %v342_v11, %v341_v10  ;;  %v357_v10 = vld [vmem:[%s1840_s21 + $0x140] sm:$0xff]  ;;  %v358_v11 = vld [vmem:[%s1840_s21 + $0x148] sm:$0xff] }
  0x5b   : > { %1539 = vmatmul.msk.bf16.gmra.mxu0 %vm445_vm0, %v393_v16 }
  0x6b   : > { %1540 = vmatmul.msk.bf16.gmra.mxu0 %vm445_vm0, %v394_v20  ;;  %v343_v20 = vld [vmem:[%s1840_s21 + $0xd0] sm:$0xff] }
  0x6c   : > { %v402_v23 = vpack.c.bf16 %v344_v21, %v343_v20 }
  0x7b   : > { %1541 = vmatmul.msk.bf16.gmra.mxu0 %vm445_vm0, %v395_v27 }
  0x8b   : > { %1542 = vmatmul.msk.bf16.gmra.mxu0 %vm445_vm0, %v396_v33  ;;  %v403_v33 = vpack.c.bf16 %v346_v31, %v345_v30  ;;  %v359_v31 = vld [vmem:[%s1840_s21 + $0x150] sm:$0xff] }
  0x98   : > { %v563_v37 = vpop.f32.mrf.mxu0 }
  0x99   : > { %v564_v39 = vadd.f32 %v1895_v38, %v563_v37 }
  0x9b   : > { %1543 = vmatmul.msk.bf16.gmra.mxu0 %vm445_vm0, %v397_v36  ;;  %v743_v42 = vmax.f32 %v564_v39, 0.0 }
  0xa0   : > { %v565_v40 = vpop.f32.mrf.mxu0 }
  0xa1   : > { %v566_v41 = vadd.f32 %v1895_v38, %v565_v40 }
  0xa3   : > { %v744_v43 = vmax.f32 %v566_v41, 0.0  ;;  %v347_v41 = vld [vmem:[%s1840_s21 + $0xf0] sm:$0xff] }
  0xa5   : > { %v815_v46 = vpack.c.bf16 %v744_v43, %v743_v42  ;;  %v348_v42 = vld [vmem:[%s1840_s21 + $0xf8] sm:$0xff] }
  0xa6   : > { %v404_v44 = vpack.c.bf16 %v348_v42, %v347_v41 }
  0xa7   : > { %927 = vmatmul.bf16.vlgmr.msra.gmra.mxu1 %v815_v46 }
  0xa8   : > { %v568_v48 = vpop.f32.mrf.mxu0 }
  0xa9   : > { %v569_v49 = vadd.f32 %v1895_v38, %v568_v48 }
  0xab   : > { %1544 = vmatmul.msk.bf16.gmra.mxu0 %vm445_vm0, %v398_v47  ;;  %v745_v52 = vmax.f32 %v569_v49, 0.0 }
  0xb0   : > { %v570_v50 = vpop.f32.mrf.mxu0 }
  0xb1   : > { %v571_v51 = vadd.f32 %v1895_v38, %v570_v50 }
  0xb3   : > { %v746_v53 = vmax.f32 %v571_v51, 0.0  ;;  %v349_v51 = vld [vmem:[%s1840_s21 + $0x100] sm:$0xff] }
  0xb5   : > { %v816_v56 = vpack.c.bf16 %v746_v53, %v745_v52  ;;  %v350_v52 = vld [vmem:[%s1840_s21 + $0x108] sm:$0xff] }
  0xb6   : > { %v405_v54 = vpack.c.bf16 %v350_v52, %v349_v51  ;;  %v362_v51 = vld [vmem:[%s1840_s21 + $0x168] sm:$0xff] }
  0xb7   : > { %932 = vmatmul.bf16.gmra.mxu1 %v816_v56  ;;  %v355_v56 = vld [vmem:[%s1840_s21 + $0x130] sm:$0xff] }
  0xb8   : > { %v573_v58 = vpop.f32.mrf.mxu0 }
  0xb9   : > { %v574_v59 = vadd.f32 %v1895_v38, %v573_v58 }
  0xbb   : > { %1545 = vmatmul.msk.bf16.gmra.mxu0 %vm445_vm0, %v399_v57  ;;  %v747_v62 = vmax.f32 %v574_v59, 0.0  ;;  %v356_v57 = vld [vmem:[%s1840_s21 + $0x138] sm:$0xff] }
  0xbc   : > { %v408_v58 = vpack.c.bf16 %v356_v57, %v355_v56 }
  0xbe   : > { %1554 = vmatmul.msk.bf16.vlgmr.msra.gmra.mxu3 %vm445_vm0, %v408_v58 }
  0xc0   : > { %v575_v60 = vpop.f32.mrf.mxu0 }
  0xc1   : > { %v576_v61 = vadd.f32 %v1895_v38, %v575_v60 }
  0xc3   : > { %v748_v63 = vmax.f32 %v576_v61, 0.0 }
  0xc5   : > { %v817_v2 = vpack.c.bf16 %v748_v63, %v747_v62  ;;  %v1953_v62 = vld [vmem:[%s2575_s5] ss:$0 sm:$0xff] }
  0xc7   : > { %937 = vmatmul.bf16.gmra.mxu1 %v817_v2  ;;  %v1180_v2 = vld [vmem:[%s1948_s17] sm:$0xff] }
  0xc8   : > { %v578_v4 = vpop.f32.mrf.mxu0 }
  0xc9   : > { %v579_v5 = vadd.f32 %v1895_v38, %v578_v4  ;;  %v352_v4 = vld [vmem:[%s1840_s21 + $0x118] sm:$0xff] }
  0xcb   : > { %1546 = vmatmul.msk.bf16.gmra.mxu0 %vm445_vm0, %v400_v3  ;;  %v749_v8 = vmax.f32 %v579_v5, 0.0  ;;  %v351_v3 = vld [vmem:[%s1840_s21 + $0x110] sm:$0xff] }
  0xd0   : > { %v580_v6 = vpop.f32.mrf.mxu0 }
  0xd1   : > { %v581_v7 = vadd.f32 %v1895_v38, %v580_v6 }
  0xd3   : > { %v750_v9 = vmax.f32 %v581_v7, 0.0 }
  0xd5   : > { %v818_v12 = vpack.c.bf16 %v750_v9, %v749_v8  ;;  %v406_v8 = vpack.c.bf16 %v352_v4, %v351_v3 }
  0xd7   : > { %942 = vmatmul.bf16.gmra.mxu1 %v818_v12  ;;  %v409_v12 = vpack.c.bf16 %v358_v11, %v357_v10 }
  0xd8   : > { %v583_v14 = vpop.f32.mrf.mxu0 }
  0xd9   : > { %v584_v15 = vadd.f32 %v1895_v38, %v583_v14  ;;  %v1181_v14 = vld [vmem:[%s1948_s17 + $0x8] sm:$0xff]  ;;  %1555 = vmatmul.msk.bf16.gmra.mxu3 %vm445_vm0, %v409_v12 }
  0xdb   : > { %1547 = vmatmul.msk.bf16.gmra.mxu0 %vm445_vm0, %v401_v13  ;;  %v751_v18 = vmax.f32 %v584_v15, 0.0 }
  0xe0   : > { %v585_v16 = vpop.f32.mrf.mxu0 }
  0xe1   : > { %v586_v17 = vadd.f32 %v1895_v38, %v585_v16 }
  0xe3   : > { %v752_v19 = vmax.f32 %v586_v17, 0.0 }
  0xe5   : > { %v819_v22 = vpack.c.bf16 %v752_v19, %v751_v18 }
  0xe7   : > { %947 = vmatmul.bf16.gmra.mxu1 %v819_v22 }
  0xe8   : > { %v588_v24 = vpop.f32.mrf.mxu0 }
  0xe9   : > { %v589_v25 = vadd.f32 %v1895_v38, %v588_v24  ;;  %v353_v24 = vld [vmem:[%s1840_s21 + $0x120] sm:$0xff] }
  0xeb   : > { %1548 = vmatmul.msk.bf16.gmra.mxu0 %vm445_vm0, %v402_v23  ;;  %v753_v28 = vmax.f32 %v589_v25, 0.0  ;;  %v1182_v23 = vld [vmem:[%s1948_s17 + $0x10] sm:$0xff]  ;;  %v354_v25 = vld [vmem:[%s1840_s21 + $0x128] sm:$0xff] }
  0xf0   : > { %v590_v26 = vpop.f32.mrf.mxu0 }
  0xf1   : > { %v591_v27 = vadd.f32 %v1895_v38, %v590_v26 }
  0xf3   : > { %v754_v29 = vmax.f32 %v591_v27, 0.0 }
  0xf5   : > { %v820_v32 = vpack.c.bf16 %v754_v29, %v753_v28  ;;  %v407_v29 = vpack.c.bf16 %v354_v25, %v353_v24  ;;  %v366_v24 = vld [vmem:[%s1840_s21 + $0x188] sm:$0xff] }
  0xf7   : > { %952 = vmatmul.bf16.gmra.mxu1 %v820_v32  ;;  %v360_v32 = vld [vmem:[%s1840_s21 + $0x158] sm:$0xff] }
  0xf8   : > { %v593_v34 = vpop.f32.mrf.mxu0 }
  0xf9   : > { %v594_v35 = vadd.f32 %v1895_v38, %v593_v34 }
  0xfb   : > { %1549 = vmatmul.msk.bf16.gmra.mxu0 %vm445_vm0, %v403_v33  ;;  %v755_v39 = vmax.f32 %v594_v35, 0.0  ;;  %v410_v33 = vpack.c.bf16 %v360_v32, %v359_v31  ;;  %v1183_v35 = vld [vmem:[%s1948_s17 + $0x18] sm:$0xff] }
  0xfd   : > { %1556 = vmatmul.msk.bf16.gmra.mxu3 %vm445_vm0, %v410_v33 }
 0x100   : > { %v595_v36 = vpop.f32.mrf.mxu0 }
 0x101   : > { %v596_v37 = vadd.f32 %v1895_v38, %v595_v36 }
 0x103   : > { %v756_v40 = vmax.f32 %v596_v37, 0.0 }
 0x105   : > { %v821_v43 = vpack.c.bf16 %v756_v40, %v755_v39 }
 0x107   : > { %957 = vmatmul.bf16.gmra.mxu1 %v821_v43 }
 0x108   : > { %v598_v45 = vpop.f32.mrf.mxu0 }
 0x109   : > { %v599_v46 = vadd.f32 %v1895_v38, %v598_v45  ;;  %v1184_v45 = vld [vmem:[%s1948_s17 + $0x20] sm:$0xff] }
 0x10b   : > { %1550 = vmatmul.msk.bf16.gmra.mxu0 %vm445_vm0, %v404_v44  ;;  %v757_v49 = vmax.f32 %v599_v46, 0.0 }
 0x110   : > { %v600_v47 = vpop.f32.mrf.mxu0 }
 0x111   : > { %v601_v48 = vadd.f32 %v1895_v38, %v600_v47 }
 0x113   : > { %v758_v50 = vmax.f32 %v601_v48, 0.0 }
 0x115   : > { %v822_v53 = vpack.c.bf16 %v758_v50, %v757_v49  ;;  %v361_v50 = vld [vmem:[%s1840_s21 + $0x160] sm:$0xff] }
 0x116   : > { %v411_v52 = vpack.c.bf16 %v362_v51, %v361_v50 }
 0x117   : > { %962 = vmatmul.bf16.gmra.mxu1 %v822_v53 }
 0x118   : > { %v603_v55 = vpop.f32.mrf.mxu0  ;;  %1557 = vmatmul.msk.bf16.gmra.mxu3 %vm445_vm0, %v411_v52 }
 0x119   : > { %v604_v59 = vadd.f32 %v1895_v38, %v603_v55 }
 0x11b   : > { %1551 = vmatmul.msk.bf16.gmra.mxu0 %vm445_vm0, %v405_v54  ;;  %v759_v63 = vmax.f32 %v604_v59, 0.0  ;;  %v1185_v54 = vld [vmem:[%s1948_s17 + $0x28] sm:$0xff] }
 0x120   : > { %v605_v60 = vpop.f32.mrf.mxu0 }
 0x121   : > { %v606_v61 = vadd.f32 %v1895_v38, %v605_v60 }
 0x123   : > { %v760_v0 = vmax.f32 %v606_v61, 0.0 }
 0x124   : > { %v928_v1 = vpop.f32.mrf.mxu1 }
 0x125   : > { %v929_v5 = vadd.f32 %v1953_v62, %v928_v1  ;;  %v823_v6 = vpack.c.bf16 %v760_v0, %v759_v63  ;;  %v1186_v0 = vld [vmem:[%s1948_s17 + $0x30] sm:$0xff] }
 0x127   : > { %1108 = vst.msk [vmem:[%s1961_s8] sm:$0xff] %vm445_vm0, %v929_v5  ;;  %v1252_v7 = vadd.f32 %v1180_v2, %v929_v5  ;;  %967 = vmatmul.bf16.gmra.mxu1 %v823_v6  ;;  %v363_v5 = vld [vmem:[%s1840_s21 + $0x170] sm:$0xff]  ;;  %v364_v6 = vld [vmem:[%s1840_s21 + $0x178] sm:$0xff] }
 0x128   : > { %v608_v9 = vpop.f32.mrf.mxu0 }
 0x129   : > { %1324 = vst.msk [vmem:[%s1969_s9] sm:$0xff] %vm445_vm0, %v1252_v7  ;;  %v609_v16 = vadd.f32 %v1895_v38, %v608_v9  ;;  %v412_v7 = vpack.c.bf16 %v364_v6, %v363_v5  ;;  %v1187_v9 = vld [vmem:[%s1948_s17 + $0x38] sm:$0xff] }
 0x12b   : > { %1552 = vmatmul.msk.bf16.gmra.mxu0 %vm445_vm0, %v406_v8  ;;  %v761_v20 = vmax.f32 %v609_v16, 0.0  ;;  %1558 = vmatmul.msk.bf16.gmra.mxu3 %vm445_vm0, %v412_v7 }
 0x12c   : > { %v930_v13 = vpop.f32.mrf.mxu1 }
 0x12d   : > { %v931_v15 = vadd.f32 %v1953_v62, %v930_v13 }
 0x12f   : > { %1109 = vst.msk [vmem:[%s1961_s8 + $0x8] sm:$0xff] %vm445_vm0, %v931_v15  ;;  %v1253_v17 = vadd.f32 %v1181_v14, %v931_v15 }
 0x130   : > { %v610_v18 = vpop.f32.mrf.mxu0 }
 0x131   : > { %1325 = vst.msk [vmem:[%s1969_s9 + $0x8] sm:$0xff] %vm445_vm0, %v1253_v17  ;;  %v611_v19 = vadd.f32 %v1895_v38, %v610_v18  ;;  %v1188_v18 = vld [vmem:[%s1948_s17 + $0x40] sm:$0xff] }
 0x133   : > { %v762_v21 = vmax.f32 %v611_v19, 0.0 }
 0x134   : > { %v933_v22 = vpop.f32.mrf.mxu1 }
 0x135   : > { %v934_v26 = vadd.f32 %v1953_v62, %v933_v22  ;;  %v824_v27 = vpack.c.bf16 %v762_v21, %v761_v20 }
 0x137   : > { %1110 = vst.msk [vmem:[%s1961_s8 + $0x10] sm:$0xff] %vm445_vm0, %v934_v26  ;;  %v1254_v28 = vadd.f32 %v1182_v23, %v934_v26  ;;  %972 = vmatmul.bf16.gmra.mxu1 %v824_v27  ;;  %v365_v23 = vld [vmem:[%s1840_s21 + $0x180] sm:$0xff]  ;;  %v1189_v27 = vld [vmem:[%s1948_s17 + $0x48] sm:$0xff] }
 0x138   : > { %v613_v30 = vpop.f32.mrf.mxu0  ;;  %v413_v25 = vpack.c.bf16 %v366_v24, %v365_v23 }
 0x139   : > { %1326 = vst.msk [vmem:[%s1969_s9 + $0x10] sm:$0xff] %vm445_vm0, %v1254_v28  ;;  %v614_v37 = vadd.f32 %v1895_v38, %v613_v30 }
 0x13b   : > { %1553 = vmatmul.msk.bf16.gmra.mxu0 %vm445_vm0, %v407_v29  ;;  %v763_v42 = vmax.f32 %v614_v37, 0.0  ;;  %1559 = vmatmul.msk.bf16.gmra.mxu3 %vm445_vm0, %v413_v25 }
 0x13c   : > { %v935_v34 = vpop.f32.mrf.mxu1 }
 0x13d   : > { %v936_v36 = vadd.f32 %v1953_v62, %v935_v34 }
 0x13f   : > { %1111 = vst.msk [vmem:[%s1961_s8 + $0x18] sm:$0xff] %vm445_vm0, %v936_v36  ;;  %v1255_v39 = vadd.f32 %v1183_v35, %v936_v36  ;;  %v1190_v36 = vld [vmem:[%s1948_s17 + $0x50] sm:$0xff] }
 0x140   : > { %v615_v40 = vpop.f32.mrf.mxu0 }
 0x141   : > { %1327 = vst.msk [vmem:[%s1969_s9 + $0x18] sm:$0xff] %vm445_vm0, %v1255_v39  ;;  %v616_v41 = vadd.f32 %v1895_v38, %v615_v40  ;;  %v2104_v24 = vpop.f32.mrf.mxu3 }
 0x143   : > { %v764_v43 = vmax.f32 %v616_v41, 0.0 }
 0x144   : > { %v938_v44 = vpop.f32.mrf.mxu1 }
 0x145   : > { %v939_v46 = vadd.f32 %v1953_v62, %v938_v44  ;;  %v825_v47 = vpack.c.bf16 %v764_v43, %v763_v42  ;;  %v367_v42 = vld [vmem:[%s1840_s21 + $0x190] sm:$0xff]  ;;  %v368_v43 = vld [vmem:[%s1840_s21 + $0x198] sm:$0xff] }
 0x146   : > { %v414_v44 = vpack.c.bf16 %v368_v43, %v367_v42 }
 0x147   : > { %1112 = vst.msk [vmem:[%s1961_s8 + $0x20] sm:$0xff] %vm445_vm0, %v939_v46  ;;  %v1256_v48 = vadd.f32 %v1184_v45, %v939_v46  ;;  %977 = vmatmul.bf16.gmra.mxu1 %v825_v47  ;;  %v1191_v46 = vld [vmem:[%s1948_s17 + $0x58] sm:$0xff] }
 0x148   : > { %v618_v49 = vpop.f32.mrf.mxu0 }
 0x149   : > { %1328 = vst.msk [vmem:[%s1969_s9 + $0x20] sm:$0xff] %vm445_vm0, %v1256_v48  ;;  %v619_v56 = vadd.f32 %v1895_v38, %v618_v49 }
 0x14b   : > { %v765_v60 = vmax.f32 %v619_v56, 0.0  ;;  %1560 = vmatmul.msk.bf16.gmra.mxu3 %vm445_vm0, %v414_v44 }
 0x14c   : > { %v940_v53 = vpop.f32.mrf.mxu1 }
 0x14d   : > { %v941_v55 = vadd.f32 %v1953_v62, %v940_v53 }
 0x14f   : > { %1113 = vst.msk [vmem:[%s1961_s8 + $0x28] sm:$0xff] %vm445_vm0, %v941_v55  ;;  %v1257_v57 = vadd.f32 %v1185_v54, %v941_v55  ;;  %v1192_v55 = vld [vmem:[%s1948_s17 + $0x60] sm:$0xff] }
 0x150   : > { %v620_v58 = vpop.f32.mrf.mxu0 }
 0x151   : > { %1329 = vst.msk [vmem:[%s1969_s9 + $0x28] sm:$0xff] %vm445_vm0, %v1257_v57  ;;  %v621_v59 = vadd.f32 %v1895_v38, %v620_v58 }
 0x153   : > { %v766_v61 = vmax.f32 %v621_v59, 0.0 }
 0x154   : > { %v943_v63 = vpop.f32.mrf.mxu1 }
 0x155   : > { %v944_v1 = vadd.f32 %v1953_v62, %v943_v63  ;;  %v826_v2 = vpack.c.bf16 %v766_v61, %v765_v60  ;;  %v369_v60 = vld [vmem:[%s1840_s21 + $0x1a0] sm:$0xff]  ;;  %v370_v61 = vld [vmem:[%s1840_s21 + $0x1a8] sm:$0xff] }
 0x156   : > { %v415_v63 = vpack.c.bf16 %v370_v61, %v369_v60  ;;  %v1199_v60 = vld [vmem:[%s1948_s17 + $0x98] sm:$0xff] }
 0x157   : > { %1114 = vst.msk [vmem:[%s1961_s8 + $0x30] sm:$0xff] %vm445_vm0, %v944_v1  ;;  %v1258_v3 = vadd.f32 %v1186_v0, %v944_v1  ;;  %982 = vmatmul.bf16.gmra.mxu1 %v826_v2  ;;  %v1193_v1 = vld [vmem:[%s1948_s17 + $0x68] sm:$0xff] }
 0x158   : > { %v623_v4 = vpop.f32.mrf.mxu0 }
 0x159   : > { %1330 = vst.msk [vmem:[%s1969_s9 + $0x30] sm:$0xff] %vm445_vm0, %v1258_v3  ;;  %v624_v11 = vadd.f32 %v1895_v38, %v623_v4 }
 0x15b   : > { %v767_v15 = vmax.f32 %v624_v11, 0.0  ;;  %1561 = vmatmul.msk.bf16.gmra.mxu3 %vm445_vm0, %v415_v63 }
 0x15c   : > { %v945_v8 = vpop.f32.mrf.mxu1 }
 0x15d   : > { %v946_v10 = vadd.f32 %v1953_v62, %v945_v8 }
 0x15f   : > { %1115 = vst.msk [vmem:[%s1961_s8 + $0x38] sm:$0xff] %vm445_vm0, %v946_v10  ;;  %v1259_v12 = vadd.f32 %v1187_v9, %v946_v10  ;;  %v1194_v10 = vld [vmem:[%s1948_s17 + $0x70] sm:$0xff] }
 0x160   : > { %v625_v13 = vpop.f32.mrf.mxu0 }
 0x161   : > { %1331 = vst.msk [vmem:[%s1969_s9 + $0x38] sm:$0xff] %vm445_vm0, %v1259_v12  ;;  %v626_v14 = vadd.f32 %v1895_v38, %v625_v13 }
 0x163   : > { %v768_v16 = vmax.f32 %v626_v14, 0.0 }
 0x164   : > { %v948_v17 = vpop.f32.mrf.mxu1 }
 0x165   : > { %v827_v19 = vpack.c.bf16 %v768_v16, %v767_v15  ;;  %v949_v20 = vadd.f32 %v1953_v62, %v948_v17  ;;  %v371_v15 = vld [vmem:[%s1840_s21 + $0x1b0] sm:$0xff]  ;;  %v372_v16 = vld [vmem:[%s1840_s21 + $0x1b8] sm:$0xff] }
 0x166   : > { %v416_v17 = vpack.c.bf16 %v372_v16, %v371_v15  ;;  %v1201_v16 = vld [vmem:[%s1948_s17 + $0xa8] sm:$0xff] }
 0x167   : > { %1116 = vst.msk [vmem:[%s1961_s8 + $0x40] sm:$0xff] %vm445_vm0, %v949_v20  ;;  %v1260_v21 = vadd.f32 %v1188_v18, %v949_v20  ;;  %987 = vmatmul.bf16.gmra.mxu1 %v827_v19  ;;  %v1195_v19 = vld [vmem:[%s1948_s17 + $0x78] sm:$0xff] }
 0x168   : > { %v628_v22 = vpop.f32.mrf.mxu0 }
 0x169   : > { %1332 = vst.msk [vmem:[%s1969_s9 + $0x40] sm:$0xff] %vm445_vm0, %v1260_v21  ;;  %v629_v29 = vadd.f32 %v1895_v38, %v628_v22 }
 0x16b   : > { %v769_v33 = vmax.f32 %v629_v29, 0.0  ;;  %1562 = vmatmul.msk.bf16.gmra.mxu3 %vm445_vm0, %v416_v17  ;;  %v1196_v29 = vld [vmem:[%s1948_s17 + $0x80] sm:$0xff]  ;;  %v659_v17 = vadd.f32 %v1895_v38, %v2104_v24 }
 0x16c   : > { %v950_v26 = vpop.f32.mrf.mxu1 }
 0x16d   : > { %v951_v28 = vadd.f32 %v1953_v62, %v950_v26 }
 0x16f   : > { %1117 = vst.msk [vmem:[%s1961_s8 + $0x48] sm:$0xff] %vm445_vm0, %v951_v28  ;;  %v1261_v30 = vadd.f32 %v1189_v27, %v951_v28 }
 0x170   : > { %v630_v31 = vpop.f32.mrf.mxu0 }
 0x171   : > { %1333 = vst.msk [vmem:[%s1969_s9 + $0x48] sm:$0xff] %vm445_vm0, %v1261_v30  ;;  %v631_v32 = vadd.f32 %v1895_v38, %v630_v31 }
 0x173   : > { %v770_v34 = vmax.f32 %v631_v32, 0.0 }
 0x174   : > { %v953_v35 = vpop.f32.mrf.mxu1 }
 0x175   : > { %v828_v37 = vpack.c.bf16 %v770_v34, %v769_v33  ;;  %v954_v39 = vadd.f32 %v1953_v62, %v953_v35  ;;  %v660_v34 = vpop.f32.mrf.mxu3  ;;  %v373_v35 = vld [vmem:[%s1840_s21 + $0x1c0] sm:$0xff] }
 0x177   : > { %1118 = vst.msk [vmem:[%s1961_s8 + $0x50] sm:$0xff] %vm445_vm0, %v954_v39  ;;  %v1262_v40 = vadd.f32 %v1190_v36, %v954_v39  ;;  %992 = vmatmul.bf16.gmra.mxu1 %v828_v37  ;;  %v374_v36 = vld [vmem:[%s1840_s21 + $0x1c8] sm:$0xff] }
 0x178   : > { %v633_v41 = vpop.f32.mrf.mxu0  ;;  %v417_v37 = vpack.c.bf16 %v374_v36, %v373_v35 }
 0x179   : > { %1334 = vst.msk [vmem:[%s1969_s9 + $0x50] sm:$0xff] %vm445_vm0, %v1262_v40  ;;  %v634_v48 = vadd.f32 %v1895_v38, %v633_v41  ;;  %v1197_v40 = vld [vmem:[%s1948_s17 + $0x88] sm:$0xff] }
 0x17b   : > { %v771_v52 = vmax.f32 %v634_v48, 0.0  ;;  %1563 = vmatmul.msk.bf16.gmra.mxu3 %vm445_vm0, %v417_v37 }
 0x17c   : > { %v955_v45 = vpop.f32.mrf.mxu1 }
 0x17d   : > { %v956_v47 = vadd.f32 %v1953_v62, %v955_v45  ;;  %v2123_v45 = vpop.f32.mrf.mxu3 }
 0x17e   : > { %v664_v35 = vadd.f32 %v1895_v38, %v2123_v45 }
 0x17f   : > { %1119 = vst.msk [vmem:[%s1961_s8 + $0x58] sm:$0xff] %vm445_vm0, %v956_v47  ;;  %v1263_v49 = vadd.f32 %v1191_v46, %v956_v47 }
 0x180   : > { %v635_v50 = vpop.f32.mrf.mxu0 }
 0x181   : > { %1335 = vst.msk [vmem:[%s1969_s9 + $0x58] sm:$0xff] %vm445_vm0, %v1263_v49  ;;  %v636_v51 = vadd.f32 %v1895_v38, %v635_v50  ;;  %v1198_v50 = vld [vmem:[%s1948_s17 + $0x90] sm:$0xff] }
 0x183   : > { %v772_v53 = vmax.f32 %v636_v51, 0.0 }
 0x184   : > { %v958_v54 = vpop.f32.mrf.mxu1 }
 0x185   : > { %v829_v56 = vpack.c.bf16 %v772_v53, %v771_v52  ;;  %v959_v57 = vadd.f32 %v1953_v62, %v958_v54 }
 0x187   : > { %1120 = vst.msk [vmem:[%s1961_s8 + $0x60] sm:$0xff] %vm445_vm0, %v959_v57  ;;  %v1264_v58 = vadd.f32 %v1192_v55, %v959_v57  ;;  %997 = vmatmul.bf16.gmra.mxu1 %v829_v56  ;;  %v665_v55 = vpop.f32.mrf.mxu3  ;;  %v375_v56 = vld [vmem:[%s1840_s21 + $0x1d0] sm:$0xff]  ;;  %v376_v57 = vld [vmem:[%s1840_s21 + $0x1d8] sm:$0xff] }
 0x188   : > { %v638_v59 = vpop.f32.mrf.mxu0  ;;  %v666_v36 = vadd.f32 %v1895_v38, %v665_v55 }
 0x189   : > { %1336 = vst.msk [vmem:[%s1969_s9 + $0x60] sm:$0xff] %vm445_vm0, %v1264_v58  ;;  %v639_v3 = vadd.f32 %v1895_v38, %v638_v59  ;;  %v418_v58 = vpack.c.bf16 %v376_v57, %v375_v56 }
 0x18b   : > { %v773_v7 = vmax.f32 %v639_v3, 0.0  ;;  %1564 = vmatmul.msk.bf16.gmra.mxu3 %vm445_vm0, %v418_v58 }
 0x18c   : > { %v960_v0 = vpop.f32.mrf.mxu1 }
 0x18d   : > { %v961_v2 = vadd.f32 %v1953_v62, %v960_v0 }
 0x18f   : > { %1121 = vst.msk [vmem:[%s1961_s8 + $0x68] sm:$0xff] %vm445_vm0, %v961_v2  ;;  %v1265_v4 = vadd.f32 %v1193_v1, %v961_v2  ;;  %v2142_v2 = vpop.f32.mrf.mxu3 }
 0x190   : > { %v640_v5 = vpop.f32.mrf.mxu0 }
 0x191   : > { %1337 = vst.msk [vmem:[%s1969_s9 + $0x68] sm:$0xff] %vm445_vm0, %v1265_v4  ;;  %v641_v6 = vadd.f32 %v1895_v38, %v640_v5 }
 0x193   : > { %v774_v8 = vmax.f32 %v641_v6, 0.0 }
 0x194   : > { %v963_v9 = vpop.f32.mrf.mxu1 }
 0x195   : > { %v830_v11 = vpack.c.bf16 %v774_v8, %v773_v7  ;;  %v964_v12 = vadd.f32 %v1953_v62, %v963_v9  ;;  %v1200_v7 = vld [vmem:[%s1948_s17 + $0xa0] sm:$0xff] }
 0x197   : > { %1122 = vst.msk [vmem:[%s1961_s8 + $0x70] sm:$0xff] %vm445_vm0, %v964_v12  ;;  %v1266_v13 = vadd.f32 %v1194_v10, %v964_v12  ;;  %1002 = vmatmul.bf16.gmra.mxu1 %v830_v11  ;;  %v670_v11 = vpop.f32.mrf.mxu3  ;;  %v377_v12 = vld [vmem:[%s1840_s21 + $0x1e0] sm:$0xff] }
 0x198   : > { %v643_v14 = vpop.f32.mrf.mxu0  ;;  %v671_v55 = vadd.f32 %v1895_v38, %v670_v11 }
 0x199   : > { %1338 = vst.msk [vmem:[%s1969_s9 + $0x70] sm:$0xff] %vm445_vm0, %v1266_v13  ;;  %v644_v21 = vadd.f32 %v1895_v38, %v643_v14  ;;  %v378_v13 = vld [vmem:[%s1840_s21 + $0x1e8] sm:$0xff] }
 0x19a   : > { %v419_v14 = vpack.c.bf16 %v378_v13, %v377_v12 }
 0x19b   : > { %v775_v26 = vmax.f32 %v644_v21, 0.0 }
 0x19c   : > { %v965_v18 = vpop.f32.mrf.mxu1  ;;  %1565 = vmatmul.msk.bf16.gmra.mxu3 %vm445_vm0, %v419_v14 }
 0x19d   : > { %v966_v20 = vadd.f32 %v1953_v62, %v965_v18  ;;  %v661_v18 = vadd.f32 %v1895_v38, %v660_v34  ;;  %v1203_v34 = vld [vmem:[%s1948_s17 + $0xb8] sm:$0xff] }
 0x19f   : > { %1123 = vst.msk [vmem:[%s1961_s8 + $0x78] sm:$0xff] %vm445_vm0, %v966_v20  ;;  %v1267_v22 = vadd.f32 %v1195_v19, %v966_v20  ;;  %v2163_v21 = vpop.f32.mrf.mxu3 }
 0x1a0   : > { %v645_v23 = vpop.f32.mrf.mxu0 }
 0x1a1   : > { %1339 = vst.msk [vmem:[%s1969_s9 + $0x78] sm:$0xff] %vm445_vm0, %v1267_v22  ;;  %v646_v25 = vadd.f32 %v1895_v38, %v645_v23  ;;  %v781_v22 = vmax.f32 %v659_v17, 0.0  ;;  %v782_v23 = vmax.f32 %v661_v18, 0.0  ;;  %v1208_v17 = vld [vmem:[%s1948_s17 + $0xe0] sm:$0xff] }
 0x1a3   : > { %v776_v27 = vmax.f32 %v646_v25, 0.0  ;;  %v1202_v25 = vld [vmem:[%s1948_s17 + $0xb0] sm:$0xff] }
 0x1a4   : > { %v968_v28 = vpop.f32.mrf.mxu1 }
 0x1a5   : > { %v831_v30 = vpack.c.bf16 %v776_v27, %v775_v26  ;;  %v969_v31 = vadd.f32 %v1953_v62, %v968_v28  ;;  %v834_v27 = vpack.c.bf16 %v782_v23, %v781_v22  ;;  %v385_v22 = vld [vmem:[%s1840_s21 + $0x220] sm:$0xff]  ;;  %v386_v23 = vld [vmem:[%s1840_s21 + $0x228] sm:$0xff] }
 0x1a7   : > { %1124 = vst.msk [vmem:[%s1961_s8 + $0x80] sm:$0xff] %vm445_vm0, %v969_v31  ;;  %v1268_v32 = vadd.f32 %v1196_v29, %v969_v31  ;;  %1007 = vmatmul.bf16.gmra.mxu1 %v831_v30  ;;  %v675_v29 = vpop.f32.mrf.mxu3  ;;  %v379_v30 = vld [vmem:[%s1840_s21 + $0x1f0] sm:$0xff]  ;;  %v380_v31 = vld [vmem:[%s1840_s21 + $0x1f8] sm:$0xff] }
 0x1a8   : > { %v648_v33 = vpop.f32.mrf.mxu0 }
 0x1a9   : > { %1340 = vst.msk [vmem:[%s1969_s9 + $0x80] sm:$0xff] %vm445_vm0, %v1268_v32  ;;  %v649_v42 = vadd.f32 %v1895_v38, %v648_v33  ;;  %v420_v32 = vpack.c.bf16 %v380_v31, %v379_v30 }
 0x1ab   : > { %v777_v47 = vmax.f32 %v649_v42, 0.0  ;;  %v784_v42 = vmax.f32 %v666_v36, 0.0 }
 0x1ac   : > { %v970_v39 = vpop.f32.mrf.mxu1  ;;  %1566 = vmatmul.msk.bf16.gmra.mxu3 %vm445_vm0, %v420_v32 }
 0x1ad   : > { %v971_v41 = vadd.f32 %v1953_v62, %v970_v39 }
 0x1af   : > { %1125 = vst.msk [vmem:[%s1961_s8 + $0x88] sm:$0xff] %vm445_vm0, %v971_v41  ;;  %v1269_v43 = vadd.f32 %v1197_v40, %v971_v41  ;;  %v2183_v40 = vpop.f32.mrf.mxu3  ;;  %v783_v41 = vmax.f32 %v664_v35, 0.0  ;;  %v1210_v35 = vld [vmem:[%s1948_s17 + $0xf0] sm:$0xff] }
 0x1b0   : > { %v650_v44 = vpop.f32.mrf.mxu0 }
 0x1b1   : > { %1341 = vst.msk [vmem:[%s1969_s9 + $0x88] sm:$0xff] %vm445_vm0, %v1269_v43  ;;  %v651_v46 = vadd.f32 %v1895_v38, %v650_v44  ;;  %v1204_v44 = vld [vmem:[%s1948_s17 + $0xc0] sm:$0xff] }
 0x1b3   : > { %v778_v48 = vmax.f32 %v651_v46, 0.0  ;;  %v835_v46 = vpack.c.bf16 %v784_v42, %v783_v41  ;;  %v387_v41 = vld [vmem:[%s1840_s21 + $0x230] sm:$0xff]  ;;  %v388_v42 = vld [vmem:[%s1840_s21 + $0x238] sm:$0xff] }
 0x1b4   : > { %v973_v49 = vpop.f32.mrf.mxu1 }
 0x1b5   : > { %v832_v51 = vpack.c.bf16 %v778_v48, %v777_v47  ;;  %v974_v52 = vadd.f32 %v1953_v62, %v973_v49  ;;  %v381_v49 = vld [vmem:[%s1840_s21 + $0x200] sm:$0xff] }
 0x1b7   : > { %1126 = vst.msk [vmem:[%s1961_s8 + $0x90] sm:$0xff] %vm445_vm0, %v974_v52  ;;  %v1270_v53 = vadd.f32 %v1198_v50, %v974_v52  ;;  %1012 = vmatmul.bf16.gmra.mxu1 %v832_v51  ;;  %v680_v48 = vpop.f32.mrf.mxu3  ;;  %v382_v50 = vld [vmem:[%s1840_s21 + $0x208] sm:$0xff] }
 0x1b8   : > { %v653_v54 = vpop.f32.mrf.mxu0  ;;  %v421_v51 = vpack.c.bf16 %v382_v50, %v381_v49 }
 0x1b9   : > { %1342 = vst.msk [vmem:[%s1969_s9 + $0x90] sm:$0xff] %vm445_vm0, %v1270_v53  ;;  %v654_v63 = vadd.f32 %v1895_v38, %v653_v54  ;;  %v1205_v53 = vld [vmem:[%s1948_s17 + $0xc8] sm:$0xff]  ;;  %v669_v54 = vadd.f32 %v1895_v38, %v2142_v2 }
 0x1bb   : > { %v779_v4 = vmax.f32 %v654_v63, 0.0  ;;  %v1206_v63 = vld [vmem:[%s1948_s17 + $0xd0] sm:$0xff] }
 0x1bc   : > { %v975_v59 = vpop.f32.mrf.mxu1  ;;  %1567 = vmatmul.msk.bf16.gmra.mxu3 %vm445_vm0, %v421_v51 }
 0x1bd   : > { %v976_v61 = vadd.f32 %v1953_v62, %v975_v59  ;;  %v785_v59 = vmax.f32 %v669_v54, 0.0  ;;  %v1212_v54 = vld [vmem:[%s1948_s17 + $0x100] sm:$0xff] }
 0x1bf   : > { %1127 = vst.msk [vmem:[%s1961_s8 + $0x98] sm:$0xff] %vm445_vm0, %v976_v61  ;;  %v1271_v0 = vadd.f32 %v1199_v60, %v976_v61  ;;  %v2203_v58 = vpop.f32.mrf.mxu3  ;;  %v786_v60 = vmax.f32 %v671_v55, 0.0 }
 0x1c0   : > { %v655_v1 = vpop.f32.mrf.mxu0 }
 0x1c1   : > { %1343 = vst.msk [vmem:[%s1969_s9 + $0x98] sm:$0xff] %vm445_vm0, %v1271_v0  ;;  %v656_v3 = vadd.f32 %v1895_v38, %v655_v1  ;;  %v836_v1 = vpack.c.bf16 %v786_v60, %v785_v59  ;;  %v1213_v59 = vld [vmem:[%s1948_s17 + $0x108] sm:$0xff]  ;;  %v2273_v60 = vld [vmem:[%s2573_s3] ss:$0 sm:$0xff] }
 0x1c3   : > { %v780_v5 = vmax.f32 %v656_v3, 0.0 }
 0x1c4   : > { %v978_v6 = vpop.f32.mrf.mxu1 }
 0x1c5   : > { %v979_v8 = vadd.f32 %v1953_v62, %v978_v6  ;;  %v833_v9 = vpack.c.bf16 %v780_v5, %v779_v4  ;;  %v383_v4 = vld [vmem:[%s1840_s21 + $0x210] sm:$0xff]  ;;  %v384_v5 = vld [vmem:[%s1840_s21 + $0x218] sm:$0xff]  ;;  %s1689_s21 = scalar_lea.hbm %s1688_s18, 576 }
 0x1c6   : > { %v422_v6 = vpack.c.bf16 %v384_v5, %v383_v4  ;;  %v1214_v5 = vld [vmem:[%s1948_s17 + $0x110] sm:$0xff]  ;;  %p1690_p11 = scmp.ne.s32.totalorder %s1688_s18, %s1689_s21  ;;  %p1695_p1 = scmp.lt.s32.totalorder %s1693_s15, %s1689_s21 }
 0x1c7   : > { %1128 = vst.msk [vmem:[%s1961_s8 + $0xa0] sm:$0xff] %vm445_vm0, %v979_v8  ;;  %v1272_v10 = vadd.f32 %v1200_v7, %v979_v8  ;;  %1017 = vmatmul.bf16.vlgmr.msra.gmra.mxu2 %v833_v9  ;;  %v685_v3 = vpop.f32.mrf.mxu3  ;;  %v1207_v8 = vld [vmem:[%s1948_s17 + $0xd8] sm:$0xff]  ;;  %v674_v9 = vadd.f32 %v1895_v38, %v2163_v21 }
 0x1c8   : > { %p1691_p12 = pnand %p1690_p11, %p1817_p5  ;;  %p1696_p2 = por %p1695_p1, %p1694_p0 }
 0x1c9   : > { %1344 = vst.msk [vmem:[%s1969_s9 + $0xa0] sm:$0xff] %vm445_vm0, %v1272_v10  ;;  %v676_v10 = vadd.f32 %v1895_v38, %v675_v29  ;;  %v787_v14 = vmax.f32 %v674_v9, 0.0 }
 0x1ca   : > { %p1692_p13 = pneg %p1691_p12 }
 0x1cc   : > { %v980_v15 = vpop.f32.mrf.mxu1  ;;  %1568 = vmatmul.msk.bf16.gmra.mxu3 %vm445_vm0, %v422_v6  ;;  %p1697_p3 = pnand %p1696_p2, %p1692_p13 }
 0x1cd   : > { %v981_v19 = vadd.f32 %v1953_v62, %v980_v15  ;;  %v788_v15 = vmax.f32 %v676_v10, 0.0 }
 0x1cf   : > { %1129 = vst.msk [vmem:[%s1961_s8 + $0xa8] sm:$0xff] %vm445_vm0, %v981_v19  ;;  %v1273_v20 = vadd.f32 %v1201_v16, %v981_v19  ;;  %v2223_v13 = vpop.f32.mrf.mxu3  ;;  %v837_v19 = vpack.c.bf16 %v788_v15, %v787_v14 }
 0x1d1   : > { %1345 = vst.msk [vmem:[%s1969_s9 + $0xa8] sm:$0xff] %vm445_vm0, %v1273_v20 }
 0x1d4   : > { %v983_v24 = vpop.f32.mrf.mxu1 }
 0x1d5   : > { %v984_v26 = vadd.f32 %v1953_v62, %v983_v24  ;;  %v423_v24 = vpack.c.bf16 %v386_v23, %v385_v22  ;;  %v1216_v22 = vld [vmem:[%s1948_s17 + $0x120] sm:$0xff] }
 0x1d7   : > { %1130 = vst.msk [vmem:[%s1961_s8 + $0xb0] sm:$0xff] %vm445_vm0, %v984_v26  ;;  %v1274_v28 = vadd.f32 %v1202_v25, %v984_v26  ;;  %1022 = vmatmul.bf16.gmra.mxu2 %v834_v27  ;;  %v690_v21 = vpop.f32.mrf.mxu3  ;;  %v1209_v26 = vld [vmem:[%s1948_s17 + $0xe8] sm:$0xff]  ;;  %v679_v27 = vadd.f32 %v1895_v38, %v2183_v40 }
 0x1d9   : > { %1346 = vst.msk [vmem:[%s1969_s9 + $0xb0] sm:$0xff] %vm445_vm0, %v1274_v28  ;;  %v681_v28 = vadd.f32 %v1895_v38, %v680_v48  ;;  %v789_v32 = vmax.f32 %v679_v27, 0.0 }
 0x1dc   : > { %v985_v33 = vpop.f32.mrf.mxu1  ;;  %1569 = vmatmul.msk.bf16.gmra.mxu3 %vm445_vm0, %v423_v24 }
 0x1dd   : > { %v986_v37 = vadd.f32 %v1953_v62, %v985_v33  ;;  %v790_v33 = vmax.f32 %v681_v28, 0.0 }
 0x1df   : > { %1131 = vst.msk [vmem:[%s1961_s8 + $0xb8] sm:$0xff] %vm445_vm0, %v986_v37  ;;  %v1275_v39 = vadd.f32 %v1203_v34, %v986_v37  ;;  %v693_v31 = vpop.f32.mrf.mxu3  ;;  %v838_v37 = vpack.c.bf16 %v790_v33, %v789_v32 }
 0x1e1   : > { %1347 = vst.msk [vmem:[%s1969_s9 + $0xb8] sm:$0xff] %vm445_vm0, %v1275_v39 }
 0x1e4   : > { %v988_v43 = vpop.f32.mrf.mxu1 }
 0x1e5   : > { %v989_v45 = vadd.f32 %v1953_v62, %v988_v43  ;;  %v424_v43 = vpack.c.bf16 %v388_v42, %v387_v41 }
 0x1e7   : > { %1132 = vst.msk [vmem:[%s1961_s8 + $0xc0] sm:$0xff] %vm445_vm0, %v989_v45  ;;  %v1276_v47 = vadd.f32 %v1204_v44, %v989_v45  ;;  %1027 = vmatmul.bf16.gmra.mxu2 %v835_v46  ;;  %v695_v40 = vpop.f32.mrf.mxu3  ;;  %v1211_v45 = vld [vmem:[%s1948_s17 + $0xf8] sm:$0xff]  ;;  %v684_v46 = vadd.f32 %v1895_v38, %v2203_v58 }
 0x1e9   : > { %1348 = vst.msk [vmem:[%s1969_s9 + $0xc0] sm:$0xff] %vm445_vm0, %v1276_v47  ;;  %v686_v47 = vadd.f32 %v1895_v38, %v685_v3  ;;  %v791_v51 = vmax.f32 %v684_v46, 0.0  ;;  %v1219_v46 = vld [vmem:[%s1948_s17 + $0x138] sm:$0xff] }
 0x1ec   : > { %v990_v52 = vpop.f32.mrf.mxu1  ;;  %1570 = vmatmul.msk.bf16.gmra.mxu3 %vm445_vm0, %v424_v43 }
 0x1ed   : > { %v991_v56 = vadd.f32 %v1953_v62, %v990_v52  ;;  %v792_v52 = vmax.f32 %v686_v47, 0.0 }
 0x1ef   : > { %1133 = vst.msk [vmem:[%s1961_s8 + $0xc8] sm:$0xff] %vm445_vm0, %v991_v56  ;;  %v1277_v57 = vadd.f32 %v1205_v53, %v991_v56  ;;  %v698_v50 = vpop.f32.mrf.mxu3  ;;  %v839_v38 = vpack.c.bf16 %v792_v52, %v791_v51  ;;  %v1220_v52 = vld [vmem:[%s1948_s17 + $0x140] sm:$0xff] }
 0x1f0   : > { %v699_v24 = vadd.f32 %v2273_v60, %v698_v50 }
 0x1f1   : > { %1349 = vst.msk [vmem:[%s1969_s9 + $0xc8] sm:$0xff] %vm445_vm0, %v1277_v57 }
 0x1f2   : > { %v797_v27 = vmax.f32 %v699_v24, 0.0 }
 0x1f4   : > { %v993_v61 = vpop.f32.mrf.mxu1 }
 0x1f5   : > { %v994_v0 = vadd.f32 %v1953_v62, %v993_v61  ;;  %v689_v61 = vadd.f32 %v2273_v60, %v2223_v13  ;;  %v696_v13 = vadd.f32 %v2273_v60, %v695_v40 }
 0x1f7   : > { %1134 = vst.msk [vmem:[%s1961_s8 + $0xd0] sm:$0xff] %vm445_vm0, %v994_v0  ;;  %v1278_v2 = vadd.f32 %v1206_v63, %v994_v0  ;;  %1032 = vmatmul.bf16.gmra.mxu2 %v836_v1  ;;  %v700_v57 = vpop.f32.mrf.mxu3  ;;  %v691_v63 = vadd.f32 %v2273_v60, %v690_v21 }
 0x1f9   : > { %1350 = vst.msk [vmem:[%s1969_s9 + $0xd0] sm:$0xff] %vm445_vm0, %v1278_v2  ;;  %v793_v2 = vmax.f32 %v689_v61, 0.0  ;;  %v794_v3 = vmax.f32 %v691_v63, 0.0  ;;  %v1221_v61 = vld [vmem:[%s1948_s17 + $0x148] sm:$0xff] }
 0x1fc   : > { %v995_v7 = vpop.f32.mrf.mxu1 }
 0x1fd   : > { %v996_v11 = vadd.f32 %v1953_v62, %v995_v7 }
 0x1ff   : > { %1135 = vst.msk [vmem:[%s1961_s8 + $0xd8] sm:$0xff] %vm445_vm0, %v996_v11  ;;  %v1279_v12 = vadd.f32 %v1207_v8, %v996_v11  ;;  %v703_v6 = vpop.f32.mrf.mxu3  ;;  %v840_v8 = vpack.c.bf16 %v794_v3, %v793_v2  ;;  %v1215_v11 = vld [vmem:[%s1948_s17 + $0x118] sm:$0xff]  ;;  %v1222_v3 = vld [vmem:[%s1948_s17 + $0x150] sm:$0xff] }
 0x200   : > { %v704_v40 = vadd.f32 %v2273_v60, %v703_v6 }
 0x201   : > { %1351 = vst.msk [vmem:[%s1969_s9 + $0xd8] sm:$0xff] %vm445_vm0, %v1279_v12  ;;  %v694_v12 = vadd.f32 %v2273_v60, %v693_v31 }
 0x202   : > { %v799_v43 = vmax.f32 %v704_v40, 0.0 }
 0x204   : > { %v998_v16 = vpop.f32.mrf.mxu1 }
 0x205   : > { %v999_v18 = vadd.f32 %v1953_v62, %v998_v16 }
 0x207   : > { %1136 = vst.msk [vmem:[%s1961_s8 + $0xe0] sm:$0xff] %vm445_vm0, %v999_v18  ;;  %v1280_v20 = vadd.f32 %v1208_v17, %v999_v18  ;;  %1037 = vmatmul.bf16.gmra.mxu2 %v837_v19  ;;  %v705_v15 = vpop.f32.mrf.mxu3  ;;  %v795_v17 = vmax.f32 %v694_v12, 0.0  ;;  %v796_v18 = vmax.f32 %v696_v13, 0.0  ;;  %v1223_v12 = vld [vmem:[%s1948_s17 + $0x158] sm:$0xff] }
 0x208   : > { %v706_v41 = vadd.f32 %v2273_v60, %v705_v15 }
 0x209   : > { %1352 = vst.msk [vmem:[%s1969_s9 + $0xe0] sm:$0xff] %vm445_vm0, %v1280_v20  ;;  %v841_v19 = vpack.c.bf16 %v796_v18, %v795_v17  ;;  %v1224_v18 = vld [vmem:[%s1948_s17 + $0x160] sm:$0xff] }
 0x20c   : > { %v1000_v25 = vpop.f32.mrf.mxu1 }
 0x20d   : > { %v1001_v29 = vadd.f32 %v1953_v62, %v1000_v25  ;;  %v701_v25 = vadd.f32 %v2273_v60, %v700_v57 }
 0x20f   : > { %1137 = vst.msk [vmem:[%s1961_s8 + $0xe8] sm:$0xff] %vm445_vm0, %v1001_v29  ;;  %v1281_v30 = vadd.f32 %v1209_v26, %v1001_v29  ;;  %v708_v20 = vpop.f32.mrf.mxu3  ;;  %v798_v28 = vmax.f32 %v701_v25, 0.0 }
 0x211   : > { %1353 = vst.msk [vmem:[%s1969_s9 + $0xe8] sm:$0xff] %vm445_vm0, %v1281_v30  ;;  %v1217_v30 = vld [vmem:[%s1948_s17 + $0x128] sm:$0xff] }
 0x214   : > { %v1003_v34 = vpop.f32.mrf.mxu1 }
 0x215   : > { %v1004_v36 = vadd.f32 %v1953_v62, %v1003_v34  ;;  %v842_v34 = vpack.c.bf16 %v798_v28, %v797_v27  ;;  %v1225_v27 = vld [vmem:[%s1948_s17 + $0x168] sm:$0xff] }
 0x217   : > { %1138 = vst.msk [vmem:[%s1961_s8 + $0xf0] sm:$0xff] %vm445_vm0, %v1004_v36  ;;  %v1282_v39 = vadd.f32 %v1210_v35, %v1004_v36  ;;  %1042 = vmatmul.bf16.gmra.mxu2 %v838_v37  ;;  %v710_v31 = vpop.f32.mrf.mxu3  ;;  %v1218_v36 = vld [vmem:[%s1948_s17 + $0x130] sm:$0xff] }
 0x219   : > { %1354 = vst.msk [vmem:[%s1969_s9 + $0xf0] sm:$0xff] %vm445_vm0, %v1282_v39 }
 0x21c   : > { %v1005_v44 = vpop.f32.mrf.mxu1 }
 0x21d   : > { %v1006_v48 = vadd.f32 %v1953_v62, %v1005_v44  ;;  %v800_v44 = vmax.f32 %v706_v41, 0.0 }
 0x21f   : > { %1139 = vst.msk [vmem:[%s1961_s8 + $0xf8] sm:$0xff] %vm445_vm0, %v1006_v48  ;;  %v1283_v49 = vadd.f32 %v1211_v45, %v1006_v48  ;;  %v713_v39 = vpop.f32.mrf.mxu3 }
 0x220   : > { %v714_v6 = vadd.f32 %v2273_v60, %v713_v39 }
 0x221   : > { %1355 = vst.msk [vmem:[%s1969_s9 + $0xf8] sm:$0xff] %vm445_vm0, %v1283_v49  ;;  %v843_v49 = vpack.c.bf16 %v800_v44, %v799_v43 }
 0x224   : > { %v1008_v53 = vpop.f32.mrf.mxu1 }
 0x225   : > { %v1009_v55 = vadd.f32 %v1953_v62, %v1008_v53 }
 0x227   : > { %1140 = vst.msk [vmem:[%s1961_s8 + $0x100] sm:$0xff] %vm445_vm0, %v1009_v55  ;;  %v1284_v56 = vadd.f32 %v1212_v54, %v1009_v55  ;;  %1047 = vmatmul.bf16.gmra.mxu2 %v839_v38  ;;  %v715_v50 = vpop.f32.mrf.mxu3  ;;  %v709_v54 = vadd.f32 %v2273_v60, %v708_v20  ;;  %v711_v55 = vadd.f32 %v2273_v60, %v710_v31 }
 0x229   : > { %1356 = vst.msk [vmem:[%s1969_s9 + $0x100] sm:$0xff] %vm445_vm0, %v1284_v56  ;;  %v801_v57 = vmax.f32 %v709_v54, 0.0 }
 0x22c   : > { %v1010_v58 = vpop.f32.mrf.mxu1 }
 0x22d   : > { %v1011_v0 = vadd.f32 %v1953_v62, %v1010_v58  ;;  %v802_v58 = vmax.f32 %v711_v55, 0.0 }
 0x22f   : > { %1141 = vst.msk [vmem:[%s1961_s8 + $0x108] sm:$0xff] %vm445_vm0, %v1011_v0  ;;  %v1285_v1 = vadd.f32 %v1213_v59, %v1011_v0  ;;  %v718_v56 = vpop.f32.mrf.mxu3 }
 0x230   : > { %v719_v20 = vadd.f32 %v2273_v60, %v718_v56  ;;  %v1229_v56 = vld [vmem:[%s1948_s17 + $0x188] sm:$0xff] }
 0x231   : > { %1357 = vst.msk [vmem:[%s1969_s9 + $0x108] sm:$0xff] %vm445_vm0, %v1285_v1  ;;  %v844_v1 = vpack.c.bf16 %v802_v58, %v801_v57 }
 0x232   : > { %v805_v24 = vmax.f32 %v719_v20, 0.0 }
 0x234   : > { %v1013_v4 = vpop.f32.mrf.mxu1 }
 0x235   : > { %v1014_v7 = vadd.f32 %v1953_v62, %v1013_v4 }
 0x237   : > { %1142 = vst.msk [vmem:[%s1961_s8 + $0x110] sm:$0xff] %vm445_vm0, %v1014_v7  ;;  %v1286_v9 = vadd.f32 %v1214_v5, %v1014_v7  ;;  %1052 = vmatmul.bf16.gmra.mxu2 %v840_v8  ;;  %v720_v4 = vpop.f32.mrf.mxu3  ;;  %v716_v7 = vadd.f32 %v2273_v60, %v715_v50 }
 0x239   : > { %1358 = vst.msk [vmem:[%s1969_s9 + $0x110] sm:$0xff] %vm445_vm0, %v1286_v9  ;;  %v803_v9 = vmax.f32 %v714_v6, 0.0 }
 0x23c   : > { %v1015_v10 = vpop.f32.mrf.mxu1 }
 0x23d   : > { %v1016_v14 = vadd.f32 %v1953_v62, %v1015_v10  ;;  %v804_v10 = vmax.f32 %v716_v7, 0.0 }
 0x23f   : > { %1143 = vst.msk [vmem:[%s1961_s8 + $0x118] sm:$0xff] %vm445_vm0, %v1016_v14  ;;  %v1287_v16 = vadd.f32 %v1215_v11, %v1016_v14  ;;  %v723_v14 = vpop.f32.mrf.mxu3  ;;  %v845_v15 = vpack.c.bf16 %v804_v10, %v803_v9  ;;  %v1231_v9 = vld [vmem:[%s1948_s17 + $0x198] sm:$0xff] }
 0x241   : > { %1359 = vst.msk [vmem:[%s1969_s9 + $0x118] sm:$0xff] %vm445_vm0, %v1287_v16 }
 0x247   : > { %1057 = vmatmul.bf16.gmra.mxu2 %v841_v19 }
 0x24a   : > { %v1018_v21 = vpop.f32.mrf.mxu2 }
 0x24b   : > { %v1019_v23 = vadd.f32 %v1953_v62, %v1018_v21  ;;  %v721_v21 = vadd.f32 %v2273_v60, %v720_v4 }
 0x24d   : > { %1144 = vst.msk [vmem:[%s1961_s8 + $0x120] sm:$0xff] %vm445_vm0, %v1019_v23  ;;  %v1288_v26 = vadd.f32 %v1216_v22, %v1019_v23  ;;  %v725_v23 = vpop.f32.mrf.mxu3  ;;  %v806_v25 = vmax.f32 %v721_v21, 0.0 }
 0x24f   : > { %1360 = vst.msk [vmem:[%s1969_s9 + $0x120] sm:$0xff] %vm445_vm0, %v1288_v26 }
 0x252   : > { %v1020_v29 = vpop.f32.mrf.mxu2 }
 0x253   : > { %v1021_v32 = vadd.f32 %v1953_v62, %v1020_v29  ;;  %v846_v29 = vpack.c.bf16 %v806_v25, %v805_v24 }
 0x255   : > { %1145 = vst.msk [vmem:[%s1961_s8 + $0x128] sm:$0xff] %vm445_vm0, %v1021_v32  ;;  %v1289_v33 = vadd.f32 %v1217_v30, %v1021_v32  ;;  %v728_v31 = vpop.f32.mrf.mxu3 }
 0x257   : > { %1361 = vst.msk [vmem:[%s1969_s9 + $0x128] sm:$0xff] %vm445_vm0, %v1289_v33  ;;  %1062 = vmatmul.bf16.gmra.mxu2 %v842_v34  ;;  %v1226_v33 = vld [vmem:[%s1948_s17 + $0x170] sm:$0xff] }
 0x25a   : > { %v1023_v35 = vpop.f32.mrf.mxu2 }
 0x25b   : > { %v1024_v37 = vadd.f32 %v1953_v62, %v1023_v35  ;;  %v724_v35 = vadd.f32 %v2273_v60, %v723_v14 }
 0x25d   : > { %1146 = vst.msk [vmem:[%s1961_s8 + $0x130] sm:$0xff] %vm445_vm0, %v1024_v37  ;;  %v1290_v42 = vadd.f32 %v1218_v36, %v1024_v37  ;;  %v726_v36 = vadd.f32 %v2273_v60, %v725_v23  ;;  %v807_v39 = vmax.f32 %v724_v35, 0.0  ;;  %v730_v43 = vpop.f32.mrf.mxu3  ;;  %v1233_v23 = vld [vmem:[%s1948_s17 + $0x1a8] sm:$0xff]  ;;  %v1236_v35 = vld [vmem:[%s1948_s17 + $0x1c0] sm:$0xff] }
 0x25f   : > { %1362 = vst.msk [vmem:[%s1969_s9 + $0x130] sm:$0xff] %vm445_vm0, %v1290_v42  ;;  %v808_v40 = vmax.f32 %v726_v36, 0.0  ;;  %v1227_v42 = vld [vmem:[%s1948_s17 + $0x178] sm:$0xff] }
 0x262   : > { %v1025_v45 = vpop.f32.mrf.mxu2 }
 0x263   : > { %v1026_v47 = vadd.f32 %v1953_v62, %v1025_v45  ;;  %v847_v45 = vpack.c.bf16 %v808_v40, %v807_v39  ;;  %v1237_v40 = vld [vmem:[%s1948_s17 + $0x1c8] sm:$0xff] }
 0x265   : > { %1147 = vst.msk [vmem:[%s1961_s8 + $0x138] sm:$0xff] %vm445_vm0, %v1026_v47  ;;  %v1291_v48 = vadd.f32 %v1219_v46, %v1026_v47  ;;  %v733_v50 = vpop.f32.mrf.mxu3 }
 0x267   : > { %1363 = vst.msk [vmem:[%s1969_s9 + $0x138] sm:$0xff] %vm445_vm0, %v1291_v48  ;;  %1067 = vmatmul.bf16.gmra.mxu2 %v843_v49  ;;  %v1228_v48 = vld [vmem:[%s1948_s17 + $0x180] sm:$0xff] }
 0x26a   : > { %v1028_v51 = vpop.f32.mrf.mxu2 }
 0x26b   : > { %v1029_v53 = vadd.f32 %v1953_v62, %v1028_v51  ;;  %v729_v51 = vadd.f32 %v2273_v60, %v728_v31  ;;  %v1235_v31 = vld [vmem:[%s1948_s17 + $0x1b8] sm:$0xff] }
 0x26d   : > { %1148 = vst.msk [vmem:[%s1961_s8 + $0x140] sm:$0xff] %vm445_vm0, %v1029_v53  ;;  %v1292_v38 = vadd.f32 %v1220_v52, %v1029_v53  ;;  %v731_v52 = vadd.f32 %v2273_v60, %v730_v43  ;;  %v809_v54 = vmax.f32 %v729_v51, 0.0 }
 0x26f   : > { %1364 = vst.msk [vmem:[%s1969_s9 + $0x140] sm:$0xff] %vm445_vm0, %v1292_v38  ;;  %v810_v55 = vmax.f32 %v731_v52, 0.0  ;;  %v1240_v52 = vld [vmem:[%s1948_s17 + $0x1e0] sm:$0xff] }
 0x271   : > { %v848_v58 = vpack.c.bf16 %v810_v55, %v809_v54 }
 0x272   : > { %v1030_v59 = vpop.f32.mrf.mxu2 }
 0x273   : > { %v1031_v63 = vadd.f32 %v1953_v62, %v1030_v59 }
 0x275   : > { %1149 = vst.msk [vmem:[%s1961_s8 + $0x148] sm:$0xff] %vm445_vm0, %v1031_v63  ;;  %v1293_v0 = vadd.f32 %v1221_v61, %v1031_v63  ;;  %v735_v61 = vpop.f32.mrf.mxu3 }
 0x277   : > { %1365 = vst.msk [vmem:[%s1969_s9 + $0x148] sm:$0xff] %vm445_vm0, %v1293_v0  ;;  %1072 = vmatmul.bf16.gmra.mxu2 %v844_v1  ;;  %v1230_v0 = vld [vmem:[%s1948_s17 + $0x190] sm:$0xff] }
 0x27a   : > { %v1033_v2 = vpop.f32.mrf.mxu2 }
 0x27b   : > { %v1034_v5 = vadd.f32 %v1953_v62, %v1033_v2  ;;  %v2351_v62 = vld [vmem:[%s2575_s5] ss:$0 sm:$0xff]  ;;  %v734_v2 = vadd.f32 %v2273_v60, %v733_v50 }
 0x27d   : > { %1150 = vst.msk [vmem:[%s1961_s8 + $0x150] sm:$0xff] %vm445_vm0, %v1034_v5  ;;  %v1294_v8 = vadd.f32 %v1222_v3, %v1034_v5  ;;  %v736_v3 = vadd.f32 %v2273_v60, %v735_v61  ;;  %v738_v5 = vpop.f32.mrf.mxu3  ;;  %v811_v6 = vmax.f32 %v734_v2, 0.0 }
 0x27f   : > { %1366 = vst.msk [vmem:[%s1969_s9 + $0x150] sm:$0xff] %vm445_vm0, %v1294_v8  ;;  %v812_v7 = vmax.f32 %v736_v3, 0.0 }
 0x282   : > { %v1035_v11 = vpop.f32.mrf.mxu2 }
 0x283   : > { %v1036_v13 = vadd.f32 %v2351_v62, %v1035_v11  ;;  %v849_v11 = vpack.c.bf16 %v812_v7, %v811_v6 }
 0x285   : > { %1151 = vst.msk [vmem:[%s1961_s8 + $0x158] sm:$0xff] %vm445_vm0, %v1036_v13  ;;  %v1295_v16 = vadd.f32 %v1223_v12, %v1036_v13  ;;  %v740_v13 = vpop.f32.mrf.mxu3 }
 0x287   : > { %1367 = vst.msk [vmem:[%s1969_s9 + $0x158] sm:$0xff] %vm445_vm0, %v1295_v16  ;;  %1077 = vmatmul.bf16.gmra.mxu2 %v845_v15  ;;  %v1232_v15 = vld [vmem:[%s1948_s17 + $0x1a0] sm:$0xff] }
 0x28a   : > { %v1038_v17 = vpop.f32.mrf.mxu2 }
 0x28b   : > { %v1039_v19 = vadd.f32 %v2351_v62, %v1038_v17  ;;  %v739_v17 = vadd.f32 %v2273_v60, %v738_v5  ;;  %v1244_v5 = vld [vmem:[%s1948_s17 + $0x200] sm:$0xff] }
 0x28d   : > { %1152 = vst.msk [vmem:[%s1961_s8 + $0x160] sm:$0xff] %vm445_vm0, %v1039_v19  ;;  %v1296_v22 = vadd.f32 %v1224_v18, %v1039_v19  ;;  %v741_v18 = vadd.f32 %v2273_v60, %v740_v13  ;;  %v813_v20 = vmax.f32 %v739_v17, 0.0  ;;  %v1246_v13 = vld [vmem:[%s1948_s17 + $0x210] sm:$0xff]  ;;  %v1247_v17 = vld [vmem:[%s1948_s17 + $0x218] sm:$0xff] }
 0x28f   : > { %1368 = vst.msk [vmem:[%s1969_s9 + $0x160] sm:$0xff] %vm445_vm0, %v1296_v22  ;;  %v814_v21 = vmax.f32 %v741_v18, 0.0 }
 0x291   : > { %v850_v25 = vpack.c.bf16 %v814_v21, %v813_v20  ;;  %v1248_v21 = vld [vmem:[%s1948_s17 + $0x220] sm:$0xff] }
 0x292   : > { %v1040_v26 = vpop.f32.mrf.mxu2 }
 0x293   : > { %v1041_v28 = vadd.f32 %v2351_v62, %v1040_v26 }
 0x295   : > { %1153 = vst.msk [vmem:[%s1961_s8 + $0x168] sm:$0xff] %vm445_vm0, %v1041_v28  ;;  %v1297_v30 = vadd.f32 %v1225_v27, %v1041_v28  ;;  %v1234_v27 = vld [vmem:[%s1948_s17 + $0x1b0] sm:$0xff] }
 0x297   : > { %1369 = vst.msk [vmem:[%s1969_s9 + $0x168] sm:$0xff] %vm445_vm0, %v1297_v30  ;;  %1082 = vmatmul.bf16.gmra.mxu2 %v846_v29 }
 0x29a   : > { %v1043_v32 = vpop.f32.mrf.mxu2 }
 0x29b   : > { %v1044_v34 = vadd.f32 %v2351_v62, %v1043_v32 }
 0x29d   : > { %1154 = vst.msk [vmem:[%s1961_s8 + $0x170] sm:$0xff] %vm445_vm0, %v1044_v34  ;;  %v1298_v37 = vadd.f32 %v1226_v33, %v1044_v34 }
 0x29f   : > { %1370 = vst.msk [vmem:[%s1969_s9 + $0x170] sm:$0xff] %vm445_vm0, %v1298_v37 }
 0x2a2   : > { %v1045_v41 = vpop.f32.mrf.mxu2 }
 0x2a3   : > { %v1046_v44 = vadd.f32 %v2351_v62, %v1045_v41 }
 0x2a5   : > { %1155 = vst.msk [vmem:[%s1961_s8 + $0x178] sm:$0xff] %vm445_vm0, %v1046_v44  ;;  %v1299_v46 = vadd.f32 %v1227_v42, %v1046_v44  ;;  %v1238_v44 = vld [vmem:[%s1948_s17 + $0x1d0] sm:$0xff] }
 0x2a7   : > { %1371 = vst.msk [vmem:[%s1969_s9 + $0x178] sm:$0xff] %vm445_vm0, %v1299_v46  ;;  %1087 = vmatmul.bf16.gmra.mxu2 %v847_v45 }
 0x2aa   : > { %v1048_v47 = vpop.f32.mrf.mxu2 }
 0x2ab   : > { %v1049_v49 = vadd.f32 %v2351_v62, %v1048_v47 }
 0x2ad   : > { %1156 = vst.msk [vmem:[%s1961_s8 + $0x180] sm:$0xff] %vm445_vm0, %v1049_v49  ;;  %v1300_v53 = vadd.f32 %v1228_v48, %v1049_v49  ;;  %v1239_v48 = vld [vmem:[%s1948_s17 + $0x1d8] sm:$0xff] }
 0x2af   : > { %1372 = vst.msk [vmem:[%s1969_s9 + $0x180] sm:$0xff] %vm445_vm0, %v1300_v53 }
 0x2b2   : > { %v1050_v38 = vpop.f32.mrf.mxu2 }
 0x2b3   : > { %v1051_v57 = vadd.f32 %v2351_v62, %v1050_v38  ;;  %v1241_v38 = vld [vmem:[%s1948_s17 + $0x1e8] sm:$0xff] }
 0x2b5   : > { %1157 = vst.msk [vmem:[%s1961_s8 + $0x188] sm:$0xff] %vm445_vm0, %v1051_v57  ;;  %v1301_v59 = vadd.f32 %v1229_v56, %v1051_v57 }
 0x2b7   : > { %1373 = vst.msk [vmem:[%s1969_s9 + $0x188] sm:$0xff] %vm445_vm0, %v1301_v59  ;;  %1092 = vmatmul.bf16.gmra.mxu2 %v848_v58  ;;  %v1242_v59 = vld [vmem:[%s1948_s17 + $0x1f0] sm:$0xff] }
 0x2ba   : > { %v1053_v63 = vpop.f32.mrf.mxu2 }
 0x2bb   : > { %v1054_v1 = vadd.f32 %v2351_v62, %v1053_v63 }
 0x2bd   : > { %1158 = vst.msk [vmem:[%s1961_s8 + $0x190] sm:$0xff] %vm445_vm0, %v1054_v1  ;;  %v1302_v4 = vadd.f32 %v1230_v0, %v1054_v1  ;;  %v1243_v1 = vld [vmem:[%s1948_s17 + $0x1f8] sm:$0xff] }
 0x2bf   : > { %1374 = vst.msk [vmem:[%s1969_s9 + $0x190] sm:$0xff] %vm445_vm0, %v1302_v4 }
 0x2c2   : > { %v1055_v8 = vpop.f32.mrf.mxu2 }
 0x2c3   : > { %v1056_v10 = vadd.f32 %v2351_v62, %v1055_v8 }
 0x2c5   : > { %1159 = vst.msk [vmem:[%s1961_s8 + $0x198] sm:$0xff] %vm445_vm0, %v1056_v10  ;;  %v1303_v12 = vadd.f32 %v1231_v9, %v1056_v10  ;;  %v1245_v9 = vld [vmem:[%s1948_s17 + $0x208] sm:$0xff] }
 0x2c7   : > { %1375 = vst.msk [vmem:[%s1969_s9 + $0x198] sm:$0xff] %vm445_vm0, %v1303_v12  ;;  %1097 = vmatmul.bf16.gmra.mxu2 %v849_v11 }
 0x2ca   : > { %v1058_v14 = vpop.f32.mrf.mxu2 }
 0x2cb   : > { %v1059_v16 = vadd.f32 %v2351_v62, %v1058_v14 }
 0x2cd   : > { %1160 = vst.msk [vmem:[%s1961_s8 + $0x1a0] sm:$0xff] %vm445_vm0, %v1059_v16  ;;  %v1304_v19 = vadd.f32 %v1232_v15, %v1059_v16 }
 0x2cf   : > { %1376 = vst.msk [vmem:[%s1969_s9 + $0x1a0] sm:$0xff] %vm445_vm0, %v1304_v19 }
 0x2d2   : > { %v1060_v22 = vpop.f32.mrf.mxu2 }
 0x2d3   : > { %v1061_v24 = vadd.f32 %v2351_v62, %v1060_v22 }
 0x2d5   : > { %1161 = vst.msk [vmem:[%s1961_s8 + $0x1a8] sm:$0xff] %vm445_vm0, %v1061_v24  ;;  %v1305_v60 = vadd.f32 %v1233_v23, %v1061_v24 }
 0x2d7   : > { %1377 = vst.msk [vmem:[%s1969_s9 + $0x1a8] sm:$0xff] %vm445_vm0, %v1305_v60  ;;  %1102 = vmatmul.bf16.gmra.mxu2 %v850_v25  ;;  %v1249_v25 = vld [vmem:[%s1948_s17 + $0x228] sm:$0xff] }
 0x2da   : > { %v1063_v26 = vpop.f32.mrf.mxu2 }
 0x2db   : > { %v1064_v28 = vadd.f32 %v2351_v62, %v1063_v26 }
 0x2dd   : > { %1162 = vst.msk [vmem:[%s1961_s8 + $0x1b0] sm:$0xff] %vm445_vm0, %v1064_v28  ;;  %v1306_v29 = vadd.f32 %v1234_v27, %v1064_v28  ;;  %v1250_v28 = vld [vmem:[%s1948_s17 + $0x230] sm:$0xff] }
 0x2df   : > { %1378 = vst.msk [vmem:[%s1969_s9 + $0x1b0] sm:$0xff] %vm445_vm0, %v1306_v29 }
 0x2e2   : > { %v1065_v30 = vpop.f32.mrf.mxu2 }
 0x2e3   : > { %v1066_v32 = vadd.f32 %v2351_v62, %v1065_v30 }
 0x2e5   : > { %1163 = vst.msk [vmem:[%s1961_s8 + $0x1b8] sm:$0xff] %vm445_vm0, %v1066_v32  ;;  %v1307_v33 = vadd.f32 %v1235_v31, %v1066_v32  ;;  %v1251_v32 = vld [vmem:[%s1948_s17 + $0x238] sm:$0xff] }
 0x2e7   : > { %1379 = vst.msk [vmem:[%s1969_s9 + $0x1b8] sm:$0xff] %vm445_vm0, %v1307_v33 }
 0x2ea   : > { %v1068_v34 = vpop.f32.mrf.mxu2 }
 0x2eb   : > { %v1069_v36 = vadd.f32 %v2351_v62, %v1068_v34 }
 0x2ed   : > { %1164 = vst.msk [vmem:[%s1961_s8 + $0x1c0] sm:$0xff] %vm445_vm0, %v1069_v36  ;;  %v1308_v37 = vadd.f32 %v1236_v35, %v1069_v36 }
 0x2ef   : > { %1380 = vst.msk [vmem:[%s1969_s9 + $0x1c0] sm:$0xff] %vm445_vm0, %v1308_v37 }
 0x2f2   : > { %v1070_v39 = vpop.f32.mrf.mxu2 }
 0x2f3   : > { %v1071_v41 = vadd.f32 %v2351_v62, %v1070_v39 }
 0x2f5   : > { %1165 = vst.msk [vmem:[%s1961_s8 + $0x1c8] sm:$0xff] %vm445_vm0, %v1071_v41  ;;  %v1309_v42 = vadd.f32 %v1237_v40, %v1071_v41 }
 0x2f7   : > { %1381 = vst.msk [vmem:[%s1969_s9 + $0x1c8] sm:$0xff] %vm445_vm0, %v1309_v42 }
 0x2fa   : > { %v1073_v43 = vpop.f32.mrf.mxu2 }
 0x2fb   : > { %v1074_v45 = vadd.f32 %v2351_v62, %v1073_v43 }
 0x2fd   : > { %1166 = vst.msk [vmem:[%s1961_s8 + $0x1d0] sm:$0xff] %vm445_vm0, %v1074_v45  ;;  %v1310_v46 = vadd.f32 %v1238_v44, %v1074_v45 }
 0x2ff   : > { %1382 = vst.msk [vmem:[%s1969_s9 + $0x1d0] sm:$0xff] %vm445_vm0, %v1310_v46 }
 0x302   : > { %v1075_v47 = vpop.f32.mrf.mxu2 }
 0x303   : > { %v1076_v49 = vadd.f32 %v2351_v62, %v1075_v47 }
 0x305   : > { %1167 = vst.msk [vmem:[%s1961_s8 + $0x1d8] sm:$0xff] %vm445_vm0, %v1076_v49  ;;  %v1311_v50 = vadd.f32 %v1239_v48, %v1076_v49 }
 0x307   : > { %1383 = vst.msk [vmem:[%s1969_s9 + $0x1d8] sm:$0xff] %vm445_vm0, %v1311_v50 }
 0x30a   : > { %v1078_v51 = vpop.f32.mrf.mxu2 }
 0x30b   : > { %v1079_v53 = vadd.f32 %v2351_v62, %v1078_v51 }
 0x30d   : > { %1168 = vst.msk [vmem:[%s1961_s8 + $0x1e0] sm:$0xff] %vm445_vm0, %v1079_v53  ;;  %v1312_v54 = vadd.f32 %v1240_v52, %v1079_v53 }
 0x30f   : > { %1384 = vst.msk [vmem:[%s1969_s9 + $0x1e0] sm:$0xff] %vm445_vm0, %v1312_v54 }
 0x312   : > { %v1080_v55 = vpop.f32.mrf.mxu2 }
 0x313   : > { %v1081_v56 = vadd.f32 %v2351_v62, %v1080_v55 }
 0x315   : > { %1169 = vst.msk [vmem:[%s1961_s8 + $0x1e8] sm:$0xff] %vm445_vm0, %v1081_v56  ;;  %v1313_v57 = vadd.f32 %v1241_v38, %v1081_v56 }
 0x317   : > { %1385 = vst.msk [vmem:[%s1969_s9 + $0x1e8] sm:$0xff] %vm445_vm0, %v1313_v57 }
 0x31a   : > { %v1083_v58 = vpop.f32.mrf.mxu2 }
 0x31b   : > { %v1084_v61 = vadd.f32 %v2351_v62, %v1083_v58 }
 0x31d   : > { %1170 = vst.msk [vmem:[%s1961_s8 + $0x1f0] sm:$0xff] %vm445_vm0, %v1084_v61  ;;  %v1314_v63 = vadd.f32 %v1242_v59, %v1084_v61 }
 0x31f   : > { %1386 = vst.msk [vmem:[%s1969_s9 + $0x1f0] sm:$0xff] %vm445_vm0, %v1314_v63 }
 0x322   : > { %v1085_v0 = vpop.f32.mrf.mxu2 }
 0x323   : > { %v1086_v2 = vadd.f32 %v2351_v62, %v1085_v0 }
 0x325   : > { %1171 = vst.msk [vmem:[%s1961_s8 + $0x1f8] sm:$0xff] %vm445_vm0, %v1086_v2  ;;  %v1315_v3 = vadd.f32 %v1243_v1, %v1086_v2 }
 0x327   : > { %1387 = vst.msk [vmem:[%s1969_s9 + $0x1f8] sm:$0xff] %vm445_vm0, %v1315_v3 }
 0x32a   : > { %v1088_v4 = vpop.f32.mrf.mxu2 }
 0x32b   : > { %v1089_v6 = vadd.f32 %v2351_v62, %v1088_v4 }
 0x32d   : > { %1172 = vst.msk [vmem:[%s1961_s8 + $0x200] sm:$0xff] %vm445_vm0, %v1089_v6  ;;  %v1316_v7 = vadd.f32 %v1244_v5, %v1089_v6 }
 0x32f   : > { %1388 = vst.msk [vmem:[%s1969_s9 + $0x200] sm:$0xff] %vm445_vm0, %v1316_v7 }
 0x332   : > { %v1090_v8 = vpop.f32.mrf.mxu2 }
 0x333   : > { %v1091_v10 = vadd.f32 %v2351_v62, %v1090_v8 }
 0x335   : > { %1173 = vst.msk [vmem:[%s1961_s8 + $0x208] sm:$0xff] %vm445_vm0, %v1091_v10  ;;  %v1317_v11 = vadd.f32 %v1245_v9, %v1091_v10 }
 0x337   : > { %1389 = vst.msk [vmem:[%s1969_s9 + $0x208] sm:$0xff] %vm445_vm0, %v1317_v11 }
 0x33a   : > { %v1093_v12 = vpop.f32.mrf.mxu2 }
 0x33b   : > { %v1094_v14 = vadd.f32 %v2351_v62, %v1093_v12 }
 0x33d   : > { %1174 = vst.msk [vmem:[%s1961_s8 + $0x210] sm:$0xff] %vm445_vm0, %v1094_v14  ;;  %v1318_v15 = vadd.f32 %v1246_v13, %v1094_v14 }
 0x33f   : > { %1390 = vst.msk [vmem:[%s1969_s9 + $0x210] sm:$0xff] %vm445_vm0, %v1318_v15 }
 0x342   : > { %v1095_v16 = vpop.f32.mrf.mxu2 }
 0x343   : > { %v1096_v18 = vadd.f32 %v2351_v62, %v1095_v16 }
 0x345   : > { %1175 = vst.msk [vmem:[%s1961_s8 + $0x218] sm:$0xff] %vm445_vm0, %v1096_v18  ;;  %v1319_v19 = vadd.f32 %v1247_v17, %v1096_v18 }
 0x347   : > { %1391 = vst.msk [vmem:[%s1969_s9 + $0x218] sm:$0xff] %vm445_vm0, %v1319_v19 }
 0x34a   : > { %v1098_v20 = vpop.f32.mrf.mxu2 }
 0x34b   : > { %v1099_v22 = vadd.f32 %v2351_v62, %v1098_v20 }
 0x34d   : > { %1176 = vst.msk [vmem:[%s1961_s8 + $0x220] sm:$0xff] %vm445_vm0, %v1099_v22  ;;  %v1320_v23 = vadd.f32 %v1248_v21, %v1099_v22 }
 0x34f   : > { %1392 = vst.msk [vmem:[%s1969_s9 + $0x220] sm:$0xff] %vm445_vm0, %v1320_v23 }
 0x352   : > { %v1100_v24 = vpop.f32.mrf.mxu2 }
 0x353   : > { %v1101_v60 = vadd.f32 %v2351_v62, %v1100_v24 }
 0x355   : > { %1177 = vst.msk [vmem:[%s1961_s8 + $0x228] sm:$0xff] %vm445_vm0, %v1101_v60  ;;  %v1321_v26 = vadd.f32 %v1249_v25, %v1101_v60 }
 0x357   : > { %1393 = vst.msk [vmem:[%s1969_s9 + $0x228] sm:$0xff] %vm445_vm0, %v1321_v26 }
 0x35a   : > { %v1103_v27 = vpop.f32.mrf.mxu2 }
 0x35b   : > { %v1104_v29 = vadd.f32 %v2351_v62, %v1103_v27 }
 0x35d   : > { %1178 = vst.msk [vmem:[%s1961_s8 + $0x230] sm:$0xff] %vm445_vm0, %v1104_v29  ;;  %v1322_v30 = vadd.f32 %v1250_v28, %v1104_v29 }
 0x35f   : > { %1394 = vst.msk [vmem:[%s1969_s9 + $0x230] sm:$0xff] %vm445_vm0, %v1322_v30 }
 0x362   : > { %v1105_v31 = vpop.f32.mrf.mxu2 }
 0x363   : > { %v1106_v33 = vadd.f32 %v2351_v62, %v1105_v31 }
 0x365   : > { %1179 = vst.msk [vmem:[%s1961_s8 + $0x238] sm:$0xff] %vm445_vm0, %v1106_v33  ;;  %v1323_v34 = vadd.f32 %v1251_v32, %v1106_v33 }
 0x367   : > { %1395 = vst.msk [vmem:[%s1969_s9 + $0x238] sm:$0xff] %vm445_vm0, %v1323_v34 }
 0x368   : > { %1700 = shalt.err (!%p1697_p3)
}
 0x369   : > { %s1737_s14 = smov 128   ;;  %s1738_s8 = smov 8  }
 0x36a   : > { %1628 = dma.vmem_to_hbm [thread:$0]  (%p1817_p5), %s1415_s23, 9216, %s1417_s29, %s1397_s28, %s1737_s14, %s1737_s14, %s1738_s8  }
 0x36b PF: > { %p1634_p4 = scmp.ge.s32.totalorder %s1735_s27, 2  ;;  %s1435_s9 = sand.u32 1, %s1723_s24  }
 0x36c   : > { %s1436_s20 = scalar_lea.sflag [#allocation3], %s1435_s9 }
 0x36d   : > { %p1631_p7 = pnand %p1634_p4, %p1821_p6 }
 0x36f   : > { %p1632_p8 = pneg %p1631_p7 }
 0x371   : > { %1718 = dma.done.wait (%p1632_p8), %s1436_s20, 9216  }
 0x372   : > { %1720 = vsyncadd (%p1632_p8), %s1436_s20, 4294958080  ;;  %p18_p9 = scmp.ge.s32.totalorder %s1804_s30, 4   ;;  %s2580_s24 = smov %s1727_s25 }
 0x373   : > { %s2581_s25 = smov %s1731_s26  ;;  %s2582_s26 = smov %s1815_s10 }
 0x374   : > { %s2583_s27 = smov %s1804_s30  ;;  %20 = sbr.rel (!%p18_p9) target bundleno = 3 (0x3), region = 94 }
 0x379   :  { %1450 = vsyncpa [#allocation3], 1 }
 0x37a   :  { %1452 = vsyncpa [#allocation3 + $0x1], 1 }

// kernel: ffno_forward.15
= control target key start
LH: loop header
LB: loop body
LE: loop exit
PB: predicated region body
PF: predicated region fallthrough
CT: control target
= control target key end

     0   :  { %vm139_vm0 = vcmask 261120   ;;  %vm674_vm1 = vcmask 7168   ;;  %s1515_s1 = inlined_call_operand.vmem [shape: bf16[32,128], index: 1, kind: input, shape index: {}]   ;;  %s1516_s0 = inlined_call_operand.vmem [shape: f32[512,32], index: 0, kind: input, shape index: {}]   ;;  %s1517_s2 = inlined_call_operand.vmem [shape: f32[1,128], index: 2, kind: input, shape index: {}]   ;;  %s1518_s3 = inlined_call_operand.vmem [shape: bf16[128,1], index: 3, kind: input, shape index: {}]   ;;  %s1519_s4 = inlined_call_operand.<no memory space> [shape: f32[1,1], index: 4, kind: input, shape index: {}]   ;;  %s1520_s5 = inlined_call_operand.vmem [shape: f32[512,1], index: 5, kind: output, shape index: {}]  }
   0x1   :  { %v816_v0 = vld [vmem:[%s1515_s1 + $0x8] sm:$0xff]  ;;  %v815_v1 = vld [vmem:[%s1515_s1] sm:$0xff]  ;;  %v25_v5 = vld [vmem:[%s1516_s0 + $0x10] sm:$0xff] }
   0x2   :  { %242 = vmatpush.bf16.msra.mxu0 %v816_v0  ;;  %v23_v2 = vld [vmem:[%s1516_s0] sm:$0xff]  ;;  %v24_v3 = vld [vmem:[%s1516_s0 + $0x8] sm:$0xff]  ;;  %825 = vmatpush.bf16.msra.mxu3 %v816_v0  ;;  %v26_v6 = vld [vmem:[%s1516_s0 + $0x18] sm:$0xff] }
   0x3   :  { %v87_v4 = vpack.c.bf16 %v24_v3, %v23_v2  ;;  %v88_v7 = vpack.c.bf16 %v26_v6, %v25_v5  ;;  %v27_v8 = vld [vmem:[%s1516_s0 + $0x20] sm:$0xff]  ;;  %v28_v9 = vld [vmem:[%s1516_s0 + $0x28] sm:$0xff]  ;;  %v29_v11 = vld [vmem:[%s1516_s0 + $0x30] sm:$0xff] }
   0x4   :  { %v89_v10 = vpack.c.bf16 %v28_v9, %v27_v8  ;;  %v30_v12 = vld [vmem:[%s1516_s0 + $0x38] sm:$0xff]  ;;  %v31_v14 = vld [vmem:[%s1516_s0 + $0x40] sm:$0xff]  ;;  %v32_v15 = vld [vmem:[%s1516_s0 + $0x48] sm:$0xff] }
   0x5   :  { %v90_v13 = vpack.c.bf16 %v30_v12, %v29_v11  ;;  %v91_v16 = vpack.c.bf16 %v32_v15, %v31_v14  ;;  %v824_v17 = vld [vmem:[%s1518_s3 + $0x38] sm:$0xff]  ;;  %v823_v18 = vld [vmem:[%s1518_s3 + $0x30] sm:$0xff]  ;;  %v822_v22 = vld [vmem:[%s1518_s3 + $0x28] sm:$0xff] }
   0x6   :  { %243 = vmatpush.bf16.msra.mxu0 %v815_v1  ;;  %826 = vmatpush.bf16.msra.mxu3 %v815_v1  ;;  %v33_v19 = vld [vmem:[%s1516_s0 + $0x50] sm:$0xff]  ;;  %v34_v20 = vld [vmem:[%s1516_s0 + $0x58] sm:$0xff]  ;;  %v821_v23 = vld [vmem:[%s1518_s3 + $0x20] sm:$0xff] }
   0x7   :  { %505 = vmatpush.bf16.msra.mxu1 %v824_v17  ;;  %827 = vmatpush.bf16.msra.mxu2 %v824_v17  ;;  %v92_v21 = vpack.c.bf16 %v34_v20, %v33_v19  ;;  %v820_v24 = vld [vmem:[%s1518_s3 + $0x18] sm:$0xff]  ;;  %v35_v25 = vld [vmem:[%s1516_s0 + $0x60] sm:$0xff]  ;;  %v36_v26 = vld [vmem:[%s1516_s0 + $0x68] sm:$0xff] }
   0x8   :  { %v93_v27 = vpack.c.bf16 %v36_v26, %v35_v25  ;;  %v819_v28 = vld [vmem:[%s1518_s3 + $0x10] sm:$0xff]  ;;  %v818_v29 = vld [vmem:[%s1518_s3 + $0x8] sm:$0xff]  ;;  %v817_v30 = vld [vmem:[%s1518_s3] sm:$0xff] }
   0x9   :  { %751 = vmatmul.msk.bf16.vlgmr.msra.gmra.mxu0 %vm139_vm0, %v87_v4  ;;  %v37_v31 = vld [vmem:[%s1516_s0 + $0x70] sm:$0xff]  ;;  %v38_v32 = vld [vmem:[%s1516_s0 + $0x78] sm:$0xff]  ;;  %v39_v34 = vld [vmem:[%s1516_s0 + $0x80] sm:$0xff] }
   0xa   :  { %v94_v33 = vpack.c.bf16 %v38_v32, %v37_v31  ;;  %v40_v35 = vld [vmem:[%s1516_s0 + $0x88] sm:$0xff]  ;;  %v963_v38 = vld [vmem:[%s1517_s2] ss:$0 sm:$0xff]  ;;  %v41_v43 = vld [vmem:[%s1516_s0 + $0x90] sm:$0xff] }
   0xb   :  { %506 = vmatpush.bf16.msra.mxu1 %v823_v18  ;;  %828 = vmatpush.bf16.msra.mxu2 %v823_v18  ;;  %v95_v36 = vpack.c.bf16 %v40_v35, %v39_v34  ;;  %v42_v44 = vld [vmem:[%s1516_s0 + $0x98] sm:$0xff]  ;;  %v43_v51 = vld [vmem:[%s1516_s0 + $0xa0] sm:$0xff]  ;;  %v44_v52 = vld [vmem:[%s1516_s0 + $0xa8] sm:$0xff] }
   0xc   :  { %v96_v45 = vpack.c.bf16 %v42_v44, %v41_v43  ;;  %v97_v53 = vpack.c.bf16 %v44_v52, %v43_v51  ;;  %v45_v59 = vld [vmem:[%s1516_s0 + $0xb0] sm:$0xff]  ;;  %v46_v60 = vld [vmem:[%s1516_s0 + $0xb8] sm:$0xff]  ;;  %v47_v3 = vld [vmem:[%s1516_s0 + $0xc0] sm:$0xff] }
   0xd   :  { %v98_v61 = vpack.c.bf16 %v46_v60, %v45_v59  ;;  %v48_v4 = vld [vmem:[%s1516_s0 + $0xc8] sm:$0xff]  ;;  %v49_v11 = vld [vmem:[%s1516_s0 + $0xd0] sm:$0xff]  ;;  %v50_v12 = vld [vmem:[%s1516_s0 + $0xd8] sm:$0xff] }
   0xe   :  { %v99_v5 = vpack.c.bf16 %v48_v4, %v47_v3  ;;  %v51_v19 = vld [vmem:[%s1516_s0 + $0xe0] sm:$0xff]  ;;  %v52_v20 = vld [vmem:[%s1516_s0 + $0xe8] sm:$0xff]  ;;  %v58_v25 = vld [vmem:[%s1516_s0 + $0x118] sm:$0xff] }
   0xf   :  { %507 = vmatpush.bf16.msra.mxu1 %v822_v22  ;;  %829 = vmatpush.bf16.msra.mxu2 %v822_v22  ;;  %v53_v31 = vld [vmem:[%s1516_s0 + $0xf0] sm:$0xff]  ;;  %v54_v32 = vld [vmem:[%s1516_s0 + $0xf8] sm:$0xff]  ;;  %v59_v35 = vld [vmem:[%s1516_s0 + $0x120] sm:$0xff] }
  0x10   :  { %v55_v43 = vld [vmem:[%s1516_s0 + $0x100] sm:$0xff]  ;;  %v56_v44 = vld [vmem:[%s1516_s0 + $0x108] sm:$0xff] }
  0x11   :  { %v63_v59 = vld [vmem:[%s1516_s0 + $0x140] sm:$0xff]  ;;  %v64_v60 = vld [vmem:[%s1516_s0 + $0x148] sm:$0xff] }
  0x13   :  { %508 = vmatpush.bf16.msra.mxu1 %v821_v23  ;;  %830 = vmatpush.bf16.msra.mxu2 %v821_v23  ;;  %v10_v23 = vstv %s1519_s4 }
  0x14   :  { %11 = vst [vmem:[#allocation2] sm:$0x1] %v10_v23 }
  0x17   :  { %509 = vmatpush.bf16.msra.mxu1 %v820_v24  ;;  %831 = vmatpush.bf16.msra.mxu2 %v820_v24  ;;  %v57_v24 = vld [vmem:[%s1516_s0 + $0x110] sm:$0xff] }
  0x18   :  { %v104_v26 = vpack.c.bf16 %v58_v25, %v57_v24 }
  0x19   :  { %752 = vmatmul.msk.bf16.gmra.mxu0 %vm139_vm0, %v88_v7 }
  0x1a   :  { %768 = vmatmul.msk.bf16.vlgmr.msra.gmra.mxu3 %vm139_vm0, %v104_v26 }
  0x1b   :  { %510 = vmatpush.bf16.msra.mxu1 %v819_v28  ;;  %832 = vmatpush.bf16.msra.mxu2 %v819_v28 }
  0x1f   :  { %511 = vmatpush.bf16.msra.mxu1 %v818_v29  ;;  %833 = vmatpush.bf16.msra.mxu2 %v818_v29 }
  0x23   :  { %512 = vmatpush.bf16.msra.mxu1 %v817_v30  ;;  %834 = vmatpush.bf16.msra.mxu2 %v817_v30 }
  0x29   :  { %753 = vmatmul.msk.bf16.gmra.mxu0 %vm139_vm0, %v89_v10 }
  0x39   :  { %754 = vmatmul.msk.bf16.gmra.mxu0 %vm139_vm0, %v90_v13  ;;  %v100_v13 = vpack.c.bf16 %v50_v12, %v49_v11 }
  0x49   :  { %755 = vmatmul.msk.bf16.gmra.mxu0 %vm139_vm0, %v91_v16 }
  0x59   :  { %756 = vmatmul.msk.bf16.gmra.mxu0 %vm139_vm0, %v92_v21  ;;  %v101_v21 = vpack.c.bf16 %v52_v20, %v51_v19  ;;  %v67_v19 = vld [vmem:[%s1516_s0 + $0x160] sm:$0xff]  ;;  %v68_v20 = vld [vmem:[%s1516_s0 + $0x168] sm:$0xff] }
  0x69   :  { %757 = vmatmul.msk.bf16.gmra.mxu0 %vm139_vm0, %v93_v27 }
  0x79   :  { %758 = vmatmul.msk.bf16.gmra.mxu0 %vm139_vm0, %v94_v33  ;;  %v102_v33 = vpack.c.bf16 %v54_v32, %v53_v31  ;;  %v69_v31 = vld [vmem:[%s1516_s0 + $0x170] sm:$0xff]  ;;  %v70_v32 = vld [vmem:[%s1516_s0 + $0x178] sm:$0xff] }
  0x86   :  { %v245_v37 = vpop.f32.mrf.mxu0 }
  0x87   :  { %v246_v40 = vadd.f32 %v963_v38, %v245_v37 }
  0x89   :  { %759 = vmatmul.msk.bf16.gmra.mxu0 %vm139_vm0, %v95_v36  ;;  %v60_v36 = vld [vmem:[%s1516_s0 + $0x128] sm:$0xff] }
  0x8a   :  { %v105_v37 = vpack.c.bf16 %v60_v36, %v59_v35 }
  0x8c   :  { %769 = vmatmul.msk.bf16.gmra.mxu3 %vm139_vm0, %v105_v37 }
  0x8e   :  { %v247_v39 = vpop.f32.mrf.mxu0 }
  0x8f   :  { %v248_v41 = vadd.f32 %v963_v38, %v247_v39 }
  0x91   :  { %v405_v42 = vpack.c.bf16 %v248_v41, %v246_v40 }
  0x93   :  { %513 = vmatmul.bf16.vlgmr.msra.gmra.mxu1 %v405_v42 }
  0x96   :  { %v250_v46 = vpop.f32.mrf.mxu0 }
  0x97   :  { %v251_v48 = vadd.f32 %v963_v38, %v250_v46 }
  0x99   :  { %760 = vmatmul.msk.bf16.gmra.mxu0 %vm139_vm0, %v96_v45  ;;  %v103_v45 = vpack.c.bf16 %v56_v44, %v55_v43  ;;  %v71_v44 = vld [vmem:[%s1516_s0 + $0x180] sm:$0xff] }
  0x9e   :  { %v252_v47 = vpop.f32.mrf.mxu0 }
  0x9f   :  { %v253_v49 = vadd.f32 %v963_v38, %v252_v47  ;;  %v61_v47 = vld [vmem:[%s1516_s0 + $0x130] sm:$0xff] }
  0xa1   :  { %v406_v50 = vpack.c.bf16 %v253_v49, %v251_v48  ;;  %v62_v48 = vld [vmem:[%s1516_s0 + $0x138] sm:$0xff] }
  0xa2   :  { %v106_v49 = vpack.c.bf16 %v62_v48, %v61_v47 }
  0xa3   :  { %518 = vmatmul.bf16.gmra.mxu1 %v406_v50  ;;  %v1061_v50 = vld [vmem:[#allocation2] ss:$0 sm:$0xff] }
  0xa4   :  { %770 = vmatmul.msk.bf16.gmra.mxu3 %vm139_vm0, %v106_v49 }
  0xa6   :  { %v255_v54 = vpop.f32.mrf.mxu0 }
  0xa7   :  { %v256_v56 = vadd.f32 %v963_v38, %v255_v54 }
  0xa9   :  { %761 = vmatmul.msk.bf16.gmra.mxu0 %vm139_vm0, %v97_v53 }
  0xae   :  { %v257_v55 = vpop.f32.mrf.mxu0 }
  0xaf   :  { %v258_v57 = vadd.f32 %v963_v38, %v257_v55 }
  0xb1   :  { %v407_v58 = vpack.c.bf16 %v258_v57, %v256_v56 }
  0xb3   :  { %523 = vmatmul.bf16.gmra.mxu1 %v407_v58 }
  0xb6   :  { %v260_v62 = vpop.f32.mrf.mxu0 }
  0xb7   :  { %v261_v0 = vadd.f32 %v963_v38, %v260_v62  ;;  %v107_v62 = vpack.c.bf16 %v64_v60, %v63_v59 }
  0xb9   :  { %762 = vmatmul.msk.bf16.gmra.mxu0 %vm139_vm0, %v98_v61  ;;  %771 = vmatmul.msk.bf16.gmra.mxu3 %vm139_vm0, %v107_v62  ;;  %v330_v62 = vpop.f32.mrf.mxu3 }
  0xbe   :  { %v262_v63 = vpop.f32.mrf.mxu0 }
  0xbf   :  { %v263_v1 = vadd.f32 %v963_v38, %v262_v63 }
  0xc1   :  { %v408_v2 = vpack.c.bf16 %v263_v1, %v261_v0 }
  0xc3   :  { %528 = vmatmul.bf16.gmra.mxu1 %v408_v2 }
  0xc6   :  { %v265_v6 = vpop.f32.mrf.mxu0 }
  0xc7   :  { %v266_v8 = vadd.f32 %v963_v38, %v265_v6 }
  0xc9   :  { %763 = vmatmul.msk.bf16.gmra.mxu0 %vm139_vm0, %v99_v5 }
  0xce   :  { %v267_v7 = vpop.f32.mrf.mxu0 }
  0xcf   :  { %v268_v9 = vadd.f32 %v963_v38, %v267_v7  ;;  %v65_v7 = vld [vmem:[%s1516_s0 + $0x150] sm:$0xff] }
  0xd1   :  { %v409_v10 = vpack.c.bf16 %v268_v9, %v266_v8  ;;  %v66_v8 = vld [vmem:[%s1516_s0 + $0x158] sm:$0xff] }
  0xd3   :  { %533 = vmatmul.bf16.gmra.mxu1 %v409_v10  ;;  %v108_v10 = vpack.c.bf16 %v66_v8, %v65_v7  ;;  %v75_v7 = vld [vmem:[%s1516_s0 + $0x1a0] sm:$0xff]  ;;  %v76_v8 = vld [vmem:[%s1516_s0 + $0x1a8] sm:$0xff] }
  0xd5   :  { %772 = vmatmul.msk.bf16.gmra.mxu3 %vm139_vm0, %v108_v10  ;;  %v113_v10 = vpack.c.bf16 %v76_v8, %v75_v7  ;;  %v85_v8 = vld [vmem:[%s1516_s0 + $0x1f0] sm:$0xff] }
  0xd6   :  { %v270_v14 = vpop.f32.mrf.mxu0 }
  0xd7   :  { %v271_v16 = vadd.f32 %v963_v38, %v270_v14 }
  0xd9   :  { %764 = vmatmul.msk.bf16.gmra.mxu0 %vm139_vm0, %v100_v13 }
  0xde   :  { %v272_v15 = vpop.f32.mrf.mxu0 }
  0xdf   :  { %v273_v17 = vadd.f32 %v963_v38, %v272_v15 }
  0xe1   :  { %v410_v18 = vpack.c.bf16 %v273_v17, %v271_v16 }
  0xe3   :  { %538 = vmatmul.bf16.gmra.mxu1 %v410_v18 }
  0xe6   :  { %v275_v22 = vpop.f32.mrf.mxu0 }
  0xe7   :  { %v276_v28 = vadd.f32 %v963_v38, %v275_v22  ;;  %v109_v22 = vpack.c.bf16 %v68_v20, %v67_v19 }
  0xe9   :  { %765 = vmatmul.msk.bf16.gmra.mxu0 %vm139_vm0, %v101_v21  ;;  %773 = vmatmul.msk.bf16.gmra.mxu3 %vm139_vm0, %v109_v22  ;;  %v78_v22 = vld [vmem:[%s1516_s0 + $0x1b8] sm:$0xff] }
  0xee   :  { %v277_v27 = vpop.f32.mrf.mxu0 }
  0xef   :  { %v278_v29 = vadd.f32 %v963_v38, %v277_v27 }
  0xf1   :  { %v411_v30 = vpack.c.bf16 %v278_v29, %v276_v28 }
  0xf3   :  { %543 = vmatmul.bf16.gmra.mxu1 %v411_v30 }
  0xf6   :  { %v280_v34 = vpop.f32.mrf.mxu0 }
  0xf7   :  { %v281_v40 = vadd.f32 %v963_v38, %v280_v34  ;;  %v110_v34 = vpack.c.bf16 %v70_v32, %v69_v31 }
  0xf9   :  { %766 = vmatmul.msk.bf16.gmra.mxu0 %vm139_vm0, %v102_v33  ;;  %774 = vmatmul.msk.bf16.gmra.mxu3 %vm139_vm0, %v110_v34  ;;  %v79_v34 = vld [vmem:[%s1516_s0 + $0x1c0] sm:$0xff] }
  0xfe   :  { %v282_v39 = vpop.f32.mrf.mxu0 }
  0xff   :  { %v283_v41 = vadd.f32 %v963_v38, %v282_v39 }
 0x101   :  { %v412_v42 = vpack.c.bf16 %v283_v41, %v281_v40 }
 0x103   :  { %548 = vmatmul.bf16.gmra.mxu1 %v412_v42 }
 0x106   :  { %v285_v46 = vpop.f32.mrf.mxu0 }
 0x107   :  { %v286_v52 = vadd.f32 %v963_v38, %v285_v46 }
 0x109   :  { %767 = vmatmul.msk.bf16.gmra.mxu0 %vm139_vm0, %v103_v45  ;;  %v72_v45 = vld [vmem:[%s1516_s0 + $0x188] sm:$0xff] }
 0x10a   :  { %v111_v47 = vpack.c.bf16 %v72_v45, %v71_v44 }
 0x10c   :  { %775 = vmatmul.msk.bf16.gmra.mxu3 %vm139_vm0, %v111_v47  ;;  %v81_v47 = vld [vmem:[%s1516_s0 + $0x1d0] sm:$0xff] }
 0x10e   :  { %v287_v51 = vpop.f32.mrf.mxu0 }
 0x10f   :  { %v288_v53 = vadd.f32 %v963_v38, %v287_v51 }
 0x110   :  { %v514_v54 = vpop.f32.mrf.mxu1 }
 0x111   :  { %v515_v55 = vadd.f32 %v1061_v50, %v514_v54  ;;  %v413_v56 = vpack.c.bf16 %v288_v53, %v286_v52 }
 0x113   :  { %675 = vst.msk [vmem:[%s1520_s5] sm:$0xff] %vm674_vm1, %v515_v55  ;;  %553 = vmatmul.bf16.gmra.mxu1 %v413_v56 }
 0x116   :  { %v290_v57 = vpop.f32.mrf.mxu0 }
 0x117   :  { %v291_v0 = vadd.f32 %v963_v38, %v290_v57  ;;  %v73_v57 = vld [vmem:[%s1516_s0 + $0x190] sm:$0xff] }
 0x118   :  { %v516_v58 = vpop.f32.mrf.mxu1 }
 0x119   :  { %v517_v61 = vadd.f32 %v1061_v50, %v516_v58  ;;  %v74_v58 = vld [vmem:[%s1516_s0 + $0x198] sm:$0xff] }
 0x11a   :  { %v112_v60 = vpack.c.bf16 %v74_v58, %v73_v57 }
 0x11b   :  { %676 = vst.msk [vmem:[%s1520_s5 + $0x8] sm:$0xff] %vm674_vm1, %v517_v61 }
 0x11c   :  { %776 = vmatmul.msk.bf16.gmra.mxu3 %vm139_vm0, %v112_v60  ;;  %v83_v60 = vld [vmem:[%s1516_s0 + $0x1e0] sm:$0xff] }
 0x11e   :  { %v292_v63 = vpop.f32.mrf.mxu0 }
 0x11f   :  { %v293_v1 = vadd.f32 %v963_v38, %v292_v63 }
 0x120   :  { %v519_v2 = vpop.f32.mrf.mxu1 }
 0x121   :  { %v520_v3 = vadd.f32 %v1061_v50, %v519_v2  ;;  %v414_v4 = vpack.c.bf16 %v293_v1, %v291_v0 }
 0x123   :  { %677 = vst.msk [vmem:[%s1520_s5 + $0x10] sm:$0xff] %vm674_vm1, %v520_v3  ;;  %558 = vmatmul.bf16.gmra.mxu1 %v414_v4 }
 0x126   :  { %v295_v5 = vpop.f32.mrf.mxu0 }
 0x127   :  { %v296_v12 = vadd.f32 %v963_v38, %v295_v5  ;;  %v332_v5 = vpop.f32.mrf.mxu3 }
 0x128   :  { %v521_v6 = vpop.f32.mrf.mxu1 }
 0x129   :  { %v522_v9 = vadd.f32 %v1061_v50, %v521_v6 }
 0x12b   :  { %678 = vst.msk [vmem:[%s1520_s5 + $0x18] sm:$0xff] %vm674_vm1, %v522_v9 }
 0x12c   :  { %777 = vmatmul.msk.bf16.gmra.mxu3 %vm139_vm0, %v113_v10 }
 0x12e   :  { %v297_v11 = vpop.f32.mrf.mxu0 }
 0x12f   :  { %v298_v13 = vadd.f32 %v963_v38, %v297_v11 }
 0x130   :  { %v524_v14 = vpop.f32.mrf.mxu1 }
 0x131   :  { %v525_v15 = vadd.f32 %v1061_v50, %v524_v14  ;;  %v415_v16 = vpack.c.bf16 %v298_v13, %v296_v12  ;;  %v335_v12 = vpop.f32.mrf.mxu3 }
 0x133   :  { %679 = vst.msk [vmem:[%s1520_s5 + $0x20] sm:$0xff] %vm674_vm1, %v525_v15  ;;  %563 = vmatmul.bf16.gmra.mxu1 %v415_v16 }
 0x136   :  { %v300_v17 = vpop.f32.mrf.mxu0 }
 0x137   :  { %v301_v24 = vadd.f32 %v963_v38, %v300_v17 }
 0x138   :  { %v526_v18 = vpop.f32.mrf.mxu1 }
 0x139   :  { %v527_v21 = vadd.f32 %v1061_v50, %v526_v18  ;;  %v337_v19 = vpop.f32.mrf.mxu3 }
 0x13b   :  { %680 = vst.msk [vmem:[%s1520_s5 + $0x28] sm:$0xff] %vm674_vm1, %v527_v21  ;;  %v77_v21 = vld [vmem:[%s1516_s0 + $0x1b0] sm:$0xff] }
 0x13e   :  { %v302_v23 = vpop.f32.mrf.mxu0 }
 0x13f   :  { %v303_v25 = vadd.f32 %v963_v38, %v302_v23 }
 0x140   :  { %v529_v26 = vpop.f32.mrf.mxu1 }
 0x141   :  { %v530_v27 = vadd.f32 %v1061_v50, %v529_v26  ;;  %v416_v28 = vpack.c.bf16 %v303_v25, %v301_v24  ;;  %v114_v24 = vpack.c.bf16 %v78_v22, %v77_v21  ;;  %v340_v26 = vpop.f32.mrf.mxu3 }
 0x143   :  { %681 = vst.msk [vmem:[%s1520_s5 + $0x30] sm:$0xff] %vm674_vm1, %v530_v27  ;;  %568 = vmatmul.bf16.gmra.mxu1 %v416_v28  ;;  %778 = vmatmul.msk.bf16.gmra.mxu3 %vm139_vm0, %v114_v24 }
 0x146   :  { %v305_v29 = vpop.f32.mrf.mxu0 }
 0x147   :  { %v306_v36 = vadd.f32 %v963_v38, %v305_v29 }
 0x148   :  { %v531_v30 = vpop.f32.mrf.mxu1 }
 0x149   :  { %v532_v33 = vadd.f32 %v1061_v50, %v531_v30  ;;  %v342_v32 = vpop.f32.mrf.mxu3 }
 0x14b   :  { %682 = vst.msk [vmem:[%s1520_s5 + $0x38] sm:$0xff] %vm674_vm1, %v532_v33 }
 0x14e   :  { %v307_v35 = vpop.f32.mrf.mxu0 }
 0x14f   :  { %v308_v37 = vadd.f32 %v963_v38, %v307_v35  ;;  %v80_v35 = vld [vmem:[%s1516_s0 + $0x1c8] sm:$0xff] }
 0x150   :  { %v534_v39 = vpop.f32.mrf.mxu1 }
 0x151   :  { %v417_v40 = vpack.c.bf16 %v308_v37, %v306_v36  ;;  %v535_v41 = vadd.f32 %v1061_v50, %v534_v39  ;;  %v115_v37 = vpack.c.bf16 %v80_v35, %v79_v34  ;;  %v331_v39 = vadd.f32 %v963_v38, %v330_v62 }
 0x153   :  { %683 = vst.msk [vmem:[%s1520_s5 + $0x40] sm:$0xff] %vm674_vm1, %v535_v41  ;;  %573 = vmatmul.bf16.gmra.mxu1 %v417_v40  ;;  %779 = vmatmul.msk.bf16.gmra.mxu3 %vm139_vm0, %v115_v37  ;;  %v333_v40 = vadd.f32 %v963_v38, %v332_v5  ;;  %v345_v41 = vpop.f32.mrf.mxu3 }
 0x155   :  { %v422_v44 = vpack.c.bf16 %v333_v40, %v331_v39 }
 0x156   :  { %v310_v42 = vpop.f32.mrf.mxu0 }
 0x157   :  { %v311_v49 = vadd.f32 %v963_v38, %v310_v42 }
 0x158   :  { %v536_v43 = vpop.f32.mrf.mxu1 }
 0x159   :  { %v537_v46 = vadd.f32 %v1061_v50, %v536_v43 }
 0x15b   :  { %684 = vst.msk [vmem:[%s1520_s5 + $0x48] sm:$0xff] %vm674_vm1, %v537_v46  ;;  %v347_v45 = vpop.f32.mrf.mxu3 }
 0x15e   :  { %v312_v48 = vpop.f32.mrf.mxu0 }
 0x15f   :  { %v313_v51 = vadd.f32 %v963_v38, %v312_v48  ;;  %v82_v48 = vld [vmem:[%s1516_s0 + $0x1d8] sm:$0xff] }
 0x160   :  { %v539_v52 = vpop.f32.mrf.mxu1 }
 0x161   :  { %v418_v53 = vpack.c.bf16 %v313_v51, %v311_v49  ;;  %v540_v54 = vadd.f32 %v1061_v50, %v539_v52  ;;  %v116_v51 = vpack.c.bf16 %v82_v48, %v81_v47  ;;  %v336_v52 = vadd.f32 %v963_v38, %v335_v12 }
 0x162   :  { %v346_v12 = vadd.f32 %v963_v38, %v345_v41 }
 0x163   :  { %685 = vst.msk [vmem:[%s1520_s5 + $0x50] sm:$0xff] %vm674_vm1, %v540_v54  ;;  %578 = vmatmul.bf16.gmra.mxu1 %v418_v53  ;;  %780 = vmatmul.msk.bf16.gmra.mxu3 %vm139_vm0, %v116_v51  ;;  %v338_v53 = vadd.f32 %v963_v38, %v337_v19  ;;  %v350_v54 = vpop.f32.mrf.mxu3 }
 0x164   :  { %v351_v21 = vadd.f32 %v963_v38, %v350_v54 }
 0x165   :  { %v423_v57 = vpack.c.bf16 %v338_v53, %v336_v52 }
 0x166   :  { %v315_v55 = vpop.f32.mrf.mxu0 }
 0x167   :  { %v316_v63 = vadd.f32 %v963_v38, %v315_v55 }
 0x168   :  { %v541_v56 = vpop.f32.mrf.mxu1 }
 0x169   :  { %v542_v59 = vadd.f32 %v1061_v50, %v541_v56 }
 0x16b   :  { %686 = vst.msk [vmem:[%s1520_s5 + $0x58] sm:$0xff] %vm674_vm1, %v542_v59  ;;  %v352_v58 = vpop.f32.mrf.mxu3 }
 0x16c   :  { %v353_v22 = vadd.f32 %v963_v38, %v352_v58 }
 0x16e   :  { %v317_v61 = vpop.f32.mrf.mxu0 }
 0x16f   :  { %v318_v0 = vadd.f32 %v963_v38, %v317_v61  ;;  %v84_v61 = vld [vmem:[%s1516_s0 + $0x1e8] sm:$0xff] }
 0x170   :  { %v544_v1 = vpop.f32.mrf.mxu1 }
 0x171   :  { %v419_v2 = vpack.c.bf16 %v318_v0, %v316_v63  ;;  %v545_v3 = vadd.f32 %v1061_v50, %v544_v1  ;;  %v117_v63 = vpack.c.bf16 %v84_v61, %v83_v60  ;;  %v341_v0 = vadd.f32 %v963_v38, %v340_v26 }
 0x172   :  { %v343_v1 = vadd.f32 %v963_v38, %v342_v32 }
 0x173   :  { %687 = vst.msk [vmem:[%s1520_s5 + $0x60] sm:$0xff] %vm674_vm1, %v545_v3  ;;  %583 = vmatmul.bf16.gmra.mxu1 %v419_v2  ;;  %781 = vmatmul.msk.bf16.gmra.mxu3 %vm139_vm0, %v117_v63  ;;  %v355_v2 = vpop.f32.mrf.mxu3 }
 0x174   :  { %v424_v5 = vpack.c.bf16 %v343_v1, %v341_v0 }
 0x176   :  { %v320_v4 = vpop.f32.mrf.mxu0 }
 0x177   :  { %v321_v13 = vadd.f32 %v963_v38, %v320_v4 }
 0x178   :  { %v546_v6 = vpop.f32.mrf.mxu1 }
 0x179   :  { %v547_v9 = vadd.f32 %v1061_v50, %v546_v6 }
 0x17b   :  { %688 = vst.msk [vmem:[%s1520_s5 + $0x68] sm:$0xff] %vm674_vm1, %v547_v9  ;;  %v357_v6 = vpop.f32.mrf.mxu3  ;;  %v86_v9 = vld [vmem:[%s1516_s0 + $0x1f8] sm:$0xff] }
 0x17e   :  { %v322_v11 = vpop.f32.mrf.mxu0 }
 0x17f   :  { %v323_v14 = vadd.f32 %v963_v38, %v322_v11  ;;  %v118_v11 = vpack.c.bf16 %v86_v9, %v85_v8 }
 0x180   :  { %v549_v15 = vpop.f32.mrf.mxu1 }
 0x181   :  { %v420_v16 = vpack.c.bf16 %v323_v14, %v321_v13  ;;  %v550_v17 = vadd.f32 %v1061_v50, %v549_v15  ;;  %v348_v13 = vadd.f32 %v963_v38, %v347_v45 }
 0x183   :  { %689 = vst.msk [vmem:[%s1520_s5 + $0x70] sm:$0xff] %vm674_vm1, %v550_v17  ;;  %588 = vmatmul.bf16.gmra.mxu1 %v420_v16  ;;  %782 = vmatmul.msk.bf16.gmra.mxu3 %vm139_vm0, %v118_v11  ;;  %v360_v15 = vpop.f32.mrf.mxu3  ;;  %v425_v17 = vpack.c.bf16 %v348_v13, %v346_v12 }
 0x184   :  { %v361_v39 = vadd.f32 %v963_v38, %v360_v15 }
 0x186   :  { %v325_v18 = vpop.f32.mrf.mxu0 }
 0x187   :  { %v326_v27 = vadd.f32 %v963_v38, %v325_v18 }
 0x188   :  { %v551_v20 = vpop.f32.mrf.mxu1 }
 0x189   :  { %v552_v23 = vadd.f32 %v1061_v50, %v551_v20 }
 0x18b   :  { %690 = vst.msk [vmem:[%s1520_s5 + $0x78] sm:$0xff] %vm674_vm1, %v552_v23  ;;  %v362_v20 = vpop.f32.mrf.mxu3 }
 0x18c   :  { %v363_v40 = vadd.f32 %v963_v38, %v362_v20 }
 0x18e   :  { %v327_v25 = vpop.f32.mrf.mxu0 }
 0x18f   :  { %v328_v28 = vadd.f32 %v963_v38, %v327_v25  ;;  %v426_v25 = vpack.c.bf16 %v353_v22, %v351_v21 }
 0x190   :  { %v554_v29 = vpop.f32.mrf.mxu1 }
 0x191   :  { %v555_v30 = vadd.f32 %v1061_v50, %v554_v29  ;;  %v421_v31 = vpack.c.bf16 %v328_v28, %v326_v27  ;;  %v356_v29 = vadd.f32 %v963_v38, %v355_v2 }
 0x193   :  { %691 = vst.msk [vmem:[%s1520_s5 + $0x80] sm:$0xff] %vm674_vm1, %v555_v30  ;;  %593 = vmatmul.bf16.vlgmr.msra.gmra.mxu2 %v421_v31  ;;  %v365_v26 = vpop.f32.mrf.mxu3  ;;  %v358_v30 = vadd.f32 %v963_v38, %v357_v6 }
 0x194   :  { %v366_v48 = vadd.f32 %v963_v38, %v365_v26 }
 0x195   :  { %v427_v34 = vpack.c.bf16 %v358_v30, %v356_v29 }
 0x198   :  { %v556_v33 = vpop.f32.mrf.mxu1 }
 0x199   :  { %v557_v36 = vadd.f32 %v1061_v50, %v556_v33 }
 0x19b   :  { %692 = vst.msk [vmem:[%s1520_s5 + $0x88] sm:$0xff] %vm674_vm1, %v557_v36  ;;  %v367_v31 = vpop.f32.mrf.mxu3 }
 0x1a0   :  { %v559_v42 = vpop.f32.mrf.mxu1 }
 0x1a1   :  { %v560_v43 = vadd.f32 %v1061_v50, %v559_v42 }
 0x1a3   :  { %693 = vst.msk [vmem:[%s1520_s5 + $0x90] sm:$0xff] %vm674_vm1, %v560_v43  ;;  %598 = vmatmul.bf16.gmra.mxu2 %v422_v44  ;;  %v370_v36 = vpop.f32.mrf.mxu3  ;;  %v428_v43 = vpack.c.bf16 %v363_v40, %v361_v39 }
 0x1a8   :  { %v561_v46 = vpop.f32.mrf.mxu1 }
 0x1a9   :  { %v562_v49 = vadd.f32 %v1061_v50, %v561_v46 }
 0x1ab   :  { %694 = vst.msk [vmem:[%s1520_s5 + $0x98] sm:$0xff] %vm674_vm1, %v562_v49  ;;  %v372_v44 = vpop.f32.mrf.mxu3  ;;  %v368_v49 = vadd.f32 %v963_v38, %v367_v31 }
 0x1ad   :  { %v429_v51 = vpack.c.bf16 %v368_v49, %v366_v48 }
 0x1b0   :  { %v564_v55 = vpop.f32.mrf.mxu1 }
 0x1b1   :  { %v565_v56 = vadd.f32 %v1061_v50, %v564_v55  ;;  %v371_v55 = vadd.f32 %v963_v38, %v370_v36 }
 0x1b3   :  { %695 = vst.msk [vmem:[%s1520_s5 + $0xa0] sm:$0xff] %vm674_vm1, %v565_v56  ;;  %603 = vmatmul.bf16.gmra.mxu2 %v423_v57  ;;  %v375_v47 = vpop.f32.mrf.mxu3  ;;  %v373_v56 = vadd.f32 %v963_v38, %v372_v44 }
 0x1b4   :  { %v376_v0 = vadd.f32 %v963_v38, %v375_v47 }
 0x1b5   :  { %v430_v60 = vpack.c.bf16 %v373_v56, %v371_v55 }
 0x1b8   :  { %v566_v59 = vpop.f32.mrf.mxu1 }
 0x1b9   :  { %v567_v62 = vadd.f32 %v1061_v50, %v566_v59 }
 0x1bb   :  { %696 = vst.msk [vmem:[%s1520_s5 + $0xa8] sm:$0xff] %vm674_vm1, %v567_v62  ;;  %v377_v53 = vpop.f32.mrf.mxu3 }
 0x1bc   :  { %v378_v1 = vadd.f32 %v963_v38, %v377_v53 }
 0x1c0   :  { %v569_v3 = vpop.f32.mrf.mxu1 }
 0x1c1   :  { %v570_v4 = vadd.f32 %v1061_v50, %v569_v3 }
 0x1c3   :  { %697 = vst.msk [vmem:[%s1520_s5 + $0xb0] sm:$0xff] %vm674_vm1, %v570_v4  ;;  %608 = vmatmul.bf16.gmra.mxu2 %v424_v5  ;;  %v431_v4 = vpack.c.bf16 %v378_v1, %v376_v0 }
 0x1c6   :  { %v380_v59 = vpop.f32.mrf.mxu3 }
 0x1c7   :  { %v381_v8 = vadd.f32 %v963_v38, %v380_v59 }
 0x1c8   :  { %v571_v7 = vpop.f32.mrf.mxu1 }
 0x1c9   :  { %v572_v10 = vadd.f32 %v1061_v50, %v571_v7 }
 0x1cb   :  { %698 = vst.msk [vmem:[%s1520_s5 + $0xb8] sm:$0xff] %vm674_vm1, %v572_v10 }
 0x1ce   :  { %v382_v63 = vpop.f32.mrf.mxu3 }
 0x1cf   :  { %v383_v9 = vadd.f32 %v963_v38, %v382_v63 }
 0x1d0   :  { %v574_v14 = vpop.f32.mrf.mxu1 }
 0x1d1   :  { %v575_v16 = vadd.f32 %v1061_v50, %v574_v14  ;;  %v432_v13 = vpack.c.bf16 %v383_v9, %v381_v8 }
 0x1d3   :  { %699 = vst.msk [vmem:[%s1520_s5 + $0xc0] sm:$0xff] %vm674_vm1, %v575_v16  ;;  %613 = vmatmul.bf16.gmra.mxu2 %v425_v17 }
 0x1d6   :  { %v385_v5 = vpop.f32.mrf.mxu3 }
 0x1d7   :  { %v386_v17 = vadd.f32 %v963_v38, %v385_v5 }
 0x1d8   :  { %v576_v18 = vpop.f32.mrf.mxu1 }
 0x1d9   :  { %v577_v19 = vadd.f32 %v1061_v50, %v576_v18 }
 0x1db   :  { %700 = vst.msk [vmem:[%s1520_s5 + $0xc8] sm:$0xff] %vm674_vm1, %v577_v19 }
 0x1de   :  { %v387_v11 = vpop.f32.mrf.mxu3 }
 0x1df   :  { %v388_v18 = vadd.f32 %v963_v38, %v387_v11 }
 0x1e0   :  { %v579_v23 = vpop.f32.mrf.mxu1 }
 0x1e1   :  { %v580_v24 = vadd.f32 %v1061_v50, %v579_v23  ;;  %v433_v21 = vpack.c.bf16 %v388_v18, %v386_v17 }
 0x1e3   :  { %701 = vst.msk [vmem:[%s1520_s5 + $0xd0] sm:$0xff] %vm674_vm1, %v580_v24  ;;  %618 = vmatmul.bf16.gmra.mxu2 %v426_v25 }
 0x1e6   :  { %v390_v16 = vpop.f32.mrf.mxu3 }
 0x1e7   :  { %v391_v26 = vadd.f32 %v963_v38, %v390_v16 }
 0x1e8   :  { %v581_v27 = vpop.f32.mrf.mxu1 }
 0x1e9   :  { %v582_v28 = vadd.f32 %v1061_v50, %v581_v27 }
 0x1eb   :  { %702 = vst.msk [vmem:[%s1520_s5 + $0xd8] sm:$0xff] %vm674_vm1, %v582_v28 }
 0x1ee   :  { %v392_v22 = vpop.f32.mrf.mxu3 }
 0x1ef   :  { %v393_v27 = vadd.f32 %v963_v38, %v392_v22 }
 0x1f0   :  { %v584_v32 = vpop.f32.mrf.mxu1 }
 0x1f1   :  { %v585_v33 = vadd.f32 %v1061_v50, %v584_v32  ;;  %v434_v30 = vpack.c.bf16 %v393_v27, %v391_v26 }
 0x1f3   :  { %703 = vst.msk [vmem:[%s1520_s5 + $0xe0] sm:$0xff] %vm674_vm1, %v585_v33  ;;  %623 = vmatmul.bf16.gmra.mxu2 %v427_v34 }
 0x1f6   :  { %v395_v25 = vpop.f32.mrf.mxu3 }
 0x1f7   :  { %v396_v34 = vadd.f32 %v963_v38, %v395_v25 }
 0x1f8   :  { %v586_v35 = vpop.f32.mrf.mxu1 }
 0x1f9   :  { %v587_v37 = vadd.f32 %v1061_v50, %v586_v35 }
 0x1fb   :  { %704 = vst.msk [vmem:[%s1520_s5 + $0xe8] sm:$0xff] %vm674_vm1, %v587_v37 }
 0x1fe   :  { %v397_v31 = vpop.f32.mrf.mxu3 }
 0x1ff   :  { %v398_v35 = vadd.f32 %v963_v38, %v397_v31 }
 0x200   :  { %v589_v41 = vpop.f32.mrf.mxu1 }
 0x201   :  { %v590_v42 = vadd.f32 %v1061_v50, %v589_v41  ;;  %v435_v40 = vpack.c.bf16 %v398_v35, %v396_v34 }
 0x203   :  { %705 = vst.msk [vmem:[%s1520_s5 + $0xf0] sm:$0xff] %vm674_vm1, %v590_v42  ;;  %628 = vmatmul.bf16.gmra.mxu2 %v428_v43 }
 0x206   :  { %v400_v39 = vpop.f32.mrf.mxu3 }
 0x207   :  { %v401_v44 = vadd.f32 %v963_v38, %v400_v39 }
 0x208   :  { %v591_v45 = vpop.f32.mrf.mxu1 }
 0x209   :  { %v592_v46 = vadd.f32 %v1061_v50, %v591_v45 }
 0x20b   :  { %706 = vst.msk [vmem:[%s1520_s5 + $0xf8] sm:$0xff] %vm674_vm1, %v592_v46 }
 0x20e   :  { %v402_v43 = vpop.f32.mrf.mxu3 }
 0x20f   :  { %v403_v45 = vadd.f32 %v963_v38, %v402_v43 }
 0x211   :  { %v436_v48 = vpack.c.bf16 %v403_v45, %v401_v44 }
 0x213   :  { %633 = vmatmul.bf16.gmra.mxu2 %v429_v51 }
 0x216   :  { %v594_v52 = vpop.f32.mrf.mxu2 }
 0x217   :  { %v595_v54 = vadd.f32 %v1061_v50, %v594_v52 }
 0x219   :  { %707 = vst.msk [vmem:[%s1520_s5 + $0x100] sm:$0xff] %vm674_vm1, %v595_v54 }
 0x21e   :  { %v596_v57 = vpop.f32.mrf.mxu2 }
 0x21f   :  { %v597_v58 = vadd.f32 %v1061_v50, %v596_v57 }
 0x221   :  { %708 = vst.msk [vmem:[%s1520_s5 + $0x108] sm:$0xff] %vm674_vm1, %v597_v58 }
 0x223   :  { %638 = vmatmul.bf16.gmra.mxu2 %v430_v60 }
 0x226   :  { %v599_v61 = vpop.f32.mrf.mxu2 }
 0x227   :  { %v600_v62 = vadd.f32 %v1061_v50, %v599_v61 }
 0x229   :  { %709 = vst.msk [vmem:[%s1520_s5 + $0x110] sm:$0xff] %vm674_vm1, %v600_v62 }
 0x22e   :  { %v601_v2 = vpop.f32.mrf.mxu2 }
 0x22f   :  { %v602_v3 = vadd.f32 %v1061_v50, %v601_v2 }
 0x231   :  { %710 = vst.msk [vmem:[%s1520_s5 + $0x118] sm:$0xff] %vm674_vm1, %v602_v3 }
 0x233   :  { %643 = vmatmul.bf16.gmra.mxu2 %v431_v4 }
 0x236   :  { %v604_v6 = vpop.f32.mrf.mxu2 }
 0x237   :  { %v605_v7 = vadd.f32 %v1061_v50, %v604_v6 }
 0x239   :  { %711 = vst.msk [vmem:[%s1520_s5 + $0x120] sm:$0xff] %vm674_vm1, %v605_v7 }
 0x23e   :  { %v606_v10 = vpop.f32.mrf.mxu2 }
 0x23f   :  { %v607_v12 = vadd.f32 %v1061_v50, %v606_v10 }
 0x241   :  { %712 = vst.msk [vmem:[%s1520_s5 + $0x128] sm:$0xff] %vm674_vm1, %v607_v12 }
 0x243   :  { %648 = vmatmul.bf16.gmra.mxu2 %v432_v13 }
 0x246   :  { %v609_v14 = vpop.f32.mrf.mxu2 }
 0x247   :  { %v610_v15 = vadd.f32 %v1061_v50, %v609_v14 }
 0x249   :  { %713 = vst.msk [vmem:[%s1520_s5 + $0x130] sm:$0xff] %vm674_vm1, %v610_v15 }
 0x24e   :  { %v611_v19 = vpop.f32.mrf.mxu2 }
 0x24f   :  { %v612_v20 = vadd.f32 %v1061_v50, %v611_v19 }
 0x251   :  { %714 = vst.msk [vmem:[%s1520_s5 + $0x138] sm:$0xff] %vm674_vm1, %v612_v20 }
 0x253   :  { %653 = vmatmul.bf16.gmra.mxu2 %v433_v21 }
 0x256   :  { %v614_v23 = vpop.f32.mrf.mxu2 }
 0x257   :  { %v615_v24 = vadd.f32 %v1061_v50, %v614_v23 }
 0x259   :  { %715 = vst.msk [vmem:[%s1520_s5 + $0x140] sm:$0xff] %vm674_vm1, %v615_v24 }
 0x25e   :  { %v616_v28 = vpop.f32.mrf.mxu2 }
 0x25f   :  { %v617_v29 = vadd.f32 %v1061_v50, %v616_v28 }
 0x261   :  { %716 = vst.msk [vmem:[%s1520_s5 + $0x148] sm:$0xff] %vm674_vm1, %v617_v29 }
 0x263   :  { %658 = vmatmul.bf16.gmra.mxu2 %v434_v30 }
 0x266   :  { %v619_v32 = vpop.f32.mrf.mxu2 }
 0x267   :  { %v620_v33 = vadd.f32 %v1061_v50, %v619_v32 }
 0x269   :  { %717 = vst.msk [vmem:[%s1520_s5 + $0x150] sm:$0xff] %vm674_vm1, %v620_v33 }
 0x26e   :  { %v621_v36 = vpop.f32.mrf.mxu2 }
 0x26f   :  { %v622_v37 = vadd.f32 %v1061_v50, %v621_v36 }
 0x271   :  { %718 = vst.msk [vmem:[%s1520_s5 + $0x158] sm:$0xff] %vm674_vm1, %v622_v37 }
 0x273   :  { %663 = vmatmul.bf16.gmra.mxu2 %v435_v40 }
 0x276   :  { %v624_v41 = vpop.f32.mrf.mxu2 }
 0x277   :  { %v625_v42 = vadd.f32 %v1061_v50, %v624_v41 }
 0x279   :  { %719 = vst.msk [vmem:[%s1520_s5 + $0x160] sm:$0xff] %vm674_vm1, %v625_v42 }
 0x27e   :  { %v626_v46 = vpop.f32.mrf.mxu2 }
 0x27f   :  { %v627_v47 = vadd.f32 %v1061_v50, %v626_v46 }
 0x281   :  { %720 = vst.msk [vmem:[%s1520_s5 + $0x168] sm:$0xff] %vm674_vm1, %v627_v47 }
 0x283   :  { %668 = vmatmul.bf16.gmra.mxu2 %v436_v48 }
 0x286   :  { %v629_v49 = vpop.f32.mrf.mxu2 }
 0x287   :  { %v630_v51 = vadd.f32 %v1061_v50, %v629_v49 }
 0x289   :  { %721 = vst.msk [vmem:[%s1520_s5 + $0x170] sm:$0xff] %vm674_vm1, %v630_v51 }
 0x28e   :  { %v631_v52 = vpop.f32.mrf.mxu2 }
 0x28f   :  { %v632_v38 = vadd.f32 %v1061_v50, %v631_v52 }
 0x291   :  { %722 = vst.msk [vmem:[%s1520_s5 + $0x178] sm:$0xff] %vm674_vm1, %v632_v38 }
 0x296   :  { %v634_v53 = vpop.f32.mrf.mxu2 }
 0x297   :  { %v635_v54 = vadd.f32 %v1061_v50, %v634_v53 }
 0x299   :  { %723 = vst.msk [vmem:[%s1520_s5 + $0x180] sm:$0xff] %vm674_vm1, %v635_v54 }
 0x29e   :  { %v636_v55 = vpop.f32.mrf.mxu2 }
 0x29f   :  { %v637_v56 = vadd.f32 %v1061_v50, %v636_v55 }
 0x2a1   :  { %724 = vst.msk [vmem:[%s1520_s5 + $0x188] sm:$0xff] %vm674_vm1, %v637_v56 }
 0x2a6   :  { %v639_v57 = vpop.f32.mrf.mxu2 }
 0x2a7   :  { %v640_v58 = vadd.f32 %v1061_v50, %v639_v57 }
 0x2a9   :  { %725 = vst.msk [vmem:[%s1520_s5 + $0x190] sm:$0xff] %vm674_vm1, %v640_v58 }
 0x2ae   :  { %v641_v59 = vpop.f32.mrf.mxu2 }
 0x2af   :  { %v642_v60 = vadd.f32 %v1061_v50, %v641_v59 }
 0x2b1   :  { %726 = vst.msk [vmem:[%s1520_s5 + $0x198] sm:$0xff] %vm674_vm1, %v642_v60 }
 0x2b6   :  { %v644_v61 = vpop.f32.mrf.mxu2 }
 0x2b7   :  { %v645_v62 = vadd.f32 %v1061_v50, %v644_v61 }
 0x2b9   :  { %727 = vst.msk [vmem:[%s1520_s5 + $0x1a0] sm:$0xff] %vm674_vm1, %v645_v62 }
 0x2be   :  { %v646_v63 = vpop.f32.mrf.mxu2 }
 0x2bf   :  { %v647_v0 = vadd.f32 %v1061_v50, %v646_v63 }
 0x2c1   :  { %728 = vst.msk [vmem:[%s1520_s5 + $0x1a8] sm:$0xff] %vm674_vm1, %v647_v0 }
 0x2c6   :  { %v649_v1 = vpop.f32.mrf.mxu2 }
 0x2c7   :  { %v650_v2 = vadd.f32 %v1061_v50, %v649_v1 }
 0x2c9   :  { %729 = vst.msk [vmem:[%s1520_s5 + $0x1b0] sm:$0xff] %vm674_vm1, %v650_v2 }
 0x2ce   :  { %v651_v3 = vpop.f32.mrf.mxu2 }
 0x2cf   :  { %v652_v4 = vadd.f32 %v1061_v50, %v651_v3 }
 0x2d1   :  { %730 = vst.msk [vmem:[%s1520_s5 + $0x1b8] sm:$0xff] %vm674_vm1, %v652_v4 }
 0x2d6   :  { %v654_v5 = vpop.f32.mrf.mxu2 }
 0x2d7   :  { %v655_v6 = vadd.f32 %v1061_v50, %v654_v5 }
 0x2d9   :  { %731 = vst.msk [vmem:[%s1520_s5 + $0x1c0] sm:$0xff] %vm674_vm1, %v655_v6 }
 0x2de   :  { %v656_v7 = vpop.f32.mrf.mxu2 }
 0x2df   :  { %v657_v8 = vadd.f32 %v1061_v50, %v656_v7 }
 0x2e1   :  { %732 = vst.msk [vmem:[%s1520_s5 + $0x1c8] sm:$0xff] %vm674_vm1, %v657_v8 }
 0x2e6   :  { %v659_v9 = vpop.f32.mrf.mxu2 }
 0x2e7   :  { %v660_v10 = vadd.f32 %v1061_v50, %v659_v9 }
 0x2e9   :  { %733 = vst.msk [vmem:[%s1520_s5 + $0x1d0] sm:$0xff] %vm674_vm1, %v660_v10 }
 0x2ee   :  { %v661_v11 = vpop.f32.mrf.mxu2 }
 0x2ef   :  { %v662_v12 = vadd.f32 %v1061_v50, %v661_v11 }
 0x2f1   :  { %734 = vst.msk [vmem:[%s1520_s5 + $0x1d8] sm:$0xff] %vm674_vm1, %v662_v12 }
 0x2f6   :  { %v664_v13 = vpop.f32.mrf.mxu2 }
 0x2f7   :  { %v665_v14 = vadd.f32 %v1061_v50, %v664_v13 }
 0x2f9   :  { %735 = vst.msk [vmem:[%s1520_s5 + $0x1e0] sm:$0xff] %vm674_vm1, %v665_v14 }
 0x2fe   :  { %v666_v15 = vpop.f32.mrf.mxu2 }
 0x2ff   :  { %v667_v16 = vadd.f32 %v1061_v50, %v666_v15 }
 0x301   :  { %736 = vst.msk [vmem:[%s1520_s5 + $0x1e8] sm:$0xff] %vm674_vm1, %v667_v16 }
 0x306   :  { %v669_v17 = vpop.f32.mrf.mxu2 }
 0x307   :  { %v670_v18 = vadd.f32 %v1061_v50, %v669_v17 }
 0x309   :  { %737 = vst.msk [vmem:[%s1520_s5 + $0x1f0] sm:$0xff] %vm674_vm1, %v670_v18 }
 0x30e   :  { %v671_v19 = vpop.f32.mrf.mxu2 }
 0x30f   :  { %v672_v20 = vadd.f32 %v1061_v50, %v671_v19 }
 0x311   :  { %738 = vst.msk [vmem:[%s1520_s5 + $0x1f8] sm:$0xff] %vm674_vm1, %v672_v20 }

</bundles_post_ra>
